<compile_context>
chip_gen: v7x
topology: tpu7x:2x2x1
jax: 0.10.0
libtpu: 0.0.40
codegen_flags: <defaults>
</compile_context>

<pallas_src>
import functools

import jax
import jax.numpy as jnp
from jax.experimental import pallas as pl
from jax.experimental.pallas import tpu as pltpu


def _matcher_kernel(q_ref, s_ref, qs_ref,
                    wih_ref, whh_h_ref, whh_r_ref, bias_ref,
                    out_ref, *, dp, b_tile, q_per_b, process_step):
    """One batch tile of the Matcher forward.

    q_ref     : (1, rows, Dp)   bf16  query rows (head + rel + tail), zero-padded to Dp
    s_ref     : (1, b_tile, Dp) bf16  one support row per batch (head + rel + tail)
    qs_ref    : (1, 1, rows)    f32   query_score, lane-dense
    wih_ref   : (Dp, 4*Dp)      bf16  pruned W_ih.T, gates fused (i|f|g|o), lane-padded
    whh_h_ref : (Dp, 4*Dp)      bf16  pruned W_hh.T rows acting on the `h` half of h_r
    whh_r_ref : (Dp, 4*Dp)      bf16  pruned W_hh.T rows acting on the `r` half of h_r
    bias_ref  : (1, 4*Dp)       f32   pruned b_ih + b_hh, lane-padded
    out_ref   : (1, 1, rows)    f32
    """
    f32 = jnp.float32
    bf16 = jnp.bfloat16
    Dp = dp
    rows = b_tile * q_per_b

    q = q_ref[0]                      # (rows, Dp) bf16
    s_b = s_ref[0]                    # (b_tile, Dp) bf16
    wih = wih_ref[...]                # (Dp, 4Dp)
    whh_h = whh_h_ref[...]            # (Dp, 4Dp)
    whh_r = whh_r_ref[...]            # (Dp, 4Dp)
    bias = bias_ref[...]              # (1, 4Dp) f32

    # Expand the per-batch support row to one row per query with a tiny one-hot
    # matmul (exact copy; avoids both an HBM broadcast and an in-kernel reshape).
    r_ids = jax.lax.broadcasted_iota(jnp.int32, (rows, b_tile), 0)
    b_off = jax.lax.broadcasted_iota(jnp.int32, (rows, b_tile), 1) * q_per_b
    one_hot = jnp.where((r_ids >= b_off) & (r_ids < b_off + q_per_b), 1.0, 0.0)
    s_rows32 = jnp.dot(one_hot.astype(bf16), s_b, preferred_element_type=f32)   # (rows, Dp) f32
    s_rows = s_rows32.astype(bf16)

    # Loop-invariant gate contributions, hoisted out of the recurrence:
    #   x_gate = q @ W_ih.T + b          (q never changes across steps)
    #   xr     = x_gate + s @ W_hh_r.T   (softmax over the size-1 support axis is
    #                                     exactly 1, so r == support for steps >= 1)
    x_gate = jnp.dot(q, wih, preferred_element_type=f32) + bias                  # (rows, 4Dp)
    xr = x_gate + jnp.dot(s_rows, whh_r, preferred_element_type=f32)             # (rows, 4Dp)

    q32 = q.astype(f32)
    c = jnp.zeros((rows, Dp), f32)
    h = q32  # overwritten at step 0 before any use in the recurrence
    for step in range(process_step):                                             # static unroll
        if step == 0:
            gates = x_gate            # h == 0 and r == 0 at step 0
        else:
            gates = xr + jnp.dot(h.astype(bf16), whh_h, preferred_element_type=f32)
        i_g = jax.nn.sigmoid(gates[:, 0 * Dp:1 * Dp])
        f_g = jax.nn.sigmoid(gates[:, 1 * Dp:2 * Dp])
        g_g = jnp.tanh(gates[:, 2 * Dp:3 * Dp])
        o_g = jax.nn.sigmoid(gates[:, 3 * Dp:4 * Dp])
        c = f_g * c + i_g * g_g                                                  # (rows, Dp)
        h = q32 + o_g * jnp.tanh(c)                                              # (rows, Dp)

    sim = jnp.sum(h * s_rows32, axis=1)                                          # (rows,) == h @ support.T
    out_ref[0, 0, :] = qs_ref[0, 0, :] * sim


def _prune_gate_rows(w, D, H):
    # Keep rows [k*H, k*H+D) of each of the 4 gate blocks: the second half of
    # every gate only feeds h_r_[:, D:] / c[:, D:], which the Matcher never reads.
    return jnp.concatenate([w[k * H:k * H + D] for k in range(4)], axis=0)


def _pack_gate_blocks(w_t, D, Dp):
    # (D, 4D) fused gate weight -> (Dp, 4Dp): contraction dim and every gate's
    # column block zero-padded to a 128-lane boundary (exact; padded columns
    # stay identically zero through the recurrence).
    blocks = []
    for k in range(4):
        blk = w_t[:, k * D:(k + 1) * D]
        blocks.append(jnp.pad(blk, ((0, Dp - D), (0, Dp - D))))
    return jnp.concatenate(blocks, axis=1)


def _vmem_limit_bytes():
    cap = 64 << 20
    try:
        cap = int(getattr(pltpu.get_tpu_info(), "vmem_capacity_bytes", cap))
    except Exception:
        pass
    return int(min(cap * 3 // 4, 112 << 20))


def _plan_tiling(B, Q, Dp, vmem_limit):
    """Pick (batches per tile, number of grid tiles).

    Targets >=256 flattened rows per tile (MXU fill, amortized pipeline
    overhead, lane-dense output), capped so the bf16 input blocks plus the f32
    gate temporaries fit the VMEM budget, and biased toward >=2 grid tiles so
    the "parallel" axis can shard across v7x's two TensorCores.
    """
    weight_bytes = 3 * 2 * (Dp * 4 * Dp * 2)          # 3 bf16 (Dp, 4Dp) weights, double-buffered
    budget = max(vmem_limit - weight_bytes - (2 << 20), vmem_limit // 4)
    per_row = 2 * (2 * Dp) + 5 * (4 * Dp) * 4         # bf16 q (x2 buffers) + ~5 live f32 gate temps
    max_rows = min(2048, max(Q, budget // per_row))
    cap_bt = max(1, max_rows // Q)                    # VMEM cap on batches per tile
    min_bt = max(1, -(-128 // Q))                     # >=128 rows
    tgt_bt = max(1, -(-256 // Q))                     # prefer >=256 rows

    if B <= cap_bt:
        if B >= 2 * min_bt:
            num_tiles = 2                             # megacore split (v7x); harmless on v5e/v6e
            b_tile = -(-B // 2)
        else:
            num_tiles = 1
            b_tile = min(cap_bt, max(B, tgt_bt))      # pad small B up toward 256 rows
    else:
        b_tile = cap_bt                               # largest block that fits
        num_tiles = -(-B // b_tile)
        b_tile = max(min(tgt_bt, cap_bt), -(-B // num_tiles))   # rebalance padding
        num_tiles = -(-B // b_tile)

    b8 = -(-b_tile // 8) * 8                          # sublane-friendly support block
    if max(1, -(-B // b8)) == num_tiles:
        b_tile = b8
    return b_tile, max(1, -(-B // b_tile))


def init_matcher_params(input_dim, key):
    """Deterministic init matching nn.LSTMCell(input_dim, 2*input_dim) shapes."""
    D = input_dim
    H = 2 * D
    k = 1.0 / (H ** 0.5)
    k1, k2, k3, k4 = jax.random.split(key, 4)
    return dict(
        w_ih=jax.random.uniform(k1, (4 * H, D), jnp.float32, -k, k),
        w_hh=jax.random.uniform(k2, (4 * H, H), jnp.float32, -k, k),
        b_ih=jax.random.uniform(k3, (4 * H,), jnp.float32, -k, k),
        b_hh=jax.random.uniform(k4, (4 * H,), jnp.float32, -k, k),
    )


def matcher_forward(params, batch_support, batch_support_confidence,
                    batch_query, query_score, rel, *, input_dim, process_step=4):
    # batch_support_confidence is accepted for API parity; the PyTorch sort runs
    # over a size-1 trailing dim, so it always selects support row 0.
    del batch_support_confidence
    # TODO(synk): process_step == 0 returns `query` of shape (B, Q, D) in PyTorch; not supported here.
    assert process_step >= 1

    D = input_dim
    H = 2 * D
    Dp = -(-D // 128) * 128            # lane-aligned feature / gate-block width
    Gp = 4 * Dp
    B, Q = batch_query.shape[0], batch_query.shape[1]

    f32 = jnp.float32
    bf16 = jnp.bfloat16
    rel32 = rel.astype(f32)                                                            # (B, 1, D)
    qry = (batch_query[:, :, 0, :] + rel32 + batch_query[:, :, 1, :]).astype(f32)      # (B, Q, D)
    sup = (batch_support[:, 0, 0, :] + rel32[:, 0, :] + batch_support[:, 0, 1, :]).astype(f32)  # (B, D)

    # --- Weight prep: dead-half pruning, gate fusion, lane padding, bf16 cast ---
    w_ih = _prune_gate_rows(params["w_ih"].astype(f32), D, H)        # (4D, D)
    w_hh = _prune_gate_rows(params["w_hh"].astype(f32), D, H)        # (4D, 2D)
    b_all = (params["b_ih"] + params["b_hh"]).astype(f32)            # (4H,)

    wih_p = _pack_gate_blocks(w_ih.T, D, Dp).astype(bf16)            # (Dp, Gp)
    whh_h_p = _pack_gate_blocks(w_hh[:, :D].T, D, Dp).astype(bf16)   # (Dp, Gp)
    whh_r_p = _pack_gate_blocks(w_hh[:, D:].T, D, Dp).astype(bf16)   # (Dp, Gp)
    bias_p = jnp.concatenate(
        [jnp.pad(b_all[k * H:k * H + D], (0, Dp - D)) for k in range(4)]).reshape(1, Gp)

    # --- Batch/row tiling plan + VMEM budget ---
    vmem_limit = _vmem_limit_bytes()
    b_tile, num_tiles = _plan_tiling(B, Q, Dp, vmem_limit)
    B_pad = num_tiles * b_tile
    rows = b_tile * Q
    pad_b, pad_d = B_pad - B, Dp - D

    q_flat = jnp.pad(qry, ((0, pad_b), (0, 0), (0, pad_d))).astype(bf16).reshape(num_tiles, rows, Dp)
    s_flat = jnp.pad(sup, ((0, pad_b), (0, pad_d))).astype(bf16).reshape(num_tiles, b_tile, Dp)
    qs_flat = jnp.pad(query_score.astype(f32), ((0, pad_b), (0, 0))).reshape(num_tiles, 1, rows)

    kernel = functools.partial(_matcher_kernel, dp=Dp, b_tile=b_tile, q_per_b=Q,
                               process_step=process_step)

    out = pl.pallas_call(
        kernel,
        out_shape=jax.ShapeDtypeStruct((num_tiles, 1, rows), f32),
        grid_spec=pltpu.PrefetchScalarGridSpec(
            num_scalar_prefetch=0,
            grid=(num_tiles,),
            in_specs=[
                pl.BlockSpec((1, rows, Dp), lambda t: (t, 0, 0)),     # query rows (bf16)
                pl.BlockSpec((1, b_tile, Dp), lambda t: (t, 0, 0)),   # support rows (bf16)
                pl.BlockSpec((1, 1, rows), lambda t: (t, 0, 0)),      # query_score (f32)
                pl.BlockSpec((Dp, Gp), lambda t: (0, 0)),             # W_ih.T (pruned/fused)
                pl.BlockSpec((Dp, Gp), lambda t: (0, 0)),             # W_hh.T (h half)
                pl.BlockSpec((Dp, Gp), lambda t: (0, 0)),             # W_hh.T (r half)
                pl.BlockSpec((1, Gp), lambda t: (0, 0)),              # bias
            ],
            out_specs=pl.BlockSpec((1, 1, rows), lambda t: (t, 0, 0)),
        ),
        compiler_params=pltpu.CompilerParams(
            dimension_semantics=("parallel",),
            vmem_limit_bytes=vmem_limit,
        ),
    )(q_flat, s_flat, qs_flat, wih_p, whh_h_p, whh_r_p, bias_p)
    return out.reshape(B_pad, Q)[:B]


def matcher_reference(params, batch_support, batch_support_confidence,
                      batch_query, query_score, rel, *, input_dim, process_step=4):
    """Pure-JAX transcription of the PyTorch forward (for sanity checking)."""
    D = input_dim
    H = 2 * D
    B = batch_query.shape[0]
    Q = batch_query.shape[1]
    sup = batch_support[:, :, 0, :] + rel + batch_support[:, :, 1, :]   # (B, few, D)
    qry = batch_query[:, :, 0, :] + rel + batch_query[:, :, 1, :]       # (B, Q, D)
    w_ih, w_hh = params["w_ih"], params["w_hh"]
    b = params["b_ih"] + params["b_hh"]
    sims = []
    for bi in range(B):
        s = sup[bi, 0:1]                    # sort over size-1 dim -> always index 0
        q = qry[bi]
        h_r = jnp.zeros((Q, H), jnp.float32)
        c = jnp.zeros((Q, H), jnp.float32)
        h = q
        for _ in range(process_step):
            g = q @ w_ih.T + h_r @ w_hh.T + b
            i_g = jax.nn.sigmoid(g[:, :H])
            f_g = jax.nn.sigmoid(g[:, H:2 * H])
            g_g = jnp.tanh(g[:, 2 * H:3 * H])
            o_g = jax.nn.sigmoid(g[:, 3 * H:])
            c = f_g * c + i_g * g_g
            h_r_ = o_g * jnp.tanh(c)
            h = q + h_r_[:, :D]
            attn = jax.nn.softmax(h @ s.T, axis=1)
            r = attn @ s
            h_r = jnp.concatenate([h, r], axis=1)
        sims.append((h @ s.T)[:, 0])
    return query_score * jnp.stack(sims)


if __name__ == "__main__":
    B, few, Q, D = 2, 3, 8, 32
    process_step = 4

    key = jax.random.PRNGKey(0)
    kp, ks, kc, kq, kqs, kr = jax.random.split(key, 6)
    params = init_matcher_params(D, kp)

    batch_support = jax.random.normal(ks, (B, few, 2, D), jnp.float32)
    batch_support_confidence = jax.random.uniform(kc, (B, few, 1), jnp.float32)
    batch_query = jax.random.normal(kq, (B, Q, 2, D), jnp.float32)
    # NOTE: query_score is used as (B, Q) so the documented (B, Q) output holds
    # (a (B, Q, 1) score would not broadcast against the (B, Q) similarity).
    query_score = jax.random.normal(kqs, (B, Q), jnp.float32)
    rel = jax.random.normal(kr, (B, 1, D), jnp.float32)

    out = matcher_forward(params, batch_support, batch_support_confidence,
                          batch_query, query_score, rel,
                          input_dim=D, process_step=process_step)
    out = jax.block_until_ready(out)

    ref = matcher_reference(params, batch_support, batch_support_confidence,
                            batch_query, query_score, rel,
                            input_dim=D, process_step=process_step)
    assert out.shape == (B, Q)
    scale = float(jnp.maximum(jnp.max(jnp.abs(ref)), 1.0))
    err = float(jnp.max(jnp.abs(out - ref))) / scale
    assert err < 2e-2, (err, out, ref)
    print("KERNEL_OK")
</pallas_src>

<mosaic_0001>
module attributes {stable_mosaic.version = 11 : i64} {
  func.func @_matcher_kernel(%arg0: i32, %arg1: memref<1x256x128xbf16, #tpu.memory_space<vmem>>, %arg2: memref<1x32x128xbf16, #tpu.memory_space<vmem>>, %arg3: memref<1x1x256xf32, #tpu.memory_space<vmem>>, %arg4: memref<128x512xbf16, #tpu.memory_space<vmem>>, %arg5: memref<128x512xbf16, #tpu.memory_space<vmem>>, %arg6: memref<128x512xbf16, #tpu.memory_space<vmem>>, %arg7: memref<1x512xf32, #tpu.memory_space<vmem>>, %arg8: memref<1x1x256xf32, #tpu.memory_space<vmem>>) attributes {dimension_semantics = [#tpu.dimension_semantics<parallel>], iteration_bounds = array<i64: 1>, scalar_prefetch = 0 : i64, scratch_operands = 0 : i64, tpu.core_type = #tpu.core_type<tc>, window_params = [{transform_indices = @transform_0, window_bounds = array<i64: 1, 256, 128>}, {transform_indices = @transform_1, window_bounds = array<i64: 1, 32, 128>}, {transform_indices = @transform_2, window_bounds = array<i64: 1, 1, 256>}, {pipeline_mode = #tpu.pipeline_mode<synchronous>, transform_indices = @transform_3, window_bounds = array<i64: 128, 512>}, {pipeline_mode = #tpu.pipeline_mode<synchronous>, transform_indices = @transform_4, window_bounds = array<i64: 128, 512>}, {pipeline_mode = #tpu.pipeline_mode<synchronous>, transform_indices = @transform_5, window_bounds = array<i64: 128, 512>}, {pipeline_mode = #tpu.pipeline_mode<synchronous>, transform_indices = @transform_6, window_bounds = array<i64: 1, 512>}, {transform_indices = @transform_7, window_bounds = array<i64: 1, 1, 256>}]} {
    %c0 = arith.constant 0 : index
    %c0_0 = arith.constant 0 : index
    %c0_1 = arith.constant 0 : index
    %0 = vector.load %arg1[%c0, %c0_0, %c0_1] : memref<1x256x128xbf16, #tpu.memory_space<vmem>>, vector<1x256x128xbf16>
    %1 = vector.shape_cast %0 : vector<1x256x128xbf16> to vector<256x128xbf16>
    %c0_2 = arith.constant 0 : index
    %c0_3 = arith.constant 0 : index
    %c0_4 = arith.constant 0 : index
    %2 = vector.load %arg2[%c0_2, %c0_3, %c0_4] : memref<1x32x128xbf16, #tpu.memory_space<vmem>>, vector<1x32x128xbf16>
    %3 = vector.shape_cast %2 : vector<1x32x128xbf16> to vector<32x128xbf16>
    %c0_5 = arith.constant 0 : index
    %c0_6 = arith.constant 0 : index
    %4 = vector.load %arg4[%c0_5, %c0_6] : memref<128x512xbf16, #tpu.memory_space<vmem>>, vector<128x512xbf16>
    %c0_7 = arith.constant 0 : index
    %c0_8 = arith.constant 0 : index
    %5 = vector.load %arg5[%c0_7, %c0_8] : memref<128x512xbf16, #tpu.memory_space<vmem>>, vector<128x512xbf16>
    %c0_9 = arith.constant 0 : index
    %c0_10 = arith.constant 0 : index
    %6 = vector.load %arg6[%c0_9, %c0_10] : memref<128x512xbf16, #tpu.memory_space<vmem>>, vector<128x512xbf16>
    %c0_11 = arith.constant 0 : index
    %c0_12 = arith.constant 0 : index
    %7 = vector.load %arg7[%c0_11, %c0_12] : memref<1x512xf32, #tpu.memory_space<vmem>>, vector<1x512xf32>
    %8 = tpu.iota {dimensions = array<i32: 0>} : vector<256x32xi32>
    %9 = tpu.iota {dimensions = array<i32: 1>} : vector<256x32xi32>
    %c8_i32 = arith.constant 8 : i32
    %10 = vector.broadcast %c8_i32 : i32 to vector<256x32xi32>
    %11 = arith.muli %9, %10 : vector<256x32xi32>
    %12 = arith.cmpi sge, %8, %11 : vector<256x32xi32>
    %c8_i32_13 = arith.constant 8 : i32
    %13 = vector.broadcast %c8_i32_13 : i32 to vector<256x32xi32>
    %14 = arith.addi %11, %13 : vector<256x32xi32>
    %15 = arith.cmpi slt, %8, %14 : vector<256x32xi32>
    %16 = arith.andi %12, %15 : vector<256x32xi1>
    %cst = arith.constant 1.000000e+00 : f32
    %cst_14 = arith.constant 0.000000e+00 : f32
    %17 = vector.broadcast %cst : f32 to vector<256x32xf32>
    %18 = vector.broadcast %cst_14 : f32 to vector<256x32xf32>
    %19 = arith.select %16, %17, %18 : vector<256x32xi1>, vector<256x32xf32>
    %20 = arith.truncf %19 : vector<256x32xf32> to vector<256x32xbf16>
    %cst_15 = arith.constant dense<0.000000e+00> : vector<256x128xf32>
    %21 = tpu.matmul %20, %3, %cst_15 {dimension_numbers = #tpu.dot_dimension_numbers<[1], [0], [0], [1], [0, 0, 1, 1], [], []>} : vector<256x32xbf16>, vector<32x128xbf16>, vector<256x128xf32> -> vector<256x128xf32>
    %22 = arith.truncf %21 : vector<256x128xf32> to vector<256x128xbf16>
    %cst_16 = arith.constant dense<0.000000e+00> : vector<256x512xf32>
    %23 = tpu.matmul %1, %4, %cst_16 {dimension_numbers = #tpu.dot_dimension_numbers<[1], [0], [0], [1], [0, 0, 1, 1], [], []>} : vector<256x128xbf16>, vector<128x512xbf16>, vector<256x512xf32> -> vector<256x512xf32>
    %24 = vector.broadcast %7 : vector<1x512xf32> to vector<256x512xf32>
    %25 = arith.addf %23, %24 : vector<256x512xf32>
    %cst_17 = arith.constant dense<0.000000e+00> : vector<256x512xf32>
    %26 = tpu.matmul %22, %6, %cst_17 {dimension_numbers = #tpu.dot_dimension_numbers<[1], [0], [0], [1], [0, 0, 1, 1], [], []>} : vector<256x128xbf16>, vector<128x512xbf16>, vector<256x512xf32> -> vector<256x512xf32>
    %27 = arith.addf %25, %26 : vector<256x512xf32>
    %28 = arith.extf %1 : vector<256x128xbf16> to vector<256x128xf32>
    %cst_18 = arith.constant 0.000000e+00 : f32
    %29 = vector.broadcast %cst_18 : f32 to vector<256x128xf32>
    %30 = vector.extract_strided_slice %25 {offsets = [0, 0], sizes = [256, 128], strides = [1, 1]} : vector<256x512xf32> to vector<256x128xf32>
    %31 = arith.negf %30 : vector<256x128xf32>
    %32 = math.exp %31 : vector<256x128xf32>
    %cst_19 = arith.constant 1.000000e+00 : f32
    %33 = vector.broadcast %cst_19 : f32 to vector<256x128xf32>
    %34 = arith.addf %33, %32 : vector<256x128xf32>
    %35 = arith.divf %33, %34 : vector<256x128xf32>
    %36 = vector.extract_strided_slice %25 {offsets = [0, 128], sizes = [256, 128], strides = [1, 1]} : vector<256x512xf32> to vector<256x128xf32>
    %37 = arith.negf %36 : vector<256x128xf32>
    %38 = math.exp %37 : vector<256x128xf32>
    %cst_20 = arith.constant 1.000000e+00 : f32
    %39 = vector.broadcast %cst_20 : f32 to vector<256x128xf32>
    %40 = arith.addf %39, %38 : vector<256x128xf32>
    %41 = arith.divf %39, %40 : vector<256x128xf32>
    %42 = vector.extract_strided_slice %25 {offsets = [0, 256], sizes = [256, 128], strides = [1, 1]} : vector<256x512xf32> to vector<256x128xf32>
    %43 = math.tanh %42 : vector<256x128xf32>
    %44 = vector.extract_strided_slice %25 {offsets = [0, 384], sizes = [256, 128], strides = [1, 1]} : vector<256x512xf32> to vector<256x128xf32>
    %45 = arith.negf %44 : vector<256x128xf32>
    %46 = math.exp %45 : vector<256x128xf32>
    %cst_21 = arith.constant 1.000000e+00 : f32
    %47 = vector.broadcast %cst_21 : f32 to vector<256x128xf32>
    %48 = arith.addf %47, %46 : vector<256x128xf32>
    %49 = arith.divf %47, %48 : vector<256x128xf32>
    %50 = arith.mulf %41, %29 : vector<256x128xf32>
    %51 = arith.mulf %35, %43 : vector<256x128xf32>
    %52 = arith.addf %50, %51 : vector<256x128xf32>
    %53 = math.tanh %52 : vector<256x128xf32>
    %54 = arith.mulf %49, %53 : vector<256x128xf32>
    %55 = arith.addf %28, %54 : vector<256x128xf32>
    %56 = arith.truncf %55 : vector<256x128xf32> to vector<256x128xbf16>
    %cst_22 = arith.constant dense<0.000000e+00> : vector<256x512xf32>
    %57 = tpu.matmul %56, %5, %cst_22 {dimension_numbers = #tpu.dot_dimension_numbers<[1], [0], [0], [1], [0, 0, 1, 1], [], []>} : vector<256x128xbf16>, vector<128x512xbf16>, vector<256x512xf32> -> vector<256x512xf32>
    %58 = arith.addf %27, %57 : vector<256x512xf32>
    %59 = vector.extract_strided_slice %58 {offsets = [0, 0], sizes = [256, 128], strides = [1, 1]} : vector<256x512xf32> to vector<256x128xf32>
    %60 = arith.negf %59 : vector<256x128xf32>
    %61 = math.exp %60 : vector<256x128xf32>
    %cst_23 = arith.constant 1.000000e+00 : f32
    %62 = vector.broadcast %cst_23 : f32 to vector<256x128xf32>
    %63 = arith.addf %62, %61 : vector<256x128xf32>
    %64 = arith.divf %62, %63 : vector<256x128xf32>
    %65 = vector.extract_strided_slice %58 {offsets = [0, 128], sizes = [256, 128], strides = [1, 1]} : vector<256x512xf32> to vector<256x128xf32>
    %66 = arith.negf %65 : vector<256x128xf32>
    %67 = math.exp %66 : vector<256x128xf32>
    %cst_24 = arith.constant 1.000000e+00 : f32
    %68 = vector.broadcast %cst_24 : f32 to vector<256x128xf32>
    %69 = arith.addf %68, %67 : vector<256x128xf32>
    %70 = arith.divf %68, %69 : vector<256x128xf32>
    %71 = vector.extract_strided_slice %58 {offsets = [0, 256], sizes = [256, 128], strides = [1, 1]} : vector<256x512xf32> to vector<256x128xf32>
    %72 = math.tanh %71 : vector<256x128xf32>
    %73 = vector.extract_strided_slice %58 {offsets = [0, 384], sizes = [256, 128], strides = [1, 1]} : vector<256x512xf32> to vector<256x128xf32>
    %74 = arith.negf %73 : vector<256x128xf32>
    %75 = math.exp %74 : vector<256x128xf32>
    %cst_25 = arith.constant 1.000000e+00 : f32
    %76 = vector.broadcast %cst_25 : f32 to vector<256x128xf32>
    %77 = arith.addf %76, %75 : vector<256x128xf32>
    %78 = arith.divf %76, %77 : vector<256x128xf32>
    %79 = arith.mulf %70, %52 : vector<256x128xf32>
    %80 = arith.mulf %64, %72 : vector<256x128xf32>
    %81 = arith.addf %79, %80 : vector<256x128xf32>
    %82 = math.tanh %81 : vector<256x128xf32>
    %83 = arith.mulf %78, %82 : vector<256x128xf32>
    %84 = arith.addf %28, %83 : vector<256x128xf32>
    %85 = arith.truncf %84 : vector<256x128xf32> to vector<256x128xbf16>
    %cst_26 = arith.constant dense<0.000000e+00> : vector<256x512xf32>
    %86 = tpu.matmul %85, %5, %cst_26 {dimension_numbers = #tpu.dot_dimension_numbers<[1], [0], [0], [1], [0, 0, 1, 1], [], []>} : vector<256x128xbf16>, vector<128x512xbf16>, vector<256x512xf32> -> vector<256x512xf32>
    %87 = arith.addf %27, %86 : vector<256x512xf32>
    %88 = vector.extract_strided_slice %87 {offsets = [0, 0], sizes = [256, 128], strides = [1, 1]} : vector<256x512xf32> to vector<256x128xf32>
    %89 = arith.negf %88 : vector<256x128xf32>
    %90 = math.exp %89 : vector<256x128xf32>
    %cst_27 = arith.constant 1.000000e+00 : f32
    %91 = vector.broadcast %cst_27 : f32 to vector<256x128xf32>
    %92 = arith.addf %91, %90 : vector<256x128xf32>
    %93 = arith.divf %91, %92 : vector<256x128xf32>
    %94 = vector.extract_strided_slice %87 {offsets = [0, 128], sizes = [256, 128], strides = [1, 1]} : vector<256x512xf32> to vector<256x128xf32>
    %95 = arith.negf %94 : vector<256x128xf32>
    %96 = math.exp %95 : vector<256x128xf32>
    %cst_28 = arith.constant 1.000000e+00 : f32
    %97 = vector.broadcast %cst_28 : f32 to vector<256x128xf32>
    %98 = arith.addf %97, %96 : vector<256x128xf32>
    %99 = arith.divf %97, %98 : vector<256x128xf32>
    %100 = vector.extract_strided_slice %87 {offsets = [0, 256], sizes = [256, 128], strides = [1, 1]} : vector<256x512xf32> to vector<256x128xf32>
    %101 = math.tanh %100 : vector<256x128xf32>
    %102 = vector.extract_strided_slice %87 {offsets = [0, 384], sizes = [256, 128], strides = [1, 1]} : vector<256x512xf32> to vector<256x128xf32>
    %103 = arith.negf %102 : vector<256x128xf32>
    %104 = math.exp %103 : vector<256x128xf32>
    %cst_29 = arith.constant 1.000000e+00 : f32
    %105 = vector.broadcast %cst_29 : f32 to vector<256x128xf32>
    %106 = arith.addf %105, %104 : vector<256x128xf32>
    %107 = arith.divf %105, %106 : vector<256x128xf32>
    %108 = arith.mulf %99, %81 : vector<256x128xf32>
    %109 = arith.mulf %93, %101 : vector<256x128xf32>
    %110 = arith.addf %108, %109 : vector<256x128xf32>
    %111 = math.tanh %110 : vector<256x128xf32>
    %112 = arith.mulf %107, %111 : vector<256x128xf32>
    %113 = arith.addf %28, %112 : vector<256x128xf32>
    %114 = arith.truncf %113 : vector<256x128xf32> to vector<256x128xbf16>
    %cst_30 = arith.constant dense<0.000000e+00> : vector<256x512xf32>
    %115 = tpu.matmul %114, %5, %cst_30 {dimension_numbers = #tpu.dot_dimension_numbers<[1], [0], [0], [1], [0, 0, 1, 1], [], []>} : vector<256x128xbf16>, vector<128x512xbf16>, vector<256x512xf32> -> vector<256x512xf32>
    %116 = arith.addf %27, %115 : vector<256x512xf32>
    %117 = vector.extract_strided_slice %116 {offsets = [0, 0], sizes = [256, 128], strides = [1, 1]} : vector<256x512xf32> to vector<256x128xf32>
    %118 = arith.negf %117 : vector<256x128xf32>
    %119 = math.exp %118 : vector<256x128xf32>
    %cst_31 = arith.constant 1.000000e+00 : f32
    %120 = vector.broadcast %cst_31 : f32 to vector<256x128xf32>
    %121 = arith.addf %120, %119 : vector<256x128xf32>
    %122 = arith.divf %120, %121 : vector<256x128xf32>
    %123 = vector.extract_strided_slice %116 {offsets = [0, 128], sizes = [256, 128], strides = [1, 1]} : vector<256x512xf32> to vector<256x128xf32>
    %124 = arith.negf %123 : vector<256x128xf32>
    %125 = math.exp %124 : vector<256x128xf32>
    %cst_32 = arith.constant 1.000000e+00 : f32
    %126 = vector.broadcast %cst_32 : f32 to vector<256x128xf32>
    %127 = arith.addf %126, %125 : vector<256x128xf32>
    %128 = arith.divf %126, %127 : vector<256x128xf32>
    %129 = vector.extract_strided_slice %116 {offsets = [0, 256], sizes = [256, 128], strides = [1, 1]} : vector<256x512xf32> to vector<256x128xf32>
    %130 = math.tanh %129 : vector<256x128xf32>
    %131 = vector.extract_strided_slice %116 {offsets = [0, 384], sizes = [256, 128], strides = [1, 1]} : vector<256x512xf32> to vector<256x128xf32>
    %132 = arith.negf %131 : vector<256x128xf32>
    %133 = math.exp %132 : vector<256x128xf32>
    %cst_33 = arith.constant 1.000000e+00 : f32
    %134 = vector.broadcast %cst_33 : f32 to vector<256x128xf32>
    %135 = arith.addf %134, %133 : vector<256x128xf32>
    %136 = arith.divf %134, %135 : vector<256x128xf32>
    %137 = arith.mulf %128, %110 : vector<256x128xf32>
    %138 = arith.mulf %122, %130 : vector<256x128xf32>
    %139 = arith.addf %137, %138 : vector<256x128xf32>
    %140 = math.tanh %139 : vector<256x128xf32>
    %141 = arith.mulf %136, %140 : vector<256x128xf32>
    %142 = arith.addf %28, %141 : vector<256x128xf32>
    %143 = arith.mulf %142, %21 : vector<256x128xf32>
    %cst_34 = arith.constant dense<0.000000e+00> : vector<256xf32>
    %144 = vector.multi_reduction <add>, %143, %cst_34 [1] : vector<256x128xf32> to vector<256xf32>
    %c0_35 = arith.constant 0 : index
    %c0_36 = arith.constant 0 : index
    %c0_37 = arith.constant 0 : index
    %145 = vector.load %arg3[%c0_35, %c0_36, %c0_37] : memref<1x1x256xf32, #tpu.memory_space<vmem>>, vector<1x1x256xf32>
    %146 = vector.shape_cast %145 : vector<1x1x256xf32> to vector<256xf32>
    %147 = arith.mulf %146, %144 : vector<256xf32>
    %c0_38 = arith.constant 0 : index
    %c0_39 = arith.constant 0 : index
    %c0_40 = arith.constant 0 : index
    %148 = vector.load %arg8[%c0_38, %c0_39, %c0_40] : memref<1x1x256xf32, #tpu.memory_space<vmem>>, vector<1x1x256xf32>
    %149 = vector.shape_cast %148 : vector<1x1x256xf32> to vector<256xf32>
    %150 = vector.shape_cast %147 : vector<256xf32> to vector<1x1x256xf32>
    tpu.vector_store %arg8[%c0_38, %c0_39, %c0_40], %150 {strides = array<i32>} : memref<1x1x256xf32, #tpu.memory_space<vmem>>, vector<1x1x256xf32>,
    return
  }
  func.func @transform_0(%arg0: i32) -> (i32, i32, i32) {
    %c0_i32 = arith.constant 0 : i32
    %c0_i32_0 = arith.constant 0 : i32
    %c0_i32_1 = arith.constant 0 : i32
    return %arg0, %c0_i32, %c0_i32_0 : i32, i32, i32
  }
  func.func @transform_1(%arg0: i32) -> (i32, i32, i32) {
    %c0_i32 = arith.constant 0 : i32
    %c0_i32_0 = arith.constant 0 : i32
    %c0_i32_1 = arith.constant 0 : i32
    return %arg0, %c0_i32, %c0_i32_0 : i32, i32, i32
  }
  func.func @transform_2(%arg0: i32) -> (i32, i32, i32) {
    %c0_i32 = arith.constant 0 : i32
    %c0_i32_0 = arith.constant 0 : i32
    %c0_i32_1 = arith.constant 0 : i32
    return %arg0, %c0_i32, %c0_i32_0 : i32, i32, i32
  }
  func.func @transform_3(%arg0: i32) -> (i32, i32) {
    %c0_i32 = arith.constant 0 : i32
    %c0_i32_0 = arith.constant 0 : i32
    %c0_i32_1 = arith.constant 0 : i32
    return %c0_i32, %c0_i32_0 : i32, i32
  }
  func.func @transform_4(%arg0: i32) -> (i32, i32) {
    %c0_i32 = arith.constant 0 : i32
    %c0_i32_0 = arith.constant 0 : i32
    %c0_i32_1 = arith.constant 0 : i32
    return %c0_i32, %c0_i32_0 : i32, i32
  }
  func.func @transform_5(%arg0: i32) -> (i32, i32) {
    %c0_i32 = arith.constant 0 : i32
    %c0_i32_0 = arith.constant 0 : i32
    %c0_i32_1 = arith.constant 0 : i32
    return %c0_i32, %c0_i32_0 : i32, i32
  }
  func.func @transform_6(%arg0: i32) -> (i32, i32) {
    %c0_i32 = arith.constant 0 : i32
    %c0_i32_0 = arith.constant 0 : i32
    %c0_i32_1 = arith.constant 0 : i32
    return %c0_i32, %c0_i32_0 : i32, i32
  }
  func.func @transform_7(%arg0: i32) -> (i32, i32, i32) {
    %c0_i32 = arith.constant 0 : i32
    %c0_i32_0 = arith.constant 0 : i32
    %c0_i32_1 = arith.constant 0 : i32
    return %arg0, %c0_i32, %c0_i32_0 : i32, i32, i32
  }
}

</mosaic_0001>

<bundles_post_ra>
// kernel: tpu_custom_call.1
= control target key start
LH: loop header
LB: loop body
LE: loop exit
PB: predicated region body
PF: predicated region fallthrough
CT: control target
= control target key end

     0   :  { %12 = vsyncpa [#allocation3], 0  ;;  %s18157_s0 = inlined_call_operand.hbm [shape: bf16[1,256,128], index: 0, kind: input, shape index: {}]   ;;  %s18158_s1 = inlined_call_operand.hbm [shape: bf16[1,32,128], index: 1, kind: input, shape index: {}]   ;;  %s18159_s2 = inlined_call_operand.vmem [shape: f32[1,1,256], index: 2, kind: input, shape index: {}]   ;;  %s18160_s3 = inlined_call_operand.hbm [shape: bf16[128,512], index: 3, kind: input, shape index: {}]   ;;  %s18161_s4 = inlined_call_operand.hbm [shape: bf16[128,512], index: 4, kind: input, shape index: {}]   ;;  %s18162_s5 = inlined_call_operand.hbm [shape: bf16[128,512], index: 5, kind: input, shape index: {}]   ;;  %s18163_s6 = inlined_call_operand.vmem [shape: f32[1,512], index: 6, kind: input, shape index: {}]   ;;  %s18164_s7 = inlined_call_operand.hbm [shape: f32[1,1,256], index: 7, kind: output, shape index: {}]  }
   0x1   :  { %13 = vsyncpa [#allocation6], 0 }
   0x2   :  { %14 = vsyncpa [#allocation9], 0 }
   0x3   :  { %15 = vsyncpa [#allocation4], 0  ;;  %s13042_s24 = smov [#allocation5]   ;;  %s12902_s28 = scalar_lea.hbm %s18158_s1, 256 }
   0x4   :  { %s33_s25 = sshll.u32 %s13042_s24, 4  ;;  %p12903_p0 = scmp.ne.s32.totalorder %s18158_s1, %s12902_s28  ;;  %s34_s25 = int_to_ptr.vmem [resolvable:$true] %s33_s25 }
   0x5   :  { %p12906_p1 = scmp.lt.u32.totalorder %s12902_s28, %s18158_s1 }
   0x7   :  { %p12908_p2 = pnand %p12906_p1, %p12903_p0 }
   0x9   :  { %12911 = shalt.err (!%p12908_p2)
}
   0xa   :  { %s12912_s10 = scalar_lea.vmem %s34_s25, 256  ;;  %p12917_p4 = scmp.lt.s32.totalorder %s34_s25, %s34_s25 }
   0xb   :  { %p12913_p3 = scmp.ne.s32.totalorder %s34_s25, %s12912_s10  ;;  %p12918_p5 = scmp.lt.s32.totalorder %s12912_s10, %s12912_s10 }
   0xd   :  { %p12919_p6 = por %p12918_p5, %p12917_p4 }
   0xf   :  { %p12920_p7 = pnand %p12919_p6, %p12913_p3 }
  0x11   :  { %12923 = shalt.err (!%p12920_p7)
}
  0x12   :  { %s13043_s11 = smov 64   ;;  %s13044_s12 = smov 4  }
  0x13   :  { %39 = dma.hbm_to_vmem [thread:$0]  %s18158_s1, 256, %s34_s25, [#allocation6], %s13043_s11, %s13043_s11, %s13044_s12  }
  0x14   :  { %s13045_s15 = smov [#allocation8]   ;;  %s13046_s17 = smov [#allocation2]  }
  0x15   :  { %s59_s16 = sshll.u32 %s13045_s15, 4  ;;  %s21_s18 = sshll.u32 %s13046_s17, 4  ;;  %s60_s16 = int_to_ptr.vmem [resolvable:$true] %s59_s16  ;;  %s22_s18 = int_to_ptr.vmem [resolvable:$true] %s21_s18 }
  0x16   :  { %s12924_s21 = scalar_lea.hbm %s18161_s4, 4096 }
  0x17   :  { %p12925_p8 = scmp.ne.s32.totalorder %s18161_s4, %s12924_s21  ;;  %p12928_p9 = scmp.lt.u32.totalorder %s12924_s21, %s18161_s4 }
  0x19   :  { %p12930_p10 = pnand %p12928_p9, %p12925_p8 }
  0x1b   :  { %12933 = shalt.err (!%p12930_p10)
}
  0x1c   :  { %s12934_s1 = scalar_lea.vmem %s60_s16, 4096  ;;  %p12939_p12 = scmp.lt.s32.totalorder %s60_s16, %s60_s16 }
  0x1d   :  { %p12935_p11 = scmp.ne.s32.totalorder %s60_s16, %s12934_s1  ;;  %p12940_p13 = scmp.lt.s32.totalorder %s12934_s1, %s12934_s1 }
  0x1f   :  { %p12941_p0 = por %p12940_p13, %p12939_p12 }
  0x21   :  { %p12942_p1 = pnand %p12941_p0, %p12935_p11 }
  0x23   :  { %12945 = shalt.err (!%p12942_p1)
}
  0x24   :  { %s13047_s25 = smov 256   ;;  %s13048_s27 = smov 16  }
  0x25   :  { %65 = dma.hbm_to_vmem [thread:$0]  %s18161_s4, 4096, %s60_s16, [#allocation9], %s13047_s25, %s13047_s25, %s13048_s27  }
  0x26   :  { %s12946_s9 = scalar_lea.hbm %s18157_s0, 2048 }
  0x27   :  { %p12947_p2 = scmp.ne.s32.totalorder %s18157_s0, %s12946_s9  ;;  %p12950_p3 = scmp.lt.u32.totalorder %s12946_s9, %s18157_s0 }
  0x29   :  { %p12952_p4 = pnand %p12950_p3, %p12947_p2 }
  0x2b   :  { %12955 = shalt.err (!%p12952_p4)
}
  0x2c   :  { %s12956_s17 = scalar_lea.vmem %s22_s18, 2048  ;;  %p12961_p6 = scmp.lt.s32.totalorder %s22_s18, %s22_s18 }
  0x2d   :  { %p12957_p5 = scmp.ne.s32.totalorder %s22_s18, %s12956_s17  ;;  %p12962_p7 = scmp.lt.s32.totalorder %s12956_s17, %s12956_s17 }
  0x2f   :  { %p12963_p8 = por %p12962_p7, %p12961_p6 }
  0x31   :  { %p12964_p9 = pnand %p12963_p8, %p12957_p5 }
  0x33   :  { %12967 = shalt.err (!%p12964_p9)
}
  0x34   :  { %27 = dma.hbm_to_vmem [thread:$0]  %s18157_s0, 2048, %s22_s18, [#allocation3], %s13043_s11, %s13043_s11, %s13044_s12  }
  0x35   :  { %s13049_s19 = smov [#allocation7]   ;;  %s13050_s21 = smov [#allocation10]  }
  0x36   :  { %s47_s20 = sshll.u32 %s13049_s19, 4  ;;  %s71_s22 = sshll.u32 %s13050_s21, 4  ;;  %s48_s20 = int_to_ptr.vmem [resolvable:$true] %s47_s20  ;;  %s72_s22 = int_to_ptr.vmem [resolvable:$true] %s71_s22 }
  0x37   :  { %s12968_s26 = scalar_lea.hbm %s18160_s3, 4096 }
  0x38   :  { %p12969_p10 = scmp.ne.s32.totalorder %s18160_s3, %s12968_s26  ;;  %p12972_p11 = scmp.lt.u32.totalorder %s12968_s26, %s18160_s3 }
  0x3a   :  { %p12974_p12 = pnand %p12972_p11, %p12969_p10 }
  0x3c   :  { %12977 = shalt.err (!%p12974_p12)
}
  0x3d   :  { %s12978_s0 = scalar_lea.vmem %s48_s20, 4096  ;;  %p12983_p0 = scmp.lt.s32.totalorder %s48_s20, %s48_s20 }
  0x3e   :  { %p12979_p13 = scmp.ne.s32.totalorder %s48_s20, %s12978_s0  ;;  %p12984_p1 = scmp.lt.s32.totalorder %s12978_s0, %s12978_s0 }
  0x40   :  { %p12985_p2 = por %p12984_p1, %p12983_p0 }
  0x42   :  { %p12986_p3 = pnand %p12985_p2, %p12979_p13 }
  0x44   :  { %12989 = shalt.err (!%p12986_p3)
}
  0x45   :  { %53 = dma.hbm_to_vmem [thread:$0]  %s18160_s3, 4096, %s48_s20, [#allocation6], %s13047_s25, %s13047_s25, %s13048_s27  }
  0x46   :  { %s12990_s9 = scalar_lea.hbm %s18162_s5, 4096 }
  0x47   :  { %p12991_p4 = scmp.ne.s32.totalorder %s18162_s5, %s12990_s9  ;;  %p12994_p5 = scmp.lt.u32.totalorder %s12990_s9, %s18162_s5 }
  0x49   :  { %p12996_p6 = pnand %p12994_p5, %p12991_p4 }
  0x4b   :  { %12999 = shalt.err (!%p12996_p6)
}
  0x4c   :  { %s13000_s17 = scalar_lea.vmem %s72_s22, 4096  ;;  %p13005_p8 = scmp.lt.s32.totalorder %s72_s22, %s72_s22 }
  0x4d   :  { %p13001_p7 = scmp.ne.s32.totalorder %s72_s22, %s13000_s17  ;;  %p13006_p9 = scmp.lt.s32.totalorder %s13000_s17, %s13000_s17 }
  0x4f   :  { %p13007_p10 = por %p13006_p9, %p13005_p8 }
  0x51   :  { %p13008_p11 = pnand %p13007_p10, %p13001_p7 }
  0x53   :  { %13011 = shalt.err (!%p13008_p11)
}
  0x54   :  { %77 = dma.hbm_to_vmem [thread:$0]  %s18162_s5, 4096, %s72_s22, [#allocation9], %s13047_s25, %s13047_s25, %s13048_s27  }
  0x55   :  { %13034 = dma.done.wait [#allocation3], 2048  }
  0x56   :  { %13035 = vsyncadd [#allocation3], 4294965248 }
  0x57   :  { %13036 = dma.done.wait [#allocation6], 4352  }
  0x58   :  { %13037 = vsyncadd [#allocation6], 4294962944 }
  0x59   :  { %13038 = dma.done.wait [#allocation9], 8192  }
  0x5a   :  { %13039 = vsyncadd [#allocation9], 4294959104  ;;  %v18165_v0 = vlaneseq  ;;  %v18170_v1 = vmov 0   ;;  %vm422_vm1 = vcmask 261120   ;;  %v10598_v12 = vld [vmem:[#allocation5] sm:$0xff]   ;;  %v10599_v14 = vld [vmem:[#allocation5 + $0x8] sm:$0xff]  }
  0x5b   :  { %10596 = vset.pattern.permute.xlu0 %v18170_v1  ;;  %10597 = vset.pattern.permute.xlu1 %v18170_v1  ;;  %v13052_v15 = vmov 0.0   ;;  %v10602_v24 = vld [vmem:[#allocation7 + $0x4] ss:$16 sps:$4 sm:$0xff]   ;;  %v10609_v34 = vld [vmem:[#allocation7 + $0x8] ss:$16 sps:$4 sm:$0xff]   ;;  %s13054_s16 = smov [#allocation11]  }
  0x5c   :  { %v13173_v2 = vshrl.u32 %v18165_v0, 7  ;;  %v13176_v3 = vand.u32 127, %v18165_v0  ;;  %10543 = vmatprep.subr.bf16.mxu0 %v10598_v12  ;;  %10579 = vmatprep.subr.bf16.mxu1 %v10598_v12  ;;  %v10611_v37 = vld [vmem:[#allocation7 + $0xc] ss:$16 sps:$4 sm:$0xff]   ;;  %v10615_v45 = vld [vmem:[#allocation7 + $0x28] ss:$16 sps:$4 sm:$0xff]  }
  0x5d   :  { %10544 = vmatpush3.bf16.msra.mxu0 %v10598_v12  ;;  %10581 = vmatpush3.bf16.msra.mxu1 %v10598_v12  ;;  %v10617_v48 = vld [vmem:[#allocation7 + $0x2c] ss:$16 sps:$4 sm:$0xff]   ;;  %v10621_v56 = vld [vmem:[#allocation7 + $0x48] ss:$16 sps:$4 sm:$0xff]   ;;  %s10000_s19 = sshll.u32 %s13054_s16, 4  ;;  %s10001_s19 = int_to_ptr.vmem [resolvable:$true] %s10000_s19 }
  0x5e   :  { %18742 = vst [vmem:[#allocation16_spill] sm:$0xff] %v13173_v2  ;;  %18743 = vst [vmem:[#allocation17_spill] sm:$0xff] %v13176_v3  ;;  %v231_v4 = vadd.s32 8, %v13173_v2  ;;  %v13180_v5 = vmul.u32 8, %v13176_v3  ;;  %v232_v6 = vadd.s32 16, %v13173_v2  ;;  %v233_v7 = vadd.s32 24, %v13173_v2  ;;  %10545 = vmatprep.subr.bf16.mxu0 %v10599_v14  ;;  %10580 = vmatprep.subr.bf16.mxu1 %v10599_v14  ;;  %p13017_p13 = scmp.lt.s32.totalorder %s10001_s19, %s10001_s19 }
  0x5f   :  { %v234_v8 = vadd.s32 32, %v13173_v2  ;;  %v235_v9 = vadd.s32 40, %v13173_v2  ;;  %v236_v10 = vadd.s32 48, %v13173_v2  ;;  %v237_v13 = vadd.s32 56, %v13173_v2  ;;  %v10623_v60 = vld [vmem:[#allocation7 + $0x4c] ss:$16 sps:$4 sm:$0xff]  }
  0x60   :  { %vm265_vm0 = vcmp.ge.s32.totalorder %v13173_v2, %v13180_v5  ;;  %v13190_v11 = vadd.s32 8, %v13180_v5  ;;  %vm266_vm2 = vcmp.ge.s32.totalorder %v231_v4, %v13180_v5  ;;  %vm267_vm3 = vcmp.ge.s32.totalorder %v232_v6, %v13180_v5  ;;  %v10643_v54 = vld [vmem:[#allocation7 + $0xc8] ss:$16 sps:$4 sm:$0xff]   ;;  %s13012_s20 = scalar_lea.vmem %s10001_s19, 32 }
  0x61   :  { %vm268_vm4 = vcmp.ge.s32.totalorder %v233_v7, %v13180_v5  ;;  %vm269_vm8 = vcmp.ge.s32.totalorder %v234_v8, %v13180_v5  ;;  %vm270_vm11 = vcmp.ge.s32.totalorder %v235_v9, %v13180_v5  ;;  %vm271_vm13 = vcmp.ge.s32.totalorder %v236_v10, %v13180_v5  ;;  %10546 = vmatpush3.bf16.msra.mxu0 %v10599_v14  ;;  %p13013_p12 = scmp.ne.s32.totalorder %s10001_s19, %s13012_s20  ;;  %p13018_p0 = scmp.lt.s32.totalorder %s13012_s20, %s13012_s20 }
  0x62   :  { %vm298_vm5 = vcmp.lt.s32.totalorder %v13173_v2, %v13190_v11  ;;  %vm299_vm6 = vcmp.lt.s32.totalorder %v231_v4, %v13190_v11  ;;  %vm300_vm7 = vcmp.lt.s32.totalorder %v232_v6, %v13190_v11  ;;  %vm301_vm10 = vcmp.lt.s32.totalorder %v233_v7, %v13190_v11  ;;  %10582 = vmatpush3.bf16.msra.mxu1 %v10599_v14  ;;  %v10600_v4 = vld [vmem:[#allocation7] ss:$16 sps:$4 sm:$0xff]  }
  0x63   :  { %vm330_vm9 = vmand %vm265_vm0, %vm298_vm5  ;;  %vm302_vm12 = vcmp.lt.s32.totalorder %v234_v8, %v13190_v11  ;;  %vm303_vm15 = vcmp.lt.s32.totalorder %v235_v9, %v13190_v11  ;;  %v238_v17 = vadd.s32 64, %v13173_v2  ;;  %v239_v18 = vadd.s32 72, %v13173_v2  ;;  %925 = vmatprep.subr.bf16.mxu1 %v10602_v24  ;;  %1118 = vmatprep.subr.bf16.mxu0 %v10611_v37  ;;  %v10605_v9 = vld [vmem:[#allocation7 + $0x24] ss:$16 sps:$4 sm:$0xff]   ;;  %p13019_p1 = por %p13018_p0, %p13017_p13 }
  0x64   :  { %vm331_vm14 = vmand %vm266_vm2, %vm299_vm6  ;;  %v362_v16 = vsel %vm330_vm9, 1.0, %v13052_v15  ;;  %vm272_vm2 = vcmp.ge.s32.totalorder %v237_v13, %v13180_v5  ;;  %v240_v20 = vadd.s32 80, %v13173_v2  ;;  %v241_v21 = vadd.s32 88, %v13173_v2 }
  0x65   :  { %v363_v19 = vsel %vm331_vm14, 1.0, %v13052_v15  ;;  %vm332_vm0 = vmand %vm267_vm3, %vm300_vm7  ;;  %vm304_vm6 = vcmp.lt.s32.totalorder %v236_v10, %v13190_v11  ;;  %vm305_vm9 = vcmp.lt.s32.totalorder %v237_v13, %v13190_v11  ;;  %vm273_vm7 = vcmp.ge.s32.totalorder %v238_v17, %v13180_v5  ;;  %p13020_p2 = pnand %p13019_p1, %p13013_p12 }
  0x66   :  { %v394_v22 = vpack.c.bf16 %v363_v19, %v362_v16  ;;  %vm333_vm5 = vmand %vm268_vm4, %vm301_vm10  ;;  %v364_v23 = vsel %vm332_vm0, 1.0, %v13052_v15  ;;  %vm274_vm14 = vcmp.ge.s32.totalorder %v239_v18, %v13180_v5  ;;  %v242_v26 = vadd.s32 96, %v13173_v2  ;;  %v10603_v19 = vld [vmem:[#allocation7 + $0x20] ss:$16 sps:$4 sm:$0xff]  }
  0x67   :  { %v365_v25 = vsel %vm333_vm5, 1.0, %v13052_v15  ;;  %vm334_vm3 = vmand %vm269_vm8, %vm302_vm12  ;;  %vm306_vm10 = vcmp.lt.s32.totalorder %v238_v17, %v13190_v11  ;;  %vm307_vm8 = vcmp.lt.s32.totalorder %v239_v18, %v13190_v11  ;;  %vm275_vm0 = vcmp.ge.s32.totalorder %v240_v20, %v13180_v5  ;;  %v10629_v18 = vld [vmem:[#allocation7 + $0x6c] ss:$16 sps:$4 sm:$0xff]  }
  0x68   :  { %10547 = vmatprep.mubr.msk.bf16.mxu0 %vm422_vm1, %v394_v22  ;;  %v395_v27 = vpack.c.bf16 %v365_v25, %v364_v23  ;;  %vm335_vm4 = vmand %vm270_vm11, %vm303_vm15  ;;  %v366_v28 = vsel %vm334_vm3, 1.0, %v13052_v15  ;;  %vm276_vm5 = vcmp.ge.s32.totalorder %v241_v21, %v13180_v5  ;;  %v243_v30 = vadd.s32 104, %v13173_v2 }
  0x69   :  { %v367_v29 = vsel %vm335_vm4, 1.0, %v13052_v15  ;;  %vm336_vm12 = vmand %vm271_vm13, %vm304_vm6  ;;  %vm308_vm15 = vcmp.lt.s32.totalorder %v240_v20, %v13190_v11  ;;  %v244_v33 = vadd.s32 112, %v13173_v2  ;;  %vm309_vm6 = vcmp.lt.s32.totalorder %v241_v21, %v13190_v11  ;;  %v10627_v21 = vld [vmem:[#allocation7 + $0x68] ss:$16 sps:$4 sm:$0xff]  }
  0x6a   :  { %v396_v31 = vpack.c.bf16 %v367_v29, %v366_v28  ;;  %vm337_vm11 = vmand %vm272_vm2, %vm305_vm9  ;;  %v368_v32 = vsel %vm336_vm12, 1.0, %v13052_v15  ;;  %10548 = vmatmul.mubr.msk.bf16.vlgmr.msra.gmra.mrb[0].mxu0 %vm422_vm1, %v395_v27  ;;  %vm277_vm2 = vcmp.ge.s32.totalorder %v242_v26, %v13180_v5  ;;  %v245_v36 = vadd.s32 120, %v13173_v2  ;;  %v10608_v27 = vld [vmem:[#allocation7 + $0x44] ss:$16 sps:$4 sm:$0xff]   ;;  %v10635_v28 = vld [vmem:[#allocation7 + $0x8c] ss:$16 sps:$4 sm:$0xff]  }
  0x6b   :  { %v369_v35 = vsel %vm337_vm11, 1.0, %v13052_v15  ;;  %vm338_vm13 = vmand %vm273_vm7, %vm306_vm10  ;;  %vm278_vm3 = vcmp.ge.s32.totalorder %v243_v30, %v13180_v5  ;;  %vm310_vm4 = vcmp.lt.s32.totalorder %v242_v26, %v13190_v11  ;;  %vm311_vm7 = vcmp.lt.s32.totalorder %v243_v30, %v13190_v11  ;;  %1119 = vmatpush1.bf16.msra.mxu0 %v10609_v34 }
  0x6c   :  { %10551 = vmatprep.mubr.msk.bf16.mxu0 %vm422_vm1, %v396_v31  ;;  %v397_v38 = vpack.c.bf16 %v369_v35, %v368_v32  ;;  %vm339_vm9 = vmand %vm274_vm14, %vm307_vm8  ;;  %v370_v39 = vsel %vm338_vm13, 1.0, %v13052_v15  ;;  %vm279_vm12 = vcmp.ge.s32.totalorder %v244_v33, %v13180_v5  ;;  %v246_v41 = vadd.s32 128, %v13173_v2  ;;  %1120 = vmatprep.subr.bf16.mxu0 %v10617_v48  ;;  %v10606_v35 = vld [vmem:[#allocation7 + $0x40] ss:$16 sps:$4 sm:$0xff]  }
  0x6d   :  { %v371_v40 = vsel %vm339_vm9, 1.0, %v13052_v15  ;;  %vm340_vm10 = vmand %vm275_vm0, %vm308_vm15  ;;  %vm312_vm8 = vcmp.lt.s32.totalorder %v244_v33, %v13190_v11  ;;  %v247_v43 = vadd.s32 136, %v13173_v2  ;;  %v248_v44 = vadd.s32 144, %v13173_v2  ;;  %v10633_v33 = vld [vmem:[#allocation7 + $0x88] ss:$16 sps:$4 sm:$0xff]  }
  0x6e   :  { %vm341_vm14 = vmand %vm276_vm5, %vm309_vm6  ;;  %v13287_v42 = vsel %vm340_vm10, 1.0, %v13052_v15  ;;  %vm280_vm5 = vcmp.ge.s32.totalorder %v245_v36, %v13180_v5  ;;  %vm313_vm11 = vcmp.lt.s32.totalorder %v245_v36, %v13190_v11  ;;  %v249_v47 = vadd.s32 152, %v13173_v2  ;;  %v10612_v48 = vld [vmem:[#allocation7 + $0x60] ss:$16 sps:$4 sm:$0xff]  }
  0x6f   :  { %v13293_v46 = vsel %vm341_vm14, 1.0, %v13052_v15  ;;  %vm342_vm0 = vmand %vm277_vm2, %vm310_vm4  ;;  %v398_v49 = vpack.c.bf16 %v371_v40, %v370_v39  ;;  %vm281_vm13 = vcmp.ge.s32.totalorder %v246_v41, %v13180_v5  ;;  %vm314_vm6 = vcmp.lt.s32.totalorder %v246_v41, %v13190_v11  ;;  %1121 = vmatpush1.bf16.msra.mxu0 %v10615_v45  ;;  %v10641_v40 = vld [vmem:[#allocation7 + $0xac] ss:$16 sps:$4 sm:$0xff]   ;;  %v10682_v36 = vld [vmem:[#allocation10 + $0x80] ss:$16 sps:$4 sm:$0xff]  }
  0x70   :  { %v399_v50 = vpack.c.bf16 %v13293_v46, %v13287_v42  ;;  %vm343_vm15 = vmand %vm278_vm3, %vm311_vm7  ;;  %v13311_v51 = vsel %vm342_vm0, 1.0, %v13052_v15  ;;  %vm282_vm9 = vcmp.ge.s32.totalorder %v247_v43, %v13180_v5  ;;  %vm315_vm3 = vcmp.lt.s32.totalorder %v247_v43, %v13190_v11  ;;  %1122 = vmatprep.subr.bf16.mxu0 %v10623_v60  ;;  %v10639_v46 = vld [vmem:[#allocation7 + $0xa8] ss:$16 sps:$4 sm:$0xff]   ;;  %v10690_v39 = vld [vmem:[#allocation10 + $0xa0] ss:$16 sps:$4 sm:$0xff]  }
  0x71   :  { %v13314_v52 = vsel %vm343_vm15, 1.0, %v13052_v15  ;;  %vm13320_vm2 = vmand %vm279_vm12, %vm312_vm8  ;;  %vm283_vm7 = vcmp.ge.s32.totalorder %v248_v44, %v13180_v5  ;;  %vm284_vm10 = vcmp.ge.s32.totalorder %v249_v47, %v13180_v5  ;;  %vm316_vm12 = vcmp.lt.s32.totalorder %v248_v44, %v13190_v11  ;;  %v10646_v60 = vld [vmem:[#allocation7 + $0xe8] ss:$16 sps:$4 sm:$0xff]   ;;  %v10708_v42 = vld [vmem:[#allocation10 + $0xe4] ss:$16 sps:$4 sm:$0xff]  }
  0x72   :  { %vm13328_vm4 = vmand %vm280_vm5, %vm313_vm11  ;;  %v250_v55 = vadd.s32 160, %v13173_v2  ;;  %10552 = vmatmul.mubr.msk.bf16.gmra.mrb[4].mxu0 %vm422_vm1, %v397_v38  ;;  %vm317_vm8 = vcmp.lt.s32.totalorder %v249_v47, %v13190_v11  ;;  %v251_v57 = vadd.s32 168, %v13173_v2  ;;  %v252_v58 = vadd.s32 176, %v13173_v2  ;;  %v10614_v38 = vld [vmem:[#allocation7 + $0x64] ss:$16 sps:$4 sm:$0xff]  }
  0x73   :  { %vm346_vm14 = vmand %vm281_vm13, %vm314_vm6  ;;  %v253_v59 = vadd.s32 184, %v13173_v2  ;;  %10555 = vmatprep.mubr.msk.bf16.mxu0 %vm422_vm1, %v398_v49  ;;  %v400_v61 = vpack.c.bf16 %v13314_v52, %v13311_v51  ;;  %1123 = vmatpush1.bf16.msra.mxu0 %v10621_v56  ;;  %v254_v10 = vadd.s32 192, %v13173_v2  ;;  %v255_v12 = vadd.s32 200, %v13173_v2  ;;  %v10645_v47 = vld [vmem:[#allocation7 + $0xcc] ss:$16 sps:$4 sm:$0xff]  }
  0x74   :  { %vm347_vm0 = vmand %vm282_vm9, %vm315_vm3  ;;  %v378_v62 = vsel %vm346_vm14, 1.0, %v13052_v15  ;;  %vm285_vm5 = vcmp.ge.s32.totalorder %v250_v55, %v13180_v5  ;;  %vm318_vm11 = vcmp.lt.s32.totalorder %v250_v55, %v13190_v11  ;;  %vm286_vm13 = vcmp.ge.s32.totalorder %v251_v57, %v13180_v5  ;;  %1124 = vmatprep.subr.bf16.mxu0 %v10629_v18  ;;  %v10620_v51 = vld [vmem:[#allocation7 + $0x84] ss:$16 sps:$4 sm:$0xff]   ;;  %v10648_v56 = vld [vmem:[#allocation7 + $0xec] ss:$16 sps:$4 sm:$0xff]  }
  0x75   :  { %v379_v63 = vsel %vm347_vm0, 1.0, %v13052_v15  ;;  %vm348_vm15 = vmand %vm283_vm7, %vm316_vm12  ;;  %vm319_vm6 = vcmp.lt.s32.totalorder %v251_v57, %v13190_v11  ;;  %vm287_vm9 = vcmp.ge.s32.totalorder %v252_v58, %v13180_v5  ;;  %vm288_vm14 = vcmp.ge.s32.totalorder %v253_v59, %v13180_v5  ;;  %v10618_v57 = vld [vmem:[#allocation7 + $0x80] ss:$16 sps:$4 sm:$0xff]   ;;  %v10681_v18 = vld [vmem:[#allocation10 + $0x6c] ss:$16 sps:$4 sm:$0xff]  }
  0x76   :  { %v402_v6 = vpack.c.bf16 %v379_v63, %v378_v62  ;;  %vm349_vm3 = vmand %vm284_vm10, %vm317_vm8  ;;  %v380_v7 = vsel %vm348_vm15, 1.0, %v13052_v15  ;;  %vm320_vm7 = vcmp.lt.s32.totalorder %v252_v58, %v13190_v11  ;;  %vm321_vm0 = vcmp.lt.s32.totalorder %v253_v59, %v13190_v11  ;;  %v10626_v59 = vld [vmem:[#allocation7 + $0xa4] ss:$16 sps:$4 sm:$0xff]   ;;  %v10706_v44 = vld [vmem:[#allocation10 + $0xe0] ss:$16 sps:$4 sm:$0xff]  }
  0x77   :  { %v381_v8 = vsel %vm349_vm3, 1.0, %v13052_v15  ;;  %vm350_vm12 = vmand %vm285_vm5, %vm318_vm11  ;;  %v256_v16 = vadd.s32 208, %v13173_v2  ;;  %v257_v17 = vadd.s32 216, %v13173_v2  ;;  %vm289_vm5 = vcmp.ge.s32.totalorder %v254_v10, %v13180_v5  ;;  %1125 = vmatpush1.bf16.msra.mxu0 %v10627_v21  ;;  %v96_v63 = vld [vmem:[#allocation2] sm:$0xff]   ;;  %v100_v21 = vld [vmem:[#allocation2 + $0x10] sm:$0xff]  }
  0x78   :  { %10563 = vmatprep.mubr.msk.bf16.mxu1 %vm422_vm1, %v402_v6  ;;  %v403_v13 = vpack.c.bf16 %v381_v8, %v380_v7  ;;  %vm351_vm10 = vmand %vm286_vm13, %vm319_vm6  ;;  %v382_v14 = vsel %vm350_vm12, 1.0, %v13052_v15  ;;  %vm290_vm11 = vcmp.ge.s32.totalorder %v255_v12, %v13180_v5  ;;  %vm322_vm15 = vcmp.lt.s32.totalorder %v254_v10, %v13190_v11  ;;  %1126 = vmatprep.subr.bf16.mxu0 %v10635_v28  ;;  %v10655_v6 = vld [vmem:[#allocation10 + $0x8] ss:$16 sps:$4 sm:$0xff]   ;;  %v10665_v8 = vld [vmem:[#allocation10 + $0x2c] ss:$16 sps:$4 sm:$0xff]  }
  0x79   :  { %v383_v20 = vsel %vm351_vm10, 1.0, %v13052_v15  ;;  %vm352_vm8 = vmand %vm287_vm9, %vm320_vm7  ;;  %v376_v22 = vsel %vm13320_vm2, 1.0, %v13052_v15  ;;  %v377_v23 = vsel %vm13328_vm4, 1.0, %v13052_v15  ;;  %vm323_vm6 = vcmp.lt.s32.totalorder %v255_v12, %v13190_v11  ;;  %v10638_v10 = vld [vmem:[#allocation7 + $0xe4] ss:$16 sps:$4 sm:$0xff]  }
  0x7a   :  { %10564 = vmatmul.mubr.msk.bf16.vlgmr.msra.gmra.mrb[0].mxu1 %vm422_vm1, %v403_v13  ;;  %v404_v24 = vpack.c.bf16 %v383_v20, %v382_v14  ;;  %vm353_vm13 = vmand %vm288_vm14, %vm321_vm0  ;;  %10556 = vmatmul.mubr.msk.bf16.gmra.mrb[8].mxu0 %vm422_vm1, %v399_v50  ;;  %v384_v25 = vsel %vm352_vm8, 1.0, %v13052_v15  ;;  %vm291_vm4 = vcmp.ge.s32.totalorder %v256_v16, %v13180_v5  ;;  %vm324_vm9 = vcmp.lt.s32.totalorder %v256_v16, %v13190_v11  ;;  %v10663_v12 = vld [vmem:[#allocation10 + $0x28] ss:$16 sps:$4 sm:$0xff]   ;;  %v10636_v13 = vld [vmem:[#allocation7 + $0xe0] ss:$16 sps:$4 sm:$0xff]  }
  0x7b   :  { %926 = vmatpush1.bf16.msra.mxu1 %v10600_v4  ;;  %v385_v26 = vsel %vm353_vm13, 1.0, %v13052_v15  ;;  %vm354_vm2 = vmand %vm289_vm5, %vm322_vm15  ;;  %10559 = vmatprep.mubr.msk.bf16.mxu0 %vm422_vm1, %v400_v61  ;;  %vm292_vm14 = vcmp.ge.s32.totalorder %v257_v17, %v13180_v5  ;;  %vm325_vm7 = vcmp.lt.s32.totalorder %v257_v17, %v13190_v11  ;;  %v258_v29 = vadd.s32 224, %v13173_v2  ;;  %v10632_v4 = vld [vmem:[#allocation7 + $0xc4] ss:$16 sps:$4 sm:$0xff]   ;;  %v98_v14 = vld [vmem:[#allocation2 + $0x8] sm:$0xff]  }
  0x7c   :  { %927 = vmatprep.subr.bf16.mxu1 %v10605_v9  ;;  %vm355_vm3 = vmand %vm290_vm11, %vm323_vm6  ;;  %v259_v30 = vadd.s32 232, %v13173_v2  ;;  %10567 = vmatprep.mubr.msk.bf16.mxu1 %vm422_vm1, %v404_v24  ;;  %v386_v31 = vsel %vm354_vm2, 1.0, %v13052_v15  ;;  %v405_v34 = vpack.c.bf16 %v385_v26, %v384_v25  ;;  %v401_v37 = vpack.c.bf16 %v377_v23, %v376_v22  ;;  %v10630_v9 = vld [vmem:[#allocation7 + $0xc0] ss:$16 sps:$4 sm:$0xff]   ;;  %v10652_v16 = vld [vmem:[#allocation10 + $0x4] ss:$16 sps:$4 sm:$0xff]  }
  0x7d   :  { %v387_v32 = vsel %vm355_vm3, 1.0, %v13052_v15  ;;  %vm13430_vm12 = vmand %vm291_vm4, %vm324_vm9  ;;  %vm293_vm0 = vcmp.ge.s32.totalorder %v258_v29, %v13180_v5  ;;  %vm326_vm5 = vcmp.lt.s32.totalorder %v258_v29, %v13190_v11  ;;  %v260_v43 = vadd.s32 240, %v13173_v2  ;;  %1127 = vmatpush1.bf16.msra.mxu0 %v10633_v33  ;;  %v10671_v17 = vld [vmem:[#allocation10 + $0x48] ss:$16 sps:$4 sm:$0xff]   ;;  %v10660_v20 = vld [vmem:[#allocation10 + $0x24] ss:$16 sps:$4 sm:$0xff]  }
  0x7e   :  { %vm294_vm10 = vcmp.ge.s32.totalorder %v259_v30, %v13180_v5  ;;  %vm13440_vm8 = vmand %vm292_vm14, %vm325_vm7  ;;  %vm327_vm11 = vcmp.lt.s32.totalorder %v259_v30, %v13190_v11  ;;  %v406_v41 = vpack.c.bf16 %v387_v32, %v386_v31  ;;  %v261_v45 = vadd.s32 248, %v13173_v2  ;;  %1128 = vmatprep.subr.bf16.mxu0 %v10641_v40  ;;  %v10679_v22 = vld [vmem:[#allocation10 + $0x68] ss:$16 sps:$4 sm:$0xff]   ;;  %v10689_v23 = vld [vmem:[#allocation10 + $0x8c] ss:$16 sps:$4 sm:$0xff]  }
  0x7f   :  { %928 = vmatpush1.bf16.msra.mxu1 %v10603_v19  ;;  %vm13446_vm15 = vmand %vm293_vm0, %vm326_vm5  ;;  %v388_v49 = vsel %vm13430_vm12, 1.0, %v13052_v15  ;;  %v389_v50 = vsel %vm13440_vm8, 1.0, %v13052_v15  ;;  %vm295_vm6 = vcmp.ge.s32.totalorder %v260_v43, %v13180_v5  ;;  %vm328_vm2 = vcmp.lt.s32.totalorder %v260_v43, %v13190_v11  ;;  %v10650_v19 = vld [vmem:[#allocation10] ss:$16 sps:$4 sm:$0xff]   ;;  %v10668_v25 = vld [vmem:[#allocation10 + $0x44] ss:$16 sps:$4 sm:$0xff]  }
  0x80   :  { %929 = vmatprep.subr.bf16.mxu1 %v10608_v27  ;;  %vm13451_vm13 = vmand %vm294_vm10, %vm327_vm11  ;;  %v390_v52 = vsel %vm13446_vm15, 1.0, %v13052_v15  ;;  %vm296_vm4 = vcmp.ge.s32.totalorder %v261_v45, %v13180_v5  ;;  %vm329_vm9 = vcmp.lt.s32.totalorder %v261_v45, %v13190_v11  ;;  %v407_v55 = vpack.c.bf16 %v389_v50, %v388_v49  ;;  %v10624_v5 = vld [vmem:[#allocation7 + $0xa0] ss:$16 sps:$4 sm:$0xff]   ;;  %v10657_v11 = vld [vmem:[#allocation10 + $0xc] ss:$16 sps:$4 sm:$0xff]  }
  0x81   :  { %v391_v53 = vsel %vm13451_vm13, 1.0, %v13052_v15  ;;  %1129 = vmatpush1.bf16.msra.mxu0 %v10639_v46  ;;  %vm360_vm3 = vmand %vm295_vm6, %vm328_vm2  ;;  %v10658_v24 = vld [vmem:[#allocation10 + $0x20] ss:$16 sps:$4 sm:$0xff]   ;;  %v10687_v26 = vld [vmem:[#allocation10 + $0x88] ss:$16 sps:$4 sm:$0xff]   ;;  %v13683_v0 = vsub.s32 2, %v13173_v2 }
  0x82   :  { %10568 = vmatmul.mubr.msk.bf16.gmra.mrb[4].mxu1 %vm422_vm1, %v405_v34  ;;  %10560 = vmatmul.mubr.msk.bf16.gmra.mrb[12].mxu0 %vm422_vm1, %v401_v37  ;;  %v408_v58 = vpack.c.bf16 %v391_v53, %v390_v52  ;;  %vm361_vm14 = vmand %vm296_vm4, %vm329_vm9  ;;  %v392_v61 = vsel %vm360_vm3, 1.0, %v13052_v15  ;;  %v10697_v27 = vld [vmem:[#allocation10 + $0xac] ss:$16 sps:$4 sm:$0xff]   ;;  %v10666_v28 = vld [vmem:[#allocation10 + $0x40] ss:$16 sps:$4 sm:$0xff]   ;;  %vm9800_vm7 = vcmask 195712  }
  0x83   :  { %930 = vmatpush1.bf16.msra.mxu1 %v10606_v35  ;;  %10571 = vmatprep.mubr.msk.bf16.mxu1 %vm422_vm1, %v406_v41  ;;  %v393_v62 = vsel %vm361_vm14, 1.0, %v13052_v15  ;;  %v10673_v15 = vld [vmem:[#allocation10 + $0x4c] ss:$16 sps:$4 sm:$0xff]   ;;  %v10676_v29 = vld [vmem:[#allocation10 + $0x64] ss:$16 sps:$4 sm:$0xff]   ;;  %18792 = vst [vmem:[#allocation54_spill] sm:$0xff] %v13683_v0 }
  0x84   :  { %931 = vmatprep.subr.bf16.mxu1 %v10614_v38  ;;  %1150 = vmatprep.mubr.bf16.mxu0 %v18170_v1  ;;  %v409_v7 = vpack.c.bf16 %v393_v62, %v392_v61  ;;  %v10695_v30 = vld [vmem:[#allocation10 + $0xa8] ss:$16 sps:$4 sm:$0xff]   ;;  %v10705_v31 = vld [vmem:[#allocation10 + $0xcc] ss:$16 sps:$4 sm:$0xff]   ;;  %v10674_v33 = vld [vmem:[#allocation10 + $0x60] ss:$16 sps:$4 sm:$0xff]  }
  0x85   :  { %1130 = vmatprep.subr.bf16.mxu0 %v10645_v47  ;;  %v102_v32 = vld [vmem:[#allocation2 + $0x18] sm:$0xff]   ;;  %v10684_v34 = vld [vmem:[#allocation10 + $0x84] ss:$16 sps:$4 sm:$0xff]   ;;  %v10698_v41 = vld [vmem:[#allocation10 + $0xc0] ss:$16 sps:$4 sm:$0xff]   ;;  %vm9807_vm12 = vcmask 261312  }
  0x86   :  { %1131 = vmatpush1.bf16.msra.mxu0 %v10643_v54  ;;  %v10703_v35 = vld [vmem:[#allocation10 + $0xc8] ss:$16 sps:$4 sm:$0xff]   ;;  %v10692_v37 = vld [vmem:[#allocation10 + $0xa4] ss:$16 sps:$4 sm:$0xff]   ;;  %v10711_v46 = vld [vmem:[#allocation10 + $0xec] ss:$16 sps:$4 sm:$0xff]  }
  0x87   :  { %932 = vmatpush1.bf16.msra.mxu1 %v10612_v48  ;;  %1132 = vmatprep.subr.bf16.mxu0 %v10648_v56  ;;  %v104_v38 = vld [vmem:[#allocation2 + $0x20] sm:$0xff]   ;;  %v106_v43 = vld [vmem:[#allocation2 + $0x28] sm:$0xff]   ;;  %v108_v45 = vld [vmem:[#allocation2 + $0x30] sm:$0xff]   ;;  %vm9814_vm0 = vcmask 326912   ;;  %vm9821_vm10 = vcmask 392512   ;;  %vm9828_vm8 = vcmask 458112  }
  0x88   :  { %933 = vmatprep.subr.bf16.mxu1 %v10620_v51  ;;  %v10700_v40 = vld [vmem:[#allocation10 + $0xc4] ss:$16 sps:$4 sm:$0xff]   ;;  %v10709_v47 = vld [vmem:[#allocation10 + $0xe8] ss:$16 sps:$4 sm:$0xff]   ;;  %v13500_v51 = vld [vmem:[#allocation8 + $0xc] ss:$16 sps:$4 sm:$0xff]  }
  0x89   :  { %v13494_v48 = vld [vmem:[#allocation8 + $0x4] ss:$16 sps:$4 sm:$0xff]   ;;  %v110_v49 = vld [vmem:[#allocation2 + $0x38] sm:$0xff]   ;;  %v114_v52 = vld [vmem:[#allocation2 + $0x48] sm:$0xff]   ;;  %vm9835_vm5 = vcmask 523712   ;;  %vm9842_vm11 = vcmask 589312  }
  0x8a   :  { %10572 = vmatmul.mubr.msk.bf16.gmra.mrb[8].mxu1 %vm422_vm1, %v407_v55  ;;  %1133 = vmatpush1.bf16.msra.mxu0 %v10646_v60  ;;  %v112_v50 = vld [vmem:[#allocation2 + $0x40] sm:$0xff]   ;;  %v116_v53 = vld [vmem:[#allocation2 + $0x50] sm:$0xff]   ;;  %v118_v54 = vld [vmem:[#allocation2 + $0x58] sm:$0xff]   ;;  %vm9849_vm15 = vcmask 654912   ;;  %vm9856_vm13 = vcmask 720512   ;;  %vm9863_vm6 = vcmask 786112  }
  0x8b   :  { %934 = vmatpush1.bf16.msra.mxu1 %v10618_v57  ;;  %10575 = vmatprep.mubr.msk.bf16.mxu1 %vm422_vm1, %v408_v58  ;;  %v120_v55 = vld [vmem:[#allocation2 + $0x60] sm:$0xff]   ;;  %v122_v56 = vld [vmem:[#allocation2 + $0x68] sm:$0xff]   ;;  %v124_v57 = vld [vmem:[#allocation2 + $0x70] sm:$0xff]   ;;  %vm9870_vm2 = vcmask 851712   ;;  %vm9877_vm4 = vcmask 917312   ;;  %vm9884_vm9 = vcmask 982912  }
  0x8c   :  { %935 = vmatprep.subr.bf16.mxu1 %v10626_v59  ;;  %1664 = vmatprep.subr.bf16.mxu0 %v10657_v11  ;;  %v126_v58 = vld [vmem:[#allocation2 + $0x78] sm:$0xff]   ;;  %v10712_v61 = vld [vmem:[#allocation8] ss:$16 sps:$4 sm:$0xff]   ;;  %vm9891_vm3 = vcmask 1048512  }
  0x8d   :  { %1151 = vmatmul.mubr.bf16.vlgmr.msra.gmra.mrb[16].mxu0 %v96_v63 }
  0x8e   :  { %1160 = vmatprep.mubr.bf16.mxu0 %v18170_v1  ;;  %1665 = vmatpush1.bf16.msra.mxu0 %v10655_v6  ;;  %v10715_v6 = vld [vmem:[#allocation8 + $0x8] ss:$16 sps:$4 sm:$0xff]  }
  0x8f   :  { %936 = vmatpush1.bf16.msra.mxu1 %v10624_v5  ;;  %1666 = vmatprep.subr.bf16.mxu0 %v10665_v8  ;;  %v10718_v8 = vld [vmem:[#allocation8 + $0x20] ss:$16 sps:$4 sm:$0xff]  }
  0x90   :  { %937 = vmatprep.subr.bf16.mxu1 %v10632_v4  ;;  %v10720_v4 = vld [vmem:[#allocation8 + $0x24] ss:$16 sps:$4 sm:$0xff]  }
  0x92   :  { %10576 = vmatmul.mubr.msk.bf16.gmra.mrb[12].mxu1 %vm422_vm1, %v409_v7  ;;  %1667 = vmatpush1.bf16.msra.mxu0 %v10663_v12  ;;  %v10723_v7 = vld [vmem:[#allocation8 + $0x2c] ss:$16 sps:$4 sm:$0xff]   ;;  %vm9793_vm1 = vcmask 130112  }
  0x93   :  { %938 = vmatpush1.bf16.msra.mxu1 %v10630_v9  ;;  %957 = vmatprep.mubr.bf16.mxu1 %v18170_v1 }
  0x94   :  { %939 = vmatprep.subr.bf16.mxu1 %v10638_v10  ;;  %1668 = vmatprep.subr.bf16.mxu0 %v10673_v15  ;;  %v10726_v10 = vld [vmem:[#allocation8 + $0x44] ss:$16 sps:$4 sm:$0xff]   ;;  %v10721_v15 = vld [vmem:[#allocation8 + $0x28] ss:$16 sps:$4 sm:$0xff]  }
  0x95   :  { %1161 = vmatmul.mubr.bf16.gmra.mrb[20].mxu0 %v98_v14 }
  0x96   :  { %1170 = vmatprep.mubr.bf16.mxu0 %v18170_v1  ;;  %1669 = vmatpush1.bf16.msra.mxu0 %v10671_v17 }
  0x97   :  { %940 = vmatpush1.bf16.msra.mxu1 %v10636_v13  ;;  %1670 = vmatprep.subr.bf16.mxu0 %v10681_v18  ;;  %v10724_v18 = vld [vmem:[#allocation8 + $0x40] ss:$16 sps:$4 sm:$0xff]  }
  0x98   :  { %1471 = vmatprep.subr.bf16.mxu1 %v10652_v16 }
  0x9a   :  { %958 = vmatmul.mubr.bf16.vlgmr.msra.gmra.mrb[16].mxu1 %v96_v63  ;;  %1671 = vmatpush1.bf16.msra.mxu0 %v10679_v22  ;;  %v10735_v22 = vld [vmem:[#allocation8 + $0x6c] ss:$16 sps:$4 sm:$0xff]  }
  0x9b   :  { %967 = vmatprep.mubr.bf16.mxu1 %v18170_v1  ;;  %1472 = vmatpush1.bf16.msra.mxu1 %v10650_v19  ;;  %v10729_v19 = vld [vmem:[#allocation8 + $0x4c] ss:$16 sps:$4 sm:$0xff]  }
  0x9c   :  { %1473 = vmatprep.subr.bf16.mxu1 %v10660_v20  ;;  %1672 = vmatprep.subr.bf16.mxu0 %v10689_v23  ;;  %v10727_v20 = vld [vmem:[#allocation8 + $0x48] ss:$16 sps:$4 sm:$0xff]  }
  0x9d   :  { %1171 = vmatmul.mubr.bf16.gmra.mrb[24].mxu0 %v100_v21 }
  0x9e   :  { %1180 = vmatprep.mubr.bf16.mxu0 %v18170_v1  ;;  %1673 = vmatpush1.bf16.msra.mxu0 %v10687_v26  ;;  %v10730_v26 = vld [vmem:[#allocation8 + $0x60] ss:$16 sps:$4 sm:$0xff]  }
  0x9f   :  { %1474 = vmatpush1.bf16.msra.mxu1 %v10658_v24  ;;  %1674 = vmatprep.subr.bf16.mxu0 %v10697_v27 }
  0xa0   :  { %1475 = vmatprep.subr.bf16.mxu1 %v10668_v25 }
  0xa2   :  { %968 = vmatmul.mubr.bf16.gmra.mrb[20].mxu1 %v98_v14  ;;  %1675 = vmatpush1.bf16.msra.mxu0 %v10695_v30  ;;  %v10738_v30 = vld [vmem:[#allocation8 + $0x84] ss:$16 sps:$4 sm:$0xff]  }
  0xa3   :  { %977 = vmatprep.mubr.bf16.mxu1 %v18170_v1  ;;  %1476 = vmatpush1.bf16.msra.mxu1 %v10666_v28 }
  0xa4   :  { %1477 = vmatprep.subr.bf16.mxu1 %v10676_v29  ;;  %1676 = vmatprep.subr.bf16.mxu0 %v10705_v31  ;;  %v10733_v29 = vld [vmem:[#allocation8 + $0x68] ss:$16 sps:$4 sm:$0xff]  }
  0xa5   :  { %1181 = vmatmul.mubr.bf16.gmra.mrb[28].mxu0 %v102_v32 }
  0xa6   :  { %1190 = vmatprep.mubr.bf16.mxu0 %v18170_v1  ;;  %1677 = vmatpush1.bf16.msra.mxu0 %v10703_v35 }
  0xa7   :  { %1478 = vmatpush1.bf16.msra.mxu1 %v10674_v33  ;;  %1678 = vmatprep.subr.bf16.mxu0 %v10711_v46  ;;  %v10742_v46 = vld [vmem:[#allocation8 + $0xa0] ss:$16 sps:$4 sm:$0xff]  }
  0xa8   :  { %1479 = vmatprep.subr.bf16.mxu1 %v10684_v34 }
  0xaa   :  { %978 = vmatmul.mubr.bf16.gmra.mrb[24].mxu1 %v100_v21  ;;  %1679 = vmatpush1.bf16.msra.mxu0 %v10709_v47  ;;  %v10732_v21 = vld [vmem:[#allocation8 + $0x64] ss:$16 sps:$4 sm:$0xff]  }
  0xab   :  { %987 = vmatprep.mubr.bf16.mxu1 %v18170_v1  ;;  %1480 = vmatpush1.bf16.msra.mxu1 %v10682_v36 }
  0xac   :  { %1481 = vmatprep.subr.bf16.mxu1 %v10692_v37  ;;  %3186 = vmatprep.subr.bf16.mxu0 %v13500_v51 }
  0xad   :  { %1191 = vmatmul.mubr.bf16.gmra.mrb[32].mxu0 %v104_v38 }
  0xae   :  { %1200 = vmatprep.mubr.bf16.mxu0 %v18170_v1 }
  0xaf   :  { %1482 = vmatpush1.bf16.msra.mxu1 %v10690_v39  ;;  %v10741_v39 = vld [vmem:[#allocation8 + $0x8c] ss:$16 sps:$4 sm:$0xff]  }
  0xb0   :  { %1483 = vmatprep.subr.bf16.mxu1 %v10700_v40  ;;  %v10739_v40 = vld [vmem:[#allocation8 + $0x88] ss:$16 sps:$4 sm:$0xff]  }
  0xb2   :  { %988 = vmatmul.mubr.bf16.gmra.mrb[28].mxu1 %v102_v32 }
  0xb3   :  { %997 = vmatprep.mubr.bf16.mxu1 %v18170_v1  ;;  %1484 = vmatpush1.bf16.msra.mxu1 %v10698_v41  ;;  %v10744_v41 = vld [vmem:[#allocation8 + $0xa4] ss:$16 sps:$4 sm:$0xff]  }
  0xb4   :  { %1485 = vmatprep.subr.bf16.mxu1 %v10708_v42  ;;  %v10747_v42 = vld [vmem:[#allocation8 + $0xac] ss:$16 sps:$4 sm:$0xff]  }
  0xb5   :  { %1201 = vmatmul.mubr.bf16.gmra.mrb[36].mxu0 %v106_v43 }
  0xb6   :  { %1210 = vmatprep.mubr.bf16.mxu0 %v18170_v1 }
  0xb7   :  { %1486 = vmatpush1.bf16.msra.mxu1 %v10706_v44 }
  0xb8   :  { %2993 = vmatprep.subr.bf16.mxu1 %v13494_v48 }
  0xba   :  { %998 = vmatmul.mubr.bf16.gmra.mrb[32].mxu1 %v104_v38  ;;  %v10736_v38 = vld [vmem:[#allocation8 + $0x80] ss:$16 sps:$4 sm:$0xff]  }
  0xbb   :  { %1007 = vmatprep.mubr.bf16.mxu1 %v18170_v1 }
  0xbd   :  { %1211 = vmatmul.mubr.bf16.gmra.mrb[40].mxu0 %v108_v45 }
  0xbe   :  { %1220 = vmatprep.mubr.bf16.mxu0 %v18170_v1 }
  0xc2   :  { %1008 = vmatmul.mubr.bf16.gmra.mrb[36].mxu1 %v106_v43 }
  0xc3   :  { %1017 = vmatprep.mubr.bf16.mxu1 %v18170_v1 }
  0xc5   :  { %1221 = vmatmul.mubr.bf16.gmra.mrb[44].mxu0 %v110_v49 }
  0xc6   :  { %1230 = vmatprep.mubr.bf16.mxu0 %v18170_v1 }
  0xca   :  { %1018 = vmatmul.mubr.bf16.gmra.mrb[40].mxu1 %v108_v45 }
  0xcb   :  { %1027 = vmatprep.mubr.bf16.mxu1 %v18170_v1 }
  0xcd   :  { %1231 = vmatmul.mubr.bf16.gmra.mrb[48].mxu0 %v112_v50 }
  0xce   :  { %1240 = vmatprep.mubr.bf16.mxu0 %v18170_v1 }
  0xd2   :  { %1028 = vmatmul.mubr.bf16.gmra.mrb[44].mxu1 %v110_v49 }
  0xd3   :  { %1037 = vmatprep.mubr.bf16.mxu1 %v18170_v1 }
  0xd5   :  { %1241 = vmatmul.mubr.bf16.gmra.mrb[52].mxu0 %v114_v52 }
  0xd6   :  { %1250 = vmatprep.mubr.bf16.mxu0 %v18170_v1 }
  0xda   :  { %1038 = vmatmul.mubr.bf16.gmra.mrb[48].mxu1 %v112_v50  ;;  %v10745_v50 = vld [vmem:[#allocation8 + $0xa8] ss:$16 sps:$4 sm:$0xff]  }
  0xdb   :  { %1047 = vmatprep.mubr.bf16.mxu1 %v18170_v1 }
  0xdd   :  { %1251 = vmatmul.mubr.bf16.gmra.mrb[56].mxu0 %v116_v53 }
  0xde   :  { %1260 = vmatprep.mubr.bf16.mxu0 %v18170_v1 }
  0xe2   :  { %1048 = vmatmul.mubr.bf16.gmra.mrb[52].mxu1 %v114_v52  ;;  %v10750_v52 = vld [vmem:[#allocation8 + $0xc4] ss:$16 sps:$4 sm:$0xff]  }
  0xe3   :  { %1057 = vmatprep.mubr.bf16.mxu1 %v18170_v1 }
  0xe5   :  { %1261 = vmatmul.mubr.bf16.gmra.mrb[60].mxu0 %v118_v54 }
  0xe6   :  { %1270 = vmatprep.mubr.bf16.mxu0 %v18170_v1 }
  0xea   :  { %1058 = vmatmul.mubr.bf16.gmra.mrb[56].mxu1 %v116_v53 }
  0xeb   :  { %1067 = vmatprep.mubr.bf16.mxu1 %v18170_v1 }
  0xed   :  { %1271 = vmatmul.mubr.bf16.gmra.mrb[64].mxu0 %v120_v55 }
  0xee   :  { %1280 = vmatprep.mubr.bf16.mxu0 %v18170_v1 }
  0xf2   :  { %1068 = vmatmul.mubr.bf16.gmra.mrb[60].mxu1 %v118_v54 }
  0xf3   :  { %1077 = vmatprep.mubr.bf16.mxu1 %v18170_v1 }
  0xf5   :  { %1281 = vmatmul.mubr.bf16.gmra.mrb[68].mxu0 %v122_v56 }
  0xf6   :  { %1290 = vmatprep.mubr.bf16.mxu0 %v18170_v1 }
  0xfa   :  { %1078 = vmatmul.mubr.bf16.gmra.mrb[64].mxu1 %v120_v55 }
  0xfb   :  { %1087 = vmatprep.mubr.bf16.mxu1 %v18170_v1 }
  0xfd   :  { %1291 = vmatmul.mubr.bf16.gmra.mrb[72].mxu0 %v124_v57 }
  0xfe   :  { %1300 = vmatprep.mubr.bf16.mxu0 %v18170_v1 }
 0x102   :  { %1088 = vmatmul.mubr.bf16.gmra.mrb[68].mxu1 %v122_v56 }
 0x103   :  { %1097 = vmatprep.mubr.bf16.mxu1 %v18170_v1 }
 0x105   :  { %1301 = vmatmul.mubr.bf16.gmra.mrb[76].mxu0 %v126_v58 }
 0x106   :  { %1696 = vmatprep.mubr.bf16.mxu0 %v18170_v1 }
 0x10a   :  { %1098 = vmatmul.mubr.bf16.gmra.mrb[72].mxu1 %v124_v57 }
 0x10b   :  { %1107 = vmatprep.mubr.bf16.mxu1 %v18170_v1 }
 0x112   :  { %1108 = vmatmul.mubr.bf16.gmra.mrb[76].mxu1 %v126_v58 }
 0x113   :  { %1503 = vmatprep.mubr.bf16.mxu1 %v18170_v1 }
 0x13d   :  { %v13520_v59 = vpop.f32.mrb[0].mxu0 }
 0x13e   :  { %18756 = vst [vmem:[#allocation18_spill] sm:$0xff] %v13520_v59  ;;  %v13522_v60 = vpop.f32.mrb[1].mxu0 }
 0x13f   :  { %18757 = vst [vmem:[#allocation19_spill] sm:$0xff] %v13522_v60  ;;  %v13524_v5 = vpop.f32.mrb[2].mxu0 }
 0x140   :  { %18758 = vst [vmem:[#allocation20_spill] sm:$0xff] %v13524_v5  ;;  %v13526_v11 = vpop.f32.mrb[3].mxu0  ;;  %v633_v62 = vpack.c.bf16 %v13524_v5, %v13520_v59 }
 0x141   :  { %18759 = vst [vmem:[#allocation21_spill] sm:$0xff] %v13526_v11  ;;  %v632_v63 = vpack.c.bf16 %v13526_v11, %v13522_v60 }
 0x143   :  { %1504 = vmatmul.mubr.bf16.vlgmr.msra.gmra.mrb[80].mxu1 %v632_v63  ;;  %1697 = vmatmul.mubr.bf16.vlgmr.msra.gmra.mrb[80].mxu0 %v632_v63  ;;  %v10753_v63 = vld [vmem:[#allocation8 + $0xcc] ss:$16 sps:$4 sm:$0xff]  }
 0x144   :  { %2994 = vmatpush1.bf16.msra.mxu1 %v10712_v61  ;;  %1513 = vmatprep.mubr.bf16.mxu1 %v18170_v1 }
 0x145   :  { %v13533_v9 = vpop.f32.mrb[4].mxu0  ;;  %1706 = vmatprep.mubr.bf16.mxu0 %v18170_v1  ;;  %2995 = vmatprep.subr.bf16.mxu1 %v10720_v4  ;;  %v10751_v4 = vld [vmem:[#allocation8 + $0xc8] ss:$16 sps:$4 sm:$0xff]  }
 0x146   :  { %18760 = vst [vmem:[#allocation22_spill] sm:$0xff] %v13533_v9  ;;  %v13536_v12 = vpop.f32.mrb[5].mxu0  ;;  %3187 = vmatpush1.bf16.msra.mxu0 %v10715_v6  ;;  %v10756_v6 = vld [vmem:[#allocation8 + $0xe4] ss:$16 sps:$4 sm:$0xff]  }
 0x147   :  { %18761 = vst [vmem:[#allocation23_spill] sm:$0xff] %v13536_v12  ;;  %v13538_v13 = vpop.f32.mrb[6].mxu0  ;;  %3188 = vmatprep.subr.bf16.mxu0 %v10723_v7  ;;  %v10759_v7 = vld [vmem:[#allocation8 + $0xec] ss:$16 sps:$4 sm:$0xff]  }
 0x148   :  { %18762 = vst [vmem:[#allocation24_spill] sm:$0xff] %v13538_v13  ;;  %v13540_v14 = vpop.f32.mrb[7].mxu0  ;;  %2996 = vmatpush1.bf16.msra.mxu1 %v10718_v8  ;;  %v13544_v16 = vpack.c.bf16 %v13538_v13, %v13533_v9 }
 0x149   :  { %18763 = vst [vmem:[#allocation25_spill] sm:$0xff] %v13540_v14  ;;  %v634_v17 = vpack.c.bf16 %v13540_v14, %v13536_v12  ;;  %2997 = vmatprep.subr.bf16.mxu1 %v10726_v10 }
 0x14a   :  { %3189 = vmatpush1.bf16.msra.mxu0 %v10721_v15  ;;  %v10754_v15 = vld [vmem:[#allocation8 + $0xe0] ss:$16 sps:$4 sm:$0xff]  }
 0x14b   :  { %1514 = vmatmul.mubr.bf16.gmra.mrb[84].mxu1 %v633_v62  ;;  %1707 = vmatmul.mubr.bf16.gmra.mrb[84].mxu0 %v633_v62  ;;  %v10748_v62 = vld [vmem:[#allocation8 + $0xc0] ss:$16 sps:$4 sm:$0xff]  }
 0x14c   :  { %1523 = vmatprep.mubr.bf16.mxu1 %v18170_v1  ;;  %1716 = vmatprep.mubr.bf16.mxu0 %v18170_v1 }
 0x14d   :  { %v13550_v23 = vpop.f32.mrb[0].mxu1  ;;  %v13552_v24 = vpop.f32.mrb[8].mxu0  ;;  %2998 = vmatpush1.bf16.msra.mxu1 %v10724_v18  ;;  %3190 = vmatprep.subr.bf16.mxu0 %v10729_v19  ;;  %v10757_v18 = vld [vmem:[#allocation8 + $0xe8] ss:$16 sps:$4 sm:$0xff]  }
 0x14e   :  { %18764 = vst [vmem:[#allocation26_spill] sm:$0xff] %v13550_v23  ;;  %18765 = vst [vmem:[#allocation27_spill] sm:$0xff] %v13552_v24  ;;  %v13554_v25 = vpop.f32.mrb[1].mxu1  ;;  %v13556_v27 = vpop.f32.mrb[9].mxu0  ;;  %2999 = vmatprep.subr.bf16.mxu1 %v10732_v21  ;;  %3191 = vmatpush1.bf16.msra.mxu0 %v10727_v20 }
 0x14f   :  { %18766 = vst [vmem:[#allocation28_spill] sm:$0xff] %v13554_v25  ;;  %18767 = vst [vmem:[#allocation29_spill] sm:$0xff] %v13556_v27  ;;  %v13558_v28 = vpop.f32.mrb[2].mxu1  ;;  %v13560_v31 = vpop.f32.mrb[10].mxu0  ;;  %3192 = vmatprep.subr.bf16.mxu0 %v10735_v22 }
 0x150   :  { %18768 = vst [vmem:[#allocation30_spill] sm:$0xff] %v13558_v28  ;;  %18769 = vst [vmem:[#allocation31_spill] sm:$0xff] %v13560_v31  ;;  %v13562_v32 = vpop.f32.mrb[3].mxu1  ;;  %v13566_v33 = vpack.c.bf16 %v13558_v28, %v13550_v23  ;;  %v13568_v34 = vpop.f32.mrb[11].mxu0  ;;  %v13572_v35 = vpack.c.bf16 %v13560_v31, %v13552_v24 }
 0x151   :  { %18770 = vst [vmem:[#allocation32_spill] sm:$0xff] %v13562_v32  ;;  %18771 = vst [vmem:[#allocation33_spill] sm:$0xff] %v13568_v34  ;;  %v13576_v36 = vpack.c.bf16 %v13562_v32, %v13554_v25  ;;  %v636_v37 = vpack.c.bf16 %v13568_v34, %v13556_v27  ;;  %3000 = vmatpush1.bf16.msra.mxu1 %v10730_v26 }
 0x152   :  { %3001 = vmatprep.subr.bf16.mxu1 %v10738_v30  ;;  %3193 = vmatpush1.bf16.msra.mxu0 %v10733_v29 }
 0x153   :  { %1524 = vmatmul.mubr.bf16.gmra.mrb[88].mxu1 %v634_v17  ;;  %1717 = vmatmul.mubr.bf16.gmra.mrb[88].mxu0 %v634_v17 }
 0x154   :  { %1533 = vmatprep.mubr.bf16.mxu1 %v18170_v1  ;;  %1726 = vmatprep.mubr.bf16.mxu0 %v18170_v1 }
 0x155   :  { %v13582_v43 = vpop.f32.mrb[4].mxu1  ;;  %v13584_v44 = vpop.f32.mrb[12].mxu0  ;;  %3002 = vmatpush1.bf16.msra.mxu1 %v10736_v38  ;;  %3194 = vmatprep.subr.bf16.mxu0 %v10741_v39  ;;  %v13642_v38 = vsub.s32 0, %v13173_v2 }
 0x156   :  { %18772 = vst [vmem:[#allocation34_spill] sm:$0xff] %v13582_v43  ;;  %18773 = vst [vmem:[#allocation35_spill] sm:$0xff] %v13584_v44  ;;  %v13586_v45 = vpop.f32.mrb[5].mxu1  ;;  %v13588_v47 = vpop.f32.mrb[13].mxu0  ;;  %3003 = vmatprep.subr.bf16.mxu1 %v10744_v41  ;;  %3195 = vmatpush1.bf16.msra.mxu0 %v10739_v40 }
 0x157   :  { %18774 = vst [vmem:[#allocation36_spill] sm:$0xff] %v13586_v45  ;;  %18775 = vst [vmem:[#allocation37_spill] sm:$0xff] %v13588_v47  ;;  %v13590_v49 = vpop.f32.mrb[6].mxu1  ;;  %v13592_v53 = vpop.f32.mrb[14].mxu0  ;;  %3196 = vmatprep.subr.bf16.mxu0 %v10747_v42 }
 0x158   :  { %18776 = vst [vmem:[#allocation38_spill] sm:$0xff] %v13590_v49  ;;  %18777 = vst [vmem:[#allocation39_spill] sm:$0xff] %v13592_v53  ;;  %v13594_v54 = vpop.f32.mrb[7].mxu1  ;;  %v13598_v55 = vpack.c.bf16 %v13590_v49, %v13582_v43  ;;  %v13600_v56 = vpop.f32.mrb[15].mxu0  ;;  %v13604_v57 = vpack.c.bf16 %v13592_v53, %v13584_v44 }
 0x159   :  { %18778 = vst [vmem:[#allocation40_spill] sm:$0xff] %v13594_v54  ;;  %18779 = vst [vmem:[#allocation41_spill] sm:$0xff] %v13600_v56  ;;  %v13608_v58 = vpack.c.bf16 %v13594_v54, %v13586_v45  ;;  %v13612_v61 = vpack.c.bf16 %v13600_v56, %v13588_v47  ;;  %3004 = vmatpush1.bf16.msra.mxu1 %v10742_v46  ;;  %v13660_v46 = vsub.s32 3, %v13173_v2 }
 0x15a   :  { %3005 = vmatprep.subr.bf16.mxu1 %v10750_v52  ;;  %3197 = vmatpush1.bf16.msra.mxu0 %v10745_v50  ;;  %18786 = vst [vmem:[#allocation48_spill] sm:$0xff] %v13642_v38 }
 0x15b   :  { %1534 = vmatmul.mubr.bf16.gmra.mrb[92].mxu1 %v13544_v16  ;;  %1727 = vmatmul.mubr.bf16.gmra.mrb[92].mxu0 %v13544_v16  ;;  %18790 = vst [vmem:[#allocation52_spill] sm:$0xff] %v13660_v46 }
 0x15c   :  { %1543 = vmatprep.mubr.bf16.mxu1 %v18170_v1  ;;  %1736 = vmatprep.mubr.bf16.mxu0 %v18170_v1 }
 0x15d   :  { %v13618_v8 = vpop.f32.mrb[8].mxu1  ;;  %3006 = vmatpush1.bf16.msra.mxu1 %v10748_v62  ;;  %3198 = vmatprep.subr.bf16.mxu0 %v10753_v63 }
 0x15e   :  { %18780 = vst [vmem:[#allocation42_spill] sm:$0xff] %v13618_v8  ;;  %v13620_v10 = vpop.f32.mrb[9].mxu1  ;;  %3007 = vmatprep.subr.bf16.mxu1 %v10756_v6  ;;  %3199 = vmatpush1.bf16.msra.mxu0 %v10751_v4 }
 0x15f   :  { %18781 = vst [vmem:[#allocation43_spill] sm:$0xff] %v13620_v10  ;;  %v13622_v17 = vpop.f32.mrb[10].mxu1  ;;  %3200 = vmatprep.subr.bf16.mxu0 %v10759_v7 }
 0x160   :  { %18782 = vst [vmem:[#allocation44_spill] sm:$0xff] %v13622_v17  ;;  %v13624_v19 = vpop.f32.mrb[11].mxu1  ;;  %v13628_v16 = vpack.c.bf16 %v13622_v17, %v13618_v8  ;;  %v1152_v21 = vpop.f32.mrb[16].mxu0 }
 0x161   :  { %18783 = vst [vmem:[#allocation45_spill] sm:$0xff] %v13624_v19  ;;  %v13632_v20 = vpack.c.bf16 %v13624_v19, %v13620_v10  ;;  %3008 = vmatpush1.bf16.msra.mxu1 %v10754_v15  ;;  %v1154_v22 = vpop.f32.mrb[17].mxu0 }
 0x162   :  { %3201 = vmatpush1.bf16.msra.mxu0 %v10757_v18  ;;  %4323 = vmatprep.subr.bf16.mxu1 %v13494_v48  ;;  %v1156_v29 = vpop.f32.mrb[18].mxu0  ;;  %v228_v48 = vld [vmem:[%s18163_s6] sm:$0xf] }
 0x163   :  { %1544 = vmatmul.mubr.bf16.gmra.mrb[96].mxu1 %v636_v37  ;;  %1737 = vmatmul.mubr.bf16.gmra.mrb[96].mxu0 %v636_v37  ;;  %v1158_v39 = vpop.f32.mrb[19].mxu0  ;;  %v13651_v37 = vsub.s32 1, %v13173_v2  ;;  %v13667_v50 = vrot.slane %v228_v48, %v13642_v38  ;;  %v13677_v6 = vrot.slane %v228_v48, %v13660_v46 }
 0x164   :  { %1553 = vmatprep.mubr.bf16.mxu1 %v18170_v1  ;;  %1746 = vmatprep.mubr.bf16.mxu0 %v18170_v1 }
 0x165   :  { %v13637_v26 = vpop.f32.mrb[12].mxu1  ;;  %4516 = vmatprep.subr.bf16.mxu0 %v13500_v51  ;;  %18788 = vst [vmem:[#allocation50_spill] sm:$0xff] %v13651_v37  ;;  %v13670_v52 = vrot.slane %v228_v48, %v13651_v37  ;;  %v13697_v17 = vadd.f32 %v1154_v22, %v13677_v6 }
 0x166   :  { %18784 = vst [vmem:[#allocation46_spill] sm:$0xff] %v13637_v26  ;;  %v13639_v30 = vpop.f32.mrb[13].mxu1 }
 0x167   :  { %18785 = vst [vmem:[#allocation47_spill] sm:$0xff] %v13639_v30  ;;  %v13645_v40 = vpop.f32.mrb[14].mxu1  ;;  %18796 = vst [vmem:[#allocation58_spill] sm:$0xff] %v13697_v17 }
 0x168   :  { %18787 = vst [vmem:[#allocation49_spill] sm:$0xff] %v13645_v40  ;;  %v13653_v41 = vpop.f32.mrb[15].mxu1  ;;  %v13657_v42 = vpack.c.bf16 %v13645_v40, %v13637_v26  ;;  %v1162_v62 = vpop.f32.mrb[20].mxu0 }
 0x169   :  { %18789 = vst [vmem:[#allocation51_spill] sm:$0xff] %v13653_v41  ;;  %v13664_v51 = vpack.c.bf16 %v13653_v41, %v13639_v30  ;;  %v1164_v63 = vpop.f32.mrb[21].mxu0 }
 0x16a   :  { %v1166_v7 = vpop.f32.mrb[22].mxu0 }
 0x16b   :  { %1554 = vmatmul.mubr.bf16.gmra.mrb[100].mxu1 %v13572_v35  ;;  %1747 = vmatmul.mubr.bf16.gmra.mrb[100].mxu0 %v13572_v35  ;;  %v1168_v3 = vpop.f32.mrb[23].mxu0 }
 0x16c   :  { %1563 = vmatprep.mubr.bf16.mxu1 %v18170_v1  ;;  %1756 = vmatprep.mubr.bf16.mxu0 %v18170_v1  ;;  %v13731_v2 = vadd.f32 %v1168_v3, %v13677_v6 }
 0x16d   :  { %v959_v4 = vpop.f32.mrb[16].mxu1 }
 0x16e   :  { %v13680_v15 = vadd.f32 %v959_v4, %v13667_v50  ;;  %v961_v18 = vpop.f32.mrb[17].mxu1  ;;  %18802 = vst [vmem:[#allocation63_spill] sm:$0xff] %v13731_v2 }
 0x16f   :  { %v13686_v35 = vadd.f32 %v961_v18, %v13670_v52  ;;  %v963_v40 = vpop.f32.mrb[18].mxu1  ;;  %v13701_v18 = vrot.slane %v228_v48, %v13683_v0  ;;  %v13722_v0 = vadd.f32 %v1164_v63, %v13677_v6 }
 0x170   :  { %18791 = vst [vmem:[#allocation53_spill] sm:$0xff] %v13680_v15  ;;  %v10109_v26 = vmul.f32 -1.442695, %v13680_v15  ;;  %v13690_v1 = vadd.f32 %v963_v40, %v13667_v50  ;;  %v965_v41 = vpop.f32.mrb[19].mxu1  ;;  %v13705_v40 = vadd.f32 %v1158_v39, %v13677_v6  ;;  %v13707_v10 = vpop.f32.mrb[24].mxu0 }
 0x171   :  { %18793 = vst [vmem:[#allocation55_spill] sm:$0xff] %v13686_v35  ;;  %v10141_v30 = vmul.f32 -1.442695, %v13686_v35  ;;  %v13694_v4 = vadd.f32 %v965_v41, %v13670_v52  ;;  %v13711_v22 = vpop.f32.mrb[25].mxu0  ;;  %v13719_v46 = vadd.f32 %v1152_v21, %v13701_v18  ;;  %18800 = vst [vmem:[#allocation61_spill] sm:$0xff] %v13722_v0  ;;  %v13728_v43 = vadd.f32 %v1156_v29, %v13701_v18 }
 0x172   :  { %18794 = vst [vmem:[#allocation56_spill] sm:$0xff] %v13690_v1  ;;  %10776 = vpow2.f32 %v10109_v26  ;;  %v10110_v8 = vmul.f32 -1.442695, %v13690_v1  ;;  %18797 = vst [vmem:[#allocation59_spill] sm:$0xff] %v13705_v40  ;;  %v18798_v26 = vmov 0   ;;  %v13716_v41 = vpop.f32.mrb[26].mxu0  ;;  %v13737_v21 = vadd.f32 %v1162_v62, %v13701_v18 }
 0x173   :  { %18795 = vst [vmem:[#allocation57_spill] sm:$0xff] %v13694_v4  ;;  %10778 = vpow2.f32 %v10141_v30  ;;  %v10142_v19 = vmul.f32 -1.442695, %v13694_v4  ;;  %1564 = vmatmul.mubr.bf16.gmra.mrb[104].mxu1 %v13612_v61  ;;  %1757 = vmatmul.mubr.bf16.gmra.mrb[104].mxu0 %v13612_v61  ;;  %v10173_v30 = vmul.f32 -1.442695, %v13697_v17  ;;  %18799 = vst [vmem:[#allocation60_spill] sm:$0xff] %v13719_v46  ;;  %v13745_v29 = vadd.f32 %v1166_v7, %v13701_v18 }
 0x174   :  { %1573 = vmatprep.mubr.bf16.mxu1 %v18798_v26  ;;  %1766 = vmatprep.mubr.bf16.mxu0 %v18798_v26  ;;  %10780 = vpow2.f32 %v10110_v8  ;;  %v13724_v61 = vpop.f32.mrb[27].mxu0  ;;  %v10174_v38 = vmul.f32 -1.442695, %v13705_v40  ;;  %18801 = vst [vmem:[#allocation62_spill] sm:$0xff] %v13728_v43  ;;  %18804 = vst [vmem:[#allocation65_spill] sm:$0xff] %v13737_v21  ;;  %v13812_v11 = vadd.f32 %v13707_v10, %v13701_v18 }
 0x175   :  { %v969_v48 = vpop.f32.mrb[20].mxu1  ;;  %10782 = vpow2.f32 %v10142_v19  ;;  %v10175_v19 = vmul.f32 -1.442695, %v13722_v0  ;;  %18806 = vst [vmem:[#allocation67_spill] sm:$0xff] %v13745_v29  ;;  %v10176_v62 = vmul.f32 -1.442695, %v13731_v2 }
 0x176   :  { %v971_v39 = vpop.f32.mrb[21].mxu1  ;;  %v13734_v8 = vadd.f32 %v969_v48, %v13667_v50  ;;  %10784 = vpow2.f32 %v10173_v30  ;;  %18814 = vst [vmem:[#allocation75_spill] sm:$0xff] %v13812_v11 }
 0x177   :  { %v973_v37 = vpop.f32.mrb[22].mxu1  ;;  %v13740_v63 = vadd.f32 %v971_v39, %v13670_v52  ;;  %10786 = vtanh.f32 %v13719_v46 }
 0x178   :  { %v975_v49 = vpop.f32.mrb[23].mxu1  ;;  %18803 = vst [vmem:[#allocation64_spill] sm:$0xff] %v13734_v8  ;;  %10788 = vpow2.f32 %v10174_v38  ;;  %v13747_v3 = vpop.f32.mrb[28].mxu0  ;;  %v10111_v38 = vmul.f32 -1.442695, %v13734_v8  ;;  %v13759_v7 = vadd.f32 %v973_v37, %v13667_v50 }
 0x179   :  { %18805 = vst [vmem:[#allocation66_spill] sm:$0xff] %v13740_v63  ;;  %10790 = vtanh.f32 %v13728_v43  ;;  %v13753_v48 = vpop.f32.mrb[29].mxu0  ;;  %v10143_v45 = vmul.f32 -1.442695, %v13740_v63  ;;  %v13766_v28 = vadd.f32 %v975_v49, %v13670_v52 }
 0x17a   :  { %18807 = vst [vmem:[#allocation68_spill] sm:$0xff] %v13759_v7  ;;  %10792 = vtanh.f32 %v13737_v21  ;;  %v10112_v31 = vmul.f32 -1.442695, %v13759_v7 }
 0x17b   :  { %1574 = vmatmul.mubr.bf16.gmra.mrb[108].mxu1 %v13604_v57  ;;  %1767 = vmatmul.mubr.bf16.gmra.mrb[108].mxu0 %v13604_v57  ;;  %v13762_v57 = vpop.f32.mrb[30].mxu0  ;;  %18808 = vst [vmem:[#allocation69_spill] sm:$0xff] %v13766_v28  ;;  %10794 = vpow2.f32 %v10175_v19  ;;  %v10144_v49 = vmul.f32 -1.442695, %v13766_v28 }
 0x17c   :  { %v10777_v54 = vpop.eup %10776  ;;  %1583 = vmatprep.mubr.bf16.mxu1 %v18798_v26  ;;  %1776 = vmatprep.mubr.bf16.mxu0 %v18798_v26  ;;  %v13768_v32 = vpop.f32.mrb[31].mxu0  ;;  %10796 = vtanh.f32 %v13745_v29 }
 0x17d   :  { %v10779_v30 = vpop.eup %10778  ;;  %v979_v39 = vpop.f32.mrb[24].mxu1  ;;  %v2113_v25 = vadd.f32 1.0, %v10777_v54  ;;  %10798 = vpow2.f32 %v10176_v62 }
 0x17e   :  { %v981_v23 = vpop.f32.mrb[25].mxu1  ;;  %v10781_v37 = vpop.eup %10780  ;;  %v2305_v44 = vadd.f32 1.0, %v10779_v30  ;;  %10800 = vpow2.f32 %v10111_v38  ;;  %v13773_v24 = vadd.f32 %v979_v39, %v13667_v50 }
 0x17f   :  { %v983_v53 = vpop.f32.mrb[26].mxu1  ;;  %v10783_v47 = vpop.eup %10782  ;;  %10802 = vpow2.f32 %v10143_v45  ;;  %v2114_v54 = vadd.f32 1.0, %v10781_v37  ;;  %v13777_v34 = vadd.f32 %v981_v23, %v13670_v52 }
 0x180   :  { %v985_v56 = vpop.f32.mrb[27].mxu1  ;;  %18809 = vst [vmem:[#allocation70_spill] sm:$0xff] %v13773_v24  ;;  %v10785_v19 = vpop.eup %10784  ;;  %10804 = vrcp.f32 %v2113_v25  ;;  %v2306_v62 = vadd.f32 1.0, %v10783_v47  ;;  %v10113_v23 = vmul.f32 -1.442695, %v13773_v24 }
 0x181   :  { %18810 = vst [vmem:[#allocation71_spill] sm:$0xff] %v13777_v34  ;;  %v13779_v27 = vpop.f32.mrb[32].mxu0  ;;  %v13781_v30 = vpop.eup %10786  ;;  %10806 = vrcp.f32 %v2305_v44  ;;  %v2529_v13 = vadd.f32 1.0, %v10785_v19  ;;  %v13803_v59 = vadd.f32 %v985_v56, %v13670_v52 }
 0x182   :  { %v13785_v38 = vpop.f32.mrb[33].mxu0  ;;  %v10789_v45 = vpop.eup %10788  ;;  %10808 = vpow2.f32 %v10112_v31  ;;  %v10145_v31 = vmul.f32 -1.442695, %v13777_v34 }
 0x183   :  { %1584 = vmatmul.mubr.bf16.gmra.mrb[112].mxu1 %v13576_v36  ;;  %1777 = vmatmul.mubr.bf16.gmra.mrb[112].mxu0 %v13576_v36  ;;  %v13790_v39 = vpop.f32.mrb[34].mxu0  ;;  %v13792_v37 = vpop.eup %10790  ;;  %10810 = vpow2.f32 %v10144_v49  ;;  %v13795_v36 = vadd.f32 %v983_v53, %v13667_v50  ;;  %v2530_v5 = vadd.f32 1.0, %v10789_v45  ;;  %18812 = vst [vmem:[#allocation73_spill] sm:$0xff] %v13803_v59  ;;  %v10146_v10 = vmul.f32 -1.442695, %v13803_v59 }
 0x184   :  { %1593 = vmatprep.mubr.bf16.mxu1 %v18798_v26  ;;  %1786 = vmatprep.mubr.bf16.mxu0 %v18798_v26  ;;  %v13797_v47 = vpop.f32.mrb[35].mxu0  ;;  %v13799_v9 = vpop.eup %10792  ;;  %10812 = vrcp.f32 %v2114_v54 }
 0x185   :  { %v989_v25 = vpop.f32.mrb[28].mxu1  ;;  %18811 = vst [vmem:[#allocation72_spill] sm:$0xff] %v13795_v36  ;;  %v10795_v12 = vpop.eup %10794  ;;  %10814 = vrcp.f32 %v2306_v62  ;;  %v10114_v60 = vmul.f32 -1.442695, %v13795_v36 }
 0x186   :  { %v991_v44 = vpop.f32.mrb[29].mxu1  ;;  %v13805_v19 = vpop.eup %10796  ;;  %10816 = vpow2.f32 %v10113_v23  ;;  %v13808_v53 = vadd.f32 %v989_v25, %v13667_v50  ;;  %v2531_v45 = vadd.f32 1.0, %v10795_v12 }
 0x187   :  { %v993_v14 = vpop.f32.mrb[30].mxu1  ;;  %v10799_v54 = vpop.eup %10798  ;;  %10818 = vrcp.f32 %v2529_v13  ;;  %v13816_v56 = vadd.f32 %v991_v44, %v13670_v52 }
 0x188   :  { %v995_v49 = vpop.f32.mrb[31].mxu1  ;;  %18813 = vst [vmem:[#allocation74_spill] sm:$0xff] %v13808_v53  ;;  %v10801_v62 = vpop.eup %10800  ;;  %10820 = vpow2.f32 %v10145_v31  ;;  %v10115_v12 = vmul.f32 -1.442695, %v13808_v53  ;;  %v13829_v44 = vadd.f32 %v993_v14, %v13667_v50 }
 0x189   :  { %18815 = vst [vmem:[#allocation76_spill] sm:$0xff] %v13816_v56  ;;  %v13818_v34 = vpop.f32.mrb[36].mxu0  ;;  %v10803_v23 = vpop.eup %10802  ;;  %10822 = vrcp.f32 %v2530_v5  ;;  %v10147_v21 = vmul.f32 -1.442695, %v13816_v56  ;;  %v13844_v56 = vadd.f32 %v995_v49, %v13670_v52 }
 0x18a   :  { %v13823_v25 = vpop.f32.mrb[37].mxu0  ;;  %v10805_v13 = vpop.eup %10804  ;;  %18816 = vst [vmem:[#allocation77_spill] sm:$0xff] %v13829_v44  ;;  %10824 = vtanh.f32 %v13812_v11  ;;  %v2307_v14 = vadd.f32 1.0, %v10803_v23 }
 0x18b   :  { %1594 = vmatmul.mubr.bf16.gmra.mrb[116].mxu1 %v13566_v33  ;;  %1787 = vmatmul.mubr.bf16.gmra.mrb[116].mxu0 %v13566_v33  ;;  %v13832_v36 = vpop.f32.mrb[38].mxu0  ;;  %v10807_v5 = vpop.eup %10806  ;;  %v2115_v33 = vadd.f32 1.0, %v10801_v62  ;;  %10826 = vpow2.f32 %v10114_v60  ;;  %v2657_v7 = vmul.f32 %v10805_v13, %v13781_v30  ;;  %v10116_v60 = vmul.f32 -1.442695, %v13829_v44  ;;  %18817 = vst [vmem:[#allocation78_spill] sm:$0xff] %v13844_v56 }
 0x18c   :  { %1603 = vmatprep.mubr.bf16.mxu1 %v18798_v26  ;;  %1796 = vmatprep.mubr.bf16.mxu0 %v18798_v26  ;;  %v13834_v24 = vpop.f32.mrb[39].mxu0  ;;  %v10809_v29 = vpop.eup %10808  ;;  %10828 = vrcp.f32 %v2531_v45  ;;  %v2625_v28 = vmul.f32 0.0, %v10807_v5  ;;  %v2532_v30 = vadd.f32 1.0, %v10799_v54 }
 0x18d   :  { %v999_v31 = vpop.f32.mrb[32].mxu1  ;;  %v10811_v53 = vpop.eup %10810  ;;  %10830 = vpow2.f32 %v10146_v10  ;;  %v2116_v63 = vadd.f32 1.0, %v10809_v29 }
 0x18e   :  { %v1001_v59 = vpop.f32.mrb[33].mxu1  ;;  %v10813_v11 = vpop.eup %10812  ;;  %10832 = vpow2.f32 %v10115_v12  ;;  %v2308_v8 = vadd.f32 1.0, %v10811_v53  ;;  %v13854_v29 = vadd.f32 %v2657_v7, %v2625_v28 }
 0x18f   :  { %v13837_v2 = vpop.f32.mrb[34].mxu1  ;;  %v10815_v62 = vpop.eup %10814  ;;  %10834 = vrcp.f32 %v2115_v33  ;;  %v2658_v28 = vmul.f32 %v10813_v11, %v13792_v37 }
 0x190   :  { %v13839_v0 = vpop.f32.mrb[35].mxu1  ;;  %v10817_v45 = vpop.eup %10816  ;;  %10836 = vpow2.f32 %v10147_v21  ;;  %18818 = vst [vmem:[#allocation79_spill] sm:$0xff] %v13854_v29  ;;  %v13859_v21 = vadd.f32 %v999_v31, %v13667_v50  ;;  %v2626_v54 = vmul.f32 0.0, %v10815_v62  ;;  %v10148_v31 = vmul.f32 -1.442695, %v13844_v56 }
 0x191   :  { %v13846_v23 = vpop.f32.mrb[40].mxu0  ;;  %v13848_v10 = vpop.eup %10818  ;;  %10838 = vrcp.f32 %v2307_v14  ;;  %v2117_v5 = vadd.f32 1.0, %v10817_v45 }
 0x192   :  { %v13852_v13 = vpop.f32.mrb[41].mxu0  ;;  %v10821_v12 = vpop.eup %10820  ;;  %10840 = vpow2.f32 %v10116_v60  ;;  %18819 = vst [vmem:[#allocation80_spill] sm:$0xff] %v13859_v21  ;;  %v10117_v37 = vmul.f32 -1.442695, %v13859_v21  ;;  %v13887_v45 = vadd.f32 %v2658_v28, %v2626_v54 }
 0x193   :  { %1604 = vmatmul.mubr.bf16.gmra.mrb[120].mxu1 %v13608_v58  ;;  %1797 = vmatmul.mubr.bf16.gmra.mrb[120].mxu0 %v13608_v58  ;;  %v13863_v53 = vpop.f32.mrb[42].mxu0  ;;  %v13865_v58 = vpop.eup %10822  ;;  %10842 = vrcp.f32 %v2116_v63  ;;  %v2309_v43 = vadd.f32 1.0, %v10821_v12  ;;  %v13879_v63 = vadd.f32 %v13711_v22, %v13677_v6 }
 0x194   :  { %1613 = vmatprep.mubr.bf16.mxu1 %v18798_v26  ;;  %1806 = vmatprep.mubr.bf16.mxu0 %v18798_v26  ;;  %v13870_v33 = vpop.f32.mrb[43].mxu0  ;;  %v13872_v14 = vpop.eup %10824  ;;  %10844 = vrcp.f32 %v2308_v8  ;;  %18821 = vst [vmem:[#allocation82_spill] sm:$0xff] %v13887_v45 }
 0x195   :  { %v13861_v49 = vpop.f32.mrb[36].mxu1  ;;  %v10827_v44 = vpop.eup %10826  ;;  %10846 = vrcp.f32 %v2532_v30  ;;  %18820 = vst [vmem:[#allocation81_spill] sm:$0xff] %v13879_v63  ;;  %v13890_v30 = vadd.f32 %v1001_v59, %v13670_v52  ;;  %v10177_v21 = vmul.f32 -1.442695, %v13879_v63  ;;  %v13905_v59 = vadd.f32 %v13837_v2, %v13667_v50 }
 0x196   :  { %v13868_v7 = vpop.f32.mrb[37].mxu1  ;;  %v13883_v11 = vpop.eup %10828  ;;  %10848 = vtanh.f32 %v13854_v29  ;;  %v2118_v46 = vadd.f32 1.0, %v10827_v44  ;;  %v13921_v2 = vadd.f32 %v13724_v61, %v13677_v6  ;;  %v13940_v35 = vadd.f32 %v13861_v49, %v13667_v50 }
 0x197   :  { %v13875_v60 = vpop.f32.mrb[38].mxu1  ;;  %v10831_v8 = vpop.eup %10830  ;;  %10850 = vrcp.f32 %v2117_v5  ;;  %18822 = vst [vmem:[#allocation83_spill] sm:$0xff] %v13890_v30  ;;  %18824 = vst [vmem:[#allocation85_spill] sm:$0xff] %v13905_v59 }
 0x198   :  { %v13881_v62 = vpop.f32.mrb[39].mxu1  ;;  %v10833_v56 = vpop.eup %10832  ;;  %10852 = vpow2.f32 %v10148_v31  ;;  %v2310_v28 = vadd.f32 1.0, %v10831_v8  ;;  %18827 = vst [vmem:[#allocation88_spill] sm:$0xff] %v13921_v2  ;;  %18829 = vst [vmem:[#allocation90_spill] sm:$0xff] %v13940_v35 }
 0x199   :  { %v13892_v22 = vpop.f32.mrb[44].mxu0  ;;  %v13894_v12 = vpop.eup %10834  ;;  %10854 = vrcp.f32 %v2309_v43 }
 0x19a   :  { %18823 = vst [vmem:[#allocation84_spill] sm:$0xff] %v13892_v22  ;;  %v13899_v5 = vpop.f32.mrb[45].mxu0  ;;  %v10837_v54 = vpop.eup %10836  ;;  %10856 = vpow2.f32 %v10117_v37  ;;  %v10149_v37 = vmul.f32 -1.442695, %v13890_v30 }
 0x19b   :  { %1614 = vmatmul.mubr.bf16.gmra.mrb[124].mxu1 %v13598_v55  ;;  %1807 = vmatmul.mubr.bf16.gmra.mrb[124].mxu0 %v13598_v55  ;;  %v13909_v31 = vpop.f32.mrb[46].mxu0  ;;  %v13911_v43 = vpop.eup %10838  ;;  %10858 = vtanh.f32 %v13887_v45  ;;  %v2119_v55 = vadd.f32 1.0, %v10833_v56  ;;  %v2311_v4 = vadd.f32 1.0, %v10837_v54  ;;  %v13929_v56 = vadd.f32 %v13839_v0, %v13670_v52 }
 0x19c   :  { %1623 = vmatprep.mubr.bf16.mxu1 %v18798_v26  ;;  %1816 = vmatprep.mubr.bf16.mxu0 %v18798_v26  ;;  %18825 = vst [vmem:[#allocation86_spill] sm:$0xff] %v13909_v31  ;;  %v13916_v8 = vpop.f32.mrb[47].mxu0  ;;  %v10841_v29 = vpop.eup %10840  ;;  %10860 = vrcp.f32 %v2118_v46  ;;  %v10118_v46 = vmul.f32 -1.442695, %v13905_v59  ;;  %v10178_v0 = vmul.f32 -1.442695, %v13921_v2 }
 0x19d   :  { %v13907_v44 = vpop.f32.mrb[40].mxu1  ;;  %18826 = vst [vmem:[#allocation87_spill] sm:$0xff] %v13916_v8  ;;  %v13925_v17 = vpop.eup %10842  ;;  %10862 = vpow2.f32 %v10177_v21  ;;  %18828 = vst [vmem:[#allocation89_spill] sm:$0xff] %v13929_v56  ;;  %v2120_v61 = vadd.f32 1.0, %v10841_v29  ;;  %v10150_v29 = vmul.f32 -1.442695, %v13929_v56 }
 0x19e   :  { %v13914_v63 = vpop.f32.mrb[41].mxu1  ;;  %v13933_v1 = vpop.eup %10844  ;;  %10864 = vrcp.f32 %v2310_v28  ;;  %v10119_v59 = vmul.f32 -1.442695, %v13940_v35  ;;  %v13989_v35 = vadd.f32 %v13875_v60, %v13667_v50  ;;  %v14003_v60 = vadd.f32 %v13768_v32, %v13677_v6 }
 0x19f   :  { %v13923_v40 = vpop.f32.mrb[42].mxu1  ;;  %v13936_v30 = vpop.eup %10846  ;;  %10866 = vrcp.f32 %v2119_v55  ;;  %v13958_v55 = vadd.f32 %v13716_v41, %v13701_v18  ;;  %v14018_v32 = vadd.f32 %v13881_v62, %v13670_v52 }
 0x1a0   :  { %v13931_v45 = vpop.f32.mrb[43].mxu1  ;;  %v13942_v21 = vpop.eup %10848  ;;  %10868 = vpow2.f32 %v10149_v37  ;;  %v13962_v37 = vadd.f32 %v13753_v48, %v13677_v6  ;;  %v13981_v48 = vadd.f32 %v13868_v7, %v13670_v52  ;;  %18838 = vst [vmem:[#allocation99_spill] sm:$0xff] %v13989_v35  ;;  %18839 = vst [vmem:[#allocation100_spill] sm:$0xff] %v14003_v60  ;;  %v10180_v62 = vmul.f32 -1.442695, %v14003_v60 }
 0x1a1   :  { %v13945_v54 = vpop.f32.mrb[48].mxu0  ;;  %v13947_v15 = vpop.eup %10850  ;;  %10870 = vrcp.f32 %v2311_v4  ;;  %18832 = vst [vmem:[#allocation93_spill] sm:$0xff] %v13958_v55  ;;  %18843 = vst [vmem:[#allocation104_spill] sm:$0xff] %v14018_v32 }
 0x1a2   :  { %18830 = vst [vmem:[#allocation91_spill] sm:$0xff] %v13945_v54  ;;  %v13952_v28 = vpop.f32.mrb[49].mxu0  ;;  %v10853_v49 = vpop.eup %10852  ;;  %10872 = vpow2.f32 %v10118_v46  ;;  %18833 = vst [vmem:[#allocation94_spill] sm:$0xff] %v13962_v37  ;;  %v13977_v46 = vadd.f32 %v13747_v3, %v13701_v18  ;;  %v10179_v3 = vmul.f32 -1.442695, %v13962_v37 }
 0x1a3   :  { %1624 = vmatmul.mubr.bf16.gmra.mrb[128].mxu1 %v13632_v20  ;;  %1817 = vmatmul.mubr.bf16.gmra.mrb[128].mxu0 %v13632_v20  ;;  %18831 = vst [vmem:[#allocation92_spill] sm:$0xff] %v13952_v28  ;;  %v13966_v4 = vpop.f32.mrb[50].mxu0  ;;  %v13968_v56 = vpop.eup %10854  ;;  %10874 = vrcp.f32 %v2120_v61  ;;  %18837 = vst [vmem:[#allocation98_spill] sm:$0xff] %v13981_v48  ;;  %v2312_v61 = vadd.f32 1.0, %v10853_v49 }
 0x1a4   :  { %1633 = vmatprep.mubr.bf16.mxu1 %v18798_v26  ;;  %1826 = vmatprep.mubr.bf16.mxu0 %v18798_v26  ;;  %18834 = vst [vmem:[#allocation95_spill] sm:$0xff] %v13966_v4  ;;  %v13973_v54 = vpop.f32.mrb[51].mxu0  ;;  %v10857_v41 = vpop.eup %10856  ;;  %10876 = vpow2.f32 %v10178_v0  ;;  %18836 = vst [vmem:[#allocation97_spill] sm:$0xff] %v13977_v46 }
 0x1a5   :  { %v13964_v20 = vpop.f32.mrb[44].mxu1  ;;  %18835 = vst [vmem:[#allocation96_spill] sm:$0xff] %v13973_v54  ;;  %v13985_v28 = vpop.eup %10858  ;;  %10878 = vpow2.f32 %v10150_v29  ;;  %v2121_v8 = vadd.f32 1.0, %v10857_v41  ;;  %v10151_v29 = vmul.f32 -1.442695, %v13981_v48 }
 0x1a6   :  { %v13971_v2 = vpop.f32.mrb[45].mxu1  ;;  %v13993_v0 = vpop.eup %10860  ;;  %10880 = vtanh.f32 %v13958_v55 }
 0x1a7   :  { %v13983_v4 = vpop.f32.mrb[46].mxu1  ;;  %v10863_v7 = vpop.eup %10862  ;;  %10882 = vpow2.f32 %v10119_v59  ;;  %v10120_v59 = vmul.f32 -1.442695, %v13989_v35  ;;  %v14028_v35 = vadd.f32 %v13762_v57, %v13701_v18 }
 0x1a8   :  { %v13991_v54 = vpop.f32.mrb[47].mxu1  ;;  %v13997_v31 = vpop.eup %10864  ;;  %10884 = vtanh.f32 %v13977_v46  ;;  %v2533_v37 = vadd.f32 1.0, %v10863_v7 }
 0x1a9   :  { %v14005_v49 = vpop.f32.mrb[52].mxu0  ;;  %v14007_v22 = vpop.eup %10866  ;;  %10886 = vrcp.f32 %v2312_v61  ;;  %18846 = vst [vmem:[#allocation107_spill] sm:$0xff] %v14028_v35 }
 0x1aa   :  { %18840 = vst [vmem:[#allocation101_spill] sm:$0xff] %v14005_v49  ;;  %18841 = vst [vmem:[#allocation102_spill] sm:$0xff] %v14007_v22  ;;  %v14012_v41 = vpop.f32.mrb[53].mxu0  ;;  %v10869_v46 = vpop.eup %10868  ;;  %10888 = vpow2.f32 %v10179_v3  ;;  %v14037_v49 = vadd.f32 %v13907_v44, %v13667_v50  ;;  %v14049_v44 = vadd.f32 %v13785_v38, %v13677_v6 }
 0x1ab   :  { %1634 = vmatmul.mubr.bf16.gmra.mrb[132].mxu1 %v13628_v16  ;;  %1827 = vmatmul.mubr.bf16.gmra.mrb[132].mxu0 %v13628_v16  ;;  %18842 = vst [vmem:[#allocation103_spill] sm:$0xff] %v14012_v41  ;;  %v14022_v48 = vpop.f32.mrb[54].mxu0  ;;  %v14024_v16 = vpop.eup %10870  ;;  %10890 = vrcp.f32 %v2121_v8  ;;  %v2313_v8 = vadd.f32 1.0, %v10869_v46 }
 0x1ac   :  { %1643 = vmatprep.mubr.bf16.mxu1 %v18798_v26  ;;  %1836 = vmatprep.mubr.bf16.mxu0 %v18798_v26  ;;  %18844 = vst [vmem:[#allocation105_spill] sm:$0xff] %v14022_v48  ;;  %18845 = vst [vmem:[#allocation106_spill] sm:$0xff] %v14024_v16  ;;  %v14032_v55 = vpop.f32.mrb[55].mxu0  ;;  %v10873_v3 = vpop.eup %10872  ;;  %10892 = vpow2.f32 %v10151_v29  ;;  %v10121_v46 = vmul.f32 -1.442695, %v14037_v49 }
 0x1ad   :  { %v14020_v61 = vpop.f32.mrb[48].mxu1  ;;  %18847 = vst [vmem:[#allocation108_spill] sm:$0xff] %v14032_v55  ;;  %18848 = vst [vmem:[#allocation109_spill] sm:$0xff] %v14037_v49  ;;  %v14041_v41 = vpop.eup %10874  ;;  %10894 = vpow2.f32 %v10120_v59  ;;  %v10152_v55 = vmul.f32 -1.442695, %v14018_v32  ;;  %v2122_v29 = vadd.f32 1.0, %v10873_v3  ;;  %v14060_v3 = vadd.f32 %v13914_v63, %v13670_v52 }
 0x1ae   :  { %v14030_v7 = vpop.f32.mrb[49].mxu1  ;;  %18849 = vst [vmem:[#allocation110_spill] sm:$0xff] %v14041_v41  ;;  %v10877_v22 = vpop.eup %10876  ;;  %10896 = vrcp.f32 %v2533_v37  ;;  %18850 = vst [vmem:[#allocation111_spill] sm:$0xff] %v14049_v44 }
 0x1af   :  { %v14039_v48 = vpop.f32.mrb[50].mxu1  ;;  %v10879_v16 = vpop.eup %10878  ;;  %10898 = vtanh.f32 %v14028_v35  ;;  %v2534_v37 = vadd.f32 1.0, %v10877_v22  ;;  %18852 = vst [vmem:[#allocation113_spill] sm:$0xff] %v14060_v3 }
 0x1b0   :  { %v14043_v57 = vpop.f32.mrb[51].mxu1  ;;  %v14051_v60 = vpop.eup %10880  ;;  %10900 = vpow2.f32 %v10180_v62  ;;  %v2314_v62 = vadd.f32 1.0, %v10879_v16 }
 0x1b1   :  { %v14054_v59 = vpop.f32.mrb[56].mxu0  ;;  %v10883_v41 = vpop.eup %10882  ;;  %10902 = vrcp.f32 %v2313_v8 }
 0x1b2   :  { %18851 = vst [vmem:[#allocation112_spill] sm:$0xff] %v14054_v59  ;;  %v14062_v38 = vpop.f32.mrb[57].mxu0  ;;  %v14064_v32 = vpop.eup %10884  ;;  %10904 = vpow2.f32 %v10152_v55  ;;  %v2123_v16 = vadd.f32 1.0, %v10883_v41  ;;  %v14081_v55 = vadd.f32 %v13923_v40, %v13667_v50  ;;  %v14096_v40 = vadd.f32 %v13779_v27, %v13701_v18 }
 0x1b3   :  { %1644 = vmatmul.mubr.bf16.gmra.mrb[136].mxu1 %v13664_v51  ;;  %1837 = vmatmul.mubr.bf16.gmra.mrb[136].mxu0 %v13664_v51  ;;  %18853 = vst [vmem:[#allocation114_spill] sm:$0xff] %v14062_v38  ;;  %18854 = vst [vmem:[#allocation115_spill] sm:$0xff] %v14064_v32  ;;  %v14070_v22 = vpop.f32.mrb[58].mxu0  ;;  %v14072_v49 = vpop.eup %10886  ;;  %10906 = vrcp.f32 %v2122_v29  ;;  %v10181_v51 = vmul.f32 -1.442695, %v14049_v44 }
 0x1b4   :  { %1653 = vmatprep.mubr.bf16.mxu1 %v18798_v26  ;;  %1846 = vmatprep.mubr.bf16.mxu0 %v18798_v26  ;;  %18855 = vst [vmem:[#allocation116_spill] sm:$0xff] %v14070_v22  ;;  %18856 = vst [vmem:[#allocation117_spill] sm:$0xff] %v14072_v49  ;;  %v14077_v35 = vpop.f32.mrb[59].mxu0  ;;  %v10889_v59 = vpop.eup %10888  ;;  %10908 = vpow2.f32 %v10121_v46  ;;  %v10153_v29 = vmul.f32 -1.442695, %v14060_v3  ;;  %v12824_v49 = vld [vmem:[#allocation2] sm:$0xff]   ;;  %v2754_v3 = vmul.f32 %v13985_v28, %v13865_v58 }
 0x1b5   :  { %v14068_v8 = vpop.f32.mrb[52].mxu1  ;;  %18858 = vst [vmem:[#allocation119_spill] sm:$0xff] %v14077_v35  ;;  %18859 = vst [vmem:[#allocation120_spill] sm:$0xff] %v14081_v55  ;;  %v14085_v32 = vpop.eup %10890  ;;  %10910 = vrcp.f32 %v2534_v37  ;;  %v14092_v35 = vunpack.c.h.bf16 %v12824_v49  ;;  %v2535_v46 = vadd.f32 1.0, %v10889_v59  ;;  %v2753_v37 = vmul.f32 %v13942_v21, %v13848_v10 }
 0x1b6   :  { %v14075_v63 = vpop.f32.mrb[53].mxu1  ;;  %18860 = vst [vmem:[#allocation121_spill] sm:$0xff] %v14085_v32  ;;  %v10893_v44 = vpop.eup %10892  ;;  %10912 = vrcp.f32 %v2314_v62  ;;  %18864 = vst [vmem:[#allocation125_spill] sm:$0xff] %v14096_v40  ;;  %v14107_v62 = vadd.f32 %v13797_v47, %v13677_v6  ;;  %v14120_v47 = vadd.f32 %v13931_v45, %v13670_v52 }
 0x1b7   :  { %18857 = vst [vmem:[#allocation118_spill] sm:$0xff] %v14075_v63  ;;  %v14083_v38 = vpop.f32.mrb[54].mxu1  ;;  %v14090_v63 = vunpack.c.l.bf16 %v12824_v49  ;;  %18863 = vst [vmem:[#allocation124_spill] sm:$0xff] %v14092_v35  ;;  %v10895_v41 = vpop.eup %10894  ;;  %10914 = vpow2.f32 %v10181_v51  ;;  %v10122_v49 = vmul.f32 -1.442695, %v14081_v55  ;;  %v2315_v59 = vadd.f32 1.0, %v10893_v44 }
 0x1b8   :  { %v14088_v22 = vpop.f32.mrb[55].mxu1  ;;  %v14102_v32 = vpop.eup %10896  ;;  %10916 = vrcp.f32 %v2123_v16  ;;  %18865 = vst [vmem:[#allocation126_spill] sm:$0xff] %v14107_v62  ;;  %v2124_v21 = vadd.f32 1.0, %v10895_v41  ;;  %18868 = vst [vmem:[#allocation129_spill] sm:$0xff] %v14120_v47  ;;  %v14132_v51 = vadd.f32 %v13790_v39, %v13701_v18  ;;  %v2786_v45 = vadd.f32 %v2754_v3, %v14092_v35 }
 0x1b9   :  { %18861 = vst [vmem:[#allocation122_spill] sm:$0xff] %v14088_v22  ;;  %18862 = vst [vmem:[#allocation123_spill] sm:$0xff] %v14090_v63  ;;  %v14109_v27 = vpop.f32.mrb[60].mxu0  ;;  %v14111_v22 = vpop.eup %10898  ;;  %10918 = vpow2.f32 %v10153_v29  ;;  %v2785_v16 = vadd.f32 %v2753_v37, %v14090_v63  ;;  %v10154_v3 = vmul.f32 -1.442695, %v14120_v47  ;;  %v14150_v37 = vadd.f32 %v13964_v20, %v13667_v50 }
 0x1ba   :  { %18866 = vst [vmem:[#allocation127_spill] sm:$0xff] %v14109_v27  ;;  %v14115_v10 = vpop.f32.mrb[61].mxu0  ;;  %v10901_v58 = vpop.eup %10900  ;;  %10920 = vtanh.f32 %v14096_v40  ;;  %18870 = vst [vmem:[#allocation131_spill] sm:$0xff] %v14132_v51  ;;  %v10182_v40 = vmul.f32 -1.442695, %v14107_v62  ;;  %v14157_v62 = vadd.f32 %v13823_v25, %v13677_v6 }
 0x1bb   :  { %1654 = vmatmul.mubr.bf16.gmra.mrb[140].mxu1 %v13657_v42  ;;  %1847 = vmatmul.mubr.bf16.gmra.mrb[140].mxu0 %v13657_v42  ;;  %18867 = vst [vmem:[#allocation128_spill] sm:$0xff] %v14115_v10  ;;  %v14126_v44 = vpop.f32.mrb[62].mxu0  ;;  %v14128_v42 = vpop.eup %10902  ;;  %10922 = vrcp.f32 %v2535_v46  ;;  %v2536_v46 = vadd.f32 1.0, %v10901_v58  ;;  %18872 = vst [vmem:[#allocation133_spill] sm:$0xff] %v14150_v37 }
 0x1bc   :  { %3025 = vmatprep.mubr.bf16.mxu1 %v18798_v26  ;;  %3218 = vmatprep.mubr.bf16.mxu0 %v18798_v26  ;;  %18869 = vst [vmem:[#allocation130_spill] sm:$0xff] %v14126_v44  ;;  %v14138_v41 = vpop.f32.mrb[63].mxu0  ;;  %v10905_v55 = vpop.eup %10904  ;;  %10924 = vpow2.f32 %v10122_v49  ;;  %18873 = vst [vmem:[#allocation134_spill] sm:$0xff] %v14157_v62 }
 0x1bd   :  { %v14124_v28 = vpop.f32.mrb[56].mxu1  ;;  %18871 = vst [vmem:[#allocation132_spill] sm:$0xff] %v14138_v41  ;;  %v14143_v27 = vpop.eup %10906  ;;  %10926 = vrcp.f32 %v2315_v59  ;;  %v2316_v49 = vadd.f32 1.0, %v10905_v55  ;;  %v2817_v59 = vpack.c.bf16 %v2786_v45, %v2785_v16  ;;  %v14169_v55 = vadd.f32 %v13971_v2, %v13670_v52 }
 0x1be   :  { %v14136_v29 = vpop.f32.mrb[57].mxu1  ;;  %v10909_v10 = vpop.eup %10908  ;;  %10928 = vrcp.f32 %v2124_v21  ;;  %v14163_v21 = vadd.f32 %v13818_v34, %v13701_v18  ;;  %v10183_v45 = vmul.f32 -1.442695, %v14157_v62  ;;  %v14183_v2 = vadd.f32 %v13983_v4, %v13667_v50  ;;  %v12827_v62 = vld [vmem:[#allocation8 + $0x24] ss:$16 sps:$4 sm:$0xff]  }
 0x1bf   :  { %v14141_v44 = vpop.f32.mrb[58].mxu1  ;;  %v14152_v35 = vpop.eup %10910  ;;  %10930 = vtanh.f32 %v14132_v51  ;;  %v2125_v63 = vadd.f32 1.0, %v10909_v10  ;;  %18876 = vst [vmem:[#allocation137_spill] sm:$0xff] %v14169_v55 }
 0x1c0   :  { %v14145_v39 = vpop.f32.mrb[59].mxu1  ;;  %v14159_v58 = vpop.eup %10912  ;;  %10932 = vpow2.f32 %v10182_v40  ;;  %18874 = vst [vmem:[#allocation135_spill] sm:$0xff] %v14163_v21  ;;  %v10123_v40 = vmul.f32 -1.442695, %v14150_v37  ;;  %18879 = vst [vmem:[#allocation140_spill] sm:$0xff] %v14183_v2 }
 0x1c1   :  { %v14165_v47 = vpop.f32.mrb[64].mxu0  ;;  %v10915_v20 = vpop.eup %10914  ;;  %10934 = vrcp.f32 %v2536_v46 }
 0x1c2   :  { %18875 = vst [vmem:[#allocation136_spill] sm:$0xff] %v14165_v47  ;;  %v14171_v25 = vpop.f32.mrb[65].mxu0  ;;  %v14173_v16 = vpop.eup %10916  ;;  %10936 = vpow2.f32 %v10154_v3  ;;  %v12826_v3 = vld [vmem:[#allocation8 + $0x8] ss:$16 sps:$4 sm:$0xff]   ;;  %v2537_v51 = vadd.f32 1.0, %v10915_v20 }
 0x1c3   :  { %3026 = vmatmul.mubr.bf16.vlgmr.msra.gmra.mrb[144].mxu1 %v2817_v59  ;;  %3219 = vmatmul.mubr.bf16.vlgmr.msra.gmra.mrb[144].mxu0 %v2817_v59  ;;  %18877 = vst [vmem:[#allocation138_spill] sm:$0xff] %v14171_v25  ;;  %18878 = vst [vmem:[#allocation139_spill] sm:$0xff] %v14173_v16  ;;  %v10919_v10 = vpop.eup %10918  ;;  %10938 = vrcp.f32 %v2316_v49  ;;  %v12825_v59 = vld [vmem:[#allocation8] ss:$16 sps:$4 sm:$0xff]   ;;  %v14192_v49 = vpop.f32.mrb[66].mxu0  ;;  %v2659_v16 = vmul.f32 %v13894_v12, %v13799_v9  ;;  %v14214_v9 = vadd.f32 %v13832_v36, %v13701_v18 }
 0x1c4   :  { %3035 = vmatprep.mubr.bf16.mxu1 %v18798_v26  ;;  %3228 = vmatprep.mubr.bf16.mxu0 %v18798_v26  ;;  %v14187_v37 = vpop.eup %10920  ;;  %10940 = vtanh.f32 %v14163_v21  ;;  %18880 = vst [vmem:[#allocation141_spill] sm:$0xff] %v14192_v49  ;;  %v12828_v25 = vld [vmem:[#allocation8 + $0x2c] ss:$16 sps:$4 sm:$0xff]   ;;  %v2627_v21 = vmul.f32 0.0, %v13911_v43  ;;  %v2317_v49 = vadd.f32 1.0, %v10919_v10  ;;  %v14226_v36 = vadd.f32 %v13991_v54, %v13670_v52 }
 0x1c5   :  { %v14178_v34 = vpop.f32.mrb[60].mxu1  ;;  %4324 = vmatpush1.bf16.msra.mxu1 %v12825_v59  ;;  %4517 = vmatpush1.bf16.msra.mxu0 %v12826_v3  ;;  %v14194_v4 = vpop.eup %10922  ;;  %10942 = vrcp.f32 %v2125_v63  ;;  %v10155_v59 = vmul.f32 -1.442695, %v14169_v55  ;;  %v2660_v63 = vmul.f32 %v13925_v17, %v13805_v19  ;;  %v10124_v55 = vmul.f32 -1.442695, %v14183_v2  ;;  %18883 = vst [vmem:[#allocation144_spill] sm:$0xff] %v14214_v9 }
 0x1c6   :  { %v14185_v46 = vpop.f32.mrb[61].mxu1  ;;  %4325 = vmatprep.subr.bf16.mxu1 %v12827_v62  ;;  %4518 = vmatprep.subr.bf16.mxu0 %v12828_v25  ;;  %v14199_v3 = vpop.f32.mrb[67].mxu0  ;;  %10944 = vpow2.f32 %v10123_v40  ;;  %v2628_v25 = vmul.f32 0.0, %v13933_v1  ;;  %v14218_v1 = vadd.f32 %v13834_v24, %v13677_v6  ;;  %v12831_v12 = vld [vmem:[#allocation8 + $0x44] ss:$16 sps:$4 sm:$0xff]   ;;  %v14222_v10 = vadd.f32 %v2659_v16, %v2627_v21  ;;  %18886 = vst [vmem:[#allocation147_spill] sm:$0xff] %v14226_v36 }
 0x1c7   :  { %v14190_v47 = vpop.f32.mrb[62].mxu1  ;;  %18882 = vst [vmem:[#allocation143_spill] sm:$0xff] %v14199_v3  ;;  %v10925_v20 = vpop.eup %10924  ;;  %10946 = vpow2.f32 %v10183_v45  ;;  %v12830_v3 = vld [vmem:[#allocation8 + $0x28] ss:$16 sps:$4 sm:$0xff]   ;;  %v12832_v17 = vld [vmem:[#allocation8 + $0x4c] ss:$16 sps:$4 sm:$0xff]  }
 0x1c8   :  { %v14197_v41 = vpop.f32.mrb[63].mxu1  ;;  %v14204_v62 = vpop.eup %10926  ;;  %10948 = vrcp.f32 %v2537_v51  ;;  %18884 = vst [vmem:[#allocation145_spill] sm:$0xff] %v14218_v1  ;;  %18885 = vst [vmem:[#allocation146_spill] sm:$0xff] %v14222_v10  ;;  %v12833_v21 = vld [vmem:[#allocation8 + $0x40] ss:$16 sps:$4 sm:$0xff]  }
 0x1c9   :  { %18881 = vst [vmem:[#allocation142_spill] sm:$0xff] %v14197_v41  ;;  %v12829_v41 = vld [vmem:[#allocation8 + $0x20] ss:$16 sps:$4 sm:$0xff]   ;;  %4519 = vmatpush1.bf16.msra.mxu0 %v12830_v3  ;;  %v14210_v43 = vpop.eup %10928  ;;  %10950 = vpow2.f32 %v10155_v59  ;;  %v14230_v24 = vpop.f32.mrb[68].mxu0  ;;  %v14234_v3 = vadd.f32 %v2660_v63, %v2628_v25  ;;  %v12834_v16 = vld [vmem:[#allocation8 + $0x48] ss:$16 sps:$4 sm:$0xff]  }
 0x1ca   :  { %4326 = vmatpush1.bf16.msra.mxu1 %v12829_v41  ;;  %4520 = vmatprep.subr.bf16.mxu0 %v12832_v17  ;;  %v14220_v19 = vpop.eup %10930  ;;  %v2126_v41 = vadd.f32 1.0, %v10925_v20  ;;  %10952 = vrcp.f32 %v2317_v49  ;;  %18887 = vst [vmem:[#allocation148_spill] sm:$0xff] %v14230_v24  ;;  %v14238_v59 = vpop.f32.mrb[69].mxu0  ;;  %v10184_v54 = vmul.f32 -1.442695, %v14218_v1  ;;  %v14244_v20 = vadd.f32 %v14020_v61, %v13667_v50 }
 0x1cb   :  { %4327 = vmatprep.subr.bf16.mxu1 %v12831_v12  ;;  %v10933_v40 = vpop.eup %10932  ;;  %18888 = vst [vmem:[#allocation149_spill] sm:$0xff] %v14234_v3  ;;  %10954 = vpow2.f32 %v10124_v55  ;;  %18889 = vst [vmem:[#allocation150_spill] sm:$0xff] %v14238_v59  ;;  %v12835_v55 = vld [vmem:[#allocation8 + $0x64] ss:$16 sps:$4 sm:$0xff]   ;;  %v12836_v63 = vld [vmem:[#allocation8 + $0x6c] ss:$16 sps:$4 sm:$0xff]   ;;  %v14257_v61 = vadd.f32 %v13852_v13, %v13677_v6 }
 0x1cc   :  { %v14232_v45 = vpop.eup %10934  ;;  %10956 = vtanh.f32 %v14214_v9  ;;  %18890 = vst [vmem:[#allocation151_spill] sm:$0xff] %v14244_v20  ;;  %v10156_v1 = vmul.f32 -1.442695, %v14226_v36  ;;  %v10125_v24 = vmul.f32 -1.442695, %v14244_v20 }
 0x1cd   :  { %v14228_v51 = vpop.f32.mrb[64].mxu1  ;;  %4521 = vmatpush1.bf16.msra.mxu0 %v12834_v16  ;;  %v10937_v49 = vpop.eup %10936  ;;  %10958 = vrcp.f32 %v2126_v41  ;;  %18892 = vst [vmem:[#allocation153_spill] sm:$0xff] %v14257_v61  ;;  %v12838_v41 = vld [vmem:[#allocation8 + $0x68] ss:$16 sps:$4 sm:$0xff]   ;;  %v12839_v36 = vld [vmem:[#allocation8 + $0x84] ss:$16 sps:$4 sm:$0xff]  }
 0x1ce   :  { %v14236_v12 = vpop.f32.mrb[65].mxu1  ;;  %4328 = vmatpush1.bf16.msra.mxu1 %v12833_v21  ;;  %4522 = vmatprep.subr.bf16.mxu0 %v12836_v63  ;;  %v14248_v17 = vpop.eup %10938  ;;  %v2538_v21 = vadd.f32 1.0, %v10933_v40  ;;  %10960 = vtanh.f32 %v14222_v10  ;;  %v12837_v63 = vld [vmem:[#allocation8 + $0x60] ss:$16 sps:$4 sm:$0xff]   ;;  %v12840_v59 = vld [vmem:[#allocation8 + $0x8c] ss:$16 sps:$4 sm:$0xff]   ;;  %v14266_v10 = vadd.f32 %v13846_v23, %v13701_v18 }
 0x1cf   :  { %v14246_v25 = vpop.f32.mrb[66].mxu1  ;;  %4329 = vmatprep.subr.bf16.mxu1 %v12835_v55  ;;  %v14252_v2 = vpop.eup %10940  ;;  %v2318_v55 = vadd.f32 1.0, %v10937_v49  ;;  %10962 = vtanh.f32 %v14234_v3  ;;  %v14270_v49 = vadd.f32 %v14030_v7, %v13670_v52  ;;  %v12841_v20 = vld [vmem:[#allocation8 + $0x80] ss:$16 sps:$4 sm:$0xff]   ;;  %v12842_v7 = vld [vmem:[#allocation8 + $0x88] ss:$16 sps:$4 sm:$0xff]  }
 0x1d0   :  { %v14250_v16 = vpop.f32.mrb[67].mxu1  ;;  %v14260_v9 = vpop.eup %10942  ;;  %10964 = vpow2.f32 %v10184_v54  ;;  %18894 = vst [vmem:[#allocation155_spill] sm:$0xff] %v14266_v10  ;;  %v10185_v54 = vmul.f32 -1.442695, %v14257_v61 }
 0x1d1   :  { %18891 = vst [vmem:[#allocation152_spill] sm:$0xff] %v14250_v16  ;;  %18893 = vst [vmem:[#allocation154_spill] sm:$0xff] %v14260_v9  ;;  %4523 = vmatpush1.bf16.msra.mxu0 %v12838_v41  ;;  %v10945_v40 = vpop.eup %10944  ;;  %10966 = vrcp.f32 %v2538_v21  ;;  %v14279_v21 = vadd.f32 %v14039_v48, %v13667_v50  ;;  %v12845_v16 = vld [vmem:[#allocation2 + $0x8] sm:$0xff]  }
 0x1d2   :  { %4330 = vmatpush1.bf16.msra.mxu1 %v12837_v63  ;;  %4524 = vmatprep.subr.bf16.mxu0 %v12840_v59  ;;  %v10947_v13 = vpop.eup %10946  ;;  %18895 = vst [vmem:[#allocation156_spill] sm:$0xff] %v14270_v49  ;;  %10968 = vpow2.f32 %v10156_v1  ;;  %v2127_v59 = vadd.f32 1.0, %v10945_v40  ;;  %v12844_v40 = vld [vmem:[#allocation8 + $0xac] ss:$16 sps:$4 sm:$0xff]   ;;  %v14289_v9 = vunpack.c.l.bf16 %v12845_v16 }
 0x1d3   :  { %4331 = vmatprep.subr.bf16.mxu1 %v12839_v36  ;;  %v14272_v63 = vpop.eup %10948  ;;  %10970 = vrcp.f32 %v2318_v55  ;;  %18897 = vst [vmem:[#allocation158_spill] sm:$0xff] %v14279_v21  ;;  %v2539_v1 = vadd.f32 1.0, %v10947_v13  ;;  %v12843_v55 = vld [vmem:[#allocation8 + $0xa4] ss:$16 sps:$4 sm:$0xff]   ;;  %v14295_v13 = vadd.f32 %v13870_v33, %v13677_v6  ;;  %v2662_v33 = vmul.f32 %v14051_v60, %v13993_v0 }
 0x1d4   :  { %v10951_v36 = vpop.eup %10950  ;;  %10972 = vpow2.f32 %v10125_v24  ;;  %18902 = vst [vmem:[#allocation163_spill] sm:$0xff] %v14289_v9 }
 0x1d5   :  { %v14275_v41 = vpop.f32.mrb[68].mxu1  ;;  %4525 = vmatpush1.bf16.msra.mxu0 %v12842_v7  ;;  %v14283_v3 = vpop.eup %10952  ;;  %10974 = vtanh.f32 %v14266_v10  ;;  %18903 = vst [vmem:[#allocation164_spill] sm:$0xff] %v14295_v13  ;;  %v10186_v0 = vmul.f32 -1.442695, %v14295_v13 }
 0x1d6   :  { %18896 = vst [vmem:[#allocation157_spill] sm:$0xff] %v14275_v41  ;;  %v14281_v23 = vpop.f32.mrb[69].mxu1  ;;  %4332 = vmatpush1.bf16.msra.mxu1 %v12841_v20  ;;  %18899 = vst [vmem:[#allocation160_spill] sm:$0xff] %v14283_v3  ;;  %v14287_v41 = vpop.f32.mrb[70].mxu0  ;;  %4526 = vmatprep.subr.bf16.mxu0 %v12844_v40  ;;  %v10157_v20 = vmul.f32 -1.442695, %v14270_v49  ;;  %v2661_v40 = vmul.f32 %v13947_v15, %v13872_v14  ;;  %10976 = vpow2.f32 %v10185_v54  ;;  %v14312_v3 = vunpack.c.h.bf16 %v12845_v16 }
 0x1d7   :  { %18898 = vst [vmem:[#allocation159_spill] sm:$0xff] %v14281_v23  ;;  %v14285_v61 = vpop.f32.mrb[70].mxu1  ;;  %18901 = vst [vmem:[#allocation162_spill] sm:$0xff] %v14287_v41  ;;  %4333 = vmatprep.subr.bf16.mxu1 %v12843_v55  ;;  %v10955_v48 = vpop.eup %10954  ;;  %v2629_v55 = vmul.f32 0.0, %v13968_v56  ;;  %v2630_v49 = vmul.f32 0.0, %v13997_v31  ;;  %10978 = vrcp.f32 %v2127_v59  ;;  %v14321_v16 = vadd.f32 %v14043_v57, %v13670_v52 }
 0x1d8   :  { %18900 = vst [vmem:[#allocation161_spill] sm:$0xff] %v14285_v61  ;;  %v14297_v24 = vpop.f32.mrb[71].mxu1  ;;  %v14299_v7 = vpop.f32.mrb[71].mxu0  ;;  %v2319_v61 = vadd.f32 1.0, %v10951_v36  ;;  %v12847_v23 = vld [vmem:[#allocation8 + $0xa8] ss:$16 sps:$4 sm:$0xff]   ;;  %10980 = vrcp.f32 %v2539_v1 }
 0x1d9   :  { %18904 = vst [vmem:[#allocation165_spill] sm:$0xff] %v14297_v24  ;;  %18905 = vst [vmem:[#allocation166_spill] sm:$0xff] %v14299_v7  ;;  %v14301_v41 = vpop.eup %10956  ;;  %v10126_v24 = vmul.f32 -1.442695, %v14279_v21  ;;  %v12846_v7 = vld [vmem:[#allocation8 + $0xa0] ss:$16 sps:$4 sm:$0xff]   ;;  %4527 = vmatpush1.bf16.msra.mxu0 %v12847_v23  ;;  %10982 = vpow2.f32 %v10157_v20  ;;  %v14316_v59 = vadd.f32 %v2661_v40, %v2629_v55 }
 0x1da   :  { %v14306_v10 = vpop.eup %10958  ;;  %4334 = vmatpush1.bf16.msra.mxu1 %v12846_v7  ;;  %18906 = vst [vmem:[#allocation167_spill] sm:$0xff] %v14312_v3  ;;  %v2128_v15 = vadd.f32 1.0, %v10955_v48  ;;  %v12848_v14 = vld [vmem:[#allocation8 + $0xc4] ss:$16 sps:$4 sm:$0xff]   ;;  %v12849_v54 = vld [vmem:[#allocation8 + $0xcc] ss:$16 sps:$4 sm:$0xff]   ;;  %10984 = vrcp.f32 %v2319_v61 }
 0x1db   :  { %v10961_v56 = vpop.eup %10960  ;;  %4335 = vmatprep.subr.bf16.mxu1 %v12848_v14  ;;  %4528 = vmatprep.subr.bf16.mxu0 %v12849_v54  ;;  %18907 = vst [vmem:[#allocation168_spill] sm:$0xff] %v14316_v59  ;;  %18908 = vst [vmem:[#allocation169_spill] sm:$0xff] %v14321_v16  ;;  %v14325_v48 = vpop.f32.mrb[72].mxu0  ;;  %10986 = vpow2.f32 %v10126_v24  ;;  %v12851_v40 = vld [vmem:[#allocation8 + $0xc8] ss:$16 sps:$4 sm:$0xff]   ;;  %v14339_v14 = vadd.f32 %v13863_v53, %v13701_v18 }
 0x1dc   :  { %v10963_v31 = vpop.eup %10962  ;;  %v2755_v36 = vmul.f32 %v10961_v56, %v13883_v11  ;;  %18909 = vst [vmem:[#allocation170_spill] sm:$0xff] %v14325_v48  ;;  %v14329_v11 = vadd.f32 %v2662_v33, %v2630_v49  ;;  %v14334_v61 = vpop.f32.mrb[73].mxu0  ;;  %10988 = vrcp.f32 %v2128_v15  ;;  %v14343_v49 = vadd.f32 %v14068_v8, %v13667_v50  ;;  %v12852_v33 = vld [vmem:[#allocation8 + $0xe4] ss:$16 sps:$4 sm:$0xff]   ;;  %v12853_v54 = vld [vmem:[#allocation8 + $0xec] ss:$16 sps:$4 sm:$0xff]  }
 0x1dd   :  { %v10965_v60 = vpop.eup %10964  ;;  %v2756_v23 = vmul.f32 %v10963_v31, %v13936_v30  ;;  %v14323_v1 = vpop.f32.mrb[72].mxu1  ;;  %18912 = vst [vmem:[#allocation173_spill] sm:$0xff] %v14334_v61  ;;  %v12850_v30 = vld [vmem:[#allocation8 + $0xc0] ss:$16 sps:$4 sm:$0xff]   ;;  %4529 = vmatpush1.bf16.msra.mxu0 %v12851_v40  ;;  %18913 = vst [vmem:[#allocation174_spill] sm:$0xff] %v14339_v14  ;;  %10990 = vpow2.f32 %v10186_v0  ;;  %v14354_v8 = vadd.f32 %v13899_v5, %v13677_v6 }
 0x1de   :  { %v14327_v7 = vpop.eup %10966  ;;  %18910 = vst [vmem:[#allocation171_spill] sm:$0xff] %v14329_v11  ;;  %v2787_v20 = vadd.f32 %v2755_v36, %v14289_v9  ;;  %v14332_v55 = vpop.f32.mrb[73].mxu1  ;;  %4336 = vmatpush1.bf16.msra.mxu1 %v12850_v30  ;;  %18914 = vst [vmem:[#allocation175_spill] sm:$0xff] %v14343_v49  ;;  %4530 = vmatprep.subr.bf16.mxu0 %v12853_v54  ;;  %v2540_v36 = vadd.f32 1.0, %v10965_v60  ;;  %v10158_v53 = vmul.f32 -1.442695, %v14321_v16  ;;  %10992 = vtanh.f32 %v14316_v59 }
 0x1df   :  { %18911 = vst [vmem:[#allocation172_spill] sm:$0xff] %v14332_v55  ;;  %v10969_v57 = vpop.eup %10968  ;;  %v2788_v56 = vadd.f32 %v2756_v23, %v14312_v3  ;;  %v14345_v24 = vpop.f32.mrb[74].mxu1  ;;  %4337 = vmatprep.subr.bf16.mxu1 %v12852_v33  ;;  %18917 = vst [vmem:[#allocation178_spill] sm:$0xff] %v14354_v8  ;;  %10994 = vtanh.f32 %v14329_v11  ;;  %v12854_v0 = vld [vmem:[#allocation8 + $0xe0] ss:$16 sps:$4 sm:$0xff]  }
 0x1e0   :  { %18915 = vst [vmem:[#allocation176_spill] sm:$0xff] %v14345_v24  ;;  %v14347_v31 = vpop.eup %10970  ;;  %v14349_v15 = vpop.f32.mrb[75].mxu1  ;;  %v2320_v33 = vadd.f32 1.0, %v10969_v57  ;;  %v12855_v60 = vld [vmem:[#allocation8 + $0xe8] ss:$16 sps:$4 sm:$0xff]   ;;  %10996 = vtanh.f32 %v14339_v14 }
 0x1e1   :  { %18916 = vst [vmem:[#allocation177_spill] sm:$0xff] %v14349_v15  ;;  %v10973_v23 = vpop.eup %10972  ;;  %v2818_v30 = vpack.c.bf16 %v2788_v56, %v2787_v20  ;;  %v14360_v54 = vpop.f32.mrb[74].mxu0  ;;  %4531 = vmatpush1.bf16.msra.mxu0 %v12855_v60  ;;  %v10127_v5 = vmul.f32 -1.442695, %v14343_v49  ;;  %10998 = vrcp.f32 %v2540_v36  ;;  %v10187_v49 = vmul.f32 -1.442695, %v14354_v8 }
 0x1e2   :  { %v14357_v40 = vpop.eup %10974  ;;  %18918 = vst [vmem:[#allocation179_spill] sm:$0xff] %v14360_v54  ;;  %4338 = vmatpush1.bf16.msra.mxu1 %v12854_v0  ;;  %v14364_v56 = vpop.f32.mrb[75].mxu0  ;;  %v2129_v57 = vadd.f32 1.0, %v10973_v23  ;;  %v18920_v0 = vld [vmem:[#allocation118_spill] sm:$0xff]  ;;  %11000 = vpow2.f32 %v10158_v53  ;;  %v12857_v23 = vld [vmem:[#allocation8 + $0xc] ss:$16 sps:$4 sm:$0xff]  }
 0x1e3   :  { %v10977_v20 = vpop.eup %10976  ;;  %3036 = vmatmul.mubr.bf16.gmra.mrb[148].mxu1 %v2818_v30  ;;  %3229 = vmatmul.mubr.bf16.gmra.mrb[148].mxu0 %v2818_v30  ;;  %18919 = vst [vmem:[#allocation180_spill] sm:$0xff] %v14364_v56  ;;  %v14372_v60 = vadd.f32 %v18920_v0, %v13670_v52  ;;  %v14374_v21 = vpop.f32.mrb[76].mxu0  ;;  %v12856_v36 = vld [vmem:[#allocation8 + $0x4] ss:$16 sps:$4 sm:$0xff]   ;;  %11002 = vrcp.f32 %v2320_v33  ;;  %v14398_v33 = vadd.f32 %v14083_v38, %v13667_v50  ;;  %v18934_v48 = vld [vmem:[#allocation115_spill] sm:$0xff] }
 0x1e4   :  { %v14366_v16 = vpop.eup %10978  ;;  %3045 = vmatprep.mubr.bf16.mxu1 %v18798_v26  ;;  %3238 = vmatprep.mubr.bf16.mxu0 %v18798_v26  ;;  %18922 = vst [vmem:[#allocation181_spill] sm:$0xff] %v14374_v21  ;;  %v14381_v13 = vpop.f32.mrb[77].mxu0  ;;  %v2541_v9 = vadd.f32 1.0, %v10977_v20  ;;  %v18926_v59 = vld [vmem:[#allocation84_spill] sm:$0xff]  ;;  %11004 = vpow2.f32 %v10127_v5  ;;  %v18933_v5 = vld [vmem:[#allocation102_spill] sm:$0xff] }
 0x1e5   :  { %18921 = vst [vmem:[#allocation118_spill] sm:$0xff] %v14372_v60  ;;  %v14376_v30 = vpop.eup %10980  ;;  %v14379_v14 = vpop.f32.mrb[76].mxu1  ;;  %18924 = vst [vmem:[#allocation183_spill] sm:$0xff] %v14381_v13  ;;  %5653 = vmatprep.subr.bf16.mxu1 %v12856_v36  ;;  %5846 = vmatprep.subr.bf16.mxu0 %v12857_v23  ;;  %v14389_v53 = vadd.f32 %v18926_v59, %v13701_v18  ;;  %v12858_v13 = vld [vmem:[#allocation2 + $0x10] sm:$0xff]   ;;  %11006 = vrcp.f32 %v2129_v57  ;;  %v10159_v36 = vmul.f32 -1.442695, %v14372_v60 }
 0x1e6   :  { %18923 = vst [vmem:[#allocation182_spill] sm:$0xff] %v14379_v14  ;;  %v10983_v3 = vpop.eup %10982  ;;  %v14383_v0 = vpop.f32.mrb[77].mxu1  ;;  %v14393_v56 = vunpack.c.l.bf16 %v12858_v13  ;;  %18930 = vst [vmem:[#allocation187_spill] sm:$0xff] %v14398_v33  ;;  %v18932_v59 = vld [vmem:[#allocation106_spill] sm:$0xff]  ;;  %v2663_v61 = vmul.f32 %v18934_v48, %v18933_v5  ;;  %11008 = vpow2.f32 %v10187_v49  ;;  %v18935_v14 = vld [vmem:[#allocation117_spill] sm:$0xff]  ;;  %v14414_v55 = vunpack.c.h.bf16 %v12858_v13 }
 0x1e7   :  { %18925 = vst [vmem:[#allocation184_spill] sm:$0xff] %v14383_v0  ;;  %v14385_v11 = vpop.eup %10984  ;;  %18927 = vst [vmem:[#allocation84_spill] sm:$0xff] %v14389_v53  ;;  %v14391_v8 = vpop.f32.mrb[78].mxu1  ;;  %v2631_v54 = vmul.f32 0.0, %v18932_v59  ;;  %v2632_v57 = vmul.f32 0.0, %v18935_v14  ;;  %v18936_v15 = vld [vmem:[#allocation110_spill] sm:$0xff]  ;;  %11010 = vrcp.f32 %v2541_v9 }
 0x1e8   :  { %18928 = vst [vmem:[#allocation185_spill] sm:$0xff] %v14391_v8  ;;  %v10987_v21 = vpop.eup %10986  ;;  %18929 = vst [vmem:[#allocation186_spill] sm:$0xff] %v14393_v56  ;;  %v14400_v20 = vpop.f32.mrb[79].mxu1  ;;  %v2321_v8 = vadd.f32 1.0, %v10983_v3  ;;  %v2664_v60 = vmul.f32 %v14111_v22, %v18936_v15  ;;  %v18937_v38 = vld [vmem:[#allocation86_spill] sm:$0xff]  ;;  %11012 = vtanh.f32 %v14389_v53  ;;  %v18941_v22 = vld [vmem:[#allocation87_spill] sm:$0xff] }
 0x1e9   :  { %18931 = vst [vmem:[#allocation188_spill] sm:$0xff] %v14400_v20  ;;  %v14402_v23 = vpop.eup %10988  ;;  %v14412_v24 = vadd.f32 %v18937_v38, %v13701_v18  ;;  %18939 = vst [vmem:[#allocation102_spill] sm:$0xff] %v14414_v55  ;;  %v2130_v59 = vadd.f32 1.0, %v10987_v21  ;;  %v14417_v48 = vpop.f32.mrb[78].mxu0  ;;  %11014 = vpow2.f32 %v10159_v36  ;;  %v10128_v14 = vmul.f32 -1.442695, %v14398_v33 }
 0x1ea   :  { %v10991_v0 = vpop.eup %10990  ;;  %18940 = vst [vmem:[#allocation115_spill] sm:$0xff] %v14417_v48  ;;  %v14423_v9 = vadd.f32 %v18941_v22, %v13677_v6  ;;  %v14425_v15 = vpop.f32.mrb[79].mxu0  ;;  %v14429_v13 = vadd.f32 %v2663_v61, %v2631_v54  ;;  %11016 = vrcp.f32 %v2321_v8  ;;  %v18944_v38 = vld [vmem:[#allocation122_spill] sm:$0xff]  ;;  %v14438_v36 = vadd.f32 %v2664_v60, %v2632_v57 }
 0x1eb   :  { %18938 = vst [vmem:[#allocation106_spill] sm:$0xff] %v14412_v24  ;;  %v10993_v20 = vpop.eup %10992  ;;  %v14434_v53 = vadd.f32 %v18944_v38, %v13670_v52  ;;  %11018 = vtanh.f32 %v14412_v24  ;;  %v2542_v33 = vadd.f32 1.0, %v10991_v0  ;;  %v12859_v24 = vld [vmem:[#allocation2 + $0x18] sm:$0xff]  }
 0x1ec   :  { %v10995_v3 = vpop.eup %10994  ;;  %v2757_v49 = vmul.f32 %v10993_v20, %v14102_v32  ;;  %18942 = vst [vmem:[#allocation117_spill] sm:$0xff] %v14423_v9  ;;  %18943 = vst [vmem:[#allocation110_spill] sm:$0xff] %v14429_v13  ;;  %11020 = vrcp.f32 %v2130_v59  ;;  %v10188_v54 = vmul.f32 -1.442695, %v14423_v9  ;;  %v2633_v9 = vmul.f32 0.0, %v14128_v42  ;;  %v18959_v42 = vld [vmem:[#allocation95_spill] sm:$0xff] }
 0x1ed   :  { %v14427_v5 = vpop.eup %10996  ;;  %v2758_v21 = vmul.f32 %v10995_v3, %v14152_v35  ;;  %18945 = vst [vmem:[#allocation86_spill] sm:$0xff] %v14434_v53  ;;  %18946 = vst [vmem:[#allocation87_spill] sm:$0xff] %v14438_v36  ;;  %v14445_v35 = vadd.f32 %v14124_v28, %v13667_v50  ;;  %11022 = vpow2.f32 %v10128_v14  ;;  %v10160_v3 = vmul.f32 -1.442695, %v14434_v53 }
 0x1ee   :  { %v14436_v32 = vpop.eup %10998  ;;  %v2789_v20 = vadd.f32 %v2757_v49, %v14393_v56  ;;  %v18948_v49 = vld [vmem:[#allocation92_spill] sm:$0xff]  ;;  %11024 = vtanh.f32 %v14429_v13  ;;  %v14499_v13 = vunpack.c.h.bf16 %v12859_v24  ;;  %v14504_v48 = vadd.f32 %v18959_v42, %v13701_v18 }
 0x1ef   :  { %v11001_v22 = vpop.eup %11000  ;;  %v2790_v61 = vadd.f32 %v2758_v21, %v14414_v55  ;;  %18947 = vst [vmem:[#allocation122_spill] sm:$0xff] %v14445_v35  ;;  %v14453_v38 = vadd.f32 %v18948_v49, %v13677_v6  ;;  %11026 = vtanh.f32 %v14438_v36  ;;  %v10129_v14 = vmul.f32 -1.442695, %v14445_v35  ;;  %v18952_v35 = vld [vmem:[#allocation91_spill] sm:$0xff]  ;;  %v18957_v55 = vld [vmem:[#allocation121_spill] sm:$0xff] }
 0x1f0   :  { %v14447_v8 = vpop.eup %11002  ;;  %v2322_v59 = vadd.f32 1.0, %v11001_v22  ;;  %11028 = vrcp.f32 %v2542_v33  ;;  %v14479_v53 = vadd.f32 %v18952_v35, %v13701_v18  ;;  %v2665_v35 = vmul.f32 %v14187_v37, %v18957_v55  ;;  %18958 = vst [vmem:[#allocation121_spill] sm:$0xff] %v14499_v13  ;;  %18960 = vst [vmem:[#allocation95_spill] sm:$0xff] %v14504_v48 }
 0x1f1   :  { %v11005_v60 = vpop.eup %11004  ;;  %v2819_v57 = vpack.c.bf16 %v2790_v61, %v2789_v20  ;;  %18949 = vst [vmem:[#allocation92_spill] sm:$0xff] %v14453_v38  ;;  %11030 = vpow2.f32 %v10188_v54  ;;  %v14466_v61 = vadd.f32 %v14136_v29, %v13670_v52  ;;  %v10189_v33 = vmul.f32 -1.442695, %v14453_v38 }
 0x1f2   :  { %v14456_v0 = vpop.eup %11006  ;;  %v2131_v20 = vadd.f32 1.0, %v11005_v60  ;;  %11032 = vpow2.f32 %v10160_v3  ;;  %v14473_v60 = vadd.f32 %v14141_v44, %v13667_v50  ;;  %18953 = vst [vmem:[#allocation91_spill] sm:$0xff] %v14479_v53  ;;  %v14483_v3 = vunpack.c.l.bf16 %v12859_v24 }
 0x1f3   :  { %v11009_v28 = vpop.eup %11008  ;;  %3046 = vmatmul.mubr.bf16.gmra.mrb[152].mxu1 %v2819_v57  ;;  %3239 = vmatmul.mubr.bf16.gmra.mrb[152].mxu0 %v2819_v57  ;;  %18950 = vst [vmem:[#allocation189_spill] sm:$0xff] %v14466_v61  ;;  %11034 = vrcp.f32 %v2322_v59  ;;  %v10161_v59 = vmul.f32 -1.442695, %v14466_v61  ;;  %v2634_v36 = vmul.f32 0.0, %v14159_v58  ;;  %v14514_v24 = vadd.f32 %v2665_v35, %v2633_v9 }
 0x1f4   :  { %v14460_v21 = vpop.eup %11010  ;;  %3055 = vmatprep.mubr.bf16.mxu1 %v18798_v26  ;;  %3248 = vmatprep.mubr.bf16.mxu0 %v18798_v26  ;;  %v2543_v49 = vadd.f32 1.0, %v11009_v28  ;;  %18951 = vst [vmem:[#allocation190_spill] sm:$0xff] %v14473_v60  ;;  %11036 = vpow2.f32 %v10129_v14  ;;  %18954 = vst [vmem:[#allocation191_spill] sm:$0xff] %v14483_v3  ;;  %v18955_v28 = vld [vmem:[#allocation96_spill] sm:$0xff]  ;;  %v10130_v61 = vmul.f32 -1.442695, %v14473_v60 }
 0x1f5   :  { %v14468_v22 = vpop.eup %11012  ;;  %11038 = vrcp.f32 %v2131_v20  ;;  %v14488_v38 = vadd.f32 %v18955_v28, %v13677_v6  ;;  %v2666_v20 = vmul.f32 %v14220_v19, %v14143_v27  ;;  %v14510_v27 = vadd.f32 %v14145_v39, %v13670_v52  ;;  %18962 = vst [vmem:[#allocation193_spill] sm:$0xff] %v14514_v24  ;;  %v18972_v60 = vld [vmem:[#allocation139_spill] sm:$0xff] }
 0x1f6   :  { %v11015_v57 = vpop.eup %11014  ;;  %11040 = vpow2.f32 %v10189_v33  ;;  %v14524_v39 = vadd.f32 %v14178_v34, %v13667_v50 }
 0x1f7   :  { %v14475_v54 = vpop.eup %11016  ;;  %18956 = vst [vmem:[#allocation96_spill] sm:$0xff] %v14488_v38  ;;  %v2323_v14 = vadd.f32 1.0, %v11015_v57  ;;  %11042 = vrcp.f32 %v2543_v49  ;;  %v10190_v58 = vmul.f32 -1.442695, %v14488_v38  ;;  %18961 = vst [vmem:[#allocation192_spill] sm:$0xff] %v14510_v27  ;;  %v14517_v49 = vadd.f32 %v2666_v20, %v2634_v36 }
 0x1f8   :  { %v14481_v29 = vpop.eup %11018  ;;  %11044 = vtanh.f32 %v14479_v53  ;;  %18964 = vst [vmem:[#allocation195_spill] sm:$0xff] %v14524_v39 }
 0x1f9   :  { %v14490_v44 = vpop.eup %11020  ;;  %11046 = vpow2.f32 %v10161_v59  ;;  %18963 = vst [vmem:[#allocation194_spill] sm:$0xff] %v14517_v49 }
 0x1fa   :  { %v11023_v56 = vpop.eup %11022  ;;  %11048 = vrcp.f32 %v2323_v14 }
 0x1fb   :  { %v11025_v28 = vpop.eup %11024  ;;  %11050 = vpow2.f32 %v10130_v61  ;;  %v2132_v59 = vadd.f32 1.0, %v11023_v56  ;;  %v18965_v61 = vld [vmem:[#allocation103_spill] sm:$0xff] }
 0x1fc   :  { %v11027_v37 = vpop.eup %11026  ;;  %v2759_v55 = vmul.f32 %v11025_v28, %v14194_v4  ;;  %11052 = vtanh.f32 %v14504_v48  ;;  %v14531_v20 = vadd.f32 %v18965_v61, %v13677_v6  ;;  %v2636_v48 = vmul.f32 0.0, %v14248_v17 }
 0x1fd   :  { %v14512_v19 = vpop.eup %11028  ;;  %v2760_v33 = vmul.f32 %v11027_v37, %v14232_v45  ;;  %11054 = vpow2.f32 %v10190_v58  ;;  %v10162_v45 = vmul.f32 -1.442695, %v14510_v27 }
 0x1fe   :  { %v11031_v57 = vpop.eup %11030  ;;  %v2791_v42 = vadd.f32 %v2759_v55, %v14483_v3  ;;  %18966 = vst [vmem:[#allocation103_spill] sm:$0xff] %v14531_v20  ;;  %11056 = vtanh.f32 %v14514_v24  ;;  %v10131_v55 = vmul.f32 -1.442695, %v14524_v39  ;;  %v12860_v39 = vld [vmem:[#allocation2 + $0x20] sm:$0xff]   ;;  %v2670_v3 = vmul.f32 %v14427_v5, %v14306_v10  ;;  %v18999_v10 = vld [vmem:[#allocation116_spill] sm:$0xff] }
 0x1ff   :  { %v11033_v4 = vpop.eup %11032  ;;  %v2792_v28 = vadd.f32 %v2760_v33, %v14499_v13  ;;  %v2544_v35 = vadd.f32 1.0, %v11031_v57  ;;  %11058 = vtanh.f32 %v14517_v49  ;;  %v14544_v57 = vadd.f32 %v14185_v46, %v13670_v52 }
 0x200   :  { %v14526_v9 = vpop.eup %11034  ;;  %v2324_v37 = vadd.f32 1.0, %v11033_v4  ;;  %11060 = vrcp.f32 %v2132_v59  ;;  %v10191_v4 = vmul.f32 -1.442695, %v14531_v20  ;;  %v14555_v27 = vunpack.c.l.bf16 %v12860_v39 }
 0x201   :  { %v11037_v36 = vpop.eup %11036  ;;  %v2820_v14 = vpack.c.bf16 %v2792_v28, %v2791_v42  ;;  %11062 = vpow2.f32 %v10162_v45  ;;  %18967 = vst [vmem:[#allocation196_spill] sm:$0xff] %v14544_v57  ;;  %v18968_v45 = vld [vmem:[#allocation101_spill] sm:$0xff]  ;;  %v10163_v46 = vmul.f32 -1.442695, %v14544_v57  ;;  %v14574_v53 = vunpack.c.h.bf16 %v12860_v39 }
 0x202   :  { %v14534_v56 = vpop.eup %11038  ;;  %v2133_v33 = vadd.f32 1.0, %v11037_v36  ;;  %11064 = vrcp.f32 %v2544_v35  ;;  %v14553_v36 = vadd.f32 %v18968_v45, %v13701_v18  ;;  %18970 = vst [vmem:[#allocation197_spill] sm:$0xff] %v14555_v27  ;;  %v14560_v35 = vadd.f32 %v14190_v47, %v13667_v50  ;;  %v18973_v57 = vld [vmem:[#allocation105_spill] sm:$0xff] }
 0x203   :  { %v11041_v34 = vpop.eup %11040  ;;  %3056 = vmatmul.mubr.bf16.gmra.mrb[156].mxu1 %v2820_v14  ;;  %3249 = vmatmul.mubr.bf16.gmra.mrb[156].mxu0 %v2820_v14  ;;  %11066 = vrcp.f32 %v2324_v37  ;;  %v2667_v45 = vmul.f32 %v14252_v2, %v18972_v60  ;;  %v14572_v47 = vadd.f32 %v18973_v57, %v13701_v18  ;;  %18975 = vst [vmem:[#allocation105_spill] sm:$0xff] %v14574_v53 }
 0x204   :  { %v14538_v58 = vpop.eup %11042  ;;  %3065 = vmatprep.mubr.bf16.mxu1 %v18798_v26  ;;  %3258 = vmatprep.mubr.bf16.mxu0 %v18798_v26  ;;  %v2545_v28 = vadd.f32 1.0, %v11041_v34  ;;  %18969 = vst [vmem:[#allocation101_spill] sm:$0xff] %v14553_v36  ;;  %11068 = vpow2.f32 %v10131_v55  ;;  %18971 = vst [vmem:[#allocation198_spill] sm:$0xff] %v14560_v35  ;;  %v2635_v34 = vmul.f32 0.0, %v14204_v62  ;;  %v10132_v17 = vmul.f32 -1.442695, %v14560_v35 }
 0x205   :  { %v14546_v42 = vpop.eup %11044  ;;  %11070 = vrcp.f32 %v2133_v33  ;;  %v2668_v33 = vmul.f32 %v14301_v41, %v14210_v43  ;;  %18974 = vst [vmem:[#allocation139_spill] sm:$0xff] %v14572_v47  ;;  %v14678_v5 = vadd.f32 %v18999_v10, %v13701_v18 }
 0x206   :  { %v11047_v59 = vpop.eup %11046  ;;  %11072 = vpow2.f32 %v10191_v4  ;;  %v18976_v4 = vld [vmem:[#allocation108_spill] sm:$0xff]  ;;  %v14585_v57 = vadd.f32 %v2667_v45, %v2635_v34 }
 0x207   :  { %v14549_v14 = vpop.eup %11048  ;;  %v2325_v20 = vadd.f32 1.0, %v11047_v59  ;;  %11074 = vrcp.f32 %v2545_v28  ;;  %v14581_v43 = vadd.f32 %v18976_v4, %v13677_v6  ;;  %v14588_v28 = vadd.f32 %v2668_v33, %v2636_v48  ;;  %19000 = vst [vmem:[#allocation116_spill] sm:$0xff] %v14678_v5 }
 0x208   :  { %v11051_v61 = vpop.eup %11050  ;;  %11076 = vtanh.f32 %v14553_v36  ;;  %18978 = vst [vmem:[#allocation199_spill] sm:$0xff] %v14585_v57 }
 0x209   :  { %v14562_v37 = vpop.eup %11052  ;;  %v2134_v62 = vadd.f32 1.0, %v11051_v61  ;;  %11078 = vpow2.f32 %v10163_v46  ;;  %18977 = vst [vmem:[#allocation108_spill] sm:$0xff] %v14581_v43  ;;  %18979 = vst [vmem:[#allocation200_spill] sm:$0xff] %v14588_v28 }
 0x20a   :  { %v11055_v55 = vpop.eup %11054  ;;  %11080 = vrcp.f32 %v2325_v20  ;;  %v10192_v20 = vmul.f32 -1.442695, %v14581_v43 }
 0x20b   :  { %v11057_v38 = vpop.eup %11056  ;;  %11082 = vtanh.f32 %v14572_v47  ;;  %v2546_v4 = vadd.f32 1.0, %v11055_v55 }
 0x20c   :  { %v11059_v2 = vpop.eup %11058  ;;  %v2761_v60 = vmul.f32 %v11057_v38, %v14272_v63  ;;  %v18980_v63 = vld [vmem:[#allocation142_spill] sm:$0xff]  ;;  %11084 = vrcp.f32 %v2134_v62 }
 0x20d   :  { %v14583_v41 = vpop.eup %11060  ;;  %v2762_v39 = vmul.f32 %v11059_v2, %v14327_v7  ;;  %v14594_v38 = vadd.f32 %v18980_v63, %v13670_v52  ;;  %v14601_v7 = vadd.f32 %v14228_v51, %v13667_v50  ;;  %11086 = vpow2.f32 %v10132_v17 }
 0x20e   :  { %v11063_v59 = vpop.eup %11062  ;;  %v2793_v61 = vadd.f32 %v2761_v60, %v14555_v27  ;;  %v18983_v60 = vld [vmem:[#allocation114_spill] sm:$0xff]  ;;  %11088 = vtanh.f32 %v14585_v57 }
 0x20f   :  { %18981 = vst [vmem:[#allocation142_spill] sm:$0xff] %v14594_v38  ;;  %v14596_v46 = vpop.eup %11064  ;;  %v2794_v34 = vadd.f32 %v2762_v39, %v14574_v53  ;;  %18982 = vst [vmem:[#allocation201_spill] sm:$0xff] %v14601_v7  ;;  %v2326_v33 = vadd.f32 1.0, %v11063_v59  ;;  %v14608_v63 = vadd.f32 %v18983_v60, %v13677_v6  ;;  %v10164_v62 = vmul.f32 -1.442695, %v14594_v38  ;;  %v18995_v53 = vld [vmem:[#allocation154_spill] sm:$0xff] }
 0x210   :  { %v14603_v48 = vpop.eup %11066  ;;  %11090 = vtanh.f32 %v14588_v28  ;;  %v10133_v17 = vmul.f32 -1.442695, %v14601_v7  ;;  %v18987_v7 = vld [vmem:[#allocation112_spill] sm:$0xff]  ;;  %v2669_v27 = vmul.f32 %v14357_v40, %v18995_v53 }
 0x211   :  { %v11069_v45 = vpop.eup %11068  ;;  %v2821_v2 = vpack.c.bf16 %v2794_v34, %v2793_v61  ;;  %18984 = vst [vmem:[#allocation114_spill] sm:$0xff] %v14608_v63  ;;  %11092 = vrcp.f32 %v2546_v4  ;;  %v14622_v61 = vadd.f32 %v14236_v12, %v13670_v52  ;;  %v10193_v4 = vmul.f32 -1.442695, %v14608_v63  ;;  %v18989_v12 = vld [vmem:[#allocation119_spill] sm:$0xff] }
 0x212   :  { %v14611_v55 = vpop.eup %11070  ;;  %v2135_v59 = vadd.f32 1.0, %v11069_v45  ;;  %11094 = vpow2.f32 %v10192_v20  ;;  %v14629_v45 = vadd.f32 %v14246_v25, %v13667_v50  ;;  %v14635_v38 = vadd.f32 %v18987_v7, %v13701_v18 }
 0x213   :  { %v11073_v51 = vpop.eup %11072  ;;  %3066 = vmatmul.mubr.bf16.gmra.mrb[160].mxu1 %v2821_v2  ;;  %3259 = vmatmul.mubr.bf16.gmra.mrb[160].mxu0 %v2821_v2  ;;  %18985 = vst [vmem:[#allocation202_spill] sm:$0xff] %v14622_v61  ;;  %11096 = vrcp.f32 %v2326_v33  ;;  %v14639_v35 = vadd.f32 %v18989_v12, %v13677_v6  ;;  %v10165_v47 = vmul.f32 -1.442695, %v14622_v61  ;;  %v18994_v12 = vld [vmem:[#allocation160_spill] sm:$0xff]  ;;  %v2638_v61 = vmul.f32 0.0, %v14347_v31 }
 0x214   :  { %v14616_v39 = vpop.eup %11074  ;;  %3075 = vmatprep.mubr.bf16.mxu1 %v18798_v26  ;;  %3268 = vmatprep.mubr.bf16.mxu0 %v18798_v26  ;;  %v2547_v60 = vadd.f32 1.0, %v11073_v51  ;;  %11098 = vpow2.f32 %v10164_v62  ;;  %18986 = vst [vmem:[#allocation203_spill] sm:$0xff] %v14629_v45  ;;  %18988 = vst [vmem:[#allocation112_spill] sm:$0xff] %v14635_v38  ;;  %v12861_v51 = vld [vmem:[#allocation2 + $0x28] sm:$0xff]   ;;  %v2637_v36 = vmul.f32 0.0, %v18994_v12 }
 0x215   :  { %v14624_v34 = vpop.eup %11076  ;;  %11100 = vpow2.f32 %v10133_v17  ;;  %18990 = vst [vmem:[#allocation119_spill] sm:$0xff] %v14639_v35  ;;  %v14647_v25 = vunpack.c.l.bf16 %v12861_v51  ;;  %v10134_v49 = vmul.f32 -1.442695, %v14629_v45  ;;  %v14671_v53 = vunpack.c.h.bf16 %v12861_v51 }
 0x216   :  { %v11079_v2 = vpop.eup %11078  ;;  %v14641_v33 = vpop.f32.mrb[80].mxu1  ;;  %11102 = vrcp.f32 %v2135_v59  ;;  %v14686_v51 = vadd.f32 %v2669_v27, %v2637_v36 }
 0x217   :  { %v14631_v20 = vpop.eup %11080  ;;  %v14643_v63 = vpop.f32.mrb[80].mxu0  ;;  %18992 = vst [vmem:[#allocation205_spill] sm:$0xff] %v14647_v25  ;;  %v2327_v28 = vadd.f32 1.0, %v11079_v2  ;;  %11104 = vpow2.f32 %v10193_v4  ;;  %18998 = vst [vmem:[#allocation207_spill] sm:$0xff] %v14671_v53  ;;  %v10194_v4 = vmul.f32 -1.442695, %v14639_v35 }
 0x218   :  { %18991 = vst [vmem:[#allocation204_spill] sm:$0xff] %v14643_v63  ;;  %v14645_v62 = vpop.eup %11082  ;;  %v14650_v43 = vpop.f32.mrb[81].mxu1  ;;  %11106 = vrcp.f32 %v2547_v60  ;;  %v19001_v60 = vld [vmem:[#allocation152_spill] sm:$0xff]  ;;  %19003 = vst [vmem:[#allocation208_spill] sm:$0xff] %v14686_v51  ;;  %v14689_v63 = vadd.f32 %v2670_v3, %v2638_v61 }
 0x219   :  { %v14652_v7 = vpop.f32.mrb[81].mxu0  ;;  %v14654_v17 = vpop.eup %11084  ;;  %11108 = vtanh.f32 %v14635_v38  ;;  %v14682_v45 = vadd.f32 %v19001_v60, %v13670_v52 }
 0x21a   :  { %18993 = vst [vmem:[#allocation206_spill] sm:$0xff] %v14652_v7  ;;  %v14659_v57 = vpop.f32.mrb[82].mxu1  ;;  %v14661_v13 = vpop.f32.mrb[82].mxu0  ;;  %11110 = vpow2.f32 %v10165_v47  ;;  %19004 = vst [vmem:[#allocation209_spill] sm:$0xff] %v14689_v63  ;;  %v19005_v47 = vld [vmem:[#allocation157_spill] sm:$0xff] }
 0x21b   :  { %18996 = vst [vmem:[#allocation160_spill] sm:$0xff] %v14661_v13  ;;  %v11087_v59 = vpop.eup %11086  ;;  %v14667_v24 = vpop.f32.mrb[83].mxu1  ;;  %19002 = vst [vmem:[#allocation152_spill] sm:$0xff] %v14682_v45  ;;  %11112 = vrcp.f32 %v2327_v28  ;;  %v10166_v3 = vmul.f32 -1.442695, %v14682_v45 }
 0x21c   :  { %v14669_v12 = vpop.f32.mrb[83].mxu0  ;;  %v11089_v40 = vpop.eup %11088  ;;  %11114 = vpow2.f32 %v10134_v49  ;;  %v2136_v60 = vadd.f32 1.0, %v11087_v59  ;;  %v19011_v59 = vld [vmem:[#allocation128_spill] sm:$0xff] }
 0x21d   :  { %18997 = vst [vmem:[#allocation154_spill] sm:$0xff] %v14669_v12  ;;  %v11091_v2 = vpop.eup %11090  ;;  %v2763_v31 = vmul.f32 %v11089_v40, %v14376_v30  ;;  %v14694_v40 = vadd.f32 %v19005_v47, %v13667_v50  ;;  %11116 = vpow2.f32 %v10194_v4 }
 0x21e   :  { %v14684_v13 = vpop.eup %11092  ;;  %v2764_v38 = vmul.f32 %v11091_v2, %v14436_v32  ;;  %v14699_v27 = vpop.f32.mrb[84].mxu1  ;;  %11118 = vtanh.f32 %v14678_v5 }
 0x21f   :  { %v11095_v35 = vpop.eup %11094  ;;  %v2795_v30 = vadd.f32 %v2763_v31, %v14647_v25  ;;  %19006 = vst [vmem:[#allocation157_spill] sm:$0xff] %v14694_v40  ;;  %19007 = vst [vmem:[#allocation210_spill] sm:$0xff] %v14699_v27  ;;  %v14701_v36 = vpop.f32.mrb[84].mxu0  ;;  %11120 = vtanh.f32 %v14686_v51  ;;  %v10135_v25 = vmul.f32 -1.442695, %v14694_v40  ;;  %v19017_v40 = vld [vmem:[#allocation159_spill] sm:$0xff] }
 0x220   :  { %v14696_v10 = vpop.eup %11096  ;;  %v2796_v12 = vadd.f32 %v2764_v38, %v14671_v53  ;;  %19008 = vst [vmem:[#allocation211_spill] sm:$0xff] %v14701_v36  ;;  %v14705_v49 = vpop.f32.mrb[85].mxu1  ;;  %v2548_v2 = vadd.f32 1.0, %v11095_v35  ;;  %v14711_v38 = vadd.f32 %v19011_v59, %v13677_v6  ;;  %11122 = vtanh.f32 %v14689_v63 }
 0x221   :  { %v11099_v32 = vpop.eup %11098  ;;  %19009 = vst [vmem:[#allocation212_spill] sm:$0xff] %v14705_v49  ;;  %v14707_v28 = vpop.f32.mrb[85].mxu0  ;;  %11124 = vrcp.f32 %v2136_v60  ;;  %v14732_v63 = vadd.f32 %v19017_v40, %v13670_v52 }
 0x222   :  { %19010 = vst [vmem:[#allocation213_spill] sm:$0xff] %v14707_v28  ;;  %v11101_v61 = vpop.eup %11100  ;;  %v2822_v31 = vpack.c.bf16 %v2796_v12, %v2795_v30  ;;  %19012 = vst [vmem:[#allocation128_spill] sm:$0xff] %v14711_v38  ;;  %v14714_v4 = vpop.f32.mrb[86].mxu1  ;;  %v2328_v30 = vadd.f32 1.0, %v11099_v32  ;;  %11126 = vpow2.f32 %v10166_v3  ;;  %v10195_v60 = vmul.f32 -1.442695, %v14711_v38 }
 0x223   :  { %19013 = vst [vmem:[#allocation214_spill] sm:$0xff] %v14714_v4  ;;  %v14716_v47 = vpop.f32.mrb[86].mxu0  ;;  %v14718_v53 = vpop.eup %11102  ;;  %v2137_v5 = vadd.f32 1.0, %v11101_v61  ;;  %19018 = vst [vmem:[#allocation159_spill] sm:$0xff] %v14732_v63  ;;  %11128 = vrcp.f32 %v2548_v2  ;;  %v19019_v3 = vld [vmem:[#allocation127_spill] sm:$0xff]  ;;  %v2639_v38 = vmul.f32 0.0, %v14385_v11 }
 0x224   :  { %19014 = vst [vmem:[#allocation215_spill] sm:$0xff] %v14716_v47  ;;  %v14722_v45 = vpop.f32.mrb[87].mxu1  ;;  %v14724_v35 = vpop.f32.mrb[87].mxu0  ;;  %3076 = vmatmul.mubr.bf16.gmra.mrb[164].mxu1 %v2822_v31  ;;  %3269 = vmatmul.mubr.bf16.gmra.mrb[164].mxu0 %v2822_v31  ;;  %11130 = vpow2.f32 %v10135_v25  ;;  %v14741_v61 = vadd.f32 %v19019_v3, %v13701_v18  ;;  %v12862_v28 = vld [vmem:[#allocation2 + $0x30] sm:$0xff]   ;;  %v10167_v2 = vmul.f32 -1.442695, %v14732_v63  ;;  %v2671_v3 = vmul.f32 %v14468_v22, %v14366_v16 }
 0x225   :  { %19015 = vst [vmem:[#allocation216_spill] sm:$0xff] %v14722_v45  ;;  %19016 = vst [vmem:[#allocation217_spill] sm:$0xff] %v14724_v35  ;;  %v11105_v12 = vpop.eup %11104  ;;  %3085 = vmatprep.mubr.bf16.mxu1 %v18798_v26  ;;  %3278 = vmatprep.mubr.bf16.mxu0 %v18798_v26  ;;  %11132 = vrcp.f32 %v2328_v30  ;;  %v14747_v45 = vunpack.c.l.bf16 %v12862_v28  ;;  %v2672_v63 = vmul.f32 %v14481_v29, %v14402_v23 }
 0x226   :  { %v14726_v59 = vpop.eup %11106  ;;  %v2549_v47 = vadd.f32 1.0, %v11105_v12  ;;  %19020 = vst [vmem:[#allocation127_spill] sm:$0xff] %v14741_v61  ;;  %v14743_v36 = vpop.f32.mrb[88].mxu1  ;;  %11134 = vrcp.f32 %v2137_v5  ;;  %v2640_v5 = vmul.f32 0.0, %v14447_v8  ;;  %v19033_v8 = vld [vmem:[#allocation161_spill] sm:$0xff] }
 0x227   :  { %v14734_v51 = vpop.eup %11108  ;;  %19021 = vst [vmem:[#allocation218_spill] sm:$0xff] %v14743_v36  ;;  %v14745_v35 = vpop.f32.mrb[88].mxu0  ;;  %19023 = vst [vmem:[#allocation220_spill] sm:$0xff] %v14747_v45  ;;  %11136 = vpow2.f32 %v10195_v60  ;;  %v14774_v60 = vunpack.c.h.bf16 %v12862_v28  ;;  %v14788_v28 = vadd.f32 %v2671_v3, %v2639_v38 }
 0x228   :  { %v11111_v32 = vpop.eup %11110  ;;  %19022 = vst [vmem:[#allocation219_spill] sm:$0xff] %v14745_v35  ;;  %v14750_v12 = vpop.f32.mrb[89].mxu1  ;;  %11138 = vrcp.f32 %v2549_v47 }
 0x229   :  { %v14737_v31 = vpop.eup %11112  ;;  %19024 = vst [vmem:[#allocation221_spill] sm:$0xff] %v14750_v12  ;;  %v14752_v25 = vpop.f32.mrb[89].mxu0  ;;  %v2329_v36 = vadd.f32 1.0, %v11111_v32  ;;  %19032 = vst [vmem:[#allocation227_spill] sm:$0xff] %v14774_v60  ;;  %11140 = vtanh.f32 %v14741_v61 }
 0x22a   :  { %v11115_v40 = vpop.eup %11114  ;;  %19025 = vst [vmem:[#allocation222_spill] sm:$0xff] %v14752_v25  ;;  %v14757_v35 = vpop.f32.mrb[90].mxu1  ;;  %v19028_v25 = vld [vmem:[#allocation130_spill] sm:$0xff]  ;;  %11142 = vpow2.f32 %v10167_v2  ;;  %19037 = vst [vmem:[#allocation228_spill] sm:$0xff] %v14788_v28 }
 0x22b   :  { %v11117_v30 = vpop.eup %11116  ;;  %19026 = vst [vmem:[#allocation223_spill] sm:$0xff] %v14757_v35  ;;  %v14759_v4 = vpop.f32.mrb[90].mxu0  ;;  %v14768_v11 = vadd.f32 %v19028_v25, %v13701_v18  ;;  %v2138_v32 = vadd.f32 1.0, %v11115_v40  ;;  %v19035_v25 = vld [vmem:[#allocation132_spill] sm:$0xff]  ;;  %11144 = vrcp.f32 %v2329_v36  ;;  %v14791_v35 = vadd.f32 %v2672_v63, %v2640_v5 }
 0x22c   :  { %19027 = vst [vmem:[#allocation224_spill] sm:$0xff] %v14759_v4  ;;  %v14761_v49 = vpop.eup %11118  ;;  %v14770_v12 = vpop.f32.mrb[91].mxu1  ;;  %v14779_v4 = vadd.f32 %v19033_v8, %v13667_v50  ;;  %v2550_v29 = vadd.f32 1.0, %v11117_v30 }
 0x22d   :  { %19029 = vst [vmem:[#allocation130_spill] sm:$0xff] %v14768_v11  ;;  %19030 = vst [vmem:[#allocation225_spill] sm:$0xff] %v14770_v12  ;;  %v14772_v16 = vpop.f32.mrb[91].mxu0  ;;  %v11121_v22 = vpop.eup %11120  ;;  %v14784_v12 = vadd.f32 %v19035_v25, %v13677_v6  ;;  %11146 = vtanh.f32 %v14768_v11 }
 0x22e   :  { %19031 = vst [vmem:[#allocation226_spill] sm:$0xff] %v14772_v16  ;;  %19034 = vst [vmem:[#allocation161_spill] sm:$0xff] %v14779_v4  ;;  %v11123_v23 = vpop.eup %11122  ;;  %v2765_v47 = vmul.f32 %v11121_v22, %v14460_v21  ;;  %v19039_v21 = vld [vmem:[#allocation165_spill] sm:$0xff]  ;;  %11148 = vrcp.f32 %v2138_v32  ;;  %v10136_v36 = vmul.f32 -1.442695, %v14779_v4  ;;  %v14803_v3 = vpop.f32.mrb[92].mxu1  ;;  %v14810_v22 = vadd.f32 %v14323_v1, %v13667_v50 }
 0x22f   :  { %19036 = vst [vmem:[#allocation132_spill] sm:$0xff] %v14784_v12  ;;  %v14786_v16 = vpop.eup %11124  ;;  %v2766_v40 = vmul.f32 %v11123_v23, %v14512_v19  ;;  %19038 = vst [vmem:[#allocation229_spill] sm:$0xff] %v14791_v35  ;;  %v14797_v2 = vadd.f32 %v19039_v21, %v13670_v52  ;;  %v14805_v19 = vpop.f32.mrb[92].mxu0  ;;  %11150 = vrcp.f32 %v2550_v29  ;;  %v10196_v5 = vmul.f32 -1.442695, %v14784_v12  ;;  %v19046_v21 = vld [vmem:[#allocation138_spill] sm:$0xff] }
 0x230   :  { %v11127_v61 = vpop.eup %11126  ;;  %v2797_v8 = vadd.f32 %v2765_v47, %v14747_v45  ;;  %19041 = vst [vmem:[#allocation230_spill] sm:$0xff] %v14803_v3  ;;  %19042 = vst [vmem:[#allocation231_spill] sm:$0xff] %v14805_v19  ;;  %v14812_v23 = vpop.f32.mrb[93].mxu1  ;;  %11152 = vtanh.f32 %v14788_v28  ;;  %v19056_v19 = vld [vmem:[#allocation143_spill] sm:$0xff] }
 0x231   :  { %19040 = vst [vmem:[#allocation165_spill] sm:$0xff] %v14797_v2  ;;  %v14799_v30 = vpop.eup %11128  ;;  %v2798_v38 = vadd.f32 %v2766_v40, %v14774_v60  ;;  %19043 = vst [vmem:[#allocation232_spill] sm:$0xff] %v14810_v22  ;;  %v14814_v47 = vpop.f32.mrb[93].mxu0  ;;  %v2330_v25 = vadd.f32 1.0, %v11127_v61  ;;  %v14820_v60 = vadd.f32 %v19046_v21, %v13677_v6  ;;  %v10168_v4 = vmul.f32 -1.442695, %v14797_v2 }
 0x232   :  { %v11131_v63 = vpop.eup %11130  ;;  %19044 = vst [vmem:[#allocation233_spill] sm:$0xff] %v14812_v23  ;;  %19045 = vst [vmem:[#allocation234_spill] sm:$0xff] %v14814_v47  ;;  %v14823_v29 = vpop.f32.mrb[94].mxu1  ;;  %11154 = vtanh.f32 %v14791_v35  ;;  %v19052_v21 = vld [vmem:[#allocation172_spill] sm:$0xff]  ;;  %v10137_v2 = vmul.f32 -1.442695, %v14810_v22  ;;  %v14856_v22 = vadd.f32 %v19056_v19, %v13677_v6  ;;  %v2673_v23 = vmul.f32 %v14546_v42, %v14456_v0 }
 0x233   :  { %v14816_v32 = vpop.eup %11132  ;;  %v2823_v40 = vpack.c.bf16 %v2798_v38, %v2797_v8  ;;  %19047 = vst [vmem:[#allocation138_spill] sm:$0xff] %v14820_v60  ;;  %19048 = vst [vmem:[#allocation235_spill] sm:$0xff] %v14823_v29  ;;  %v14825_v45 = vpop.f32.mrb[94].mxu0  ;;  %v2139_v38 = vadd.f32 1.0, %v11131_v63  ;;  %11156 = vpow2.f32 %v10136_v36  ;;  %v14837_v11 = vadd.f32 %v19052_v21, %v13670_v52  ;;  %v19054_v21 = vld [vmem:[#allocation176_spill] sm:$0xff] }
 0x234   :  { %19049 = vst [vmem:[#allocation236_spill] sm:$0xff] %v14825_v45  ;;  %v14827_v1 = vpop.eup %11134  ;;  %v14831_v12 = vpop.f32.mrb[95].mxu1  ;;  %11158 = vpow2.f32 %v10196_v5  ;;  %v10197_v63 = vmul.f32 -1.442695, %v14820_v60  ;;  %19057 = vst [vmem:[#allocation143_spill] sm:$0xff] %v14856_v22 }
 0x235   :  { %19050 = vst [vmem:[#allocation237_spill] sm:$0xff] %v14831_v12  ;;  %v14833_v61 = vpop.f32.mrb[95].mxu0  ;;  %v11137_v8 = vpop.eup %11136  ;;  %3086 = vmatmul.mubr.bf16.gmra.mrb[168].mxu1 %v2823_v40  ;;  %3279 = vmatmul.mubr.bf16.gmra.mrb[168].mxu0 %v2823_v40  ;;  %19053 = vst [vmem:[#allocation172_spill] sm:$0xff] %v14837_v11  ;;  %11160 = vrcp.f32 %v2330_v25  ;;  %v10169_v5 = vmul.f32 -1.442695, %v14837_v11 }
 0x236   :  { %19051 = vst [vmem:[#allocation238_spill] sm:$0xff] %v14833_v61  ;;  %v14839_v28 = vpop.eup %11138  ;;  %3095 = vmatprep.mubr.bf16.mxu1 %v18798_v26  ;;  %3288 = vmatprep.mubr.bf16.mxu0 %v18798_v26  ;;  %v2551_v36 = vadd.f32 1.0, %v11137_v8  ;;  %11162 = vpow2.f32 %v10168_v4  ;;  %v14849_v61 = vadd.f32 %v19054_v21, %v13667_v50  ;;  %v14858_v47 = vpop.f32.mrb[96].mxu1  ;;  %v12863_v4 = vld [vmem:[#allocation2 + $0x38] sm:$0xff]  }
 0x237   :  { %v14844_v35 = vpop.eup %11140  ;;  %11164 = vrcp.f32 %v2139_v38  ;;  %19058 = vst [vmem:[#allocation239_spill] sm:$0xff] %v14858_v47  ;;  %v14860_v25 = vpop.f32.mrb[96].mxu0  ;;  %v14864_v8 = vunpack.c.l.bf16 %v12863_v4  ;;  %v19061_v21 = vld [vmem:[#allocation136_spill] sm:$0xff]  ;;  %v19063_v38 = vld [vmem:[#allocation177_spill] sm:$0xff]  ;;  %v14897_v42 = vunpack.c.h.bf16 %v12863_v4  ;;  %v19072_v4 = vld [vmem:[#allocation182_spill] sm:$0xff] }
 0x238   :  { %v11143_v40 = vpop.eup %11142  ;;  %19055 = vst [vmem:[#allocation176_spill] sm:$0xff] %v14849_v61  ;;  %19059 = vst [vmem:[#allocation240_spill] sm:$0xff] %v14860_v25  ;;  %v14868_v12 = vadd.f32 %v19061_v21, %v13701_v18  ;;  %11166 = vpow2.f32 %v10137_v2  ;;  %v14872_v11 = vadd.f32 %v19063_v38, %v13670_v52  ;;  %v14874_v19 = vpop.f32.mrb[97].mxu1  ;;  %v2641_v25 = vmul.f32 0.0, %v14475_v54 }
 0x239   :  { %v14851_v45 = vpop.eup %11144  ;;  %19060 = vst [vmem:[#allocation241_spill] sm:$0xff] %v14864_v8  ;;  %19065 = vst [vmem:[#allocation242_spill] sm:$0xff] %v14874_v19  ;;  %v14876_v29 = vpop.f32.mrb[97].mxu0  ;;  %v2331_v3 = vadd.f32 1.0, %v11143_v40  ;;  %11168 = vpow2.f32 %v10197_v63  ;;  %v2642_v38 = vmul.f32 0.0, %v14526_v9 }
 0x23a   :  { %v14862_v60 = vpop.eup %11146  ;;  %19062 = vst [vmem:[#allocation136_spill] sm:$0xff] %v14868_v12  ;;  %19064 = vst [vmem:[#allocation177_spill] sm:$0xff] %v14872_v11  ;;  %v14883_v21 = vpop.f32.mrb[98].mxu1  ;;  %11170 = vrcp.f32 %v2551_v36  ;;  %v10138_v19 = vmul.f32 -1.442695, %v14849_v61  ;;  %v14903_v36 = vadd.f32 %v2673_v23, %v2641_v25  ;;  %v19074_v23 = vld [vmem:[#allocation141_spill] sm:$0xff] }
 0x23b   :  { %19066 = vst [vmem:[#allocation243_spill] sm:$0xff] %v14876_v29  ;;  %v14878_v47 = vpop.eup %11148  ;;  %v14885_v2 = vpop.f32.mrb[98].mxu0  ;;  %v2674_v29 = vmul.f32 %v14562_v37, %v14490_v44  ;;  %19069 = vst [vmem:[#allocation246_spill] sm:$0xff] %v14897_v42  ;;  %11172 = vpow2.f32 %v10169_v5  ;;  %v10198_v63 = vmul.f32 -1.442695, %v14856_v22  ;;  %v14911_v22 = vadd.f32 %v19072_v4, %v13667_v50 }
 0x23c   :  { %19067 = vst [vmem:[#allocation244_spill] sm:$0xff] %v14885_v2  ;;  %v14887_v27 = vpop.eup %11150  ;;  %v14893_v54 = vpop.f32.mrb[99].mxu1  ;;  %11174 = vtanh.f32 %v14868_v12  ;;  %v10170_v44 = vmul.f32 -1.442695, %v14872_v11  ;;  %19070 = vst [vmem:[#allocation247_spill] sm:$0xff] %v14903_v36  ;;  %v14918_v25 = vadd.f32 %v19074_v23, %v13701_v18 }
 0x23d   :  { %v14895_v7 = vpop.f32.mrb[99].mxu0  ;;  %v11153_v0 = vpop.eup %11152  ;;  %11176 = vrcp.f32 %v2331_v3  ;;  %v14906_v2 = vadd.f32 %v2674_v29, %v2642_v38  ;;  %19073 = vst [vmem:[#allocation182_spill] sm:$0xff] %v14911_v22 }
 0x23e   :  { %19068 = vst [vmem:[#allocation245_spill] sm:$0xff] %v14895_v7  ;;  %v11155_v40 = vpop.eup %11154  ;;  %v2767_v9 = vmul.f32 %v11153_v0, %v14538_v58  ;;  %11178 = vpow2.f32 %v10138_v19  ;;  %19075 = vst [vmem:[#allocation141_spill] sm:$0xff] %v14918_v25  ;;  %v14924_v29 = vpop.f32.mrb[100].mxu1 }
 0x23f   :  { %v11157_v37 = vpop.eup %11156  ;;  %v2768_v61 = vmul.f32 %v11155_v40, %v14596_v46  ;;  %19071 = vst [vmem:[#allocation248_spill] sm:$0xff] %v14906_v2  ;;  %11180 = vpow2.f32 %v10198_v63  ;;  %v19076_v46 = vld [vmem:[#allocation150_spill] sm:$0xff]  ;;  %v14926_v19 = vpop.f32.mrb[100].mxu0 }
 0x240   :  { %v11159_v7 = vpop.eup %11158  ;;  %v2799_v5 = vadd.f32 %v2767_v9, %v14864_v8  ;;  %v14922_v3 = vadd.f32 %v19076_v46, %v13677_v6  ;;  %19078 = vst [vmem:[#allocation249_spill] sm:$0xff] %v14926_v19  ;;  %v2140_v0 = vadd.f32 1.0, %v11157_v37  ;;  %11182 = vpow2.f32 %v10170_v44  ;;  %v14928_v40 = vpop.f32.mrb[101].mxu1 }
 0x241   :  { %v14913_v12 = vpop.eup %11160  ;;  %v2800_v58 = vadd.f32 %v2768_v61, %v14897_v42  ;;  %v14930_v9 = vpop.f32.mrb[101].mxu0  ;;  %v2552_v4 = vadd.f32 1.0, %v11159_v7  ;;  %11184 = vtanh.f32 %v14903_v36  ;;  %v10139_v8 = vmul.f32 -1.442695, %v14911_v22  ;;  %v19084_v36 = vld [vmem:[#allocation184_spill] sm:$0xff] }
 0x242   :  { %19077 = vst [vmem:[#allocation150_spill] sm:$0xff] %v14922_v3  ;;  %v11163_v38 = vpop.eup %11162  ;;  %19079 = vst [vmem:[#allocation250_spill] sm:$0xff] %v14930_v9  ;;  %v14935_v63 = vpop.f32.mrb[102].mxu1  ;;  %11186 = vtanh.f32 %v14906_v2  ;;  %v10199_v7 = vmul.f32 -1.442695, %v14922_v3 }
 0x243   :  { %v14932_v61 = vpop.eup %11164  ;;  %v2824_v23 = vpack.c.bf16 %v2800_v58, %v2799_v5  ;;  %19080 = vst [vmem:[#allocation251_spill] sm:$0xff] %v14935_v63  ;;  %v14937_v46 = vpop.f32.mrb[102].mxu0  ;;  %11188 = vtanh.f32 %v14918_v25  ;;  %v2332_v58 = vadd.f32 1.0, %v11163_v38  ;;  %v2675_v38 = vmul.f32 %v14624_v34, %v14534_v56 }
 0x244   :  { %19081 = vst [vmem:[#allocation252_spill] sm:$0xff] %v14937_v46  ;;  %v11167_v42 = vpop.eup %11166  ;;  %v14941_v44 = vpop.f32.mrb[103].mxu1  ;;  %11190 = vrcp.f32 %v2140_v0  ;;  %v2643_v0 = vmul.f32 0.0, %v14549_v14  ;;  %v19086_v46 = vld [vmem:[#allocation148_spill] sm:$0xff]  ;;  %v2676_v56 = vmul.f32 %v14645_v62, %v14583_v41 }
 0x245   :  { %19082 = vst [vmem:[#allocation253_spill] sm:$0xff] %v14941_v44  ;;  %v14943_v37 = vpop.f32.mrb[103].mxu0  ;;  %v11169_v11 = vpop.eup %11168  ;;  %3096 = vmatmul.mubr.bf16.gmra.mrb[172].mxu1 %v2824_v23  ;;  %3289 = vmatmul.mubr.bf16.gmra.mrb[172].mxu0 %v2824_v23  ;;  %11192 = vrcp.f32 %v2552_v4  ;;  %v2141_v2 = vadd.f32 1.0, %v11167_v42  ;;  %v14964_v9 = vadd.f32 %v19086_v46, %v13701_v18  ;;  %v2644_v44 = vmul.f32 0.0, %v14603_v48 }
 0x246   :  { %19083 = vst [vmem:[#allocation254_spill] sm:$0xff] %v14943_v37  ;;  %v14947_v5 = vpop.eup %11170  ;;  %3105 = vmatprep.mubr.bf16.mxu1 %v18798_v26  ;;  %3298 = vmatprep.mubr.bf16.mxu0 %v18798_v26  ;;  %v14953_v37 = vadd.f32 %v19084_v36, %v13670_v52  ;;  %v2553_v25 = vadd.f32 1.0, %v11169_v11  ;;  %11194 = vpow2.f32 %v10139_v8  ;;  %v14966_v42 = vpop.f32.mrb[104].mxu1 }
 0x247   :  { %v11173_v22 = vpop.eup %11172  ;;  %19087 = vst [vmem:[#allocation148_spill] sm:$0xff] %v14964_v9  ;;  %11196 = vpow2.f32 %v10199_v7  ;;  %19088 = vst [vmem:[#allocation255_spill] sm:$0xff] %v14966_v42  ;;  %v14968_v36 = vpop.f32.mrb[104].mxu0 }
 0x248   :  { %19085 = vst [vmem:[#allocation184_spill] sm:$0xff] %v14953_v37  ;;  %v14955_v23 = vpop.eup %11174  ;;  %19089 = vst [vmem:[#allocation256_spill] sm:$0xff] %v14968_v36  ;;  %11198 = vrcp.f32 %v2332_v58  ;;  %v2333_v11 = vadd.f32 1.0, %v11173_v22  ;;  %v14970_v8 = vpop.f32.mrb[105].mxu1  ;;  %v10171_v34 = vmul.f32 -1.442695, %v14953_v37 }
 0x249   :  { %v14957_v3 = vpop.eup %11176  ;;  %19090 = vst [vmem:[#allocation257_spill] sm:$0xff] %v14970_v8  ;;  %v14972_v19 = vpop.f32.mrb[105].mxu0  ;;  %11200 = vrcp.f32 %v2141_v2  ;;  %v12864_v58 = vld [vmem:[#allocation2 + $0x40] sm:$0xff]   ;;  %v14994_v2 = vadd.f32 %v2675_v38, %v2643_v0 }
 0x24a   :  { %v11179_v4 = vpop.eup %11178  ;;  %19091 = vst [vmem:[#allocation258_spill] sm:$0xff] %v14972_v19  ;;  %v14978_v46 = vpop.f32.mrb[106].mxu1  ;;  %v14982_v22 = vunpack.c.l.bf16 %v12864_v58  ;;  %11202 = vrcp.f32 %v2553_v25  ;;  %v19095_v19 = vld [vmem:[#allocation162_spill] sm:$0xff]  ;;  %v14992_v62 = vunpack.c.h.bf16 %v12864_v58  ;;  %v19100_v37 = vld [vmem:[#allocation185_spill] sm:$0xff]  ;;  %v15008_v58 = vadd.f32 %v2676_v56, %v2644_v44 }
 0x24b   :  { %v11181_v14 = vpop.eup %11180  ;;  %19092 = vst [vmem:[#allocation259_spill] sm:$0xff] %v14978_v46  ;;  %v14980_v7 = vpop.f32.mrb[106].mxu0  ;;  %v14986_v8 = vadd.f32 %v19095_v19, %v13701_v18  ;;  %19099 = vst [vmem:[#allocation264_spill] sm:$0xff] %v14994_v2  ;;  %11204 = vtanh.f32 %v14964_v9  ;;  %v2142_v46 = vadd.f32 1.0, %v11179_v4 }
 0x24c   :  { %19093 = vst [vmem:[#allocation260_spill] sm:$0xff] %v14980_v7  ;;  %v11183_v36 = vpop.eup %11182  ;;  %19094 = vst [vmem:[#allocation261_spill] sm:$0xff] %v14982_v22  ;;  %v14988_v48 = vpop.f32.mrb[107].mxu1  ;;  %v14999_v7 = vadd.f32 %v19100_v37, %v13667_v50  ;;  %11206 = vrcp.f32 %v2333_v11  ;;  %v2554_v50 = vadd.f32 1.0, %v11181_v14 }
 0x24d   :  { %19096 = vst [vmem:[#allocation162_spill] sm:$0xff] %v14988_v48  ;;  %v14990_v42 = vpop.f32.mrb[107].mxu0  ;;  %v11185_v41 = vpop.eup %11184  ;;  %19098 = vst [vmem:[#allocation263_spill] sm:$0xff] %v14992_v62  ;;  %v19102_v48 = vld [vmem:[#allocation188_spill] sm:$0xff]  ;;  %11208 = vpow2.f32 %v10171_v34  ;;  %v2334_v11 = vadd.f32 1.0, %v11183_v36  ;;  %v2645_v36 = vmul.f32 0.0, %v14631_v20 }
 0x24e   :  { %19097 = vst [vmem:[#allocation262_spill] sm:$0xff] %v14990_v42  ;;  %19101 = vst [vmem:[#allocation185_spill] sm:$0xff] %v14999_v7  ;;  %v11187_v25 = vpop.eup %11186  ;;  %v2769_v19 = vmul.f32 %v11185_v41, %v14616_v39  ;;  %v15004_v63 = vadd.f32 %v19102_v48, %v13670_v52  ;;  %11210 = vtanh.f32 %v14986_v8  ;;  %v19105_v39 = vld [vmem:[#allocation166_spill] sm:$0xff]  ;;  %v15025_v56 = vpop.f32.mrb[108].mxu0  ;;  %v10140_v34 = vmul.f32 -1.442695, %v14999_v7 }
 0x24f   :  { %v15006_v42 = vpop.eup %11188  ;;  %19104 = vst [vmem:[#allocation265_spill] sm:$0xff] %v15008_v58  ;;  %v2770_v0 = vmul.f32 %v11187_v25, %v14684_v13  ;;  %v15017_v4 = vadd.f32 %v19105_v39, %v13677_v6  ;;  %11212 = vtanh.f32 %v14994_v2  ;;  %v15023_v13 = vpop.f32.mrb[108].mxu1  ;;  %v2678_v7 = vmul.f32 %v14761_v49, %v14654_v17  ;;  %v19108_v17 = vld [vmem:[#allocation173_spill] sm:$0xff] }
 0x250   :  { %19103 = vst [vmem:[#allocation188_spill] sm:$0xff] %v15004_v63  ;;  %v15011_v38 = vpop.eup %11190  ;;  %v2801_v37 = vadd.f32 %v2769_v19, %v14982_v22  ;;  %11214 = vrcp.f32 %v2142_v46  ;;  %v10172_v48 = vmul.f32 -1.442695, %v15004_v63  ;;  %v15029_v41 = vpop.f32.mrb[109].mxu1  ;;  %v2646_v63 = vmul.f32 0.0, %v14696_v10 }
 0x251   :  { %19106 = vst [vmem:[#allocation166_spill] sm:$0xff] %v15017_v4  ;;  %v15019_v52 = vpop.eup %11192  ;;  %v2802_v44 = vadd.f32 %v2770_v0, %v14992_v62  ;;  %v15031_v25 = vpop.f32.mrb[109].mxu0  ;;  %v2677_v0 = vmul.f32 %v14734_v51, %v14611_v55  ;;  %11216 = vtanh.f32 %v15008_v58  ;;  %v10200_v20 = vmul.f32 -1.442695, %v15017_v4 }
 0x252   :  { %v11195_v14 = vpop.eup %11194  ;;  %v15037_v62 = vpop.f32.mrb[110].mxu1  ;;  %11218 = vrcp.f32 %v2554_v50  ;;  %v15059_v10 = vadd.f32 %v19108_v17, %v13677_v6  ;;  %v2647_v50 = vmul.f32 0.0, %v14737_v31  ;;  %v2680_v17 = vmul.f32 %v14862_v60, %v14786_v16  ;;  %v19112_v31 = vld [vmem:[#allocation170_spill] sm:$0xff] }
 0x253   :  { %v11197_v19 = vpop.eup %11196  ;;  %v2825_v39 = vpack.c.bf16 %v2802_v44, %v2801_v37  ;;  %v15039_v46 = vpop.f32.mrb[110].mxu0  ;;  %11220 = vrcp.f32 %v2334_v11  ;;  %v2143_v37 = vadd.f32 1.0, %v11195_v14  ;;  %v15064_v11 = vadd.f32 %v2677_v0, %v2645_v36 }
 0x254   :  { %19107 = vst [vmem:[#allocation266_spill] sm:$0xff] %v15039_v46  ;;  %v15041_v22 = vpop.eup %11198  ;;  %v15047_v9 = vpop.f32.mrb[111].mxu1  ;;  %v2555_v58 = vadd.f32 1.0, %v11197_v19  ;;  %11222 = vpow2.f32 %v10140_v34  ;;  %19109 = vst [vmem:[#allocation173_spill] sm:$0xff] %v15059_v10  ;;  %v2679_v14 = vmul.f32 %v14844_v35, %v14718_v53  ;;  %v2648_v34 = vmul.f32 0.0, %v14816_v32 }
 0x255   :  { %v15049_v55 = vpop.f32.mrb[111].mxu0  ;;  %v15051_v51 = vpop.eup %11200  ;;  %3106 = vmatmul.mubr.bf16.gmra.mrb[176].mxu1 %v2825_v39  ;;  %3299 = vmatmul.mubr.bf16.gmra.mrb[176].mxu0 %v2825_v39  ;;  %19110 = vst [vmem:[#allocation267_spill] sm:$0xff] %v15064_v11  ;;  %11224 = vpow2.f32 %v10172_v48  ;;  %v15071_v39 = vadd.f32 %v2678_v7, %v2646_v63  ;;  %v15077_v36 = vadd.f32 %v19112_v31, %v13701_v18  ;;  %v12865_v48 = vld [vmem:[#allocation2 + $0x48] sm:$0xff]   ;;  %v10201_v16 = vmul.f32 -1.442695, %v15059_v10 }
 0x256   :  { %v15053_v44 = vpop.eup %11202  ;;  %3115 = vmatprep.mubr.bf16.mxu1 %v18798_v26  ;;  %3308 = vmatprep.mubr.bf16.mxu0 %v18798_v26  ;;  %11226 = vpow2.f32 %v10200_v20  ;;  %v15079_v0 = vpop.f32.mrb[112].mxu1  ;;  %v15085_v32 = vunpack.c.l.bf16 %v12865_v48  ;;  %v15087_v63 = vunpack.c.h.bf16 %v12865_v48  ;;  %v19119_v31 = vld [vmem:[#allocation179_spill] sm:$0xff] }
 0x257   :  { %v15061_v49 = vpop.eup %11204  ;;  %19111 = vst [vmem:[#allocation268_spill] sm:$0xff] %v15071_v39  ;;  %11228 = vrcp.f32 %v2143_v37  ;;  %v15081_v53 = vpop.f32.mrb[112].mxu0  ;;  %v15094_v37 = vadd.f32 %v2679_v14, %v2647_v50  ;;  %v15098_v2 = vadd.f32 %v19119_v31, %v13701_v18  ;;  %v15112_v50 = vadd.f32 %v2680_v17, %v2648_v34 }
 0x258   :  { %v15068_v19 = vpop.eup %11206  ;;  %19113 = vst [vmem:[#allocation170_spill] sm:$0xff] %v15081_v53  ;;  %19114 = vst [vmem:[#allocation269_spill] sm:$0xff] %v15085_v32  ;;  %11230 = vrcp.f32 %v2555_v58  ;;  %v15090_v60 = vpop.f32.mrb[113].mxu1  ;;  %v19120_v53 = vld [vmem:[#allocation180_spill] sm:$0xff] }
 0x259   :  { %v11209_v4 = vpop.eup %11208  ;;  %19115 = vst [vmem:[#allocation270_spill] sm:$0xff] %v15087_v63  ;;  %19116 = vst [vmem:[#allocation271_spill] sm:$0xff] %v15090_v60  ;;  %v15092_v7 = vpop.f32.mrb[113].mxu0  ;;  %v15102_v46 = vadd.f32 %v19120_v53, %v13677_v6  ;;  %11232 = vtanh.f32 %v15064_v11  ;;  %v2650_v11 = vmul.f32 0.0, %v14913_v12 }
 0x25a   :  { %v15083_v35 = vpop.eup %11210  ;;  %19117 = vst [vmem:[#allocation272_spill] sm:$0xff] %v15092_v7  ;;  %19118 = vst [vmem:[#allocation273_spill] sm:$0xff] %v15094_v37  ;;  %v15105_v58 = vpop.f32.mrb[114].mxu1  ;;  %v2649_v7 = vmul.f32 0.0, %v14851_v45  ;;  %11234 = vtanh.f32 %v15071_v39 }
 0x25b   :  { %v11213_v20 = vpop.eup %11212  ;;  %19121 = vst [vmem:[#allocation179_spill] sm:$0xff] %v15102_v46  ;;  %19122 = vst [vmem:[#allocation180_spill] sm:$0xff] %v15105_v58  ;;  %v15107_v48 = vpop.f32.mrb[114].mxu0  ;;  %v2682_v58 = vmul.f32 %v15006_v42, %v14878_v47  ;;  %11236 = vtanh.f32 %v15077_v36  ;;  %v10202_v12 = vmul.f32 -1.442695, %v15102_v46  ;;  %v19125_v47 = vld [vmem:[#allocation181_spill] sm:$0xff] }
 0x25c   :  { %19123 = vst [vmem:[#allocation274_spill] sm:$0xff] %v15107_v48  ;;  %v15109_v10 = vpop.eup %11214  ;;  %19124 = vst [vmem:[#allocation275_spill] sm:$0xff] %v15112_v50  ;;  %v2771_v14 = vmul.f32 %v11213_v20, %v14726_v59  ;;  %v15116_v31 = vpop.f32.mrb[115].mxu1  ;;  %v2681_v48 = vmul.f32 %v14955_v23, %v14827_v1  ;;  %v2335_v59 = vadd.f32 1.0, %v11209_v4  ;;  %11238 = vpow2.f32 %v10201_v16  ;;  %v19126_v4 = vld [vmem:[#allocation183_spill] sm:$0xff] }
 0x25d   :  { %v15118_v53 = vpop.f32.mrb[115].mxu0  ;;  %v11217_v60 = vpop.eup %11216  ;;  %11240 = vtanh.f32 %v15098_v2  ;;  %v15137_v42 = vadd.f32 %v19125_v47, %v13701_v18  ;;  %v15141_v16 = vadd.f32 %v19126_v4, %v13677_v6 }
 0x25e   :  { %v15126_v45 = vpop.eup %11218  ;;  %v2772_v34 = vmul.f32 %v11217_v60, %v14799_v30  ;;  %v2803_v17 = vadd.f32 %v2771_v14, %v15085_v32  ;;  %11242 = vtanh.f32 %v15094_v37  ;;  %v15144_v60 = vadd.f32 %v2681_v48, %v2649_v7  ;;  %v15147_v14 = vpop.f32.mrb[116].mxu1  ;;  %v12866_v37 = vld [vmem:[#allocation2 + $0x50] sm:$0xff]  }
 0x25f   :  { %v15130_v20 = vpop.eup %11220  ;;  %19127 = vst [vmem:[#allocation181_spill] sm:$0xff] %v15141_v16  ;;  %11244 = vtanh.f32 %v15112_v50  ;;  %19129 = vst [vmem:[#allocation276_spill] sm:$0xff] %v15147_v14  ;;  %v15149_v32 = vpop.f32.mrb[116].mxu0  ;;  %v15159_v7 = vunpack.c.l.bf16 %v12866_v37  ;;  %v15161_v48 = vunpack.c.h.bf16 %v12866_v37 }
 0x260   :  { %v11223_v1 = vpop.eup %11222  ;;  %v2804_v23 = vadd.f32 %v2772_v34, %v15087_v63  ;;  %19128 = vst [vmem:[#allocation183_spill] sm:$0xff] %v15144_v60  ;;  %19130 = vst [vmem:[#allocation277_spill] sm:$0xff] %v15149_v32  ;;  %v15151_v63 = vadd.f32 %v2682_v58, %v2650_v11  ;;  %11246 = vrcp.f32 %v2335_v59  ;;  %v15153_v46 = vpop.f32.mrb[117].mxu1  ;;  %v10203_v59 = vmul.f32 -1.442695, %v15141_v16 }
 0x261   :  { %v11225_v30 = vpop.eup %11224  ;;  %v15155_v4 = vpop.f32.mrb[117].mxu0  ;;  %19132 = vst [vmem:[#allocation279_spill] sm:$0xff] %v15159_v7  ;;  %19133 = vst [vmem:[#allocation280_spill] sm:$0xff] %v15161_v48  ;;  %v2144_v50 = vadd.f32 1.0, %v11223_v1  ;;  %11248 = vpow2.f32 %v10202_v12 }
 0x262   :  { %v11227_v34 = vpop.eup %11226  ;;  %19131 = vst [vmem:[#allocation278_spill] sm:$0xff] %v15151_v63  ;;  %v2826_v47 = vpack.c.bf16 %v2804_v23, %v2803_v17  ;;  %v15163_v14 = vpop.f32.mrb[118].mxu1  ;;  %v2336_v58 = vadd.f32 1.0, %v11225_v30  ;;  %11250 = vtanh.f32 %v15137_v42  ;;  %v15173_v17 = vadd.f32 %v14425_v15, %v13677_v6 }
 0x263   :  { %v15157_v39 = vpop.eup %11228  ;;  %v15165_v32 = vpop.f32.mrb[118].mxu0  ;;  %v2651_v23 = vmul.f32 0.0, %v14957_v3  ;;  %v2683_v30 = vmul.f32 %v15061_v49, %v14932_v61  ;;  %11252 = vtanh.f32 %v15144_v60  ;;  %v2652_v15 = vmul.f32 0.0, %v15041_v22 }
 0x264   :  { %19134 = vst [vmem:[#allocation281_spill] sm:$0xff] %v15165_v32  ;;  %v15167_v11 = vpop.eup %11230  ;;  %3116 = vmatmul.mubr.bf16.gmra.mrb[180].mxu1 %v2826_v47  ;;  %3309 = vmatmul.mubr.bf16.gmra.mrb[180].mxu0 %v2826_v47  ;;  %19135 = vst [vmem:[#allocation282_spill] sm:$0xff] %v15173_v17  ;;  %v15175_v37 = vpop.f32.mrb[119].mxu1  ;;  %v19138_v47 = vld [vmem:[#allocation115_spill] sm:$0xff]  ;;  %v2684_v32 = vmul.f32 %v15083_v35, %v15011_v38  ;;  %11254 = vtanh.f32 %v15151_v63  ;;  %v2556_v49 = vadd.f32 1.0, %v11227_v34  ;;  %v12867_v34 = vld [vmem:[#allocation2 + $0x58] sm:$0xff]  }
 0x265   :  { %19136 = vst [vmem:[#allocation283_spill] sm:$0xff] %v15175_v37  ;;  %v15177_v12 = vpop.f32.mrb[119].mxu0  ;;  %v11233_v1 = vpop.eup %11232  ;;  %3125 = vmatprep.mubr.bf16.mxu1 %v18798_v26  ;;  %3318 = vmatprep.mubr.bf16.mxu0 %v18798_v26  ;;  %v15186_v16 = vadd.f32 %v19138_v47, %v13701_v18  ;;  %11256 = vrcp.f32 %v2144_v50  ;;  %v10204_v47 = vmul.f32 -1.442695, %v15173_v17  ;;  %v15197_v22 = vadd.f32 %v2683_v30, %v2651_v23 }
 0x266   :  { %19137 = vst [vmem:[#allocation284_spill] sm:$0xff] %v15177_v12  ;;  %v11235_v6 = vpop.eup %11234  ;;  %v2773_v3 = vmul.f32 %v11233_v1, %v14839_v28  ;;  %11258 = vrcp.f32 %v2336_v58  ;;  %v15201_v28 = vpop.f32.mrb[120].mxu1  ;;  %v15207_v58 = vadd.f32 %v2684_v32, %v2652_v15  ;;  %v15213_v30 = vunpack.c.h.bf16 %v12867_v34 }
 0x267   :  { %v11237_v61 = vpop.eup %11236  ;;  %v2774_v12 = vmul.f32 %v11235_v6, %v14887_v27  ;;  %19139 = vst [vmem:[#allocation115_spill] sm:$0xff] %v15197_v22  ;;  %11260 = vtanh.f32 %v15186_v16  ;;  %v15203_v35 = vpop.f32.mrb[120].mxu0  ;;  %v15205_v27 = vunpack.c.l.bf16 %v12867_v34  ;;  %v2653_v34 = vmul.f32 0.0, %v15068_v19 }
 0x268   :  { %v11239_v37 = vpop.eup %11238  ;;  %v2805_v18 = vadd.f32 %v2773_v3, %v15159_v7  ;;  %19141 = vst [vmem:[#allocation286_spill] sm:$0xff] %v15207_v58  ;;  %11262 = vpow2.f32 %v10203_v59  ;;  %v15209_v1 = vpop.f32.mrb[121].mxu1  ;;  %19142 = vst [vmem:[#allocation287_spill] sm:$0xff] %v15213_v30 }
 0x269   :  { %v11241_v60 = vpop.eup %11240  ;;  %v2806_v38 = vadd.f32 %v2774_v12, %v15161_v48  ;;  %19140 = vst [vmem:[#allocation285_spill] sm:$0xff] %v15205_v27  ;;  %v15211_v6 = vpop.f32.mrb[121].mxu0  ;;  %11264 = vrcp.f32 %v2556_v49  ;;  %v2685_v49 = vmul.f32 %v11237_v61, %v15051_v51 }
 0x26a   :  { %v11243_v50 = vpop.eup %11242  ;;  %v15216_v48 = vpop.f32.mrb[122].mxu1  ;;  %11266 = vpow2.f32 %v10204_v47  ;;  %v2686_v47 = vmul.f32 %v11241_v60, %v15109_v10 }
 0x26b   :  { %v11245_v23 = vpop.eup %11244  ;;  %v2827_v12 = vpack.c.bf16 %v2806_v38, %v2805_v18  ;;  %v2775_v3 = vmul.f32 %v11243_v50, %v14947_v5  ;;  %v15218_v7 = vpop.f32.mrb[122].mxu0  ;;  %11268 = vtanh.f32 %v15197_v22  ;;  %v2654_v18 = vmul.f32 0.0, %v15130_v20  ;;  %v12868_v22 = vld [vmem:[#allocation2 + $0x60] sm:$0xff]  }
 0x26c   :  { %19143 = vst [vmem:[#allocation288_spill] sm:$0xff] %v15218_v7  ;;  %v11247_v17 = vpop.eup %11246  ;;  %v2776_v32 = vmul.f32 %v11245_v23, %v15019_v52  ;;  %v15221_v59 = vpop.f32.mrb[123].mxu1  ;;  %11270 = vtanh.f32 %v15207_v58  ;;  %v2557_v38 = vadd.f32 1.0, %v11239_v37  ;;  %v15241_v7 = vunpack.c.l.bf16 %v12868_v22 }
 0x26d   :  { %v15223_v15 = vpop.f32.mrb[123].mxu0  ;;  %v11249_v63 = vpop.eup %11248  ;;  %3126 = vmatmul.mubr.bf16.gmra.mrb[184].mxu1 %v2827_v12  ;;  %3319 = vmatmul.mubr.bf16.gmra.mrb[184].mxu0 %v2827_v12  ;;  %v2807_v19 = vadd.f32 %v2775_v3, %v15205_v27  ;;  %v15235_v12 = vadd.f32 %v2685_v49, %v2653_v34  ;;  %v15243_v58 = vunpack.c.h.bf16 %v12868_v22  ;;  %v15245_v37 = vadd.f32 %v2686_v47, %v2654_v18 }
 0x26e   :  { %v11251_v5 = vpop.eup %11250  ;;  %3135 = vmatprep.mubr.bf16.mxu1 %v18798_v26  ;;  %3328 = vmatprep.mubr.bf16.mxu0 %v18798_v26  ;;  %v2808_v51 = vadd.f32 %v2776_v32, %v15213_v30  ;;  %v2558_v50 = vadd.f32 1.0, %v11249_v63  ;;  %v15237_v20 = vpop.f32.mrb[124].mxu1  ;;  %19147 = vst [vmem:[#allocation292_spill] sm:$0xff] %v15241_v7  ;;  %11272 = vrcp.f32 %v2557_v38  ;;  %v2655_v22 = vmul.f32 0.0, %v11247_v17 }
 0x26f   :  { %v11253_v52 = vpop.eup %11252  ;;  %19144 = vst [vmem:[#allocation289_spill] sm:$0xff] %v15235_v12  ;;  %19145 = vst [vmem:[#allocation290_spill] sm:$0xff] %v15237_v20  ;;  %v15239_v10 = vpop.f32.mrb[124].mxu0  ;;  %v2687_v18 = vmul.f32 %v11251_v5, %v15157_v39 }
 0x270   :  { %v11255_v61 = vpop.eup %11254  ;;  %19146 = vst [vmem:[#allocation291_spill] sm:$0xff] %v15239_v10  ;;  %19148 = vst [vmem:[#allocation293_spill] sm:$0xff] %v15243_v58  ;;  %v15247_v3 = vpop.f32.mrb[125].mxu1  ;;  %v2828_v34 = vpack.c.bf16 %v2808_v51, %v2807_v19  ;;  %v2777_v49 = vmul.f32 %v11253_v52, %v15053_v44  ;;  %11274 = vrcp.f32 %v2558_v50 }
 0x271   :  { %v11257_v23 = vpop.eup %11256  ;;  %19149 = vst [vmem:[#allocation294_spill] sm:$0xff] %v15245_v37  ;;  %19150 = vst [vmem:[#allocation295_spill] sm:$0xff] %v15247_v3  ;;  %v15249_v32 = vpop.f32.mrb[125].mxu0  ;;  %v2778_v30 = vmul.f32 %v11255_v61, %v15126_v45  ;;  %11276 = vtanh.f32 %v15235_v12  ;;  %v15268_v51 = vadd.f32 %v2687_v18, %v2655_v22 }
 0x272   :  { %v11259_v60 = vpop.eup %11258  ;;  %19151 = vst [vmem:[#allocation296_spill] sm:$0xff] %v15249_v32  ;;  %v15253_v27 = vpop.f32.mrb[126].mxu1  ;;  %11278 = vtanh.f32 %v15245_v37  ;;  %v2809_v5 = vadd.f32 %v2777_v49, %v15241_v7 }
 0x273   :  { %v11261_v63 = vpop.eup %11260  ;;  %v15255_v10 = vpop.f32.mrb[126].mxu0  ;;  %v2656_v45 = vmul.f32 0.0, %v11259_v60  ;;  %v2810_v38 = vadd.f32 %v2778_v30, %v15243_v58  ;;  %19152 = vst [vmem:[#allocation297_spill] sm:$0xff] %v15268_v51 }
 0x274   :  { %v11263_v20 = vpop.eup %11262  ;;  %v15258_v47 = vpop.f32.mrb[127].mxu1  ;;  %v2688_v52 = vmul.f32 %v11261_v63, %v11257_v23  ;;  %v12869_v23 = vld [vmem:[#allocation2 + $0x68] sm:$0xff]  }
 0x275   :  { %v15260_v3 = vpop.f32.mrb[127].mxu0  ;;  %v11265_v32 = vpop.eup %11264  ;;  %3136 = vmatmul.mubr.bf16.gmra.mrb[188].mxu1 %v2828_v34  ;;  %3329 = vmatmul.mubr.bf16.gmra.mrb[188].mxu0 %v2828_v34  ;;  %v2559_v39 = vadd.f32 1.0, %v11263_v20  ;;  %v15274_v63 = vunpack.c.l.bf16 %v12869_v23  ;;  %v15276_v34 = vunpack.c.h.bf16 %v12869_v23  ;;  %v2829_v30 = vpack.c.bf16 %v2810_v38, %v2809_v5 }
 0x276   :  { %v11267_v44 = vpop.eup %11266  ;;  %3145 = vmatprep.mubr.bf16.mxu1 %v18798_v26  ;;  %3338 = vmatprep.mubr.bf16.mxu0 %v18798_v26  ;;  %v15270_v50 = vpop.f32.mrb[128].mxu1  ;;  %v15278_v37 = vadd.f32 %v2688_v52, %v2656_v45 }
 0x277   :  { %v11269_v17 = vpop.eup %11268  ;;  %v2560_v61 = vadd.f32 1.0, %v11267_v44  ;;  %v15272_v60 = vpop.f32.mrb[128].mxu0  ;;  %19153 = vst [vmem:[#allocation298_spill] sm:$0xff] %v15274_v63  ;;  %19154 = vst [vmem:[#allocation299_spill] sm:$0xff] %v15276_v34  ;;  %11280 = vrcp.f32 %v2559_v39 }
 0x278   :  { %v11271_v19 = vpop.eup %11270  ;;  %19155 = vst [vmem:[#allocation300_spill] sm:$0xff] %v15278_v37  ;;  %v15280_v20 = vpop.f32.mrb[129].mxu1  ;;  %v2779_v22 = vmul.f32 %v11269_v17, %v15167_v11  ;;  %11282 = vtanh.f32 %v15268_v51 }
 0x279   :  { %v15282_v49 = vpop.f32.mrb[129].mxu0  ;;  %v2780_v18 = vmul.f32 %v11271_v19, %v11265_v32  ;;  %v15285_v44 = vpop.f32.mrb[130].mxu1  ;;  %11284 = vrcp.f32 %v2560_v61  ;;  %v12870_v19 = vld [vmem:[#allocation2 + $0x70] sm:$0xff]  }
 0x27a   :  { %v15287_v12 = vpop.f32.mrb[130].mxu0  ;;  %v15290_v58 = vpop.f32.mrb[131].mxu1  ;;  %11286 = vtanh.f32 %v15278_v37  ;;  %v2811_v32 = vadd.f32 %v2779_v22, %v15274_v63  ;;  %v15303_v61 = vunpack.c.l.bf16 %v12870_v19  ;;  %v15309_v7 = vunpack.c.h.bf16 %v12870_v19 }
 0x27b   :  { %19156 = vst [vmem:[#allocation301_spill] sm:$0xff] %v15287_v12  ;;  %19157 = vst [vmem:[#allocation302_spill] sm:$0xff] %v15290_v58  ;;  %v15292_v23 = vpop.f32.mrb[131].mxu0  ;;  %v11273_v45 = vpop.eup %11272  ;;  %v2812_v17 = vadd.f32 %v2780_v18, %v15276_v34 }
 0x27c   :  { %19158 = vst [vmem:[#allocation303_spill] sm:$0xff] %v15292_v23  ;;  %v11275_v52 = vpop.eup %11274  ;;  %19161 = vst [vmem:[#allocation306_spill] sm:$0xff] %v15303_v61 }
 0x27d   :  { %3146 = vmatmul.mubr.bf16.gmra.mrb[192].mxu1 %v2829_v30  ;;  %3339 = vmatmul.mubr.bf16.gmra.mrb[192].mxu0 %v2829_v30  ;;  %v11277_v11 = vpop.eup %11276  ;;  %19164 = vst [vmem:[#allocation309_spill] sm:$0xff] %v15309_v7  ;;  %v2830_v37 = vpack.c.bf16 %v2812_v17, %v2811_v32 }
 0x27e   :  { %3155 = vmatprep.mubr.bf16.mxu1 %v18798_v26  ;;  %3348 = vmatprep.mubr.bf16.mxu0 %v18798_v26  ;;  %v11279_v39 = vpop.eup %11278  ;;  %v15299_v5 = vpop.f32.mrb[132].mxu1  ;;  %v2781_v12 = vmul.f32 %v11277_v11, %v11273_v45 }
 0x27f   :  { %19159 = vst [vmem:[#allocation304_spill] sm:$0xff] %v15299_v5  ;;  %v15301_v38 = vpop.f32.mrb[132].mxu0  ;;  %v15305_v30 = vpop.f32.mrb[133].mxu1  ;;  %v2782_v23 = vmul.f32 %v11279_v39, %v11275_v52  ;;  %v12871_v39 = vld [vmem:[#allocation2 + $0x78] sm:$0xff]  }
 0x280   :  { %19160 = vst [vmem:[#allocation305_spill] sm:$0xff] %v15301_v38  ;;  %19162 = vst [vmem:[#allocation307_spill] sm:$0xff] %v15305_v30  ;;  %v15307_v51 = vpop.f32.mrb[133].mxu0  ;;  %v15311_v22 = vpop.f32.mrb[134].mxu1  ;;  %v2813_v52 = vadd.f32 %v2781_v12, %v15303_v61  ;;  %v15326_v19 = vunpack.c.l.bf16 %v12871_v39 }
 0x281   :  { %19163 = vst [vmem:[#allocation308_spill] sm:$0xff] %v15307_v51  ;;  %19165 = vst [vmem:[#allocation310_spill] sm:$0xff] %v15311_v22  ;;  %v1832_v18 = vpop.f32.mrb[134].mxu0  ;;  %v15316_v63 = vpop.f32.mrb[135].mxu1  ;;  %v2814_v11 = vadd.f32 %v2782_v23, %v15309_v7 }
 0x282   :  { %v15314_v34 = vadd.f32 %v1832_v18, %v14986_v8  ;;  %19167 = vst [vmem:[#allocation312_spill] sm:$0xff] %v15316_v63  ;;  %v15318_v38 = vpop.f32.mrb[135].mxu0  ;;  %v11281_v5 = vpop.eup %11280  ;;  %19170 = vst [vmem:[#allocation315_spill] sm:$0xff] %v15326_v19 }
 0x283   :  { %19168 = vst [vmem:[#allocation313_spill] sm:$0xff] %v15318_v38  ;;  %v11283_v30 = vpop.eup %11282  ;;  %v15335_v38 = vunpack.c.h.bf16 %v12871_v39  ;;  %v2831_v63 = vpack.c.bf16 %v2814_v11, %v2813_v52 }
 0x284   :  { %19166 = vst [vmem:[#allocation311_spill] sm:$0xff] %v15314_v34  ;;  %v11285_v45 = vpop.eup %11284  ;;  %v2783_v12 = vmul.f32 %v11283_v30, %v11281_v5 }
 0x285   :  { %3156 = vmatmul.mubr.bf16.gmra.mrb[196].mxu1 %v2830_v37  ;;  %3349 = vmatmul.mubr.bf16.gmra.mrb[196].mxu0 %v2830_v37  ;;  %v11287_v32 = vpop.eup %11286  ;;  %19174 = vst [vmem:[#allocation319_spill] sm:$0xff] %v15335_v38 }
 0x286   :  { %3165 = vmatprep.mubr.bf16.mxu1 %v18798_v26  ;;  %3358 = vmatprep.mubr.bf16.mxu0 %v18798_v26  ;;  %v15324_v8 = vpop.f32.mrb[136].mxu1  ;;  %v1838_v17 = vpop.f32.mrb[136].mxu0  ;;  %v2784_v61 = vmul.f32 %v11287_v32, %v11285_v45 }
 0x287   :  { %19169 = vst [vmem:[#allocation314_spill] sm:$0xff] %v15324_v8  ;;  %v15329_v18 = vadd.f32 %v1838_v17, %v15077_v36  ;;  %v15331_v37 = vpop.f32.mrb[137].mxu1  ;;  %v15333_v34 = vpop.f32.mrb[137].mxu0  ;;  %v2815_v36 = vadd.f32 %v2783_v12, %v15326_v19 }
 0x288   :  { %19172 = vst [vmem:[#allocation317_spill] sm:$0xff] %v15331_v37  ;;  %19173 = vst [vmem:[#allocation318_spill] sm:$0xff] %v15333_v34  ;;  %v15337_v23 = vpop.f32.mrb[138].mxu1  ;;  %v1842_v7 = vpop.f32.mrb[138].mxu0  ;;  %v2816_v5 = vadd.f32 %v2784_v61, %v15335_v38 }
 0x289   :  { %19171 = vst [vmem:[#allocation316_spill] sm:$0xff] %v15329_v18  ;;  %19175 = vst [vmem:[#allocation320_spill] sm:$0xff] %v15337_v23  ;;  %v15340_v8 = vadd.f32 %v1842_v7, %v15098_v2  ;;  %v15342_v22 = vpop.f32.mrb[139].mxu1  ;;  %v15344_v51 = vpop.f32.mrb[139].mxu0 }
 0x28a   :  { %19177 = vst [vmem:[#allocation322_spill] sm:$0xff] %v15342_v22  ;;  %19178 = vst [vmem:[#allocation323_spill] sm:$0xff] %v15344_v51  ;;  %v2832_v11 = vpack.c.bf16 %v2816_v5, %v2815_v36  ;;  %v19189_v36 = vld [vmem:[#allocation55_spill] sm:$0xff]  ;;  %v19221_v22 = vld [vmem:[#allocation82_spill] sm:$0xff] }
 0x28b   :  { %19176 = vst [vmem:[#allocation321_spill] sm:$0xff] %v15340_v8  ;;  %v15376_v5 = vadd.f32 %v14650_v43, %v19189_v36 }
 0x28d   :  { %3166 = vmatmul.mubr.bf16.gmra.mrb[200].mxu1 %v2831_v63  ;;  %3359 = vmatmul.mubr.bf16.gmra.mrb[200].mxu0 %v2831_v63  ;;  %19190 = vst [vmem:[#allocation55_spill] sm:$0xff] %v15376_v5 }
 0x28e   :  { %3175 = vmatprep.mubr.bf16.mxu1 %v18798_v26  ;;  %3368 = vmatprep.mubr.bf16.mxu0 %v18798_v26  ;;  %v15350_v30 = vpop.f32.mrb[140].mxu1  ;;  %v1848_v45 = vpop.f32.mrb[140].mxu0 }
 0x28f   :  { %19179 = vst [vmem:[#allocation324_spill] sm:$0xff] %v15350_v30  ;;  %v15353_v2 = vadd.f32 %v1848_v45, %v15137_v42  ;;  %v15355_v7 = vpop.f32.mrb[141].mxu1  ;;  %v15357_v52 = vpop.f32.mrb[141].mxu0  ;;  %v19187_v42 = vld [vmem:[#allocation53_spill] sm:$0xff] }
 0x290   :  { %19181 = vst [vmem:[#allocation326_spill] sm:$0xff] %v15355_v7  ;;  %19182 = vst [vmem:[#allocation327_spill] sm:$0xff] %v15357_v52  ;;  %v15359_v63 = vpop.f32.mrb[142].mxu1  ;;  %v1852_v32 = vpop.f32.mrb[142].mxu0  ;;  %v15372_v12 = vadd.f32 %v14641_v33, %v19187_v42 }
 0x291   :  { %19180 = vst [vmem:[#allocation325_spill] sm:$0xff] %v15353_v2  ;;  %19183 = vst [vmem:[#allocation328_spill] sm:$0xff] %v15359_v63  ;;  %v15362_v17 = vadd.f32 %v1852_v32, %v15186_v16  ;;  %v15364_v39 = vpop.f32.mrb[143].mxu1  ;;  %v15366_v61 = vpop.f32.mrb[143].mxu0  ;;  %v19191_v32 = vld [vmem:[#allocation56_spill] sm:$0xff] }
 0x292   :  { %19185 = vst [vmem:[#allocation330_spill] sm:$0xff] %v15364_v39  ;;  %19186 = vst [vmem:[#allocation331_spill] sm:$0xff] %v15366_v61  ;;  %v15380_v38 = vadd.f32 %v14659_v57, %v19191_v32  ;;  %v19193_v61 = vld [vmem:[#allocation57_spill] sm:$0xff]  ;;  %v19195_v32 = vld [vmem:[#allocation58_spill] sm:$0xff] }
 0x293   :  { %19184 = vst [vmem:[#allocation329_spill] sm:$0xff] %v15362_v17  ;;  %19188 = vst [vmem:[#allocation53_spill] sm:$0xff] %v15372_v12  ;;  %v15385_v39 = vadd.f32 %v14667_v24, %v19193_v61  ;;  %v19198_v61 = vld [vmem:[#allocation59_spill] sm:$0xff] }
 0x294   :  { %19192 = vst [vmem:[#allocation56_spill] sm:$0xff] %v15380_v38 }
 0x295   :  { %3176 = vmatmul.mubr.bf16.gmra.mrb[204].mxu1 %v2832_v11  ;;  %3369 = vmatmul.mubr.bf16.gmra.mrb[204].mxu0 %v2832_v11  ;;  %19194 = vst [vmem:[#allocation57_spill] sm:$0xff] %v15385_v39 }
 0x296   :  { %4355 = vmatprep.mubr.bf16.mxu1 %v18798_v26  ;;  %4548 = vmatprep.mubr.bf16.mxu0 %v18798_v26  ;;  %v3027_v16 = vpop.f32.mrb[144].mxu1  ;;  %v3220_v45 = vpop.f32.mrb[144].mxu0 }
 0x297   :  { %v3379_v11 = vadd.f32 %v3027_v16, %v15372_v12  ;;  %v3029_v19 = vpop.f32.mrb[145].mxu1  ;;  %v3222_v17 = vpop.f32.mrb[145].mxu0  ;;  %v19196_v12 = vld [vmem:[#allocation206_spill] sm:$0xff] }
 0x298   :  { %v3380_v33 = vadd.f32 %v3029_v19, %v15376_v5  ;;  %v3031_v42 = vpop.f32.mrb[146].mxu1  ;;  %v3224_v2 = vpop.f32.mrb[146].mxu0  ;;  %v15392_v7 = vadd.f32 %v19196_v12, %v19195_v32  ;;  %v19199_v19 = vld [vmem:[#allocation154_spill] sm:$0xff] }
 0x299   :  { %v10237_v43 = vmul.f32 -1.442695, %v3379_v11  ;;  %v3383_v36 = vadd.f32 %v3031_v42, %v15380_v38  ;;  %v3033_v63 = vpop.f32.mrb[147].mxu1  ;;  %v3226_v52 = vpop.f32.mrb[147].mxu0  ;;  %v15396_v5 = vadd.f32 %v19199_v19, %v19198_v61  ;;  %v19201_v42 = vld [vmem:[#allocation60_spill] sm:$0xff] }
 0x29a   :  { %v10269_v8 = vmul.f32 -1.442695, %v3380_v33  ;;  %v3384_v57 = vadd.f32 %v3033_v63, %v15385_v39  ;;  %19197 = vst [vmem:[#allocation58_spill] sm:$0xff] %v15392_v7  ;;  %v3382_v11 = vadd.f32 %v3222_v17, %v15392_v7  ;;  %v19202_v38 = vld [vmem:[#allocation204_spill] sm:$0xff]  ;;  %v19215_v39 = vld [vmem:[#allocation214_spill] sm:$0xff] }
 0x29b   :  { %11288 = vpow2.f32 %v10237_v43  ;;  %v10238_v16 = vmul.f32 -1.442695, %v3383_v36  ;;  %19200 = vst [vmem:[#allocation206_spill] sm:$0xff] %v15396_v5  ;;  %v15401_v33 = vadd.f32 %v19202_v38, %v19201_v42  ;;  %v3386_v63 = vadd.f32 %v3226_v52, %v15396_v5  ;;  %v19214_v7 = vld [vmem:[#allocation68_spill] sm:$0xff] }
 0x29c   :  { %11290 = vpow2.f32 %v10269_v8  ;;  %v10270_v24 = vmul.f32 -1.442695, %v3384_v57  ;;  %v10301_v12 = vmul.f32 -1.442695, %v3382_v11  ;;  %v19204_v8 = vld [vmem:[#allocation62_spill] sm:$0xff]  ;;  %v19205_v57 = vld [vmem:[#allocation160_spill] sm:$0xff]  ;;  %v15421_v30 = vadd.f32 %v19215_v39, %v19214_v7 }
 0x29d   :  { %11292 = vpow2.f32 %v10238_v16  ;;  %19203 = vst [vmem:[#allocation59_spill] sm:$0xff] %v15401_v33  ;;  %v3381_v43 = vadd.f32 %v3220_v45, %v15401_v33  ;;  %v10302_v36 = vmul.f32 -1.442695, %v3386_v63  ;;  %v15407_v32 = vadd.f32 %v19205_v57, %v19204_v8 }
 0x29e   :  { %11294 = vpow2.f32 %v10270_v24  ;;  %19216 = vst [vmem:[#allocation62_spill] sm:$0xff] %v15421_v30 }
 0x29f   :  { %19206 = vst [vmem:[#allocation154_spill] sm:$0xff] %v15407_v32  ;;  %11296 = vtanh.f32 %v3381_v43  ;;  %v3385_v16 = vadd.f32 %v3224_v2, %v15407_v32  ;;  %v19207_v2 = vld [vmem:[#allocation64_spill] sm:$0xff] }
 0x2a0   :  { %11298 = vpow2.f32 %v10301_v12 }
 0x2a1   :  { %11300 = vpow2.f32 %v10302_v36 }
 0x2a5   :  { %v11289_v61 = vpop.eup %11288 }
 0x2a6   :  { %v11291_v19 = vpop.eup %11290  ;;  %v3603_v17 = vadd.f32 1.0, %v11289_v61 }
 0x2a7   :  { %v3795_v38 = vadd.f32 1.0, %v11291_v19  ;;  %v11293_v42 = vpop.eup %11292  ;;  %v19208_v19 = vld [vmem:[#allocation210_spill] sm:$0xff] }
 0x2a8   :  { %11302 = vrcp.f32 %v3603_v17  ;;  %v3604_v52 = vadd.f32 1.0, %v11293_v42  ;;  %v11295_v45 = vpop.eup %11294  ;;  %v15412_v36 = vadd.f32 %v19208_v19, %v19207_v2  ;;  %v19210_v17 = vld [vmem:[#allocation79_spill] sm:$0xff] }
 0x2a9   :  { %11304 = vrcp.f32 %v3795_v38  ;;  %v3796_v24 = vadd.f32 1.0, %v11295_v45  ;;  %v11297_v11 = vpop.eup %11296 }
 0x2aa   :  { %11306 = vtanh.f32 %v3385_v16  ;;  %v11299_v63 = vpop.eup %11298  ;;  %19209 = vst [vmem:[#allocation60_spill] sm:$0xff] %v15412_v36  ;;  %v19211_v16 = vld [vmem:[#allocation66_spill] sm:$0xff] }
 0x2ab   :  { %11308 = vrcp.f32 %v3604_v52  ;;  %v11301_v8 = vpop.eup %11300  ;;  %v4019_v12 = vadd.f32 1.0, %v11299_v63  ;;  %v19212_v52 = vld [vmem:[#allocation212_spill] sm:$0xff] }
 0x2ac   :  { %11310 = vrcp.f32 %v3796_v24  ;;  %v4020_v42 = vadd.f32 1.0, %v11301_v8  ;;  %v15417_v45 = vadd.f32 %v19212_v52, %v19211_v16  ;;  %v19218_v8 = vld [vmem:[#allocation69_spill] sm:$0xff] }
 0x2ad   :  { %11312 = vrcp.f32 %v4019_v12 }
 0x2ae   :  { %19213 = vst [vmem:[#allocation204_spill] sm:$0xff] %v15417_v45  ;;  %11314 = vrcp.f32 %v4020_v42  ;;  %v19227_v42 = vld [vmem:[#allocation217_spill] sm:$0xff] }
 0x2b2   :  { %v11303_v43 = vpop.eup %11302 }
 0x2b3   :  { %v11305_v57 = vpop.eup %11304  ;;  %v4147_v61 = vmul.f32 %v11303_v43, %v11297_v11 }
 0x2b4   :  { %v11307_v5 = vpop.eup %11306  ;;  %v4115_v38 = vmul.f32 %v11305_v57, %v19210_v17  ;;  %v19219_v17 = vld [vmem:[#allocation216_spill] sm:$0xff] }
 0x2b5   :  { %v11309_v32 = vpop.eup %11308  ;;  %v15428_v18 = vadd.f32 %v19219_v17, %v19218_v8  ;;  %v19224_v17 = vld [vmem:[#allocation213_spill] sm:$0xff] }
 0x2b6   :  { %v3037_v24 = vpop.f32.mrb[148].mxu1  ;;  %v3230_v33 = vpop.f32.mrb[148].mxu0  ;;  %v15423_v11 = vadd.f32 %v4147_v61, %v4115_v38  ;;  %v4148_v63 = vmul.f32 %v11309_v32, %v11307_v5 }
 0x2b7   :  { %v3387_v43 = vadd.f32 %v3037_v24, %v15412_v36  ;;  %v3039_v2 = vpop.f32.mrb[149].mxu1  ;;  %v3232_v19 = vpop.f32.mrb[149].mxu0  ;;  %19220 = vst [vmem:[#allocation64_spill] sm:$0xff] %v15428_v18 }
 0x2b8   :  { %19217 = vst [vmem:[#allocation160_spill] sm:$0xff] %v15423_v11  ;;  %v11311_v57 = vpop.eup %11310  ;;  %v3388_v16 = vadd.f32 %v3039_v2, %v15417_v45  ;;  %v3041_v52 = vpop.f32.mrb[150].mxu1  ;;  %11316 = vtanh.f32 %v15423_v11  ;;  %v19223_v2 = vld [vmem:[#allocation61_spill] sm:$0xff]  ;;  %v19242_v11 = vld [vmem:[#allocation223_spill] sm:$0xff] }
 0x2b9   :  { %v3234_v51 = vpop.f32.mrb[150].mxu0  ;;  %v4116_v7 = vmul.f32 %v11311_v57, %v19221_v22  ;;  %v10239_v39 = vmul.f32 -1.442695, %v3387_v43  ;;  %v3391_v5 = vadd.f32 %v3041_v52, %v15421_v30  ;;  %v3043_v32 = vpop.f32.mrb[151].mxu1  ;;  %v15439_v45 = vadd.f32 %v19224_v17, %v19223_v2  ;;  %v19226_v22 = vld [vmem:[#allocation63_spill] sm:$0xff] }
 0x2ba   :  { %v3236_v61 = vpop.f32.mrb[151].mxu0  ;;  %v10271_v38 = vmul.f32 -1.442695, %v3388_v16  ;;  %v3392_v12 = vadd.f32 %v3043_v32, %v15428_v18  ;;  %v15443_v43 = vadd.f32 %v19227_v42, %v19226_v22  ;;  %v19230_v52 = vld [vmem:[#allocation211_spill] sm:$0xff]  ;;  %v11313_v32 = vpop.eup %11312  ;;  %v19236_v18 = vld [vmem:[#allocation218_spill] sm:$0xff] }
 0x2bb   :  { %v15434_v24 = vadd.f32 %v4148_v63, %v4116_v7  ;;  %11318 = vpow2.f32 %v10239_v39  ;;  %v10240_v8 = vmul.f32 -1.442695, %v3391_v5  ;;  %19225 = vst [vmem:[#allocation79_spill] sm:$0xff] %v15439_v45  ;;  %v3390_v16 = vadd.f32 %v3232_v19, %v15439_v45  ;;  %v19229_v63 = vld [vmem:[#allocation65_spill] sm:$0xff]  ;;  %v11315_v2 = vpop.eup %11314  ;;  %v19232_v42 = vld [vmem:[#allocation67_spill] sm:$0xff]  ;;  %v19235_v45 = vld [vmem:[#allocation70_spill] sm:$0xff] }
 0x2bc   :  { %11320 = vpow2.f32 %v10271_v38  ;;  %19228 = vst [vmem:[#allocation66_spill] sm:$0xff] %v15443_v43  ;;  %v10272_v57 = vmul.f32 -1.442695, %v3392_v12  ;;  %v15449_v7 = vadd.f32 %v19230_v52, %v19229_v63  ;;  %v3394_v39 = vadd.f32 %v3236_v61, %v15443_v43  ;;  %v19238_v61 = vld [vmem:[#allocation71_spill] sm:$0xff]  ;;  %v19239_v52 = vld [vmem:[#allocation221_spill] sm:$0xff] }
 0x2bd   :  { %19222 = vst [vmem:[#allocation210_spill] sm:$0xff] %v15434_v24  ;;  %11322 = vtanh.f32 %v15434_v24  ;;  %v10303_v38 = vmul.f32 -1.442695, %v3390_v16  ;;  %v19233_v24 = vld [vmem:[#allocation215_spill] sm:$0xff]  ;;  %v15459_v63 = vadd.f32 %v19236_v18, %v19235_v45 }
 0x2be   :  { %19231 = vst [vmem:[#allocation212_spill] sm:$0xff] %v15449_v7  ;;  %11324 = vpow2.f32 %v10240_v8  ;;  %v3389_v5 = vadd.f32 %v3230_v33, %v15449_v7  ;;  %v10304_v17 = vmul.f32 -1.442695, %v3394_v39  ;;  %v15455_v12 = vadd.f32 %v19233_v24, %v19232_v42 }
 0x2bf   :  { %11326 = vpow2.f32 %v10272_v57  ;;  %19237 = vst [vmem:[#allocation214_spill] sm:$0xff] %v15459_v63  ;;  %v15463_v33 = vadd.f32 %v19239_v52, %v19238_v61 }
 0x2c0   :  { %19234 = vst [vmem:[#allocation68_spill] sm:$0xff] %v15455_v12  ;;  %11328 = vtanh.f32 %v3389_v5  ;;  %v3393_v16 = vadd.f32 %v3234_v51, %v15455_v12  ;;  %v19241_v5 = vld [vmem:[#allocation72_spill] sm:$0xff] }
 0x2c1   :  { %19240 = vst [vmem:[#allocation69_spill] sm:$0xff] %v15463_v33  ;;  %11330 = vpow2.f32 %v10303_v38  ;;  %v15469_v36 = vadd.f32 %v19242_v11, %v19241_v5 }
 0x2c2   :  { %v11317_v22 = vpop.eup %11316  ;;  %11332 = vpow2.f32 %v10304_v17 }
 0x2c3   :  { %v4243_v24 = vmul.f32 %v11317_v22, %v11313_v32  ;;  %19243 = vst [vmem:[#allocation216_spill] sm:$0xff] %v15469_v36 }
 0x2c5   :  { %v11319_v19 = vpop.eup %11318 }
 0x2c6   :  { %v11321_v8 = vpop.eup %11320  ;;  %v3605_v57 = vadd.f32 1.0, %v11319_v19  ;;  %v3047_v39 = vpop.f32.mrb[152].mxu1 }
 0x2c7   :  { %v3240_v7 = vpop.f32.mrb[152].mxu0  ;;  %v11323_v43 = vpop.eup %11322  ;;  %v3797_v42 = vadd.f32 1.0, %v11321_v8  ;;  %v3395_v30 = vadd.f32 %v3047_v39, %v15459_v63  ;;  %v19244_v8 = vld [vmem:[#allocation73_spill] sm:$0xff] }
 0x2c8   :  { %v3049_v18 = vpop.f32.mrb[153].mxu1  ;;  %v3242_v45 = vpop.f32.mrb[153].mxu0  ;;  %v4244_v61 = vmul.f32 %v11323_v43, %v11315_v2  ;;  %11334 = vrcp.f32 %v3605_v57  ;;  %v19245_v39 = vld [vmem:[#allocation225_spill] sm:$0xff]  ;;  %v19247_v57 = vld [vmem:[#allocation123_spill] sm:$0xff] }
 0x2c9   :  { %v3396_v38 = vadd.f32 %v3049_v18, %v15463_v33  ;;  %v3051_v19 = vpop.f32.mrb[154].mxu1  ;;  %v15472_v51 = vpop.f32.mrb[154].mxu0  ;;  %11336 = vrcp.f32 %v3797_v42  ;;  %v10241_v32 = vmul.f32 -1.442695, %v3395_v30  ;;  %v15478_v63 = vadd.f32 %v19245_v39, %v19244_v8  ;;  %v19248_v30 = vld [vmem:[#allocation124_spill] sm:$0xff]  ;;  %v19249_v39 = vld [vmem:[#allocation81_spill] sm:$0xff] }
 0x2ca   :  { %v11325_v52 = vpop.eup %11324  ;;  %v3053_v22 = vpop.f32.mrb[155].mxu1  ;;  %v3399_v11 = vadd.f32 %v3051_v19, %v15469_v36  ;;  %11338 = vtanh.f32 %v3393_v16  ;;  %v4275_v18 = vadd.f32 %v4243_v24, %v19247_v57  ;;  %v4276_v33 = vadd.f32 %v4244_v61, %v19248_v30  ;;  %v19252_v16 = vld [vmem:[#allocation75_spill] sm:$0xff] }
 0x2cb   :  { %v15474_v17 = vpop.f32.mrb[155].mxu0  ;;  %19246 = vst [vmem:[#allocation82_spill] sm:$0xff] %v15478_v63  ;;  %v3606_v12 = vadd.f32 1.0, %v11325_v52  ;;  %v11327_v43 = vpop.eup %11326  ;;  %v10273_v2 = vmul.f32 -1.442695, %v3396_v38  ;;  %v3400_v42 = vadd.f32 %v3053_v22, %v15478_v63  ;;  %v19250_v52 = vld [vmem:[#allocation222_spill] sm:$0xff] }
 0x2cc   :  { %v3798_v5 = vadd.f32 1.0, %v11327_v43  ;;  %v10242_v23 = vmul.f32 -1.442695, %v3399_v11  ;;  %v4307_v34 = vpack.c.bf16 %v4276_v33, %v4275_v18  ;;  %v11329_v8 = vpop.eup %11328  ;;  %v15486_v37 = vadd.f32 %v19250_v52, %v19249_v39  ;;  %v19253_v38 = vld [vmem:[#allocation219_spill] sm:$0xff] }
 0x2cd   :  { %11340 = vrcp.f32 %v3606_v12  ;;  %v11331_v19 = vpop.eup %11330  ;;  %v15490_v36 = vadd.f32 %v19253_v38, %v19252_v16  ;;  %v10274_v12 = vmul.f32 -1.442695, %v3400_v42  ;;  %v12872_v22 = vld [vmem:[#allocation8] ss:$16 sps:$4 sm:$0xff]   ;;  %v12873_v11 = vld [vmem:[#allocation8 + $0x8] ss:$16 sps:$4 sm:$0xff]  }
 0x2ce   :  { %11342 = vpow2.f32 %v10241_v32  ;;  %19251 = vst [vmem:[#allocation61_spill] sm:$0xff] %v15486_v37  ;;  %4356 = vmatmul.mubr.bf16.vlgmr.msra.gmra.mrb[208].mxu1 %v4307_v34  ;;  %4549 = vmatmul.mubr.bf16.vlgmr.msra.gmra.mrb[208].mxu0 %v4307_v34  ;;  %v11333_v24 = vpop.eup %11332  ;;  %v3398_v61 = vadd.f32 %v3242_v45, %v15486_v37  ;;  %v4021_v18 = vadd.f32 1.0, %v11331_v19  ;;  %v12875_v34 = vld [vmem:[#allocation8 + $0x2c] ss:$16 sps:$4 sm:$0xff]   ;;  %v19255_v45 = vld [vmem:[#allocation146_spill] sm:$0xff] }
 0x2cf   :  { %11344 = vrcp.f32 %v3798_v5  ;;  %19254 = vst [vmem:[#allocation213_spill] sm:$0xff] %v15490_v36  ;;  %4365 = vmatprep.mubr.bf16.mxu1 %v18798_v26  ;;  %4558 = vmatprep.mubr.bf16.mxu0 %v18798_v26  ;;  %v3397_v32 = vadd.f32 %v3240_v7, %v15490_v36  ;;  %v12874_v5 = vld [vmem:[#allocation8 + $0x24] ss:$16 sps:$4 sm:$0xff]   ;;  %v4022_v39 = vadd.f32 1.0, %v11333_v24  ;;  %v19263_v19 = vld [vmem:[#allocation233_spill] sm:$0xff] }
 0x2d0   :  { %11346 = vpow2.f32 %v10273_v2  ;;  %5654 = vmatpush1.bf16.msra.mxu1 %v12872_v22  ;;  %5847 = vmatpush1.bf16.msra.mxu0 %v12873_v11  ;;  %v19256_v16 = vld [vmem:[#allocation74_spill] sm:$0xff]  ;;  %v19259_v36 = vld [vmem:[#allocation88_spill] sm:$0xff]  ;;  %v19274_v37 = vld [vmem:[#allocation237_spill] sm:$0xff] }
 0x2d1   :  { %11348 = vpow2.f32 %v10242_v23  ;;  %5655 = vmatprep.subr.bf16.mxu1 %v12874_v5  ;;  %5848 = vmatprep.subr.bf16.mxu0 %v12875_v34  ;;  %v19257_v38 = vld [vmem:[#allocation230_spill] sm:$0xff]  ;;  %v10305_v23 = vmul.f32 -1.442695, %v3398_v61 }
 0x2d2   :  { %v11335_v33 = vpop.eup %11334  ;;  %11350 = vpow2.f32 %v10274_v12  ;;  %v15499_v7 = vadd.f32 %v19257_v38, %v19256_v16  ;;  %v19260_v11 = vld [vmem:[#allocation226_spill] sm:$0xff]  ;;  %v19267_v16 = vld [vmem:[#allocation224_spill] sm:$0xff] }
 0x2d3   :  { %v11337_v43 = vpop.eup %11336  ;;  %v4149_v2 = vmul.f32 %v11335_v33, %v11329_v8  ;;  %v15503_v30 = vadd.f32 %v19260_v11, %v19259_v36  ;;  %v19262_v8 = vld [vmem:[#allocation76_spill] sm:$0xff]  ;;  %11352 = vtanh.f32 %v3397_v32  ;;  %v12879_v32 = vld [vmem:[#allocation8 + $0x4c] ss:$16 sps:$4 sm:$0xff]  }
 0x2d4   :  { %v4117_v42 = vmul.f32 %v11337_v43, %v19255_v45  ;;  %v11339_v52 = vpop.eup %11338  ;;  %19258 = vst [vmem:[#allocation63_spill] sm:$0xff] %v15499_v7  ;;  %v15507_v33 = vadd.f32 %v19263_v19, %v19262_v8  ;;  %v12876_v43 = vld [vmem:[#allocation8 + $0x20] ss:$16 sps:$4 sm:$0xff]   ;;  %v12877_v34 = vld [vmem:[#allocation8 + $0x28] ss:$16 sps:$4 sm:$0xff]   ;;  %11354 = vrcp.f32 %v4021_v18 }
 0x2d5   :  { %19261 = vst [vmem:[#allocation217_spill] sm:$0xff] %v15503_v30  ;;  %5656 = vmatpush1.bf16.msra.mxu1 %v12876_v43  ;;  %5849 = vmatpush1.bf16.msra.mxu0 %v12877_v34  ;;  %v19266_v45 = vld [vmem:[#allocation93_spill] sm:$0xff]  ;;  %11356 = vrcp.f32 %v4022_v39  ;;  %v3402_v34 = vadd.f32 %v15474_v17, %v15503_v30 }
 0x2d6   :  { %19264 = vst [vmem:[#allocation65_spill] sm:$0xff] %v15507_v33  ;;  %v15509_v5 = vadd.f32 %v4149_v2, %v4117_v42  ;;  %v3057_v24 = vpop.f32.mrb[156].mxu1  ;;  %v15511_v12 = vpop.f32.mrb[156].mxu0  ;;  %v15515_v38 = vadd.f32 %v19267_v16, %v19266_v45  ;;  %v12878_v42 = vld [vmem:[#allocation8 + $0x44] ss:$16 sps:$4 sm:$0xff]   ;;  %5850 = vmatprep.subr.bf16.mxu0 %v12879_v32  ;;  %v19269_v18 = vld [vmem:[#allocation77_spill] sm:$0xff]  ;;  %11358 = vpow2.f32 %v10305_v23 }
 0x2d7   :  { %v11341_v22 = vpop.eup %11340  ;;  %v3403_v11 = vadd.f32 %v3057_v24, %v15499_v7  ;;  %v3059_v8 = vpop.f32.mrb[157].mxu1  ;;  %5657 = vmatprep.subr.bf16.mxu1 %v12878_v42  ;;  %v19272_v24 = vld [vmem:[#allocation149_spill] sm:$0xff] }
 0x2d8   :  { %19265 = vst [vmem:[#allocation211_spill] sm:$0xff] %v15509_v5  ;;  %v11343_v61 = vpop.eup %11342  ;;  %19268 = vst [vmem:[#allocation67_spill] sm:$0xff] %v15515_v38  ;;  %v4150_v36 = vmul.f32 %v11341_v22, %v11339_v52  ;;  %v3252_v2 = vpop.f32.mrb[157].mxu0  ;;  %v3404_v57 = vadd.f32 %v3059_v8, %v15507_v33  ;;  %v19270_v52 = vld [vmem:[#allocation235_spill] sm:$0xff]  ;;  %v3401_v8 = vadd.f32 %v15472_v51, %v15515_v38  ;;  %v10306_v51 = vmul.f32 -1.442695, %v3402_v34 }
 0x2d9   :  { %v11345_v19 = vpop.eup %11344  ;;  %v3607_v43 = vadd.f32 1.0, %v11343_v61  ;;  %v3061_v45 = vpop.f32.mrb[158].mxu1  ;;  %v15525_v22 = vadd.f32 %v19270_v52, %v19269_v18  ;;  %v10243_v42 = vmul.f32 -1.442695, %v3403_v11  ;;  %v19273_v61 = vld [vmem:[#allocation78_spill] sm:$0xff] }
 0x2da   :  { %v15521_v16 = vpop.f32.mrb[158].mxu0  ;;  %v4118_v7 = vmul.f32 %v11345_v19, %v19272_v24  ;;  %v3063_v32 = vpop.f32.mrb[159].mxu1  ;;  %v15532_v17 = vadd.f32 %v19274_v37, %v19273_v61  ;;  %v10275_v33 = vmul.f32 -1.442695, %v3404_v57  ;;  %v12880_v30 = vld [vmem:[#allocation8 + $0x40] ss:$16 sps:$4 sm:$0xff]  }
 0x2db   :  { %19271 = vst [vmem:[#allocation215_spill] sm:$0xff] %v15525_v22  ;;  %v15528_v63 = vpop.f32.mrb[159].mxu0  ;;  %v11347_v39 = vpop.eup %11346  ;;  %11360 = vrcp.f32 %v3607_v43  ;;  %5658 = vmatpush1.bf16.msra.mxu1 %v12880_v30  ;;  %v12881_v18 = vld [vmem:[#allocation8 + $0x48] ss:$16 sps:$4 sm:$0xff]   ;;  %v3407_v11 = vadd.f32 %v3061_v45, %v15525_v22  ;;  %v12882_v52 = vld [vmem:[#allocation8 + $0x64] ss:$16 sps:$4 sm:$0xff]  }
 0x2dc   :  { %19275 = vst [vmem:[#allocation70_spill] sm:$0xff] %v15532_v17  ;;  %5851 = vmatpush1.bf16.msra.mxu0 %v12881_v18  ;;  %v15536_v19 = vadd.f32 %v4150_v36, %v4118_v7  ;;  %v3799_v23 = vadd.f32 1.0, %v11347_v39  ;;  %11362 = vpow2.f32 %v10243_v42  ;;  %5659 = vmatprep.subr.bf16.mxu1 %v12882_v52  ;;  %v12883_v24 = vld [vmem:[#allocation8 + $0x6c] ss:$16 sps:$4 sm:$0xff]   ;;  %v11349_v37 = vpop.eup %11348  ;;  %v19277_v43 = vld [vmem:[#allocation94_spill] sm:$0xff]  ;;  %v3408_v30 = vadd.f32 %v3063_v32, %v15532_v17 }
 0x2dd   :  { %5852 = vmatprep.subr.bf16.mxu0 %v12883_v24  ;;  %v19278_v61 = vld [vmem:[#allocation234_spill] sm:$0xff]  ;;  %11364 = vpow2.f32 %v10275_v33  ;;  %v3608_v57 = vadd.f32 1.0, %v11349_v37  ;;  %v11351_v7 = vpop.eup %11350  ;;  %v19280_v36 = vld [vmem:[#allocation97_spill] sm:$0xff]  ;;  %v19281_v42 = vld [vmem:[#allocation231_spill] sm:$0xff]  ;;  %v10244_v34 = vmul.f32 -1.442695, %v3407_v11 }
 0x2de   :  { %19276 = vst [vmem:[#allocation218_spill] sm:$0xff] %v15536_v19  ;;  %v15541_v58 = vadd.f32 %v19278_v61, %v19277_v43  ;;  %11366 = vrcp.f32 %v3799_v23  ;;  %v15546_v39 = vadd.f32 %v19281_v42, %v19280_v36  ;;  %v12884_v18 = vld [vmem:[#allocation8 + $0x60] ss:$16 sps:$4 sm:$0xff]   ;;  %v12885_v52 = vld [vmem:[#allocation8 + $0x68] ss:$16 sps:$4 sm:$0xff]   ;;  %v3800_v24 = vadd.f32 1.0, %v11351_v7  ;;  %v11353_v32 = vpop.eup %11352 }
 0x2df   :  { %11368 = vtanh.f32 %v3401_v8  ;;  %5660 = vmatpush1.bf16.msra.mxu1 %v12884_v18  ;;  %v12886_v33 = vld [vmem:[#allocation8 + $0x84] ss:$16 sps:$4 sm:$0xff]   ;;  %v12887_v23 = vld [vmem:[#allocation8 + $0x8c] ss:$16 sps:$4 sm:$0xff]   ;;  %v15551_v43 = vpop.eup %11354  ;;  %v12889_v11 = vld [vmem:[#allocation8 + $0x88] ss:$16 sps:$4 sm:$0xff]  }
 0x2e0   :  { %19279 = vst [vmem:[#allocation71_spill] sm:$0xff] %v15541_v58  ;;  %19282 = vst [vmem:[#allocation221_spill] sm:$0xff] %v15546_v39  ;;  %v3406_v45 = vadd.f32 %v3252_v2, %v15541_v58  ;;  %5853 = vmatpush1.bf16.msra.mxu0 %v12885_v52  ;;  %11370 = vrcp.f32 %v3608_v57  ;;  %5661 = vmatprep.subr.bf16.mxu1 %v12886_v33  ;;  %v3405_v37 = vadd.f32 %v15511_v12, %v15546_v39  ;;  %v15553_v8 = vpop.eup %11356  ;;  %v12888_v57 = vld [vmem:[#allocation8 + $0x80] ss:$16 sps:$4 sm:$0xff]   ;;  %v12890_v36 = vld [vmem:[#allocation8 + $0xa4] ss:$16 sps:$4 sm:$0xff]  }
 0x2e1   :  { %5854 = vmatprep.subr.bf16.mxu0 %v12887_v23  ;;  %11372 = vpow2.f32 %v10306_v51  ;;  %v10276_v2 = vmul.f32 -1.442695, %v3408_v30  ;;  %v11359_v7 = vpop.eup %11358  ;;  %v12891_v51 = vld [vmem:[#allocation8 + $0xac] ss:$16 sps:$4 sm:$0xff]   ;;  %v19284_v18 = vld [vmem:[#allocation236_spill] sm:$0xff] }
 0x2e2   :  { %11374 = vrcp.f32 %v3800_v24  ;;  %v10307_v61 = vmul.f32 -1.442695, %v3406_v45  ;;  %v19283_v42 = vld [vmem:[#allocation107_spill] sm:$0xff]  ;;  %v19286_v45 = vld [vmem:[#allocation100_spill] sm:$0xff]  ;;  %v19287_v24 = vld [vmem:[#allocation238_spill] sm:$0xff]  ;;  %v4023_v22 = vadd.f32 1.0, %v11359_v7 }
 0x2e3   :  { %11376 = vtanh.f32 %v15509_v5  ;;  %5662 = vmatpush1.bf16.msra.mxu1 %v12888_v57  ;;  %v15558_v52 = vadd.f32 %v19284_v18, %v19283_v42  ;;  %v15562_v33 = vadd.f32 %v19287_v24, %v19286_v45  ;;  %v19289_v23 = vld [vmem:[#allocation80_spill] sm:$0xff]  ;;  %v19290_v57 = vld [vmem:[#allocation239_spill] sm:$0xff]  ;;  %v19295_v17 = vld [vmem:[#allocation85_spill] sm:$0xff] }
 0x2e4   :  { %5855 = vmatpush1.bf16.msra.mxu0 %v12889_v11  ;;  %11378 = vpow2.f32 %v10244_v34  ;;  %5663 = vmatprep.subr.bf16.mxu1 %v12890_v36  ;;  %v15566_v11 = vadd.f32 %v19290_v57, %v19289_v23  ;;  %v19292_v58 = vld [vmem:[#allocation83_spill] sm:$0xff]  ;;  %v15574_v42 = vadd.f32 %v14883_v21, %v19295_v17  ;;  %v12894_v17 = vld [vmem:[#allocation8 + $0xc4] ss:$16 sps:$4 sm:$0xff]  }
 0x2e5   :  { %5856 = vmatprep.subr.bf16.mxu0 %v12891_v51  ;;  %v11361_v12 = vpop.eup %11360  ;;  %19285 = vst [vmem:[#allocation72_spill] sm:$0xff] %v15558_v52  ;;  %11380 = vtanh.f32 %v3405_v37  ;;  %19288 = vst [vmem:[#allocation223_spill] sm:$0xff] %v15562_v33  ;;  %v19293_v51 = vld [vmem:[#allocation242_spill] sm:$0xff] }
 0x2e6   :  { %v11363_v30 = vpop.eup %11362  ;;  %19291 = vst [vmem:[#allocation73_spill] sm:$0xff] %v15566_v11  ;;  %v4151_v34 = vmul.f32 %v11361_v12, %v11353_v32  ;;  %11382 = vpow2.f32 %v10276_v2  ;;  %v15570_v39 = vadd.f32 %v19293_v51, %v19292_v58  ;;  %19296 = vst [vmem:[#allocation81_spill] sm:$0xff] %v15574_v42  ;;  %v3067_v18 = vpop.f32.mrb[160].mxu1  ;;  %v12892_v24 = vld [vmem:[#allocation8 + $0xa0] ss:$16 sps:$4 sm:$0xff]  }
 0x2e7   :  { %v11365_v36 = vpop.eup %11364  ;;  %v3609_v37 = vadd.f32 1.0, %v11363_v30  ;;  %11384 = vpow2.f32 %v10307_v61  ;;  %v15576_v45 = vpop.f32.mrb[160].mxu0  ;;  %5664 = vmatpush1.bf16.msra.mxu1 %v12892_v24  ;;  %v12893_v23 = vld [vmem:[#allocation8 + $0xa8] ss:$16 sps:$4 sm:$0xff]   ;;  %v3411_v57 = vadd.f32 %v3067_v18, %v15566_v11  ;;  %v12895_v61 = vld [vmem:[#allocation8 + $0xcc] ss:$16 sps:$4 sm:$0xff]   ;;  %v3410_v11 = vadd.f32 %v15528_v63, %v15562_v33 }
 0x2e8   :  { %19294 = vst [vmem:[#allocation225_spill] sm:$0xff] %v15570_v39  ;;  %5857 = vmatpush1.bf16.msra.mxu0 %v12893_v23  ;;  %v11367_v32 = vpop.eup %11366  ;;  %v19297_v2 = vld [vmem:[#allocation89_spill] sm:$0xff]  ;;  %v3801_v58 = vadd.f32 1.0, %v11365_v36  ;;  %v3069_v51 = vpop.f32.mrb[161].mxu1  ;;  %11386 = vtanh.f32 %v15536_v19  ;;  %5665 = vmatprep.subr.bf16.mxu1 %v12894_v17  ;;  %v19299_v24 = vld [vmem:[#allocation168_spill] sm:$0xff]  ;;  %v19301_v33 = vld [vmem:[#allocation171_spill] sm:$0xff] }
 0x2e9   :  { %v15580_v12 = vadd.f32 %v14893_v54, %v19297_v2  ;;  %v15583_v21 = vpop.f32.mrb[161].mxu0  ;;  %5858 = vmatprep.subr.bf16.mxu0 %v12895_v61  ;;  %v11369_v30 = vpop.eup %11368  ;;  %v4119_v23 = vmul.f32 %v11367_v32, %v19299_v24  ;;  %11388 = vrcp.f32 %v3609_v37  ;;  %v3412_v54 = vadd.f32 %v3069_v51, %v15570_v39  ;;  %v12896_v24 = vld [vmem:[#allocation8 + $0xc0] ss:$16 sps:$4 sm:$0xff]  }
 0x2ea   :  { %v3071_v2 = vpop.f32.mrb[162].mxu1  ;;  %v15588_v36 = vpop.f32.mrb[162].mxu0  ;;  %11390 = vrcp.f32 %v3801_v58  ;;  %v10245_v38 = vmul.f32 -1.442695, %v3411_v57  ;;  %v3409_v37 = vadd.f32 %v15521_v16, %v15558_v52  ;;  %v12897_v58 = vld [vmem:[#allocation8 + $0xc8] ss:$16 sps:$4 sm:$0xff]  }
 0x2eb   :  { %19298 = vst [vmem:[#allocation222_spill] sm:$0xff] %v15580_v12  ;;  %v11371_v18 = vpop.eup %11370  ;;  %v3415_v17 = vadd.f32 %v3071_v2, %v15574_v42  ;;  %v3073_v19 = vpop.f32.mrb[163].mxu1  ;;  %v15595_v32 = vadd.f32 %v4151_v34, %v4119_v23  ;;  %v10277_v51 = vmul.f32 -1.442695, %v3412_v54  ;;  %5666 = vmatpush1.bf16.msra.mxu1 %v12896_v24  ;;  %v12898_v57 = vld [vmem:[#allocation8 + $0xe4] ss:$16 sps:$4 sm:$0xff]  }
 0x2ec   :  { %v15593_v61 = vpop.f32.mrb[163].mxu0  ;;  %v11373_v5 = vpop.eup %11372  ;;  %v4152_v7 = vmul.f32 %v11371_v18, %v11369_v30  ;;  %5859 = vmatpush1.bf16.msra.mxu0 %v12897_v58  ;;  %11392 = vpow2.f32 %v10245_v38  ;;  %5667 = vmatprep.subr.bf16.mxu1 %v12898_v57  ;;  %v12899_v2 = vld [vmem:[#allocation8 + $0xec] ss:$16 sps:$4 sm:$0xff]   ;;  %v3416_v30 = vadd.f32 %v3073_v19, %v15580_v12  ;;  %v10308_v16 = vmul.f32 -1.442695, %v3410_v11 }
 0x2ed   :  { %19300 = vst [vmem:[#allocation75_spill] sm:$0xff] %v15595_v32  ;;  %v11375_v39 = vpop.eup %11374  ;;  %v10246_v63 = vmul.f32 -1.442695, %v3415_v17  ;;  %5860 = vmatprep.subr.bf16.mxu0 %v12899_v2  ;;  %11394 = vpow2.f32 %v10277_v51  ;;  %v12900_v38 = vld [vmem:[#allocation8 + $0xe0] ss:$16 sps:$4 sm:$0xff]  }
 0x2ee   :  { %v11377_v42 = vpop.eup %11376  ;;  %v4120_v34 = vmul.f32 %v11375_v39, %v19301_v33  ;;  %11396 = vrcp.f32 %v4023_v22  ;;  %v12901_v17 = vld [vmem:[#allocation8 + $0xe8] ss:$16 sps:$4 sm:$0xff]   ;;  %v4024_v39 = vadd.f32 1.0, %v11373_v5  ;;  %v10278_v33 = vmul.f32 -1.442695, %v3416_v30 }
 0x2ef   :  { %v11379_v23 = vpop.eup %11378  ;;  %11398 = vtanh.f32 %v3409_v37  ;;  %5668 = vmatpush1.bf16.msra.mxu1 %v12900_v38  ;;  %v19303_v57 = vld [vmem:[#allocation125_spill] sm:$0xff]  ;;  %v19304_v2 = vld [vmem:[#allocation240_spill] sm:$0xff]  ;;  %v4245_v11 = vmul.f32 %v11377_v42, %v15551_v43  ;;  %v19314_v42 = vld [vmem:[#allocation98_spill] sm:$0xff] }
 0x2f0   :  { %v11381_v54 = vpop.eup %11380  ;;  %v15601_v18 = vadd.f32 %v4152_v7, %v4120_v34  ;;  %v3610_v24 = vadd.f32 1.0, %v11379_v23  ;;  %5861 = vmatpush1.bf16.msra.mxu0 %v12901_v17  ;;  %v15605_v52 = vadd.f32 %v19304_v2, %v19303_v57  ;;  %11400 = vpow2.f32 %v10246_v63  ;;  %v19306_v34 = vld [vmem:[#allocation111_spill] sm:$0xff]  ;;  %v19310_v57 = vld [vmem:[#allocation244_spill] sm:$0xff] }
 0x2f1   :  { %v11383_v58 = vpop.eup %11382  ;;  %v19307_v23 = vld [vmem:[#allocation243_spill] sm:$0xff] }
 0x2f2   :  { %19302 = vst [vmem:[#allocation219_spill] sm:$0xff] %v15601_v18  ;;  %19305 = vst [vmem:[#allocation146_spill] sm:$0xff] %v15605_v52  ;;  %v11385_v19 = vpop.eup %11384  ;;  %11402 = vrcp.f32 %v3610_v24  ;;  %v3802_v22 = vadd.f32 1.0, %v11383_v58  ;;  %v3413_v37 = vadd.f32 %v15576_v45, %v15605_v52  ;;  %v15612_v38 = vadd.f32 %v19307_v23, %v19306_v34  ;;  %v19309_v17 = vld [vmem:[#allocation131_spill] sm:$0xff]  ;;  %v19312_v24 = vld [vmem:[#allocation90_spill] sm:$0xff] }
 0x2f3   :  { %v11387_v7 = vpop.eup %11386  ;;  %11404 = vpow2.f32 %v10308_v16  ;;  %v15616_v5 = vadd.f32 %v19310_v57, %v19309_v17  ;;  %v15621_v43 = vadd.f32 %v14924_v29, %v19312_v24  ;;  %v15625_v45 = vadd.f32 %v14928_v40, %v19314_v42  ;;  %v19316_v58 = vld [vmem:[#allocation110_spill] sm:$0xff]  ;;  %v19317_v34 = vld [vmem:[#allocation163_spill] sm:$0xff] }
 0x2f4   :  { %v11389_v51 = vpop.eup %11388  ;;  %19308 = vst [vmem:[#allocation74_spill] sm:$0xff] %v15612_v38  ;;  %11406 = vrcp.f32 %v3802_v22  ;;  %v4246_v63 = vmul.f32 %v11387_v7, %v15553_v8  ;;  %v4277_v23 = vadd.f32 %v4245_v11, %v19317_v34  ;;  %v19318_v17 = vld [vmem:[#allocation167_spill] sm:$0xff]  ;;  %v4025_v29 = vadd.f32 1.0, %v11385_v19 }
 0x2f5   :  { %19311 = vst [vmem:[#allocation230_spill] sm:$0xff] %v15616_v5  ;;  %v11391_v30 = vpop.eup %11390  ;;  %19313 = vst [vmem:[#allocation88_spill] sm:$0xff] %v15621_v43  ;;  %11408 = vrcp.f32 %v4024_v39  ;;  %v4153_v16 = vmul.f32 %v11389_v51, %v11381_v54  ;;  %v19319_v8 = vld [vmem:[#allocation99_spill] sm:$0xff]  ;;  %v3414_v40 = vadd.f32 %v15583_v21, %v15612_v38  ;;  %v3417_v42 = vadd.f32 %v15588_v36, %v15616_v5 }
 0x2f6   :  { %19315 = vst [vmem:[#allocation226_spill] sm:$0xff] %v15625_v45  ;;  %v4121_v2 = vmul.f32 %v11391_v30, %v19316_v58  ;;  %11410 = vpow2.f32 %v10278_v33  ;;  %v4278_v22 = vadd.f32 %v4246_v63, %v19318_v17  ;;  %v11393_v57 = vpop.eup %11392  ;;  %v19320_v7 = vld [vmem:[#allocation251_spill] sm:$0xff] }
 0x2f7   :  { %v15632_v52 = vadd.f32 %v19320_v7, %v19319_v8  ;;  %11412 = vtanh.f32 %v3413_v37  ;;  %v11395_v24 = vpop.eup %11394  ;;  %v3611_v54 = vadd.f32 1.0, %v11393_v57  ;;  %v3077_v51 = vpop.f32.mrb[164].mxu1  ;;  %v19324_v8 = vld [vmem:[#allocation245_spill] sm:$0xff]  ;;  %v19329_v17 = vld [vmem:[#allocation87_spill] sm:$0xff] }
 0x2f8   :  { %v15636_v39 = vadd.f32 %v4153_v16, %v4121_v2  ;;  %v3270_v33 = vpop.f32.mrb[164].mxu0  ;;  %v4308_v30 = vpack.c.bf16 %v4278_v22, %v4277_v23  ;;  %11414 = vtanh.f32 %v15595_v32  ;;  %v11397_v11 = vpop.eup %11396  ;;  %v3803_v63 = vadd.f32 1.0, %v11395_v24  ;;  %v19323_v22 = vld [vmem:[#allocation126_spill] sm:$0xff]  ;;  %v19483_v32 = vld [vmem:[#allocation201_spill] sm:$0xff] }
 0x2f9   :  { %19321 = vst [vmem:[#allocation76_spill] sm:$0xff] %v15632_v52  ;;  %v3419_v19 = vadd.f32 %v3077_v51, %v15621_v43  ;;  %v3079_v37 = vpop.f32.mrb[165].mxu1  ;;  %v3272_v58 = vpop.f32.mrb[165].mxu0  ;;  %11416 = vtanh.f32 %v15601_v18  ;;  %v15648_v7 = vadd.f32 %v19324_v8, %v19323_v22 }
 0x2fa   :  { %19322 = vst [vmem:[#allocation233_spill] sm:$0xff] %v15636_v39  ;;  %v11399_v21 = vpop.eup %11398  ;;  %11418 = vrcp.f32 %v3611_v54  ;;  %v3420_v16 = vadd.f32 %v3079_v37, %v15625_v45  ;;  %v3081_v2 = vpop.f32.mrb[166].mxu1  ;;  %4366 = vmatmul.mubr.bf16.gmra.mrb[212].mxu1 %v4308_v30  ;;  %4559 = vmatmul.mubr.bf16.gmra.mrb[212].mxu0 %v4308_v30  ;;  %v19326_v37 = vld [vmem:[#allocation104_spill] sm:$0xff]  ;;  %v19327_v45 = vld [vmem:[#allocation253_spill] sm:$0xff] }
 0x2fb   :  { %v15644_v57 = vpop.f32.mrb[166].mxu0  ;;  %v11401_v23 = vpop.eup %11400  ;;  %19325 = vst [vmem:[#allocation93_spill] sm:$0xff] %v15648_v7  ;;  %11420 = vrcp.f32 %v3803_v63  ;;  %v10247_v36 = vmul.f32 -1.442695, %v3419_v19  ;;  %v3423_v24 = vadd.f32 %v3081_v2, %v15632_v52  ;;  %4375 = vmatprep.mubr.bf16.mxu1 %v18798_v26  ;;  %4568 = vmatprep.mubr.bf16.mxu0 %v18798_v26  ;;  %v15657_v30 = vadd.f32 %v19327_v45, %v19326_v37 }
 0x2fc   :  { %v3083_v51 = vpop.f32.mrb[167].mxu1  ;;  %v15651_v43 = vpop.f32.mrb[167].mxu0  ;;  %11422 = vrcp.f32 %v4025_v29  ;;  %v3612_v5 = vadd.f32 1.0, %v11401_v23  ;;  %v10279_v22 = vmul.f32 -1.442695, %v3420_v16  ;;  %v3418_v2 = vadd.f32 %v15593_v61, %v15648_v7  ;;  %v19330_v29 = vld [vmem:[#allocation135_spill] sm:$0xff] }
 0x2fd   :  { %v11403_v54 = vpop.eup %11402  ;;  %19328 = vst [vmem:[#allocation224_spill] sm:$0xff] %v15657_v30  ;;  %v10309_v19 = vmul.f32 -1.442695, %v3414_v40  ;;  %11424 = vtanh.f32 %v3417_v42  ;;  %v10248_v38 = vmul.f32 -1.442695, %v3423_v24  ;;  %v3424_v12 = vadd.f32 %v3083_v51, %v15657_v30  ;;  %v19331_v23 = vld [vmem:[#allocation249_spill] sm:$0xff] }
 0x2fe   :  { %v11405_v8 = vpop.eup %11404  ;;  %v4154_v63 = vmul.f32 %v11403_v54, %v11399_v21  ;;  %11426 = vrcp.f32 %v3612_v5  ;;  %v15665_v16 = vadd.f32 %v19331_v23, %v19330_v29  ;;  %v19333_v21 = vld [vmem:[#allocation134_spill] sm:$0xff]  ;;  %v10310_v51 = vmul.f32 -1.442695, %v3418_v2 }
 0x2ff   :  { %v11407_v52 = vpop.eup %11406  ;;  %11428 = vpow2.f32 %v10247_v36  ;;  %v19334_v40 = vld [vmem:[#allocation250_spill] sm:$0xff]  ;;  %v4026_v54 = vadd.f32 1.0, %v11405_v8 }
 0x300   :  { %v11409_v18 = vpop.eup %11408  ;;  %v4122_v34 = vmul.f32 %v11407_v52, %v19329_v17  ;;  %19332 = vst [vmem:[#allocation77_spill] sm:$0xff] %v15665_v16  ;;  %v15669_v42 = vadd.f32 %v19334_v40, %v19333_v21  ;;  %11430 = vpow2.f32 %v10279_v22  ;;  %v10280_v52 = vmul.f32 -1.442695, %v3424_v12  ;;  %v19337_v40 = vld [vmem:[#allocation144_spill] sm:$0xff]  ;;  %v19340_v12 = vld [vmem:[#allocation193_spill] sm:$0xff] }
 0x301   :  { %v11411_v45 = vpop.eup %11410  ;;  %11432 = vpow2.f32 %v10309_v19  ;;  %v3421_v36 = vadd.f32 %v3270_v33, %v15665_v16  ;;  %v19347_v16 = vld [vmem:[#allocation255_spill] sm:$0xff] }
 0x302   :  { %19335 = vst [vmem:[#allocation235_spill] sm:$0xff] %v15669_v42  ;;  %v11413_v61 = vpop.eup %11412  ;;  %v15671_v5 = vadd.f32 %v4154_v63, %v4122_v34  ;;  %v3804_v24 = vadd.f32 1.0, %v11411_v45  ;;  %11434 = vpow2.f32 %v10248_v38  ;;  %v3422_v29 = vadd.f32 %v3272_v58, %v15669_v42  ;;  %v19338_v34 = vld [vmem:[#allocation252_spill] sm:$0xff]  ;;  %v19341_v45 = vld [vmem:[#allocation186_spill] sm:$0xff] }
 0x303   :  { %v11415_v37 = vpop.eup %11414  ;;  %v15677_v63 = vadd.f32 %v19338_v34, %v19337_v40  ;;  %v19350_v34 = vld [vmem:[#allocation257_spill] sm:$0xff] }
 0x304   :  { %19336 = vst [vmem:[#allocation149_spill] sm:$0xff] %v15671_v5  ;;  %v11417_v17 = vpop.eup %11416  ;;  %11436 = vrcp.f32 %v3804_v24  ;;  %v4247_v23 = vmul.f32 %v11415_v37, %v11397_v11  ;;  %v19342_v24 = vld [vmem:[#allocation102_spill] sm:$0xff]  ;;  %v19343_v37 = vld [vmem:[#allocation145_spill] sm:$0xff] }
 0x305   :  { %v11419_v21 = vpop.eup %11418  ;;  %11438 = vrcp.f32 %v4026_v54  ;;  %v4248_v8 = vmul.f32 %v11417_v17, %v11409_v18  ;;  %19339 = vst [vmem:[#allocation78_spill] sm:$0xff] %v15677_v63  ;;  %v19344_v54 = vld [vmem:[#allocation254_spill] sm:$0xff]  ;;  %v19346_v17 = vld [vmem:[#allocation109_spill] sm:$0xff] }
 0x306   :  { %v11421_v22 = vpop.eup %11420  ;;  %v4155_v19 = vmul.f32 %v11419_v21, %v11413_v61  ;;  %11440 = vpow2.f32 %v10310_v51  ;;  %v4279_v33 = vadd.f32 %v4247_v23, %v19341_v45  ;;  %v15686_v18 = vadd.f32 %v19344_v54, %v19343_v37  ;;  %v19349_v21 = vld [vmem:[#allocation113_spill] sm:$0xff] }
 0x307   :  { %v15679_v2 = vpop.eup %11422  ;;  %v4123_v38 = vmul.f32 %v11421_v22, %v19340_v12  ;;  %11442 = vpow2.f32 %v10280_v52  ;;  %v4280_v58 = vadd.f32 %v4248_v8, %v19342_v24  ;;  %v15690_v40 = vadd.f32 %v19347_v16, %v19346_v17 }
 0x308   :  { %v11425_v11 = vpop.eup %11424  ;;  %19345 = vst [vmem:[#allocation237_spill] sm:$0xff] %v15686_v18  ;;  %11444 = vtanh.f32 %v3421_v36  ;;  %v10311_v61 = vmul.f32 -1.442695, %v3422_v29  ;;  %v15694_v22 = vadd.f32 %v19350_v34, %v19349_v21  ;;  %v3087_v23 = vpop.f32.mrb[168].mxu1  ;;  %v19354_v34 = vld [vmem:[#allocation259_spill] sm:$0xff] }
 0x309   :  { %19348 = vst [vmem:[#allocation94_spill] sm:$0xff] %v15690_v40  ;;  %v11427_v51 = vpop.eup %11426  ;;  %v15696_v52 = vadd.f32 %v4155_v19, %v4123_v38  ;;  %v15698_v8 = vpop.f32.mrb[168].mxu0  ;;  %v4309_v12 = vpack.c.bf16 %v4280_v58, %v4279_v33  ;;  %11446 = vtanh.f32 %v15636_v39  ;;  %v3427_v16 = vadd.f32 %v3087_v23, %v15690_v40 }
 0x30a   :  { %19351 = vst [vmem:[#allocation234_spill] sm:$0xff] %v15694_v22  ;;  %v11429_v37 = vpop.eup %11428  ;;  %v4156_v54 = vmul.f32 %v11427_v51, %v11425_v11  ;;  %v3089_v17 = vpop.f32.mrb[169].mxu1  ;;  %11448 = vtanh.f32 %v15671_v5  ;;  %v3425_v19 = vadd.f32 %v15644_v57, %v15677_v63  ;;  %v3426_v38 = vadd.f32 %v15651_v43, %v15686_v18  ;;  %v19353_v51 = vld [vmem:[#allocation120_spill] sm:$0xff]  ;;  %v19356_v57 = vld [vmem:[#allocation129_spill] sm:$0xff] }
 0x30b   :  { %19352 = vst [vmem:[#allocation97_spill] sm:$0xff] %v15696_v52  ;;  %v3282_v36 = vpop.f32.mrb[169].mxu0  ;;  %v11431_v29 = vpop.eup %11430  ;;  %v3613_v30 = vadd.f32 1.0, %v11429_v37  ;;  %v3428_v33 = vadd.f32 %v3089_v17, %v15694_v22  ;;  %4376 = vmatmul.mubr.bf16.gmra.mrb[216].mxu1 %v4309_v12  ;;  %4569 = vmatmul.mubr.bf16.gmra.mrb[216].mxu0 %v4309_v12  ;;  %v15712_v23 = vadd.f32 %v19354_v34, %v19353_v51  ;;  %11450 = vpow2.f32 %v10311_v61  ;;  %v19357_v17 = vld [vmem:[#allocation162_spill] sm:$0xff] }
 0x30c   :  { %v3091_v58 = vpop.f32.mrb[170].mxu1  ;;  %v15708_v21 = vpop.f32.mrb[170].mxu0  ;;  %v3805_v40 = vadd.f32 1.0, %v11431_v29  ;;  %4385 = vmatprep.mubr.bf16.mxu1 %v18798_v26  ;;  %4578 = vmatprep.mubr.bf16.mxu0 %v18798_v26  ;;  %v15718_v22 = vadd.f32 %v19357_v17, %v19356_v57  ;;  %v10249_v12 = vmul.f32 -1.442695, %v3427_v16  ;;  %v19359_v34 = vld [vmem:[#allocation194_spill] sm:$0xff] }
 0x30d   :  { %v11433_v11 = vpop.eup %11432  ;;  %19355 = vst [vmem:[#allocation231_spill] sm:$0xff] %v15712_v23  ;;  %v3093_v37 = vpop.f32.mrb[171].mxu1  ;;  %11452 = vrcp.f32 %v3613_v30  ;;  %v10281_v51 = vmul.f32 -1.442695, %v3428_v33  ;;  %v3431_v29 = vadd.f32 %v3091_v58, %v15712_v23  ;;  %v10312_v24 = vmul.f32 -1.442695, %v3426_v38 }
 0x30e   :  { %v3286_v42 = vpop.f32.mrb[171].mxu0  ;;  %v11435_v43 = vpop.eup %11434  ;;  %19358 = vst [vmem:[#allocation107_spill] sm:$0xff] %v15718_v22  ;;  %11454 = vrcp.f32 %v3805_v40  ;;  %v3432_v39 = vadd.f32 %v3093_v37, %v15718_v22  ;;  %v19360_v57 = vld [vmem:[#allocation153_spill] sm:$0xff]  ;;  %v19361_v17 = vld [vmem:[#allocation258_spill] sm:$0xff]  ;;  %v19364_v33 = vld [vmem:[#allocation164_spill] sm:$0xff] }
 0x30f   :  { %v11437_v63 = vpop.eup %11436  ;;  %v3614_v18 = vadd.f32 1.0, %v11435_v43  ;;  %11456 = vtanh.f32 %v3425_v19  ;;  %v15725_v30 = vadd.f32 %v19361_v17, %v19360_v57  ;;  %v19365_v58 = vld [vmem:[#allocation262_spill] sm:$0xff]  ;;  %v10250_v19 = vmul.f32 -1.442695, %v3431_v29 }
 0x310   :  { %v11439_v61 = vpop.eup %11438  ;;  %v4124_v5 = vmul.f32 %v11437_v63, %v19359_v34  ;;  %v15731_v43 = vadd.f32 %v19365_v58, %v19364_v33  ;;  %v10282_v57 = vmul.f32 -1.442695, %v3432_v39 }
 0x311   :  { %v11441_v45 = vpop.eup %11440  ;;  %11458 = vrcp.f32 %v3614_v18  ;;  %19362 = vst [vmem:[#allocation236_spill] sm:$0xff] %v15725_v30  ;;  %v4027_v18 = vadd.f32 1.0, %v11433_v11  ;;  %v3430_v37 = vadd.f32 %v3282_v36, %v15725_v30  ;;  %v19370_v11 = vld [vmem:[#allocation133_spill] sm:$0xff]  ;;  %v19378_v30 = vld [vmem:[#allocation260_spill] sm:$0xff] }
 0x312   :  { %v11443_v7 = vpop.eup %11442  ;;  %v15727_v16 = vadd.f32 %v4156_v54, %v4124_v5  ;;  %11460 = vpow2.f32 %v10249_v12  ;;  %19366 = vst [vmem:[#allocation238_spill] sm:$0xff] %v15731_v43  ;;  %v3434_v5 = vadd.f32 %v3286_v42, %v15731_v43  ;;  %v4028_v12 = vadd.f32 1.0, %v11441_v45  ;;  %v19372_v42 = vld [vmem:[#allocation191_spill] sm:$0xff]  ;;  %v19377_v43 = vld [vmem:[#allocation174_spill] sm:$0xff] }
 0x313   :  { %v11445_v40 = vpop.eup %11444  ;;  %v3806_v63 = vadd.f32 1.0, %v11443_v7  ;;  %11462 = vpow2.f32 %v10281_v51  ;;  %v19367_v7 = vld [vmem:[#allocation155_spill] sm:$0xff]  ;;  %v19368_v51 = vld [vmem:[#allocation256_spill] sm:$0xff]  ;;  %v10313_v39 = vmul.f32 -1.442695, %v3430_v37  ;;  %v15758_v22 = vadd.f32 %v19378_v30, %v19377_v43 }
 0x314   :  { %19363 = vst [vmem:[#allocation100_spill] sm:$0xff] %v15727_v16  ;;  %v11447_v38 = vpop.eup %11446  ;;  %11464 = vpow2.f32 %v10312_v24  ;;  %v15739_v29 = vadd.f32 %v19368_v51, %v19367_v7  ;;  %v15743_v24 = vadd.f32 %v15023_v13, %v19370_v11  ;;  %v10314_v7 = vmul.f32 -1.442695, %v3434_v5  ;;  %v19376_v13 = vld [vmem:[#allocation199_spill] sm:$0xff] }
 0x315   :  { %v11449_v34 = vpop.eup %11448  ;;  %11466 = vrcp.f32 %v3806_v63  ;;  %v4249_v54 = vmul.f32 %v11447_v38, %v15679_v2  ;;  %v19373_v2 = vld [vmem:[#allocation121_spill] sm:$0xff]  ;;  %19379 = vst [vmem:[#allocation242_spill] sm:$0xff] %v15758_v22  ;;  %v3433_v43 = vadd.f32 %v15708_v21, %v15758_v22 }
 0x316   :  { %v4250_v17 = vmul.f32 %v11449_v34, %v11439_v61  ;;  %11468 = vtanh.f32 %v15696_v52  ;;  %v11451_v33 = vpop.eup %11450  ;;  %19369 = vst [vmem:[#allocation80_spill] sm:$0xff] %v15739_v29  ;;  %19371 = vst [vmem:[#allocation239_spill] sm:$0xff] %v15743_v24  ;;  %v19374_v63 = vld [vmem:[#allocation137_spill] sm:$0xff]  ;;  %v19472_v52 = vld [vmem:[#allocation198_spill] sm:$0xff] }
 0x317   :  { %11470 = vpow2.f32 %v10250_v19  ;;  %v11453_v36 = vpop.eup %11452  ;;  %v4281_v58 = vadd.f32 %v4249_v54, %v19372_v42  ;;  %v15749_v38 = vadd.f32 %v15029_v41, %v19374_v63  ;;  %v3429_v19 = vadd.f32 %v15698_v8, %v15739_v29  ;;  %v19454_v29 = vld [vmem:[#allocation192_spill] sm:$0xff] }
 0x318   :  { %11472 = vrcp.f32 %v4027_v18  ;;  %v4282_v45 = vadd.f32 %v4250_v17, %v19373_v2  ;;  %v11455_v61 = vpop.eup %11454  ;;  %v4157_v34 = vmul.f32 %v11453_v36, %v11445_v40  ;;  %v3097_v18 = vpop.f32.mrb[172].mxu1  ;;  %v4029_v22 = vadd.f32 1.0, %v11451_v33 }
 0x319   :  { %19375 = vst [vmem:[#allocation83_spill] sm:$0xff] %v15749_v38  ;;  %11474 = vpow2.f32 %v10282_v57  ;;  %v11457_v51 = vpop.eup %11456  ;;  %v4125_v11 = vmul.f32 %v11455_v61, %v19376_v13  ;;  %v15754_v37 = vpop.f32.mrb[172].mxu0  ;;  %v3435_v41 = vadd.f32 %v3097_v18, %v15743_v24  ;;  %v19387_v24 = vld [vmem:[#allocation200_spill] sm:$0xff] }
 0x31a   :  { %11476 = vrcp.f32 %v4028_v12  ;;  %v4310_v54 = vpack.c.bf16 %v4282_v45, %v4281_v58  ;;  %v3099_v40 = vpop.f32.mrb[173].mxu1  ;;  %v3292_v57 = vpop.f32.mrb[173].mxu0 }
 0x31b   :  { %v11459_v17 = vpop.eup %11458  ;;  %11478 = vtanh.f32 %v15727_v16  ;;  %v15762_v12 = vadd.f32 %v4157_v34, %v4125_v11  ;;  %v3436_v8 = vadd.f32 %v3099_v40, %v15749_v38  ;;  %v3101_v61 = vpop.f32.mrb[174].mxu1  ;;  %v10251_v18 = vmul.f32 -1.442695, %v3435_v41  ;;  %v19383_v40 = vld [vmem:[#allocation178_spill] sm:$0xff] }
 0x31c   :  { %v11461_v5 = vpop.eup %11460  ;;  %v4158_v36 = vmul.f32 %v11459_v17, %v11457_v51  ;;  %11480 = vpow2.f32 %v10313_v39  ;;  %v15765_v58 = vpop.f32.mrb[174].mxu0  ;;  %4386 = vmatmul.mubr.bf16.gmra.mrb[220].mxu1 %v4310_v54  ;;  %4579 = vmatmul.mubr.bf16.gmra.mrb[220].mxu0 %v4310_v54  ;;  %v19381_v51 = vld [vmem:[#allocation140_spill] sm:$0xff]  ;;  %v15777_v21 = vadd.f32 %v15031_v25, %v19383_v40 }
 0x31d   :  { %19380 = vst [vmem:[#allocation85_spill] sm:$0xff] %v15762_v12  ;;  %v11463_v45 = vpop.eup %11462  ;;  %v3615_v30 = vadd.f32 1.0, %v11461_v5  ;;  %11482 = vpow2.f32 %v10314_v7  ;;  %v3103_v63 = vpop.f32.mrb[175].mxu1  ;;  %4395 = vmatprep.mubr.bf16.mxu1 %v18798_v26  ;;  %v15772_v39 = vadd.f32 %v15037_v62, %v19381_v51  ;;  %4588 = vmatprep.mubr.bf16.mxu0 %v18798_v26  ;;  %v10283_v7 = vmul.f32 -1.442695, %v3436_v8  ;;  %v19385_v5 = vld [vmem:[#allocation147_spill] sm:$0xff] }
 0x31e   :  { %v3296_v13 = vpop.f32.mrb[175].mxu0  ;;  %v11465_v34 = vpop.eup %11464  ;;  %11484 = vtanh.f32 %v3429_v19  ;;  %v3807_v11 = vadd.f32 1.0, %v11463_v45  ;;  %19384 = vst [vmem:[#allocation168_spill] sm:$0xff] %v15777_v21  ;;  %v15781_v38 = vadd.f32 %v15047_v9, %v19385_v5  ;;  %v19388_v45 = vld [vmem:[#allocation117_spill] sm:$0xff]  ;;  %v3438_v25 = vadd.f32 %v3292_v57, %v15777_v21 }
 0x31f   :  { %19382 = vst [vmem:[#allocation89_spill] sm:$0xff] %v15772_v39  ;;  %v11467_v17 = vpop.eup %11466  ;;  %11486 = vrcp.f32 %v3615_v30  ;;  %v3439_v19 = vadd.f32 %v3101_v61, %v15772_v39  ;;  %v15787_v51 = vadd.f32 %v15049_v55, %v19388_v45 }
 0x320   :  { %v11469_v54 = vpop.eup %11468  ;;  %19386 = vst [vmem:[#allocation171_spill] sm:$0xff] %v15781_v38  ;;  %v4126_v62 = vmul.f32 %v11467_v17, %v19387_v24  ;;  %11488 = vrcp.f32 %v3807_v11  ;;  %v3440_v9 = vadd.f32 %v3103_v63, %v15781_v38  ;;  %v4030_v11 = vadd.f32 1.0, %v11465_v34  ;;  %v19407_v38 = vld [vmem:[#allocation158_spill] sm:$0xff] }
 0x321   :  { %v11471_v41 = vpop.eup %11470  ;;  %19389 = vst [vmem:[#allocation125_spill] sm:$0xff] %v15787_v51  ;;  %11490 = vtanh.f32 %v3433_v43  ;;  %v3442_v61 = vadd.f32 %v3296_v13, %v15787_v51  ;;  %v10252_v5 = vmul.f32 -1.442695, %v3439_v19  ;;  %v10315_v57 = vmul.f32 -1.442695, %v3438_v25 }
 0x322   :  { %v11473_v8 = vpop.eup %11472  ;;  %v15790_v30 = vadd.f32 %v4158_v36, %v4126_v62  ;;  %v3616_v40 = vadd.f32 1.0, %v11471_v41  ;;  %11492 = vpow2.f32 %v10251_v18  ;;  %v19391_v36 = vld [vmem:[#allocation84_spill] sm:$0xff]  ;;  %v10284_v63 = vmul.f32 -1.442695, %v3440_v9  ;;  %v19398_v9 = vld [vmem:[#allocation271_spill] sm:$0xff] }
 0x323   :  { %v11475_v24 = vpop.eup %11474  ;;  %11494 = vpow2.f32 %v10283_v7  ;;  %v4251_v33 = vmul.f32 %v11473_v8, %v11469_v54  ;;  %v15796_v62 = vadd.f32 %v15025_v56, %v19391_v36  ;;  %v19393_v7 = vld [vmem:[#allocation151_spill] sm:$0xff]  ;;  %v10316_v41 = vmul.f32 -1.442695, %v3442_v61  ;;  %v19395_v54 = vld [vmem:[#allocation197_spill] sm:$0xff] }
 0x324   :  { %19390 = vst [vmem:[#allocation240_spill] sm:$0xff] %v15790_v30  ;;  %v11477_v17 = vpop.eup %11476  ;;  %11496 = vrcp.f32 %v3616_v40  ;;  %v3808_v55 = vadd.f32 1.0, %v11475_v24  ;;  %v15800_v13 = vadd.f32 %v15079_v0, %v19393_v7  ;;  %v19396_v8 = vld [vmem:[#allocation105_spill] sm:$0xff]  ;;  %v19397_v24 = vld [vmem:[#allocation156_spill] sm:$0xff] }
 0x325   :  { %v11479_v43 = vpop.eup %11478  ;;  %11498 = vrcp.f32 %v4029_v22  ;;  %19392 = vst [vmem:[#allocation111_spill] sm:$0xff] %v15796_v62  ;;  %v3437_v22 = vadd.f32 %v15754_v37, %v15796_v62  ;;  %v4283_v25 = vadd.f32 %v4251_v33, %v19395_v54  ;;  %v19404_v62 = vld [vmem:[#allocation266_spill] sm:$0xff]  ;;  %v19470_v54 = vld [vmem:[#allocation296_spill] sm:$0xff] }
 0x326   :  { %v11481_v45 = vpop.eup %11480  ;;  %11500 = vrcp.f32 %v3808_v55  ;;  %v4252_v18 = vmul.f32 %v11479_v43, %v11477_v17  ;;  %19394 = vst [vmem:[#allocation243_spill] sm:$0xff] %v15800_v13  ;;  %v15808_v17 = vadd.f32 %v19398_v9, %v19397_v24  ;;  %v19400_v55 = vld [vmem:[#allocation92_spill] sm:$0xff] }
 0x327   :  { %v11483_v34 = vpop.eup %11482  ;;  %11502 = vrcp.f32 %v4030_v11  ;;  %v19401_v43 = vld [vmem:[#allocation272_spill] sm:$0xff]  ;;  %v4031_v11 = vadd.f32 1.0, %v11481_v45 }
 0x328   :  { %v11485_v19 = vpop.eup %11484  ;;  %11504 = vpow2.f32 %v10252_v5  ;;  %v4284_v56 = vadd.f32 %v4252_v18, %v19396_v8  ;;  %19399 = vst [vmem:[#allocation131_spill] sm:$0xff] %v15808_v17  ;;  %v15812_v0 = vadd.f32 %v19401_v43, %v19400_v55  ;;  %v4032_v7 = vadd.f32 1.0, %v11483_v34  ;;  %v3107_v37 = vpop.f32.mrb[176].mxu1  ;;  %v19403_v18 = vld [vmem:[#allocation106_spill] sm:$0xff]  ;;  %v19406_v24 = vld [vmem:[#allocation208_spill] sm:$0xff] }
 0x329   :  { %v11487_v40 = vpop.eup %11486  ;;  %11506 = vpow2.f32 %v10315_v57  ;;  %v3300_v5 = vpop.f32.mrb[176].mxu0  ;;  %v15816_v21 = vadd.f32 %v19404_v62, %v19403_v18  ;;  %v3443_v55 = vadd.f32 %v3107_v37, %v15800_v13  ;;  %v19469_v8 = vld [vmem:[#allocation128_spill] sm:$0xff] }
 0x32a   :  { %19402 = vst [vmem:[#allocation244_spill] sm:$0xff] %v15812_v0  ;;  %v11489_v61 = vpop.eup %11488  ;;  %v4159_v36 = vmul.f32 %v11487_v40, %v11485_v19  ;;  %11508 = vpow2.f32 %v10284_v63  ;;  %v4311_v33 = vpack.c.bf16 %v4284_v56, %v4283_v25  ;;  %v3109_v43 = vpop.f32.mrb[177].mxu1  ;;  %v19408_v19 = vld [vmem:[#allocation180_spill] sm:$0xff]  ;;  %v16007_v2 = vadd.f32 %v19470_v54, %v19469_v8 }
 0x32b   :  { %v11491_v51 = vpop.eup %11490  ;;  %19405 = vst [vmem:[#allocation90_spill] sm:$0xff] %v15816_v21  ;;  %v4127_v9 = vmul.f32 %v11489_v61, %v19406_v24  ;;  %11510 = vpow2.f32 %v10316_v41  ;;  %v3302_v45 = vpop.f32.mrb[177].mxu0  ;;  %v15822_v34 = vadd.f32 %v19408_v19, %v19407_v38  ;;  %v3444_v63 = vadd.f32 %v3109_v43, %v15808_v17  ;;  %v19413_v17 = vld [vmem:[#allocation91_spill] sm:$0xff] }
 0x32c   :  { %v11493_v57 = vpop.eup %11492  ;;  %11512 = vtanh.f32 %v3437_v22  ;;  %v3446_v25 = vadd.f32 %v3302_v45, %v15812_v0  ;;  %v3111_v56 = vpop.f32.mrb[178].mxu1  ;;  %4396 = vmatmul.mubr.bf16.gmra.mrb[224].mxu1 %v4311_v33  ;;  %4589 = vmatmul.mubr.bf16.gmra.mrb[224].mxu0 %v4311_v33  ;;  %v10253_v37 = vmul.f32 -1.442695, %v3443_v55  ;;  %v3441_v43 = vadd.f32 %v15765_v58, %v15816_v21  ;;  %v19410_v55 = vld [vmem:[#allocation169_spill] sm:$0xff]  ;;  %v19429_v21 = vld [vmem:[#allocation187_spill] sm:$0xff]  ;;  %19471 = vst [vmem:[#allocation259_spill] sm:$0xff] %v16007_v2 }
 0x32d   :  { %19409 = vst [vmem:[#allocation98_spill] sm:$0xff] %v15822_v34  ;;  %v15826_v62 = vpop.f32.mrb[178].mxu0  ;;  %v11495_v41 = vpop.eup %11494  ;;  %v15828_v40 = vadd.f32 %v4159_v36, %v4127_v9  ;;  %11514 = vrcp.f32 %v4031_v11  ;;  %v3617_v61 = vadd.f32 1.0, %v11493_v57  ;;  %4405 = vmatprep.mubr.bf16.mxu1 %v18798_v26  ;;  %4598 = vmatprep.mubr.bf16.mxu0 %v18798_v26  ;;  %v3447_v33 = vadd.f32 %v3111_v56, %v15822_v34  ;;  %v19414_v56 = vld [vmem:[#allocation170_spill] sm:$0xff] }
 0x32e   :  { %v3113_v18 = vpop.f32.mrb[179].mxu1  ;;  %v3306_v24 = vpop.f32.mrb[179].mxu0  ;;  %11516 = vrcp.f32 %v4032_v7  ;;  %v3809_v22 = vadd.f32 1.0, %v11495_v41  ;;  %v10285_v11 = vmul.f32 -1.442695, %v3444_v63  ;;  %v15839_v57 = vadd.f32 %v15116_v31, %v19410_v55  ;;  %v19412_v7 = vld [vmem:[#allocation209_spill] sm:$0xff] }
 0x32f   :  { %v11497_v38 = vpop.eup %11496  ;;  %11518 = vrcp.f32 %v3617_v61  ;;  %v10317_v19 = vmul.f32 -1.442695, %v3446_v25  ;;  %v15846_v34 = vadd.f32 %v19414_v56, %v19413_v17 }
 0x330   :  { %v15835_v45 = vpop.eup %11498  ;;  %v4160_v36 = vmul.f32 %v11497_v38, %v11491_v51  ;;  %19411 = vst [vmem:[#allocation110_spill] sm:$0xff] %v15839_v57  ;;  %11520 = vrcp.f32 %v3809_v22  ;;  %v10254_v51 = vmul.f32 -1.442695, %v3447_v33  ;;  %v3448_v63 = vadd.f32 %v3113_v18, %v15839_v57  ;;  %v19416_v38 = vld [vmem:[#allocation96_spill] sm:$0xff] }
 0x331   :  { %v11501_v9 = vpop.eup %11500  ;;  %11522 = vpow2.f32 %v10253_v37  ;;  %19415 = vst [vmem:[#allocation99_spill] sm:$0xff] %v15846_v34  ;;  %v15851_v31 = vadd.f32 %v15118_v53, %v19416_v38  ;;  %v3445_v17 = vadd.f32 %v3300_v5, %v15846_v34  ;;  %v19421_v5 = vld [vmem:[#allocation95_spill] sm:$0xff]  ;;  %v19422_v38 = vld [vmem:[#allocation274_spill] sm:$0xff] }
 0x332   :  { %v15841_v0 = vpop.eup %11502  ;;  %v4128_v41 = vmul.f32 %v11501_v9, %v19412_v7  ;;  %11524 = vtanh.f32 %v3441_v43  ;;  %v10286_v18 = vmul.f32 -1.442695, %v3448_v63 }
 0x333   :  { %v11505_v58 = vpop.eup %11504  ;;  %19417 = vst [vmem:[#allocation251_spill] sm:$0xff] %v15851_v31  ;;  %11526 = vpow2.f32 %v10285_v11  ;;  %v3450_v43 = vadd.f32 %v3306_v24, %v15851_v31  ;;  %v19419_v11 = vld [vmem:[#allocation276_spill] sm:$0xff]  ;;  %v15868_v24 = vadd.f32 %v19422_v38, %v19421_v5  ;;  %v19426_v31 = vld [vmem:[#allocation101_spill] sm:$0xff] }
 0x334   :  { %v11507_v61 = vpop.eup %11506  ;;  %v15853_v25 = vadd.f32 %v4160_v36, %v4128_v41  ;;  %v3618_v22 = vadd.f32 1.0, %v11505_v58  ;;  %11528 = vpow2.f32 %v10317_v19  ;;  %v19418_v41 = vld [vmem:[#allocation175_spill] sm:$0xff] }
 0x335   :  { %v11509_v9 = vpop.eup %11508  ;;  %v4033_v53 = vadd.f32 1.0, %v11507_v61  ;;  %v15863_v58 = vadd.f32 %v19419_v11, %v19418_v41  ;;  %19423 = vst [vmem:[#allocation245_spill] sm:$0xff] %v15868_v24  ;;  %v10318_v61 = vmul.f32 -1.442695, %v3450_v43  ;;  %v19427_v41 = vld [vmem:[#allocation277_spill] sm:$0xff] }
 0x336   :  { %v11511_v37 = vpop.eup %11510  ;;  %11530 = vrcp.f32 %v3618_v22  ;;  %v3810_v55 = vadd.f32 1.0, %v11509_v9  ;;  %v15876_v11 = vadd.f32 %v19427_v41, %v19426_v31 }
 0x337   :  { %v11513_v33 = vpop.eup %11512  ;;  %11532 = vpow2.f32 %v10254_v51  ;;  %19420 = vst [vmem:[#allocation126_spill] sm:$0xff] %v15863_v58  ;;  %v4034_v19 = vadd.f32 1.0, %v11511_v37  ;;  %v19424_v51 = vld [vmem:[#allocation118_spill] sm:$0xff]  ;;  %v3117_v22 = vpop.f32.mrb[180].mxu1 }
 0x338   :  { %v15857_v7 = vpop.eup %11514  ;;  %11534 = vrcp.f32 %v3810_v55  ;;  %v15872_v63 = vadd.f32 %v15153_v46, %v19424_v51  ;;  %v3310_v9 = vpop.f32.mrb[180].mxu0  ;;  %19428 = vst [vmem:[#allocation253_spill] sm:$0xff] %v15876_v11  ;;  %v3451_v57 = vadd.f32 %v3117_v22, %v15863_v58  ;;  %v15881_v46 = vadd.f32 %v15163_v14, %v19429_v21 }
 0x339   :  { %v15859_v36 = vpop.eup %11516  ;;  %11536 = vtanh.f32 %v15762_v12  ;;  %v3119_v34 = vpop.f32.mrb[181].mxu1  ;;  %v19437_v12 = vld [vmem:[#allocation108_spill] sm:$0xff] }
 0x33a   :  { %v11519_v56 = vpop.eup %11518  ;;  %19425 = vst [vmem:[#allocation104_spill] sm:$0xff] %v15872_v63  ;;  %11538 = vtanh.f32 %v3445_v17  ;;  %v3312_v5 = vpop.f32.mrb[181].mxu0  ;;  %19430 = vst [vmem:[#allocation87_spill] sm:$0xff] %v15881_v46  ;;  %v19431_v17 = vld [vmem:[#allocation228_spill] sm:$0xff]  ;;  %v3452_v51 = vadd.f32 %v3119_v34, %v15872_v63  ;;  %v10255_v22 = vmul.f32 -1.442695, %v3451_v57 }
 0x33b   :  { %v11521_v55 = vpop.eup %11520  ;;  %v4161_v37 = vmul.f32 %v11519_v56, %v11513_v33  ;;  %11540 = vpow2.f32 %v10286_v18  ;;  %v3121_v13 = vpop.f32.mrb[182].mxu1  ;;  %v19432_v33 = vld [vmem:[#allocation103_spill] sm:$0xff] }
 0x33c   :  { %v11523_v38 = vpop.eup %11522  ;;  %v4129_v43 = vmul.f32 %v11521_v55, %v19431_v17  ;;  %11542 = vrcp.f32 %v4033_v53  ;;  %v15885_v39 = vpop.f32.mrb[182].mxu0  ;;  %v15889_v18 = vadd.f32 %v15155_v4, %v19432_v33  ;;  %v3449_v53 = vadd.f32 %v15826_v62, %v15868_v24  ;;  %v19435_v57 = vld [vmem:[#allocation283_spill] sm:$0xff]  ;;  %v19448_v24 = vld [vmem:[#allocation112_spill] sm:$0xff] }
 0x33d   :  { %v11525_v31 = vpop.eup %11524  ;;  %11544 = vrcp.f32 %v4034_v19  ;;  %v3619_v56 = vadd.f32 1.0, %v11523_v38  ;;  %v3123_v41 = vpop.f32.mrb[183].mxu1  ;;  %v3455_v34 = vadd.f32 %v3121_v13, %v15881_v46  ;;  %v10287_v63 = vmul.f32 -1.442695, %v3452_v51  ;;  %v19434_v38 = vld [vmem:[#allocation86_spill] sm:$0xff] }
 0x33e   :  { %19433 = vst [vmem:[#allocation135_spill] sm:$0xff] %v15889_v18  ;;  %v3316_v58 = vpop.f32.mrb[183].mxu0  ;;  %v11527_v14 = vpop.eup %11526  ;;  %v15891_v21 = vadd.f32 %v4161_v37, %v4129_v43  ;;  %11546 = vpow2.f32 %v10318_v61  ;;  %v3454_v4 = vadd.f32 %v3312_v5, %v15889_v18  ;;  %v15899_v33 = vadd.f32 %v19435_v57, %v19434_v38  ;;  %v19438_v37 = vld [vmem:[#allocation284_spill] sm:$0xff]  ;;  %v19440_v61 = vld [vmem:[#allocation122_spill] sm:$0xff] }
 0x33f   :  { %v11529_v55 = vpop.eup %11528  ;;  %11548 = vrcp.f32 %v3619_v56  ;;  %v3811_v17 = vadd.f32 1.0, %v11527_v14  ;;  %v15903_v43 = vadd.f32 %v19438_v37, %v19437_v12  ;;  %v15907_v13 = vadd.f32 %v15201_v28, %v19440_v61  ;;  %v19442_v12 = vld [vmem:[#allocation229_spill] sm:$0xff] }
 0x340   :  { %v11531_v19 = vpop.eup %11530  ;;  %19436 = vst [vmem:[#allocation249_spill] sm:$0xff] %v15899_v33  ;;  %11550 = vpow2.f32 %v10255_v22  ;;  %v3453_v51 = vadd.f32 %v3310_v9, %v15876_v11  ;;  %v10256_v46 = vmul.f32 -1.442695, %v3455_v34  ;;  %v3456_v38 = vadd.f32 %v3123_v41, %v15899_v33  ;;  %v3127_v28 = vpop.f32.mrb[184].mxu1  ;;  %v19443_v34 = vld [vmem:[#allocation189_spill] sm:$0xff] }
 0x341   :  { %19439 = vst [vmem:[#allocation134_spill] sm:$0xff] %v15903_v43  ;;  %v11533_v62 = vpop.eup %11532  ;;  %19441 = vst [vmem:[#allocation250_spill] sm:$0xff] %v15907_v13  ;;  %v4162_v56 = vmul.f32 %v11531_v19, %v11525_v31  ;;  %11552 = vrcp.f32 %v3811_v17  ;;  %v10319_v22 = vmul.f32 -1.442695, %v3454_v4  ;;  %v3458_v18 = vadd.f32 %v3316_v58, %v15903_v43  ;;  %v3320_v61 = vpop.f32.mrb[184].mxu0 }
 0x342   :  { %v11535_v5 = vpop.eup %11534  ;;  %v3620_v14 = vadd.f32 1.0, %v11533_v62  ;;  %11554 = vtanh.f32 %v3449_v53  ;;  %v3459_v9 = vadd.f32 %v3127_v28, %v15907_v13  ;;  %v3129_v17 = vpop.f32.mrb[185].mxu1  ;;  %v15918_v41 = vadd.f32 %v15209_v1, %v19443_v34 }
 0x343   :  { %v15911_v57 = vpop.eup %11536  ;;  %v4130_v37 = vmul.f32 %v11535_v5, %v19442_v12  ;;  %11556 = vpow2.f32 %v10287_v63  ;;  %v3322_v19 = vpop.f32.mrb[185].mxu0  ;;  %v4035_v5 = vadd.f32 1.0, %v11529_v55  ;;  %v10320_v33 = vmul.f32 -1.442695, %v3458_v18  ;;  %v19446_v55 = vld [vmem:[#allocation281_spill] sm:$0xff] }
 0x344   :  { %v11539_v31 = vpop.eup %11538  ;;  %11558 = vrcp.f32 %v3620_v14  ;;  %19444 = vst [vmem:[#allocation144_spill] sm:$0xff] %v15918_v41  ;;  %v3131_v63 = vpop.f32.mrb[186].mxu1  ;;  %v10288_v14 = vmul.f32 -1.442695, %v3456_v38  ;;  %v3460_v1 = vadd.f32 %v3129_v17, %v15918_v41  ;;  %v10257_v34 = vmul.f32 -1.442695, %v3459_v9 }
 0x345   :  { %v11541_v53 = vpop.eup %11540  ;;  %v15920_v62 = vadd.f32 %v4162_v56, %v4130_v37  ;;  %11560 = vtanh.f32 %v3453_v51  ;;  %v15922_v4 = vpop.f32.mrb[186].mxu0  ;;  %v19445_v37 = vld [vmem:[#allocation139_spill] sm:$0xff] }
 0x346   :  { %v15924_v58 = vpop.eup %11542  ;;  %v3812_v12 = vadd.f32 1.0, %v11541_v53  ;;  %11562 = vpow2.f32 %v10256_v46  ;;  %v3133_v28 = vpop.f32.mrb[187].mxu1  ;;  %v15931_v51 = vadd.f32 %v19446_v55, %v19445_v37  ;;  %v15935_v46 = vadd.f32 %v15203_v35, %v19448_v24  ;;  %v19450_v53 = vld [vmem:[#allocation190_spill] sm:$0xff] }
 0x347   :  { %v3326_v13 = vpop.f32.mrb[187].mxu0  ;;  %v15926_v43 = vpop.eup %11544  ;;  %11564 = vpow2.f32 %v10319_v22  ;;  %v15939_v22 = vadd.f32 %v15216_v48, %v19450_v53  ;;  %v19452_v55 = vld [vmem:[#allocation114_spill] sm:$0xff]  ;;  %v10289_v35 = vmul.f32 -1.442695, %v3460_v1  ;;  %v15951_v48 = vadd.f32 %v15221_v59, %v19454_v29 }
 0x348   :  { %v11547_v56 = vpop.eup %11546  ;;  %19447 = vst [vmem:[#allocation252_spill] sm:$0xff] %v15931_v51  ;;  %11566 = vrcp.f32 %v3812_v12  ;;  %19449 = vst [vmem:[#allocation193_spill] sm:$0xff] %v15935_v46  ;;  %v3457_v17 = vadd.f32 %v15885_v39, %v15931_v51  ;;  %v15945_v9 = vadd.f32 %v15211_v6, %v19452_v55  ;;  %v3137_v24 = vpop.f32.mrb[188].mxu1 }
 0x349   :  { %v11549_v11 = vpop.eup %11548  ;;  %11568 = vrcp.f32 %v4035_v5  ;;  %19451 = vst [vmem:[#allocation145_spill] sm:$0xff] %v15939_v22  ;;  %v15947_v5 = vpop.f32.mrb[188].mxu0  ;;  %19455 = vst [vmem:[#allocation109_spill] sm:$0xff] %v15951_v48  ;;  %v3463_v39 = vadd.f32 %v3131_v63, %v15939_v22  ;;  %v3464_v63 = vadd.f32 %v3133_v28, %v15951_v48 }
 0x34a   :  { %v11551_v38 = vpop.eup %11550  ;;  %v4163_v18 = vmul.f32 %v11549_v11, %v11539_v31  ;;  %11570 = vpow2.f32 %v10288_v14  ;;  %19453 = vst [vmem:[#allocation254_spill] sm:$0xff] %v15945_v9  ;;  %v19456_v11 = vld [vmem:[#allocation247_spill] sm:$0xff]  ;;  %v3139_v14 = vpop.f32.mrb[189].mxu1  ;;  %v3462_v1 = vadd.f32 %v3322_v19, %v15945_v9 }
 0x34b   :  { %v11553_v37 = vpop.eup %11552  ;;  %v3621_v12 = vadd.f32 1.0, %v11551_v38  ;;  %11572 = vpow2.f32 %v10320_v33  ;;  %v15955_v53 = vpop.f32.mrb[189].mxu0  ;;  %v4036_v38 = vadd.f32 1.0, %v11547_v56  ;;  %v3461_v33 = vadd.f32 %v3320_v61, %v15935_v46  ;;  %v19457_v19 = vld [vmem:[#allocation119_spill] sm:$0xff] }
 0x34c   :  { %v11555_v41 = vpop.eup %11554  ;;  %v4131_v31 = vmul.f32 %v11553_v37, %v19456_v11  ;;  %11574 = vpow2.f32 %v10257_v34  ;;  %v15959_v55 = vpop.f32.mrb[190].mxu1  ;;  %v15972_v46 = vadd.f32 %v15223_v15, %v19457_v19  ;;  %v10258_v22 = vmul.f32 -1.442695, %v3463_v39 }
 0x34d   :  { %v11557_v6 = vpop.eup %11556  ;;  %11576 = vrcp.f32 %v3621_v12  ;;  %v15961_v51 = vpop.f32.mrb[190].mxu0  ;;  %v10321_v48 = vmul.f32 -1.442695, %v3462_v1  ;;  %v10290_v23 = vmul.f32 -1.442695, %v3464_v63 }
 0x34e   :  { %v11559_v59 = vpop.eup %11558  ;;  %v15963_v29 = vadd.f32 %v4163_v18, %v4131_v31  ;;  %v3813_v34 = vadd.f32 1.0, %v11557_v6  ;;  %11578 = vtanh.f32 %v3457_v17  ;;  %v15966_v37 = vpop.f32.mrb[191].mxu1  ;;  %19458 = vst [vmem:[#allocation255_spill] sm:$0xff] %v15972_v46  ;;  %v19459_v31 = vld [vmem:[#allocation195_spill] sm:$0xff]  ;;  %v19460_v6 = vld [vmem:[#allocation290_spill] sm:$0xff] }
 0x34f   :  { %v15968_v11 = vpop.f32.mrb[191].mxu0  ;;  %v11561_v56 = vpop.eup %11560  ;;  %v4164_v12 = vmul.f32 %v11559_v59, %v11555_v41  ;;  %11580 = vpow2.f32 %v10289_v35  ;;  %v15976_v17 = vadd.f32 %v19460_v6, %v19459_v31  ;;  %v3466_v41 = vadd.f32 %v3326_v13, %v15972_v46  ;;  %v19462_v59 = vld [vmem:[#allocation248_spill] sm:$0xff] }
 0x350   :  { %v11563_v61 = vpop.eup %11562  ;;  %11582 = vrcp.f32 %v3813_v34  ;;  %v15983_v34 = vpop.f32.mrb[192].mxu1  ;;  %v19463_v13 = vld [vmem:[#allocation196_spill] sm:$0xff] }
 0x351   :  { %v11565_v18 = vpop.eup %11564  ;;  %19461 = vst [vmem:[#allocation113_spill] sm:$0xff] %v15976_v17  ;;  %11584 = vrcp.f32 %v4036_v38  ;;  %v3622_v28 = vadd.f32 1.0, %v11563_v61  ;;  %v3467_v39 = vadd.f32 %v3137_v24, %v15976_v17  ;;  %v15985_v19 = vpop.f32.mrb[192].mxu0  ;;  %v19464_v61 = vld [vmem:[#allocation295_spill] sm:$0xff] }
 0x352   :  { %v11567_v9 = vpop.eup %11566  ;;  %11586 = vtanh.f32 %v3461_v33  ;;  %v4037_v38 = vadd.f32 1.0, %v11565_v18  ;;  %v15987_v1 = vpop.f32.mrb[193].mxu1  ;;  %v15993_v6 = vadd.f32 %v19464_v61, %v19463_v13  ;;  %v19466_v18 = vld [vmem:[#allocation116_spill] sm:$0xff]  ;;  %v10322_v13 = vmul.f32 -1.442695, %v3466_v41 }
 0x353   :  { %v15979_v35 = vpop.eup %11568  ;;  %v4132_v15 = vmul.f32 %v11567_v9, %v19462_v59  ;;  %11588 = vrcp.f32 %v3622_v28  ;;  %v15989_v33 = vpop.f32.mrb[193].mxu0 }
 0x354   :  { %v11571_v31 = vpop.eup %11570  ;;  %11590 = vpow2.f32 %v10258_v22  ;;  %19465 = vst [vmem:[#allocation257_spill] sm:$0xff] %v15993_v6  ;;  %v15997_v24 = vpop.f32.mrb[194].mxu1  ;;  %v19467_v22 = vld [vmem:[#allocation288_spill] sm:$0xff]  ;;  %v3468_v42 = vadd.f32 %v3139_v14, %v15993_v6 }
 0x355   :  { %v11573_v63 = vpop.eup %11572  ;;  %v15995_v9 = vadd.f32 %v4164_v12, %v4132_v15  ;;  %v3814_v28 = vadd.f32 1.0, %v11571_v31  ;;  %11592 = vpow2.f32 %v10321_v48  ;;  %v15999_v59 = vpop.f32.mrb[194].mxu0  ;;  %v16003_v46 = vadd.f32 %v19467_v22, %v19466_v18 }
 0x356   :  { %v11575_v17 = vpop.eup %11574  ;;  %11594 = vpow2.f32 %v10290_v23  ;;  %v16009_v61 = vpop.f32.mrb[195].mxu1  ;;  %v10259_v31 = vmul.f32 -1.442695, %v3467_v39  ;;  %v16016_v18 = vadd.f32 %v15253_v27, %v19472_v52  ;;  %v3470_v23 = vadd.f32 %v15955_v53, %v16007_v2  ;;  %v19474_v27 = vld [vmem:[#allocation142_spill] sm:$0xff] }
 0x357   :  { %19468 = vst [vmem:[#allocation120_spill] sm:$0xff] %v16003_v46  ;;  %v16011_v12 = vpop.f32.mrb[195].mxu0  ;;  %v11577_v48 = vpop.eup %11576  ;;  %11596 = vrcp.f32 %v3814_v28  ;;  %v3623_v15 = vadd.f32 1.0, %v11575_v17  ;;  %v3465_v8 = vadd.f32 %v15922_v4, %v16003_v46  ;;  %v4038_v17 = vadd.f32 1.0, %v11573_v63 }
 0x358   :  { %v11579_v16 = vpop.eup %11578  ;;  %19473 = vst [vmem:[#allocation129_spill] sm:$0xff] %v16016_v18  ;;  %v4165_v22 = vmul.f32 %v11577_v48, %v11561_v56  ;;  %11598 = vrcp.f32 %v4037_v38  ;;  %v3471_v14 = vadd.f32 %v15959_v55, %v16016_v18  ;;  %v16028_v52 = vadd.f32 %v15258_v47, %v19474_v27  ;;  %v19476_v56 = vld [vmem:[#allocation264_spill] sm:$0xff]  ;;  %v16031_v48 = vpop.f32.mrb[196].mxu1  ;;  %v19478_v27 = vld [vmem:[#allocation127_spill] sm:$0xff] }
 0x359   :  { %v11581_v54 = vpop.eup %11580  ;;  %11600 = vrcp.f32 %v3623_v15  ;;  %v10291_v38 = vmul.f32 -1.442695, %v3468_v42  ;;  %v16033_v4 = vpop.f32.mrb[196].mxu0 }
 0x35a   :  { %v11583_v41 = vpop.eup %11582  ;;  %v3815_v39 = vadd.f32 1.0, %v11581_v54  ;;  %11602 = vpow2.f32 %v10322_v13  ;;  %19475 = vst [vmem:[#allocation162_spill] sm:$0xff] %v16028_v52  ;;  %v10323_v13 = vmul.f32 -1.442695, %v3470_v23  ;;  %v16035_v15 = vpop.f32.mrb[197].mxu1  ;;  %v3472_v47 = vadd.f32 %v15966_v37, %v16028_v52  ;;  %v19481_v52 = vld [vmem:[#allocation130_spill] sm:$0xff] }
 0x35b   :  { %v16024_v28 = vpop.eup %11584  ;;  %v4133_v53 = vmul.f32 %v11583_v41, %v19476_v56  ;;  %11604 = vpow2.f32 %v10259_v31  ;;  %v16037_v55 = vpop.f32.mrb[197].mxu0  ;;  %v19479_v56 = vld [vmem:[#allocation291_spill] sm:$0xff]  ;;  %v10260_v18 = vmul.f32 -1.442695, %v3471_v14  ;;  %v16057_v46 = vadd.f32 %v15255_v10, %v19481_v52  ;;  %v19485_v14 = vld [vmem:[#allocation132_spill] sm:$0xff]  ;;  %v19488_v10 = vld [vmem:[#allocation265_spill] sm:$0xff] }
 0x35c   :  { %v11587_v63 = vpop.eup %11586  ;;  %11606 = vrcp.f32 %v3815_v39  ;;  %v16043_v31 = vpop.f32.mrb[198].mxu1  ;;  %v16049_v39 = vadd.f32 %v19479_v56, %v19478_v27 }
 0x35d   :  { %v11589_v54 = vpop.eup %11588  ;;  %v16039_v2 = vadd.f32 %v4165_v22, %v4133_v53  ;;  %11608 = vtanh.f32 %v3465_v8  ;;  %v16045_v42 = vpop.f32.mrb[198].mxu0  ;;  %19482 = vst [vmem:[#allocation258_spill] sm:$0xff] %v16057_v46 }
 0x35e   :  { %v11591_v41 = vpop.eup %11590  ;;  %19480 = vst [vmem:[#allocation153_spill] sm:$0xff] %v16049_v39  ;;  %v4166_v23 = vmul.f32 %v11589_v54, %v11579_v16  ;;  %11610 = vrcp.f32 %v4038_v17  ;;  %v16051_v6 = vpop.f32.mrb[199].mxu1  ;;  %v3469_v16 = vadd.f32 %v15947_v5, %v16049_v39  ;;  %v16067_v54 = vadd.f32 %v15260_v3, %v19485_v14 }
 0x35f   :  { %19477 = vst [vmem:[#allocation194_spill] sm:$0xff] %v16039_v2  ;;  %v16053_v22 = vpop.f32.mrb[199].mxu0  ;;  %v11593_v8 = vpop.eup %11592  ;;  %v3624_v53 = vadd.f32 1.0, %v11591_v41  ;;  %11612 = vpow2.f32 %v10291_v38  ;;  %v16061_v2 = vadd.f32 %v15270_v50, %v19483_v32  ;;  %v10292_v41 = vmul.f32 -1.442695, %v3472_v47 }
 0x360   :  { %v11595_v37 = vpop.eup %11594  ;;  %11614 = vpow2.f32 %v10323_v13  ;;  %19486 = vst [vmem:[#allocation262_spill] sm:$0xff] %v16067_v54  ;;  %v4039_v56 = vadd.f32 1.0, %v11593_v8  ;;  %v3473_v5 = vadd.f32 %v15961_v51, %v16057_v46  ;;  %v3474_v3 = vadd.f32 %v15968_v11, %v16067_v54  ;;  %v16078_v13 = vpop.f32.mrb[200].mxu1  ;;  %v19494_v46 = vld [vmem:[#allocation203_spill] sm:$0xff] }
 0x361   :  { %19484 = vst [vmem:[#allocation164_spill] sm:$0xff] %v16061_v2  ;;  %v11597_v17 = vpop.eup %11596  ;;  %11616 = vrcp.f32 %v3624_v53  ;;  %v3816_v38 = vadd.f32 1.0, %v11595_v37  ;;  %v3475_v50 = vadd.f32 %v15983_v34, %v16061_v2  ;;  %v16080_v47 = vpop.f32.mrb[200].mxu0  ;;  %v19489_v37 = vld [vmem:[#allocation202_spill] sm:$0xff] }
 0x362   :  { %v16069_v27 = vpop.eup %11598  ;;  %v4134_v52 = vmul.f32 %v11597_v17, %v19488_v10  ;;  %11618 = vpow2.f32 %v10260_v18  ;;  %v16084_v8 = vadd.f32 %v15280_v20, %v19489_v37  ;;  %v16088_v17 = vpop.f32.mrb[201].mxu1  ;;  %v10324_v54 = vmul.f32 -1.442695, %v3474_v3 }
 0x363   :  { %19487 = vst [vmem:[#allocation155_spill] sm:$0xff] %v16069_v27  ;;  %v11601_v32 = vpop.eup %11600  ;;  %11620 = vrcp.f32 %v3816_v38  ;;  %v16090_v14 = vpop.f32.mrb[201].mxu0  ;;  %v19492_v38 = vld [vmem:[#allocation138_spill] sm:$0xff] }
 0x364   :  { %v11603_v53 = vpop.eup %11602  ;;  %19490 = vst [vmem:[#allocation256_spill] sm:$0xff] %v16084_v8  ;;  %v16086_v18 = vadd.f32 %v4166_v23, %v4134_v52  ;;  %v4167_v34 = vmul.f32 %v11601_v32, %v11587_v63  ;;  %11622 = vtanh.f32 %v3469_v16  ;;  %v16094_v11 = vadd.f32 %v15282_v49, %v19492_v38  ;;  %v16096_v10 = vpop.f32.mrb[202].mxu1 }
 0x365   :  { %v11605_v51 = vpop.eup %11604  ;;  %11624 = vpow2.f32 %v10292_v41  ;;  %v16098_v2 = vpop.f32.mrb[202].mxu0  ;;  %v10261_v52 = vmul.f32 -1.442695, %v3475_v50  ;;  %v3476_v63 = vadd.f32 %v15987_v1, %v16084_v8  ;;  %v16108_v49 = vadd.f32 %v15285_v44, %v19494_v46  ;;  %v19496_v41 = vld [vmem:[#allocation267_spill] sm:$0xff] }
 0x366   :  { %19491 = vst [vmem:[#allocation133_spill] sm:$0xff] %v16086_v18  ;;  %19493 = vst [vmem:[#allocation137_spill] sm:$0xff] %v16094_v11  ;;  %v11607_v20 = vpop.eup %11606  ;;  %11626 = vrcp.f32 %v4039_v56  ;;  %v3625_v23 = vadd.f32 1.0, %v11605_v51  ;;  %v16102_v16 = vpop.f32.mrb[203].mxu1  ;;  %v3478_v56 = vadd.f32 %v15989_v33, %v16094_v11  ;;  %v4040_v51 = vadd.f32 1.0, %v11603_v53  ;;  %v19502_v33 = vld [vmem:[#allocation302_spill] sm:$0xff] }
 0x367   :  { %v16104_v32 = vpop.f32.mrb[203].mxu0  ;;  %v11609_v37 = vpop.eup %11608  ;;  %19495 = vst [vmem:[#allocation199_spill] sm:$0xff] %v16108_v49  ;;  %v4135_v38 = vmul.f32 %v11607_v20, %v19496_v41  ;;  %11628 = vtanh.f32 %v3473_v5  ;;  %v3479_v44 = vadd.f32 %v15997_v24, %v16108_v49  ;;  %v10293_v5 = vmul.f32 -1.442695, %v3476_v63  ;;  %v19499_v20 = vld [vmem:[#allocation136_spill] sm:$0xff]  ;;  %v19504_v24 = vld [vmem:[#allocation143_spill] sm:$0xff] }
 0x368   :  { %v16111_v39 = vpop.eup %11610  ;;  %11630 = vrcp.f32 %v3625_v23  ;;  %v16122_v23 = vadd.f32 %v15272_v60, %v19499_v20  ;;  %v19501_v41 = vld [vmem:[#allocation152_spill] sm:$0xff]  ;;  %v16128_v53 = vpop.f32.mrb[204].mxu1  ;;  %v19505_v49 = vld [vmem:[#allocation303_spill] sm:$0xff]  ;;  %v10325_v63 = vmul.f32 -1.442695, %v3478_v56 }
 0x369   :  { %19497 = vst [vmem:[#allocation174_spill] sm:$0xff] %v16111_v39  ;;  %v11613_v1 = vpop.eup %11612  ;;  %v16115_v50 = vadd.f32 %v4167_v34, %v4135_v38  ;;  %11632 = vtanh.f32 %v15790_v30  ;;  %v16126_v11 = vadd.f32 %v19502_v33, %v19501_v41  ;;  %v16130_v34 = vpop.f32.mrb[204].mxu0 }
 0x36a   :  { %v11615_v46 = vpop.eup %11614  ;;  %v3817_v8 = vadd.f32 1.0, %v11613_v1  ;;  %11634 = vpow2.f32 %v10261_v52  ;;  %19500 = vst [vmem:[#allocation140_spill] sm:$0xff] %v16122_v23  ;;  %v16134_v1 = vadd.f32 %v19505_v49, %v19504_v24  ;;  %v16136_v30 = vpop.f32.mrb[205].mxu1  ;;  %v19507_v24 = vld [vmem:[#allocation268_spill] sm:$0xff] }
 0x36b   :  { %19498 = vst [vmem:[#allocation260_spill] sm:$0xff] %v16115_v50  ;;  %v11617_v3 = vpop.eup %11616  ;;  %19503 = vst [vmem:[#allocation178_spill] sm:$0xff] %v16126_v11  ;;  %11636 = vpow2.f32 %v10324_v54  ;;  %v16138_v60 = vpop.f32.mrb[205].mxu0  ;;  %v10262_v54 = vmul.f32 -1.442695, %v3479_v44  ;;  %v3480_v33 = vadd.f32 %v16009_v61, %v16126_v11  ;;  %v19508_v44 = vld [vmem:[#allocation157_spill] sm:$0xff]  ;;  %v3477_v61 = vadd.f32 %v15985_v19, %v16122_v23 }
 0x36c   :  { %v11619_v38 = vpop.eup %11618  ;;  %19506 = vst [vmem:[#allocation147_spill] sm:$0xff] %v16134_v1  ;;  %v4168_v52 = vmul.f32 %v11617_v3, %v11609_v37  ;;  %11638 = vrcp.f32 %v3817_v8  ;;  %v16142_v39 = vpop.f32.mrb[206].mxu1  ;;  %v3482_v8 = vadd.f32 %v16011_v12, %v16134_v1  ;;  %v19513_v23 = vld [vmem:[#allocation141_spill] sm:$0xff] }
 0x36d   :  { %v11621_v20 = vpop.eup %11620  ;;  %11640 = vrcp.f32 %v4040_v51  ;;  %v3626_v41 = vadd.f32 1.0, %v11619_v38  ;;  %v16144_v27 = vpop.f32.mrb[206].mxu0  ;;  %v19509_v38 = vld [vmem:[#allocation304_spill] sm:$0xff]  ;;  %v10294_v1 = vmul.f32 -1.442695, %v3480_v33 }
 0x36e   :  { %v11623_v49 = vpop.eup %11622  ;;  %v4136_v37 = vmul.f32 %v11621_v20, %v19507_v24  ;;  %11642 = vpow2.f32 %v10293_v5  ;;  %v16149_v56 = vpop.f32.mrb[207].mxu1  ;;  %v16155_v50 = vadd.f32 %v19509_v38, %v19508_v44  ;;  %v4041_v5 = vadd.f32 1.0, %v11615_v46 }
 0x36f   :  { %v16151_v3 = vpop.f32.mrb[207].mxu0  ;;  %v11625_v51 = vpop.eup %11624  ;;  %11644 = vrcp.f32 %v3626_v41  ;;  %v4253_v44 = vmul.f32 %v15911_v57, %v15835_v45  ;;  %v10326_v38 = vmul.f32 -1.442695, %v3482_v8  ;;  %v19523_v8 = vld [vmem:[#allocation308_spill] sm:$0xff] }
 0x370   :  { %19510 = vst [vmem:[#allocation200_spill] sm:$0xff] %v16155_v50  ;;  %v16159_v11 = vpop.eup %11626  ;;  %v16161_v20 = vadd.f32 %v4168_v52, %v4136_v37  ;;  %v3818_v24 = vadd.f32 1.0, %v11625_v51  ;;  %11646 = vpow2.f32 %v10325_v63  ;;  %v3483_v41 = vadd.f32 %v16031_v48, %v16155_v50  ;;  %v19516_v37 = vld [vmem:[#allocation148_spill] sm:$0xff]  ;;  %v19519_v51 = vld [vmem:[#allocation159_spill] sm:$0xff]  ;;  %v19522_v48 = vld [vmem:[#allocation150_spill] sm:$0xff] }
 0x371   :  { %19511 = vst [vmem:[#allocation117_spill] sm:$0xff] %v16159_v11  ;;  %v11629_v12 = vpop.eup %11628  ;;  %11648 = vpow2.f32 %v10262_v54  ;;  %v19514_v11 = vld [vmem:[#allocation301_spill] sm:$0xff] }
 0x372   :  { %19512 = vst [vmem:[#allocation84_spill] sm:$0xff] %v16161_v20  ;;  %v11631_v18 = vpop.eup %11630  ;;  %11650 = vrcp.f32 %v3818_v24  ;;  %v16169_v52 = vadd.f32 %v19514_v11, %v19513_v23  ;;  %v19517_v54 = vld [vmem:[#allocation305_spill] sm:$0xff]  ;;  %v19520_v24 = vld [vmem:[#allocation307_spill] sm:$0xff]  ;;  %v16184_v11 = vadd.f32 %v19523_v8, %v19522_v48  ;;  %v19526_v23 = vld [vmem:[#allocation310_spill] sm:$0xff] }
 0x373   :  { %v11633_v19 = vpop.eup %11632  ;;  %v4169_v46 = vmul.f32 %v11631_v18, %v11623_v49  ;;  %11652 = vtanh.f32 %v3477_v61  ;;  %v16173_v33 = vadd.f32 %v19517_v54, %v19516_v37  ;;  %v16177_v20 = vadd.f32 %v19520_v24, %v19519_v51  ;;  %v19525_v18 = vld [vmem:[#allocation161_spill] sm:$0xff]  ;;  %v19529_v51 = vld [vmem:[#allocation207_spill] sm:$0xff] }
 0x374   :  { %19515 = vst [vmem:[#allocation151_spill] sm:$0xff] %v16169_v52  ;;  %v11635_v63 = vpop.eup %11634  ;;  %11654 = vrcp.f32 %v4041_v5  ;;  %v4254_v45 = vmul.f32 %v11633_v19, %v15841_v0  ;;  %19524 = vst [vmem:[#allocation92_spill] sm:$0xff] %v16184_v11  ;;  %v16188_v49 = vadd.f32 %v19526_v23, %v19525_v18  ;;  %v19528_v54 = vld [vmem:[#allocation205_spill] sm:$0xff]  ;;  %v10263_v5 = vmul.f32 -1.442695, %v3483_v41 }
 0x375   :  { %19518 = vst [vmem:[#allocation156_spill] sm:$0xff] %v16173_v33  ;;  %v16180_v57 = vpop.eup %11636  ;;  %v3627_v61 = vadd.f32 1.0, %v11635_v63  ;;  %11656 = vpow2.f32 %v10294_v1  ;;  %v4285_v50 = vadd.f32 %v4253_v44, %v19528_v54  ;;  %v19530_v19 = vld [vmem:[#allocation273_spill] sm:$0xff]  ;;  %v3481_v48 = vadd.f32 %v15999_v59, %v16169_v52 }
 0x376   :  { %19521 = vst [vmem:[#allocation271_spill] sm:$0xff] %v16180_v57  ;;  %19527 = vst [vmem:[#allocation272_spill] sm:$0xff] %v16188_v49  ;;  %v11639_v37 = vpop.eup %11638  ;;  %v4286_v24 = vadd.f32 %v4254_v45, %v19529_v51  ;;  %11658 = vpow2.f32 %v10326_v38  ;;  %v3484_v8 = vadd.f32 %v16035_v15, %v16177_v20  ;;  %v3485_v44 = vadd.f32 %v16033_v4, %v16173_v33  ;;  %v19532_v4 = vld [vmem:[#allocation312_spill] sm:$0xff] }
 0x377   :  { %v16192_v0 = vpop.eup %11640  ;;  %v4137_v57 = vmul.f32 %v11639_v37, %v19530_v19  ;;  %11660 = vrcp.f32 %v3627_v61  ;;  %v3486_v38 = vadd.f32 %v16037_v55, %v16184_v11  ;;  %v3487_v59 = vadd.f32 %v16043_v31, %v16188_v49  ;;  %v19531_v61 = vld [vmem:[#allocation165_spill] sm:$0xff] }
 0x378   :  { %v11643_v63 = vpop.eup %11642  ;;  %v4312_v1 = vpack.c.bf16 %v4286_v24, %v4285_v50  ;;  %11662 = vtanh.f32 %v15828_v40  ;;  %v16211_v37 = vadd.f32 %v19532_v4, %v19531_v61  ;;  %v10295_v55 = vmul.f32 -1.442695, %v3484_v8  ;;  %v19535_v24 = vld [vmem:[#allocation313_spill] sm:$0xff] }
 0x379   :  { %v11645_v41 = vpop.eup %11644  ;;  %v16204_v45 = vadd.f32 %v4169_v46, %v4137_v57  ;;  %v3819_v18 = vadd.f32 1.0, %v11643_v63  ;;  %11664 = vtanh.f32 %v15853_v25  ;;  %v19534_v57 = vld [vmem:[#allocation166_spill] sm:$0xff]  ;;  %v10327_v19 = vmul.f32 -1.442695, %v3486_v38  ;;  %v19537_v63 = vld [vmem:[#allocation275_spill] sm:$0xff] }
 0x37a   :  { %v11647_v15 = vpop.eup %11646  ;;  %v4170_v23 = vmul.f32 %v11645_v41, %v11629_v12  ;;  %4406 = vmatmul.mubr.bf16.gmra.mrb[228].mxu1 %v4312_v1  ;;  %4599 = vmatmul.mubr.bf16.gmra.mrb[228].mxu0 %v4312_v1  ;;  %11666 = vpow2.f32 %v10263_v5  ;;  %19533 = vst [vmem:[#allocation106_spill] sm:$0xff] %v16211_v37  ;;  %v16217_v31 = vadd.f32 %v19535_v24, %v19534_v57  ;;  %v10264_v41 = vmul.f32 -1.442695, %v3487_v59  ;;  %v19540_v59 = vld [vmem:[#allocation314_spill] sm:$0xff] }
 0x37b   :  { %v11649_v50 = vpop.eup %11648  ;;  %11668 = vrcp.f32 %v3819_v18  ;;  %4415 = vmatprep.mubr.bf16.mxu1 %v18798_v26  ;;  %4608 = vmatprep.mubr.bf16.mxu0 %v18798_v26  ;;  %v3488_v18 = vadd.f32 %v16051_v6, %v16211_v37 }
 0x37c   :  { %v11651_v46 = vpop.eup %11650  ;;  %19536 = vst [vmem:[#allocation266_spill] sm:$0xff] %v16217_v31  ;;  %v3628_v12 = vadd.f32 1.0, %v11649_v50  ;;  %11670 = vtanh.f32 %v3481_v48  ;;  %v3490_v8 = vadd.f32 %v16053_v22, %v16217_v31  ;;  %v4043_v50 = vadd.f32 1.0, %v11647_v15 }
 0x37d   :  { %v11653_v5 = vpop.eup %11652  ;;  %v4138_v1 = vmul.f32 %v11651_v46, %v19537_v63  ;;  %11672 = vtanh.f32 %v3485_v44  ;;  %v19539_v44 = vld [vmem:[#allocation232_spill] sm:$0xff]  ;;  %v10296_v63 = vmul.f32 -1.442695, %v3488_v18 }
 0x37e   :  { %v16222_v61 = vpop.eup %11654  ;;  %11674 = vrcp.f32 %v3628_v12  ;;  %v16230_v24 = vadd.f32 %v19540_v59, %v19539_v44  ;;  %v10328_v22 = vmul.f32 -1.442695, %v3490_v8 }
 0x37f   :  { %v11657_v4 = vpop.eup %11656  ;;  %v16226_v57 = vadd.f32 %v4170_v23, %v4138_v1  ;;  %11676 = vpow2.f32 %v10295_v55 }
 0x380   :  { %v11659_v48 = vpop.eup %11658  ;;  %v3820_v38 = vadd.f32 1.0, %v11657_v4  ;;  %11678 = vpow2.f32 %v10327_v19  ;;  %19541 = vst [vmem:[#allocation158_spill] sm:$0xff] %v16230_v24  ;;  %v3491_v23 = vadd.f32 %v16078_v13, %v16230_v24  ;;  %v19542_v4 = vld [vmem:[#allocation172_spill] sm:$0xff]  ;;  %v19548_v13 = vld [vmem:[#allocation227_spill] sm:$0xff] }
 0x381   :  { %19538 = vst [vmem:[#allocation208_spill] sm:$0xff] %v16226_v57  ;;  %v11661_v46 = vpop.eup %11660  ;;  %v4044_v6 = vadd.f32 1.0, %v11659_v48  ;;  %11680 = vpow2.f32 %v10264_v41  ;;  %v19543_v48 = vld [vmem:[#allocation317_spill] sm:$0xff] }
 0x382   :  { %v11663_v12 = vpop.eup %11662  ;;  %v4171_v37 = vmul.f32 %v11661_v46, %v11653_v5  ;;  %11682 = vrcp.f32 %v3820_v38  ;;  %v16238_v41 = vadd.f32 %v19543_v48, %v19542_v4  ;;  %v19545_v5 = vld [vmem:[#allocation311_spill] sm:$0xff]  ;;  %v19547_v46 = vld [vmem:[#allocation220_spill] sm:$0xff] }
 0x383   :  { %v11665_v31 = vpop.eup %11664  ;;  %11684 = vrcp.f32 %v4043_v50  ;;  %v4255_v15 = vmul.f32 %v11663_v12, %v15857_v7  ;;  %v3489_v8 = vadd.f32 %v16045_v42, %v19545_v5  ;;  %v19546_v38 = vld [vmem:[#allocation183_spill] sm:$0xff]  ;;  %v19553_v48 = vld [vmem:[#allocation176_spill] sm:$0xff]  ;;  %v19617_v5 = vld [vmem:[#allocation269_spill] sm:$0xff] }
 0x384   :  { %v11667_v55 = vpop.eup %11666  ;;  %11686 = vrcp.f32 %v4044_v6  ;;  %v4256_v19 = vmul.f32 %v11665_v31, %v15859_v36  ;;  %19544 = vst [vmem:[#allocation180_spill] sm:$0xff] %v16238_v41  ;;  %v10265_v36 = vmul.f32 -1.442695, %v3491_v23  ;;  %v3492_v42 = vadd.f32 %v16088_v17, %v16238_v41 }
 0x385   :  { %v11669_v1 = vpop.eup %11668  ;;  %v3629_v18 = vadd.f32 1.0, %v11667_v55  ;;  %11688 = vpow2.f32 %v10296_v63  ;;  %v4287_v44 = vadd.f32 %v4255_v15, %v19547_v46 }
 0x386   :  { %v11671_v50 = vpop.eup %11670  ;;  %v4139_v7 = vmul.f32 %v11669_v1, %v19546_v38  ;;  %v4288_v59 = vadd.f32 %v4256_v19, %v19548_v13  ;;  %11690 = vpow2.f32 %v10328_v22  ;;  %v19550_v1 = vld [vmem:[#allocation173_spill] sm:$0xff]  ;;  %v19551_v19 = vld [vmem:[#allocation318_spill] sm:$0xff] }
 0x387   :  { %v11673_v6 = vpop.eup %11672  ;;  %11692 = vrcp.f32 %v3629_v18  ;;  %v16253_v22 = vadd.f32 %v19551_v19, %v19550_v1  ;;  %v19554_v18 = vld [vmem:[#allocation320_spill] sm:$0xff] }
 0x388   :  { %v11675_v31 = vpop.eup %11674  ;;  %v16245_v12 = vadd.f32 %v4171_v37, %v4139_v7  ;;  %v4313_v4 = vpack.c.bf16 %v4288_v59, %v4287_v44  ;;  %11694 = vtanh.f32 %v15891_v21  ;;  %v16257_v38 = vadd.f32 %v19554_v18, %v19553_v48  ;;  %v19564_v18 = vld [vmem:[#allocation316_spill] sm:$0xff] }
 0x389   :  { %v11677_v63 = vpop.eup %11676  ;;  %v4172_v55 = vmul.f32 %v11675_v31, %v11671_v50  ;;  %11696 = vtanh.f32 %v15920_v62  ;;  %19552 = vst [vmem:[#allocation209_spill] sm:$0xff] %v16253_v22  ;;  %v10297_v44 = vmul.f32 -1.442695, %v3492_v42  ;;  %v3494_v59 = vadd.f32 %v16090_v14, %v16253_v22  ;;  %v19566_v22 = vld [vmem:[#allocation324_spill] sm:$0xff] }
 0x38a   :  { %19549 = vst [vmem:[#allocation169_spill] sm:$0xff] %v16245_v12  ;;  %v11679_v15 = vpop.eup %11678  ;;  %4416 = vmatmul.mubr.bf16.gmra.mrb[232].mxu1 %v4313_v4  ;;  %4609 = vmatmul.mubr.bf16.gmra.mrb[232].mxu0 %v4313_v4  ;;  %v3821_v23 = vadd.f32 1.0, %v11677_v63  ;;  %11698 = vtanh.f32 %v3489_v8  ;;  %19555 = vst [vmem:[#allocation91_spill] sm:$0xff] %v16257_v38  ;;  %v19556_v8 = vld [vmem:[#allocation177_spill] sm:$0xff]  ;;  %v19557_v4 = vld [vmem:[#allocation322_spill] sm:$0xff]  ;;  %v3495_v19 = vadd.f32 %v16096_v10, %v16257_v38 }
 0x38b   :  { %v11681_v37 = vpop.eup %11680  ;;  %v4045_v7 = vadd.f32 1.0, %v11679_v15  ;;  %4425 = vmatprep.mubr.bf16.mxu1 %v18798_v26  ;;  %4618 = vmatprep.mubr.bf16.mxu0 %v18798_v26  ;;  %11700 = vpow2.f32 %v10265_v36  ;;  %v16265_v63 = vadd.f32 %v19557_v4, %v19556_v8  ;;  %v19559_v15 = vld [vmem:[#allocation278_spill] sm:$0xff]  ;;  %v3493_v8 = vadd.f32 %v16080_v47, %v19564_v18 }
 0x38c   :  { %v11683_v17 = vpop.eup %11682  ;;  %11702 = vrcp.f32 %v3821_v23  ;;  %v3630_v50 = vadd.f32 1.0, %v11681_v37  ;;  %v19560_v23 = vld [vmem:[#allocation179_spill] sm:$0xff]  ;;  %v10329_v10 = vmul.f32 -1.442695, %v3494_v59  ;;  %v19565_v47 = vld [vmem:[#allocation182_spill] sm:$0xff] }
 0x38d   :  { %v11685_v31 = vpop.eup %11684  ;;  %19558 = vst [vmem:[#allocation170_spill] sm:$0xff] %v16265_v63  ;;  %11704 = vtanh.f32 %v16245_v12  ;;  %v4140_v1 = vmul.f32 %v11683_v17, %v19559_v15  ;;  %v19561_v37 = vld [vmem:[#allocation323_spill] sm:$0xff]  ;;  %v3496_v17 = vadd.f32 %v16102_v16, %v16265_v63  ;;  %v16288_v18 = vadd.f32 %v19566_v22, %v19565_v47  ;;  %v19568_v63 = vld [vmem:[#allocation184_spill] sm:$0xff]  ;;  %v19611_v12 = vld [vmem:[#allocation297_spill] sm:$0xff] }
 0x38e   :  { %v16271_v36 = vpop.eup %11686  ;;  %v16275_v42 = vadd.f32 %v19561_v37, %v19560_v23  ;;  %11706 = vrcp.f32 %v3630_v50  ;;  %v10266_v23 = vmul.f32 -1.442695, %v3495_v19 }
 0x38f   :  { %v11689_v14 = vpop.eup %11688  ;;  %v16277_v48 = vadd.f32 %v4172_v55, %v4140_v1  ;;  %11708 = vrcp.f32 %v4045_v7  ;;  %19567 = vst [vmem:[#allocation276_spill] sm:$0xff] %v16288_v18 }
 0x390   :  { %19562 = vst [vmem:[#allocation96_spill] sm:$0xff] %v16275_v42  ;;  %v11691_v4 = vpop.eup %11690  ;;  %v3822_v15 = vadd.f32 1.0, %v11689_v14  ;;  %11710 = vpow2.f32 %v10297_v44  ;;  %v3498_v50 = vadd.f32 %v16104_v32, %v16275_v42  ;;  %v10298_v44 = vmul.f32 -1.442695, %v3496_v17  ;;  %v19569_v32 = vld [vmem:[#allocation326_spill] sm:$0xff] }
 0x391   :  { %19563 = vst [vmem:[#allocation175_spill] sm:$0xff] %v16277_v48  ;;  %v11693_v38 = vpop.eup %11692  ;;  %11712 = vtanh.f32 %v16277_v48  ;;  %v4046_v7 = vadd.f32 1.0, %v11691_v4  ;;  %v16294_v42 = vadd.f32 %v19569_v32, %v19568_v63  ;;  %v19571_v4 = vld [vmem:[#allocation241_spill] sm:$0xff] }
 0x392   :  { %v11695_v55 = vpop.eup %11694  ;;  %v4173_v1 = vmul.f32 %v11693_v38, %v11673_v6  ;;  %11714 = vrcp.f32 %v3822_v15  ;;  %v10330_v6 = vmul.f32 -1.442695, %v3498_v50  ;;  %v3499_v38 = vadd.f32 %v16128_v53, %v16288_v18  ;;  %v19575_v32 = vld [vmem:[#allocation321_spill] sm:$0xff] }
 0x393   :  { %v11697_v37 = vpop.eup %11696  ;;  %v4257_v16 = vmul.f32 %v11695_v55, %v15924_v58  ;;  %11716 = vtanh.f32 %v3493_v8  ;;  %19570 = vst [vmem:[#allocation95_spill] sm:$0xff] %v16294_v42  ;;  %v19572_v8 = vld [vmem:[#allocation246_spill] sm:$0xff]  ;;  %v3500_v63 = vadd.f32 %v16136_v30, %v16294_v42  ;;  %v3497_v30 = vadd.f32 %v16098_v2, %v19575_v32 }
 0x394   :  { %v11699_v59 = vpop.eup %11698  ;;  %v4258_v14 = vmul.f32 %v11697_v37, %v15926_v43  ;;  %11718 = vpow2.f32 %v10329_v10  ;;  %v19573_v43 = vld [vmem:[#allocation115_spill] sm:$0xff]  ;;  %v19582_v2 = vld [vmem:[#allocation286_spill] sm:$0xff] }
 0x395   :  { %v11701_v19 = vpop.eup %11700  ;;  %11720 = vpow2.f32 %v10266_v23  ;;  %v4289_v58 = vadd.f32 %v4257_v16, %v19571_v4 }
 0x396   :  { %v11703_v22 = vpop.eup %11702  ;;  %11722 = vrcp.f32 %v4046_v7  ;;  %v4290_v17 = vadd.f32 %v4258_v14, %v19572_v8  ;;  %v3631_v15 = vadd.f32 1.0, %v11701_v19  ;;  %v10267_v14 = vmul.f32 -1.442695, %v3499_v38 }
 0x397   :  { %v11705_v55 = vpop.eup %11704  ;;  %v4141_v10 = vmul.f32 %v11703_v22, %v19573_v43  ;;  %11724 = vpow2.f32 %v10298_v44  ;;  %v10299_v38 = vmul.f32 -1.442695, %v3500_v63 }
 0x398   :  { %v11707_v37 = vpop.eup %11706  ;;  %v4314_v47 = vpack.c.bf16 %v4290_v17, %v4289_v58  ;;  %11726 = vrcp.f32 %v3631_v15  ;;  %v4267_v16 = vmul.f32 %v11705_v55, %v11685_v31  ;;  %v19579_v17 = vld [vmem:[#allocation185_spill] sm:$0xff]  ;;  %v19580_v15 = vld [vmem:[#allocation328_spill] sm:$0xff] }
 0x399   :  { %v16303_v23 = vpop.eup %11708  ;;  %v16305_v53 = vadd.f32 %v4173_v1, %v4141_v10  ;;  %v4174_v50 = vmul.f32 %v11707_v37, %v11699_v59  ;;  %11728 = vpow2.f32 %v10330_v6  ;;  %v19576_v59 = vld [vmem:[#allocation181_spill] sm:$0xff]  ;;  %v19577_v6 = vld [vmem:[#allocation327_spill] sm:$0xff]  ;;  %v16321_v55 = vadd.f32 %v19580_v15, %v19579_v17 }
 0x39a   :  { %v11711_v7 = vpop.eup %11710  ;;  %4426 = vmatmul.mubr.bf16.gmra.mrb[236].mxu1 %v4314_v47  ;;  %4619 = vmatmul.mubr.bf16.gmra.mrb[236].mxu0 %v4314_v47  ;;  %11730 = vtanh.f32 %v15963_v29  ;;  %v16315_v31 = vadd.f32 %v19577_v6, %v19576_v59  ;;  %v19583_v10 = vld [vmem:[#allocation325_spill] sm:$0xff] }
 0x39b   :  { %19574 = vst [vmem:[#allocation274_spill] sm:$0xff] %v16305_v53  ;;  %v11713_v44 = vpop.eup %11712  ;;  %11732 = vtanh.f32 %v16305_v53  ;;  %v3823_v19 = vadd.f32 1.0, %v11711_v7  ;;  %4435 = vmatprep.mubr.bf16.mxu1 %v18798_v26  ;;  %4628 = vmatprep.mubr.bf16.mxu0 %v18798_v26  ;;  %19581 = vst [vmem:[#allocation101_spill] sm:$0xff] %v16321_v55  ;;  %v3501_v37 = vadd.f32 %v16130_v34, %v19583_v10  ;;  %v19584_v7 = vld [vmem:[#allocation292_spill] sm:$0xff]  ;;  %v19585_v6 = vld [vmem:[#allocation293_spill] sm:$0xff] }
 0x39c   :  { %v11715_v1 = vpop.eup %11714  ;;  %19578 = vst [vmem:[#allocation118_spill] sm:$0xff] %v16315_v31  ;;  %v4268_v22 = vmul.f32 %v11713_v44, %v16271_v36  ;;  %11734 = vtanh.f32 %v15995_v9  ;;  %v4299_v59 = vadd.f32 %v4267_v16, %v19584_v7  ;;  %v3502_v36 = vadd.f32 %v16138_v60, %v16315_v31  ;;  %v19586_v44 = vld [vmem:[#allocation188_spill] sm:$0xff]  ;;  %v19587_v53 = vld [vmem:[#allocation330_spill] sm:$0xff]  ;;  %v19591_v16 = vld [vmem:[#allocation331_spill] sm:$0xff] }
 0x39d   :  { %v11717_v58 = vpop.eup %11716  ;;  %v4142_v43 = vmul.f32 %v11715_v1, %v19582_v2  ;;  %11736 = vrcp.f32 %v3823_v19  ;;  %v16332_v17 = vadd.f32 %v19587_v53, %v19586_v44  ;;  %v3503_v34 = vadd.f32 %v16142_v39, %v16321_v55  ;;  %v19590_v1 = vld [vmem:[#allocation282_spill] sm:$0xff]  ;;  %v19607_v31 = vld [vmem:[#allocation271_spill] sm:$0xff] }
 0x39e   :  { %v11719_v47 = vpop.eup %11718  ;;  %v4300_v42 = vadd.f32 %v4268_v22, %v19585_v6  ;;  %11738 = vpow2.f32 %v10267_v14  ;;  %v16340_v2 = vadd.f32 %v19591_v16, %v19590_v1  ;;  %v10331_v39 = vmul.f32 -1.442695, %v3502_v36 }
 0x39f   :  { %v11721_v63 = vpop.eup %11720  ;;  %19588 = vst [vmem:[#allocation277_spill] sm:$0xff] %v16332_v17  ;;  %v16334_v15 = vadd.f32 %v4174_v50, %v4142_v43  ;;  %11740 = vtanh.f32 %v3497_v30  ;;  %v4047_v53 = vadd.f32 1.0, %v11719_v47  ;;  %v3504_v50 = vadd.f32 %v16149_v56, %v16332_v17 }
 0x3a0   :  { %v11723_v19 = vpop.eup %11722  ;;  %19592 = vst [vmem:[#allocation228_spill] sm:$0xff] %v16340_v2  ;;  %v16342_v14 = vpack.c.bf16 %v4300_v42, %v4299_v59  ;;  %v3632_v22 = vadd.f32 1.0, %v11721_v63  ;;  %11742 = vpow2.f32 %v10299_v38  ;;  %v3506_v44 = vadd.f32 %v16151_v3, %v16340_v2  ;;  %v19593_v2 = vld [vmem:[#allocation289_spill] sm:$0xff] }
 0x3a1   :  { %19589 = vst [vmem:[#allocation187_spill] sm:$0xff] %v16334_v15  ;;  %v11725_v60 = vpop.eup %11724  ;;  %11744 = vtanh.f32 %v16334_v15  ;;  %v10268_v42 = vmul.f32 -1.442695, %v3503_v34  ;;  %v10300_v15 = vmul.f32 -1.442695, %v3504_v50  ;;  %v4357_v34 = vpop.f32.mrb[208].mxu1 }
 0x3a2   :  { %v11727_v30 = vpop.eup %11726  ;;  %v3824_v43 = vadd.f32 1.0, %v11725_v60  ;;  %11746 = vtanh.f32 %v3501_v37  ;;  %v10332_v60 = vmul.f32 -1.442695, %v3506_v44 }
 0x3a3   :  { %v11729_v1 = vpop.eup %11728  ;;  %v4175_v16 = vmul.f32 %v11727_v30, %v11717_v58  ;;  %11748 = vrcp.f32 %v3632_v22  ;;  %v16352_v22 = vpop.f32.mrb[208].mxu0 }
 0x3a4   :  { %v11731_v59 = vpop.eup %11730  ;;  %11750 = vrcp.f32 %v3824_v43  ;;  %v4048_v38 = vadd.f32 1.0, %v11729_v1  ;;  %v19594_v43 = vld [vmem:[#allocation261_spill] sm:$0xff]  ;;  %v19595_v1 = vld [vmem:[#allocation263_spill] sm:$0xff]  ;;  %v16356_v44 = vpop.f32.mrb[209].mxu0 }
 0x3a5   :  { %v11733_v63 = vpop.eup %11732  ;;  %11752 = vrcp.f32 %v4047_v53  ;;  %v4259_v47 = vmul.f32 %v11731_v59, %v15979_v35 }
 0x3a6   :  { %v11735_v56 = vpop.eup %11734  ;;  %11754 = vpow2.f32 %v10331_v39  ;;  %v4359_v39 = vpop.f32.mrb[209].mxu1 }
 0x3a7   :  { %v11737_v37 = vpop.eup %11736  ;;  %v4260_v36 = vmul.f32 %v11735_v56, %v16024_v28  ;;  %11756 = vpow2.f32 %v10268_v42  ;;  %v4291_v53 = vadd.f32 %v4259_v47, %v19594_v43  ;;  %v4269_v28 = vmul.f32 %v11733_v63, %v16303_v23  ;;  %v19597_v23 = vld [vmem:[#allocation329_spill] sm:$0xff] }
 0x3a8   :  { %v11739_v3 = vpop.eup %11738  ;;  %v4143_v58 = vmul.f32 %v11737_v37, %v19593_v2  ;;  %11758 = vrcp.f32 %v4048_v38  ;;  %v4361_v2 = vpop.f32.mrb[210].mxu1 }
 0x3a9   :  { %v11741_v30 = vpop.eup %11740  ;;  %v4292_v35 = vadd.f32 %v4260_v36, %v19595_v1  ;;  %v3633_v50 = vadd.f32 1.0, %v11739_v3  ;;  %11760 = vpow2.f32 %v10300_v15  ;;  %v16361_v38 = vpop.f32.mrb[210].mxu0 }
 0x3aa   :  { %v11743_v59 = vpop.eup %11742  ;;  %v16359_v42 = vadd.f32 %v4175_v16, %v4143_v58  ;;  %11762 = vpow2.f32 %v10332_v60  ;;  %v4363_v6 = vpop.f32.mrb[211].mxu1  ;;  %v3505_v16 = vadd.f32 %v16144_v27, %v19597_v23  ;;  %v19598_v60 = vld [vmem:[#allocation298_spill] sm:$0xff]  ;;  %v19603_v27 = vld [vmem:[#allocation260_spill] sm:$0xff] }
 0x3ab   :  { %v11745_v56 = vpop.eup %11744  ;;  %v4315_v37 = vpack.c.bf16 %v4292_v35, %v4291_v53  ;;  %11764 = vrcp.f32 %v3633_v50  ;;  %v3825_v47 = vadd.f32 1.0, %v11743_v59  ;;  %v16363_v36 = vpop.f32.mrb[211].mxu0  ;;  %v4301_v58 = vadd.f32 %v4269_v28, %v19598_v60  ;;  %v19599_v53 = vld [vmem:[#allocation299_spill] sm:$0xff] }
 0x3ac   :  { %19596 = vst [vmem:[#allocation103_spill] sm:$0xff] %v16359_v42  ;;  %v11747_v15 = vpop.eup %11746  ;;  %v4270_v3 = vmul.f32 %v11745_v56, %v11723_v19  ;;  %11766 = vtanh.f32 %v16359_v42  ;;  %v19600_v19 = vld [vmem:[#allocation194_spill] sm:$0xff] }
 0x3ad   :  { %v11749_v7 = vpop.eup %11748  ;;  %4436 = vmatmul.mubr.bf16.gmra.mrb[240].mxu1 %v4315_v37  ;;  %4629 = vmatmul.mubr.bf16.gmra.mrb[240].mxu0 %v4315_v37  ;;  %11768 = vrcp.f32 %v3825_v47  ;;  %v19601_v56 = vld [vmem:[#allocation294_spill] sm:$0xff]  ;;  %v19602_v37 = vld [vmem:[#allocation133_spill] sm:$0xff] }
 0x3ae   :  { %v11751_v63 = vpop.eup %11750  ;;  %v4302_v35 = vadd.f32 %v4270_v3, %v19599_v53  ;;  %v4176_v50 = vmul.f32 %v11749_v7, %v11741_v30  ;;  %4445 = vmatprep.mubr.bf16.mxu1 %v18798_v26  ;;  %4638 = vmatprep.mubr.bf16.mxu0 %v18798_v26  ;;  %11770 = vtanh.f32 %v19600_v19  ;;  %v19605_v7 = vld [vmem:[#allocation84_spill] sm:$0xff]  ;;  %v19606_v30 = vld [vmem:[#allocation53_spill] sm:$0xff] }
 0x3af   :  { %v11753_v59 = vpop.eup %11752  ;;  %v4144_v42 = vmul.f32 %v11751_v63, %v19601_v56  ;;  %11772 = vtanh.f32 %v19602_v37  ;;  %v4709_v3 = vadd.f32 %v4357_v34, %v19606_v30  ;;  %v4042_v63 = vadd.f32 1.0, %v19607_v31  ;;  %v19608_v56 = vld [vmem:[#allocation55_spill] sm:$0xff]  ;;  %v19609_v34 = vld [vmem:[#allocation56_spill] sm:$0xff]  ;;  %v19610_v31 = vld [vmem:[#allocation57_spill] sm:$0xff] }
 0x3b0   :  { %v11755_v47 = vpop.eup %11754  ;;  %v16375_v17 = vpack.c.bf16 %v4302_v35, %v4301_v58  ;;  %11774 = vtanh.f32 %v19603_v27  ;;  %v4710_v58 = vadd.f32 %v4359_v39, %v19608_v56  ;;  %v4714_v48 = vadd.f32 %v4363_v6, %v19610_v31  ;;  %v19616_v31 = vld [vmem:[#allocation117_spill] sm:$0xff] }
 0x3b1   :  { %v11757_v28 = vpop.eup %11756  ;;  %v16378_v60 = vadd.f32 %v4176_v50, %v4144_v42  ;;  %11776 = vtanh.f32 %v19605_v7  ;;  %v10333_v42 = vmul.f32 -1.442695, %v4709_v3  ;;  %v4049_v6 = vadd.f32 1.0, %v11755_v47  ;;  %v19620_v47 = vld [vmem:[#allocation280_spill] sm:$0xff] }
 0x3b2   :  { %v11759_v53 = vpop.eup %11758  ;;  %v3634_v23 = vadd.f32 1.0, %v11757_v28  ;;  %11778 = vtanh.f32 %v3505_v16  ;;  %v4713_v28 = vadd.f32 %v4361_v2, %v19609_v34  ;;  %v10365_v30 = vmul.f32 -1.442695, %v4710_v58  ;;  %v19615_v2 = vld [vmem:[#allocation58_spill] sm:$0xff] }
 0x3b3   :  { %19604 = vst [vmem:[#allocation86_spill] sm:$0xff] %v16378_v60  ;;  %v11761_v55 = vpop.eup %11760  ;;  %11780 = vtanh.f32 %v16378_v60 }
 0x3b4   :  { %v11763_v35 = vpop.eup %11762  ;;  %11782 = vrcp.f32 %v3634_v23  ;;  %v3826_v10 = vadd.f32 1.0, %v11761_v55  ;;  %v19612_v23 = vld [vmem:[#allocation155_spill] sm:$0xff] }
 0x3b5   :  { %v11765_v18 = vpop.eup %11764  ;;  %11784 = vtanh.f32 %v16204_v45 }
 0x3b6   :  { %v11767_v50 = vpop.eup %11766  ;;  %v4177_v32 = vmul.f32 %v11765_v18, %v11747_v15  ;;  %11786 = vrcp.f32 %v3826_v10  ;;  %v19614_v18 = vld [vmem:[#allocation174_spill] sm:$0xff]  ;;  %v4712_v15 = vadd.f32 %v16356_v44, %v19615_v2 }
 0x3b7   :  { %v11769_v16 = vpop.eup %11768  ;;  %11788 = vrcp.f32 %v4042_v63  ;;  %v10334_v63 = vmul.f32 -1.442695, %v4713_v28  ;;  %v4271_v24 = vmul.f32 %v11767_v50, %v11753_v59  ;;  %v19621_v59 = vld [vmem:[#allocation59_spill] sm:$0xff] }
 0x3b8   :  { %v11771_v60 = vpop.eup %11770  ;;  %v4145_v39 = vmul.f32 %v11769_v16, %v19611_v12  ;;  %11790 = vtanh.f32 %v16226_v57  ;;  %v10366_v12 = vmul.f32 -1.442695, %v4714_v48  ;;  %v10397_v50 = vmul.f32 -1.442695, %v4712_v15  ;;  %v19625_v15 = vld [vmem:[#allocation206_spill] sm:$0xff] }
 0x3b9   :  { %v11773_v55 = vpop.eup %11772  ;;  %v4261_v56 = vmul.f32 %v11771_v60, %v19612_v23  ;;  %11792 = vpow2.f32 %v10333_v42  ;;  %v19618_v42 = vld [vmem:[#allocation270_spill] sm:$0xff] }
 0x3ba   :  { %v11775_v3 = vpop.eup %11774  ;;  %v16391_v41 = vadd.f32 %v4177_v32, %v4145_v39  ;;  %v4262_v10 = vmul.f32 %v11773_v55, %v19614_v18  ;;  %11794 = vpow2.f32 %v10365_v30  ;;  %v4050_v55 = vadd.f32 1.0, %v11763_v35  ;;  %v19619_v18 = vld [vmem:[#allocation279_spill] sm:$0xff] }
 0x3bb   :  { %v11777_v58 = vpop.eup %11776  ;;  %v4263_v34 = vmul.f32 %v11775_v3, %v19616_v31  ;;  %v4293_v60 = vadd.f32 %v4261_v56, %v19617_v5  ;;  %11796 = vpow2.f32 %v10334_v63  ;;  %v4711_v56 = vadd.f32 %v16352_v22, %v19621_v59  ;;  %v19622_v3 = vld [vmem:[#allocation306_spill] sm:$0xff]  ;;  %v19624_v63 = vld [vmem:[#allocation300_spill] sm:$0xff] }
 0x3bc   :  { %19613 = vst [vmem:[#allocation283_spill] sm:$0xff] %v16391_v41  ;;  %v11779_v16 = vpop.eup %11778  ;;  %v4294_v23 = vadd.f32 %v4262_v10, %v19618_v42  ;;  %v4264_v32 = vmul.f32 %v11777_v58, %v16192_v0  ;;  %11798 = vrcp.f32 %v4049_v6  ;;  %v4303_v0 = vadd.f32 %v4271_v24, %v19622_v3  ;;  %v19623_v10 = vld [vmem:[#allocation309_spill] sm:$0xff]  ;;  %v19768_v59 = vld [vmem:[#allocation178_spill] sm:$0xff] }
 0x3bd   :  { %v11781_v39 = vpop.eup %11780  ;;  %v4295_v57 = vadd.f32 %v4263_v34, %v19619_v18  ;;  %11800 = vpow2.f32 %v10366_v12  ;;  %v4716_v24 = vadd.f32 %v16363_v36, %v19625_v15 }
 0x3be   :  { %v11783_v44 = vpop.eup %11782  ;;  %v4272_v28 = vmul.f32 %v11781_v39, %v11759_v53  ;;  %v4316_v2 = vpack.c.bf16 %v4294_v23, %v4293_v60  ;;  %v4296_v49 = vadd.f32 %v4264_v32, %v19620_v47  ;;  %11802 = vtanh.f32 %v16391_v41  ;;  %v19627_v23 = vld [vmem:[#allocation285_spill] sm:$0xff] }
 0x3bf   :  { %v11785_v30 = vpop.eup %11784  ;;  %v4178_v48 = vmul.f32 %v11783_v44, %v11779_v16  ;;  %11804 = vrcp.f32 %v4050_v55  ;;  %v10398_v44 = vmul.f32 -1.442695, %v4716_v24 }
 0x3c0   :  { %v11787_v31 = vpop.eup %11786  ;;  %v4304_v35 = vadd.f32 %v4272_v28, %v19623_v10  ;;  %4446 = vmatmul.mubr.bf16.gmra.mrb[244].mxu1 %v4316_v2  ;;  %4639 = vmatmul.mubr.bf16.gmra.mrb[244].mxu0 %v4316_v2  ;;  %v4317_v34 = vpack.c.bf16 %v4296_v49, %v4295_v57  ;;  %v4265_v22 = vmul.f32 %v11785_v30, %v16222_v61  ;;  %11806 = vtanh.f32 %v4711_v56  ;;  %v19628_v61 = vld [vmem:[#allocation287_spill] sm:$0xff]  ;;  %v19629_v28 = vld [vmem:[#allocation154_spill] sm:$0xff] }
 0x3c1   :  { %v11789_v53 = vpop.eup %11788  ;;  %v4146_v58 = vmul.f32 %v11787_v31, %v19624_v63  ;;  %4455 = vmatprep.mubr.bf16.mxu1 %v18798_v26  ;;  %4648 = vmatprep.mubr.bf16.mxu0 %v18798_v26  ;;  %11808 = vpow2.f32 %v10397_v50  ;;  %v4715_v55 = vadd.f32 %v16361_v38, %v19629_v28 }
 0x3c2   :  { %v11791_v6 = vpop.eup %11790  ;;  %v16413_v16 = vpack.c.bf16 %v4304_v35, %v4303_v0  ;;  %v4297_v32 = vadd.f32 %v4265_v22, %v19627_v23 }
 0x3c3   :  { %v11793_v49 = vpop.eup %11792  ;;  %v16415_v57 = vadd.f32 %v4178_v48, %v4146_v58  ;;  %v4266_v2 = vmul.f32 %v11791_v6, %v11789_v53 }
 0x3c4   :  { %v4933_v12 = vadd.f32 1.0, %v11793_v49  ;;  %v11795_v60 = vpop.eup %11794 }
 0x3c5   :  { %19626 = vst [vmem:[#allocation108_spill] sm:$0xff] %v16415_v57  ;;  %11810 = vtanh.f32 %v16415_v57  ;;  %v4298_v39 = vadd.f32 %v4266_v2, %v19628_v61  ;;  %v5125_v36 = vadd.f32 1.0, %v11795_v60  ;;  %v11797_v48 = vpop.eup %11796  ;;  %v19635_v57 = vld [vmem:[#allocation62_spill] sm:$0xff] }
 0x3c6   :  { %11812 = vrcp.f32 %v4933_v12  ;;  %v11799_v56 = vpop.eup %11798  ;;  %v4934_v50 = vadd.f32 1.0, %v11797_v48  ;;  %v19630_v12 = vld [vmem:[#allocation60_spill] sm:$0xff]  ;;  %v19632_v48 = vld [vmem:[#allocation319_spill] sm:$0xff] }
 0x3c7   :  { %v4318_v30 = vpack.c.bf16 %v4298_v39, %v4297_v32  ;;  %11814 = vrcp.f32 %v5125_v36  ;;  %v11801_v31 = vpop.eup %11800  ;;  %v19631_v36 = vld [vmem:[#allocation315_spill] sm:$0xff] }
 0x3c8   :  { %4456 = vmatmul.mubr.bf16.gmra.mrb[248].mxu1 %v4317_v34  ;;  %4649 = vmatmul.mubr.bf16.gmra.mrb[248].mxu0 %v4317_v34  ;;  %11816 = vpow2.f32 %v10398_v44  ;;  %v11803_v0 = vpop.eup %11802  ;;  %v5126_v35 = vadd.f32 1.0, %v11801_v31 }
 0x3c9   :  { %4465 = vmatprep.mubr.bf16.mxu1 %v18798_v26  ;;  %4658 = vmatprep.mubr.bf16.mxu0 %v18798_v26  ;;  %11818 = vtanh.f32 %v4715_v55  ;;  %v11805_v53 = vpop.eup %11804  ;;  %v4273_v58 = vmul.f32 %v11803_v0, %v11799_v56 }
 0x3ca   :  { %11820 = vrcp.f32 %v4934_v50  ;;  %v11807_v63 = vpop.eup %11806  ;;  %v19633_v50 = vld [vmem:[#allocation204_spill] sm:$0xff] }
 0x3cb   :  { %11822 = vrcp.f32 %v5126_v35  ;;  %v11809_v38 = vpop.eup %11808  ;;  %v4305_v55 = vadd.f32 %v4273_v58, %v19631_v36 }
 0x3cc   :  { %v5349_v10 = vadd.f32 1.0, %v11809_v38 }
 0x3cd   :  { %v4367_v6 = vpop.f32.mrb[212].mxu1  ;;  %v4560_v49 = vpop.f32.mrb[212].mxu0 }
 0x3ce   :  { %v4717_v60 = vadd.f32 %v4367_v6, %v19630_v12  ;;  %v4369_v32 = vpop.f32.mrb[213].mxu1  ;;  %v4562_v39 = vpop.f32.mrb[213].mxu0 }
 0x3cf   :  { %v11811_v22 = vpop.eup %11810  ;;  %v4718_v31 = vadd.f32 %v4369_v32, %v19633_v50  ;;  %v4371_v0 = vpop.f32.mrb[214].mxu1  ;;  %v19637_v32 = vld [vmem:[#allocation64_spill] sm:$0xff] }
 0x3d0   :  { %v11813_v34 = vpop.eup %11812  ;;  %v4274_v24 = vmul.f32 %v11811_v22, %v11805_v53  ;;  %4466 = vmatmul.mubr.bf16.gmra.mrb[252].mxu1 %v4318_v30  ;;  %4659 = vmatmul.mubr.bf16.gmra.mrb[252].mxu0 %v4318_v30  ;;  %v4564_v30 = vpop.f32.mrb[214].mxu0  ;;  %v19634_v53 = vld [vmem:[#allocation160_spill] sm:$0xff]  ;;  %v10335_v3 = vmul.f32 -1.442695, %v4717_v60 }
 0x3d1   :  { %4475 = vmatprep.mubr.bf16.mxu1 %v18798_v26  ;;  %4668 = vmatprep.mubr.bf16.mxu0 %v18798_v26  ;;  %v5477_v2 = vmul.f32 %v11813_v34, %v11807_v63  ;;  %v11815_v44 = vpop.eup %11814  ;;  %v4721_v63 = vadd.f32 %v4371_v0, %v19635_v57  ;;  %v4373_v34 = vpop.f32.mrb[215].mxu1  ;;  %v10367_v15 = vmul.f32 -1.442695, %v4718_v31 }
 0x3d2   :  { %v4306_v56 = vadd.f32 %v4274_v24, %v19632_v48  ;;  %v11817_v35 = vpop.eup %11816  ;;  %v5445_v22 = vmul.f32 %v11815_v44, %v19634_v53  ;;  %v4566_v6 = vpop.f32.mrb[215].mxu0  ;;  %11824 = vpow2.f32 %v10335_v3  ;;  %v4722_v48 = vadd.f32 %v4373_v34, %v19637_v32  ;;  %v19638_v44 = vld [vmem:[#allocation210_spill] sm:$0xff] }
 0x3d3   :  { %v11819_v41 = vpop.eup %11818  ;;  %v10336_v24 = vmul.f32 -1.442695, %v4721_v63  ;;  %v5350_v28 = vadd.f32 1.0, %v11817_v35  ;;  %11826 = vpow2.f32 %v10367_v15  ;;  %v19644_v34 = vld [vmem:[#allocation214_spill] sm:$0xff] }
 0x3d4   :  { %v16432_v12 = vpack.c.bf16 %v4306_v56, %v4305_v55  ;;  %v11821_v58 = vpop.eup %11820  ;;  %v16434_v36 = vadd.f32 %v5477_v2, %v5445_v22  ;;  %11828 = vrcp.f32 %v5349_v10  ;;  %v10368_v60 = vmul.f32 -1.442695, %v4722_v48  ;;  %v19639_v2 = vld [vmem:[#allocation79_spill] sm:$0xff]  ;;  %v19642_v10 = vld [vmem:[#allocation212_spill] sm:$0xff] }
 0x3d5   :  { %v5478_v50 = vmul.f32 %v11821_v58, %v11819_v41  ;;  %v11823_v38 = vpop.eup %11822  ;;  %v4720_v56 = vadd.f32 %v4562_v39, %v19639_v2  ;;  %v19640_v41 = vld [vmem:[#allocation66_spill] sm:$0xff]  ;;  %v4719_v48 = vadd.f32 %v4560_v49, %v19642_v10  ;;  %v19643_v49 = vld [vmem:[#allocation68_spill] sm:$0xff] }
 0x3d6   :  { %19636 = vst [vmem:[#allocation284_spill] sm:$0xff] %v16434_v36  ;;  %11830 = vtanh.f32 %v16434_v36  ;;  %v5446_v55 = vmul.f32 %v11823_v38, %v19638_v44  ;;  %v4724_v3 = vadd.f32 %v4566_v6, %v19640_v41  ;;  %v4723_v63 = vadd.f32 %v4564_v30, %v19643_v49 }
 0x3d7   :  { %11832 = vpow2.f32 %v10336_v24 }
 0x3d8   :  { %4476 = vmatmul.mubr.bf16.gmra.mrb[0].mxu1 %v16342_v14  ;;  %4669 = vmatmul.mubr.bf16.gmra.mrb[0].mxu0 %v16342_v14  ;;  %v16445_v15 = vadd.f32 %v5478_v50, %v5446_v55  ;;  %11834 = vrcp.f32 %v5350_v28  ;;  %v10399_v14 = vmul.f32 -1.442695, %v4720_v56  ;;  %v10400_v31 = vmul.f32 -1.442695, %v4724_v3 }
 0x3d9   :  { %4485 = vmatprep.mubr.bf16.mxu1 %v18798_v26  ;;  %4678 = vmatprep.mubr.bf16.mxu0 %v18798_v26  ;;  %11836 = vpow2.f32 %v10368_v60 }
 0x3da   :  { %19641 = vst [vmem:[#allocation122_spill] sm:$0xff] %v16445_v15  ;;  %11838 = vtanh.f32 %v16445_v15  ;;  %v19647_v15 = vld [vmem:[#allocation216_spill] sm:$0xff] }
 0x3db   :  { %11840 = vtanh.f32 %v4719_v48  ;;  %v19646_v48 = vld [vmem:[#allocation61_spill] sm:$0xff] }
 0x3dc   :  { %v11825_v0 = vpop.eup %11824  ;;  %11842 = vpow2.f32 %v10399_v14 }
 0x3dd   :  { %v11827_v39 = vpop.eup %11826  ;;  %v4935_v35 = vadd.f32 1.0, %v11825_v0  ;;  %11844 = vpow2.f32 %v10400_v31 }
 0x3de   :  { %v4377_v53 = vpop.f32.mrb[216].mxu1  ;;  %v4570_v50 = vpop.f32.mrb[216].mxu0  ;;  %v5127_v28 = vadd.f32 1.0, %v11827_v39 }
 0x3df   :  { %v11829_v22 = vpop.eup %11828  ;;  %v4725_v6 = vadd.f32 %v4377_v53, %v19644_v34  ;;  %v4379_v58 = vpop.f32.mrb[217].mxu1  ;;  %11846 = vrcp.f32 %v4935_v35 }
 0x3e0   :  { %4486 = vmatmul.mubr.bf16.gmra.mrb[4].mxu1 %v16375_v17  ;;  %4679 = vmatmul.mubr.bf16.gmra.mrb[4].mxu0 %v16375_v17  ;;  %v4572_v24 = vpop.f32.mrb[217].mxu0  ;;  %v11831_v38 = vpop.eup %11830  ;;  %v19645_v17 = vld [vmem:[#allocation69_spill] sm:$0xff]  ;;  %11848 = vrcp.f32 %v5127_v28 }
 0x3e1   :  { %4495 = vmatprep.mubr.bf16.mxu1 %v18798_v26  ;;  %4688 = vmatprep.mubr.bf16.mxu0 %v18798_v26  ;;  %v4726_v60 = vadd.f32 %v4379_v58, %v19645_v17  ;;  %v4381_v44 = vpop.f32.mrb[218].mxu1  ;;  %v16456_v55 = vpop.f32.mrb[218].mxu0  ;;  %v10337_v3 = vmul.f32 -1.442695, %v4725_v6  ;;  %v4728_v14 = vadd.f32 %v4572_v24, %v19646_v48  ;;  %v5573_v34 = vmul.f32 %v11831_v38, %v11829_v22  ;;  %v19648_v17 = vld [vmem:[#allocation82_spill] sm:$0xff]  ;;  %v19649_v6 = vld [vmem:[#allocation217_spill] sm:$0xff] }
 0x3e2   :  { %v11833_v56 = vpop.eup %11832  ;;  %v4383_v0 = vpop.f32.mrb[219].mxu1  ;;  %v4729_v53 = vadd.f32 %v4381_v44, %v19647_v15  ;;  %11850 = vtanh.f32 %v4723_v63  ;;  %v19650_v22 = vld [vmem:[#allocation123_spill] sm:$0xff]  ;;  %v19651_v63 = vld [vmem:[#allocation124_spill] sm:$0xff] }
 0x3e3   :  { %v4576_v39 = vpop.f32.mrb[219].mxu0  ;;  %v11835_v30 = vpop.eup %11834  ;;  %v4936_v31 = vadd.f32 1.0, %v11833_v56  ;;  %v10369_v35 = vmul.f32 -1.442695, %v4726_v60  ;;  %v4730_v32 = vadd.f32 %v4383_v0, %v19648_v17  ;;  %v10401_v28 = vmul.f32 -1.442695, %v4728_v14 }
 0x3e4   :  { %v11837_v36 = vpop.eup %11836  ;;  %v4732_v24 = vadd.f32 %v4576_v39, %v19649_v6  ;;  %v10338_v44 = vmul.f32 -1.442695, %v4729_v53  ;;  %v19653_v6 = vld [vmem:[#allocation211_spill] sm:$0xff] }
 0x3e5   :  { %v11839_v41 = vpop.eup %11838  ;;  %11852 = vrcp.f32 %v4936_v31  ;;  %v5128_v58 = vadd.f32 1.0, %v11837_v36  ;;  %v5605_v36 = vadd.f32 %v5573_v34, %v19650_v22  ;;  %v10370_v60 = vmul.f32 -1.442695, %v4730_v32  ;;  %v19671_v48 = vld [vmem:[#allocation167_spill] sm:$0xff] }
 0x3e6   :  { %v5574_v49 = vmul.f32 %v11839_v41, %v11835_v30  ;;  %11854 = vpow2.f32 %v10337_v3  ;;  %v11841_v56 = vpop.eup %11840  ;;  %v10402_v0 = vmul.f32 -1.442695, %v4732_v24  ;;  %v19655_v24 = vld [vmem:[#allocation63_spill] sm:$0xff] }
 0x3e7   :  { %11856 = vrcp.f32 %v5128_v58  ;;  %v11843_v41 = vpop.eup %11842 }
 0x3e8   :  { %4496 = vmatmul.mubr.bf16.gmra.mrb[8].mxu1 %v16413_v16  ;;  %4689 = vmatmul.mubr.bf16.gmra.mrb[8].mxu0 %v16413_v16  ;;  %v5606_v38 = vadd.f32 %v5574_v49, %v19651_v63  ;;  %11858 = vpow2.f32 %v10369_v35  ;;  %v11845_v3 = vpop.eup %11844  ;;  %v19652_v16 = vld [vmem:[#allocation213_spill] sm:$0xff]  ;;  %v5351_v58 = vadd.f32 1.0, %v11843_v41 }
 0x3e9   :  { %4505 = vmatprep.mubr.bf16.mxu1 %v18798_v26  ;;  %4698 = vmatprep.mubr.bf16.mxu0 %v18798_v26  ;;  %11860 = vpow2.f32 %v10401_v28  ;;  %v11847_v39 = vpop.eup %11846  ;;  %v4727_v30 = vadd.f32 %v4570_v50, %v19652_v16  ;;  %v5352_v15 = vadd.f32 1.0, %v11845_v3 }
 0x3ea   :  { %v5637_v14 = vpack.c.bf16 %v5606_v38, %v5605_v36  ;;  %11862 = vpow2.f32 %v10338_v44  ;;  %v11849_v31 = vpop.eup %11848  ;;  %v5479_v53 = vmul.f32 %v11847_v39, %v11841_v56 }
 0x3eb   :  { %v5447_v17 = vmul.f32 %v11849_v31, %v19653_v6  ;;  %11864 = vpow2.f32 %v10370_v60  ;;  %v19656_v60 = vld [vmem:[#allocation218_spill] sm:$0xff] }
 0x3ec   :  { %v11851_v34 = vpop.eup %11850  ;;  %11866 = vpow2.f32 %v10402_v0 }
 0x3ed   :  { %v16472_v32 = vadd.f32 %v5479_v53, %v5447_v17  ;;  %11868 = vtanh.f32 %v4727_v30  ;;  %v19657_v53 = vld [vmem:[#allocation67_spill] sm:$0xff] }
 0x3ee   :  { %11870 = vrcp.f32 %v5351_v58  ;;  %v4731_v58 = vadd.f32 %v16456_v55, %v19657_v53 }
 0x3ef   :  { %v11853_v49 = vpop.eup %11852  ;;  %19654 = vst [vmem:[#allocation229_spill] sm:$0xff] %v16472_v32  ;;  %v4387_v35 = vpop.f32.mrb[220].mxu1  ;;  %11872 = vrcp.f32 %v5352_v15 }
 0x3f0   :  { %4506 = vmatmul.mubr.bf16.gmra.mrb[12].mxu1 %v16432_v12  ;;  %4699 = vmatmul.mubr.bf16.gmra.mrb[12].mxu0 %v16432_v12  ;;  %v11855_v50 = vpop.eup %11854  ;;  %v5480_v28 = vmul.f32 %v11853_v49, %v11851_v34  ;;  %v4733_v44 = vadd.f32 %v4387_v35, %v19655_v24  ;;  %v4580_v56 = vpop.f32.mrb[220].mxu0  ;;  %11874 = vtanh.f32 %v16472_v32  ;;  %v19659_v35 = vld [vmem:[#allocation65_spill] sm:$0xff] }
 0x3f1   :  { %v4389_v6 = vpop.f32.mrb[221].mxu1  ;;  %5685 = vmatprep.mubr.bf16.mxu1 %v18798_v26  ;;  %5878 = vmatprep.mubr.bf16.mxu0 %v18798_v26  ;;  %v11857_v36 = vpop.eup %11856  ;;  %v4937_v38 = vadd.f32 1.0, %v11855_v50 }
 0x3f2   :  { %v4582_v41 = vpop.f32.mrb[221].mxu0  ;;  %v4391_v12 = vpop.f32.mrb[222].mxu1  ;;  %v5448_v3 = vmul.f32 %v11857_v36, %v19656_v60  ;;  %v10339_v0 = vmul.f32 -1.442695, %v4733_v44  ;;  %v4734_v50 = vadd.f32 %v4389_v6, %v19659_v35  ;;  %v19660_v36 = vld [vmem:[#allocation215_spill] sm:$0xff] }
 0x3f3   :  { %v11859_v17 = vpop.eup %11858  ;;  %v16479_v39 = vpop.f32.mrb[222].mxu0  ;;  %11876 = vrcp.f32 %v4937_v38  ;;  %v4737_v60 = vadd.f32 %v4391_v12, %v19660_v36  ;;  %v19663_v12 = vld [vmem:[#allocation71_spill] sm:$0xff] }
 0x3f4   :  { %v4393_v30 = vpop.f32.mrb[223].mxu1  ;;  %v5129_v31 = vadd.f32 1.0, %v11859_v17  ;;  %v4586_v34 = vpop.f32.mrb[223].mxu0  ;;  %v16483_v15 = vadd.f32 %v5480_v28, %v5448_v3  ;;  %11878 = vpow2.f32 %v10339_v0  ;;  %v10371_v28 = vmul.f32 -1.442695, %v4734_v50  ;;  %v19661_v3 = vld [vmem:[#allocation70_spill] sm:$0xff] }
 0x3f5   :  { %v11861_v49 = vpop.eup %11860  ;;  %v4738_v0 = vadd.f32 %v4393_v30, %v19661_v3  ;;  %v19664_v30 = vld [vmem:[#allocation223_spill] sm:$0xff] }
 0x3f6   :  { %19658 = vst [vmem:[#allocation189_spill] sm:$0xff] %v16483_v15  ;;  %v11863_v63 = vpop.eup %11862  ;;  %11880 = vrcp.f32 %v5129_v31  ;;  %v5353_v38 = vadd.f32 1.0, %v11861_v49  ;;  %v19662_v31 = vld [vmem:[#allocation221_spill] sm:$0xff]  ;;  %v4736_v49 = vadd.f32 %v4582_v41, %v19663_v12  ;;  %v4740_v3 = vadd.f32 %v4586_v34, %v19664_v30 }
 0x3f7   :  { %11882 = vtanh.f32 %v16483_v15  ;;  %v4938_v44 = vadd.f32 1.0, %v11863_v63  ;;  %v11865_v22 = vpop.eup %11864  ;;  %v4735_v63 = vadd.f32 %v4580_v56, %v19662_v31  ;;  %v19669_v30 = vld [vmem:[#allocation81_spill] sm:$0xff] }
 0x3f8   :  { %11884 = vtanh.f32 %v4731_v58  ;;  %5686 = vmatmul.mubr.bf16.vlgmr.msra.gmra.mrb[16].mxu1 %v5637_v14  ;;  %5879 = vmatmul.mubr.bf16.vlgmr.msra.gmra.mrb[16].mxu0 %v5637_v14  ;;  %v11867_v55 = vpop.eup %11866  ;;  %v5130_v17 = vadd.f32 1.0, %v11865_v22  ;;  %v10340_v58 = vmul.f32 -1.442695, %v4737_v60  ;;  %v10372_v22 = vmul.f32 -1.442695, %v4738_v0 }
 0x3f9   :  { %11886 = vrcp.f32 %v4938_v44  ;;  %5695 = vmatprep.mubr.bf16.mxu1 %v18798_v26  ;;  %5888 = vmatprep.mubr.bf16.mxu0 %v18798_v26  ;;  %v11869_v6 = vpop.eup %11868  ;;  %v5354_v14 = vadd.f32 1.0, %v11867_v55  ;;  %v10403_v53 = vmul.f32 -1.442695, %v4736_v49  ;;  %v19667_v49 = vld [vmem:[#allocation225_spill] sm:$0xff] }
 0x3fa   :  { %v11871_v15 = vpop.eup %11870  ;;  %11888 = vrcp.f32 %v5130_v17 }
 0x3fb   :  { %v11873_v32 = vpop.eup %11872  ;;  %11890 = vrcp.f32 %v5353_v38  ;;  %v19665_v38 = vld [vmem:[#allocation75_spill] sm:$0xff] }
 0x3fc   :  { %v11875_v44 = vpop.eup %11874  ;;  %11892 = vpow2.f32 %v10371_v28  ;;  %v19666_v28 = vld [vmem:[#allocation73_spill] sm:$0xff] }
 0x3fd   :  { %v11877_v50 = vpop.eup %11876  ;;  %11894 = vtanh.f32 %v4735_v63  ;;  %v5575_v31 = vmul.f32 %v11875_v44, %v11871_v15 }
 0x3fe   :  { %v11879_v36 = vpop.eup %11878  ;;  %v5481_v35 = vmul.f32 %v11877_v50, %v11869_v6  ;;  %11896 = vpow2.f32 %v10340_v58  ;;  %v10404_v6 = vmul.f32 -1.442695, %v4740_v3 }
 0x3ff   :  { %11898 = vrcp.f32 %v5354_v14  ;;  %v4939_v17 = vadd.f32 1.0, %v11879_v36  ;;  %v4397_v41 = vpop.f32.mrb[224].mxu1  ;;  %v4590_v60 = vpop.f32.mrb[224].mxu0 }
 0x400   :  { %v11881_v56 = vpop.eup %11880  ;;  %11900 = vpow2.f32 %v10372_v22  ;;  %v4741_v0 = vadd.f32 %v4397_v41, %v19666_v28  ;;  %v4399_v24 = vpop.f32.mrb[225].mxu1  ;;  %v19670_v41 = vld [vmem:[#allocation163_spill] sm:$0xff] }
 0x401   :  { %v11883_v12 = vpop.eup %11882  ;;  %v5449_v55 = vmul.f32 %v11881_v56, %v19665_v38  ;;  %v4592_v63 = vpop.f32.mrb[225].mxu0  ;;  %11902 = vrcp.f32 %v4939_v17  ;;  %v4742_v58 = vadd.f32 %v4399_v24, %v19667_v49  ;;  %v5607_v28 = vadd.f32 %v5575_v31, %v19670_v41  ;;  %v19674_v31 = vld [vmem:[#allocation72_spill] sm:$0xff]  ;;  %v19678_v41 = vld [vmem:[#allocation230_spill] sm:$0xff] }
 0x402   :  { %v11885_v16 = vpop.eup %11884  ;;  %v5576_v34 = vmul.f32 %v11883_v12, %v11873_v32  ;;  %v4401_v50 = vpop.f32.mrb[226].mxu1  ;;  %11904 = vpow2.f32 %v10403_v53  ;;  %v10341_v44 = vmul.f32 -1.442695, %v4741_v0 }
 0x403   :  { %v4594_v15 = vpop.f32.mrb[226].mxu0  ;;  %v11887_v14 = vpop.eup %11886  ;;  %v16497_v36 = vadd.f32 %v5481_v35, %v5449_v55  ;;  %v4745_v56 = vadd.f32 %v4401_v50, %v19669_v30  ;;  %v10373_v12 = vmul.f32 -1.442695, %v4742_v58  ;;  %v19672_v35 = vld [vmem:[#allocation219_spill] sm:$0xff]  ;;  %v19675_v58 = vld [vmem:[#allocation222_spill] sm:$0xff] }
 0x404   :  { %v4403_v22 = vpop.f32.mrb[227].mxu1  ;;  %v4596_v38 = vpop.f32.mrb[227].mxu0  ;;  %v5608_v57 = vadd.f32 %v5576_v34, %v19671_v48  ;;  %v5482_v32 = vmul.f32 %v11887_v14, %v11885_v16  ;;  %v4739_v34 = vadd.f32 %v16479_v39, %v19674_v31 }
 0x405   :  { %19668 = vst [vmem:[#allocation139_spill] sm:$0xff] %v16497_v36  ;;  %v11889_v3 = vpop.eup %11888  ;;  %11906 = vtanh.f32 %v16497_v36  ;;  %v10342_v24 = vmul.f32 -1.442695, %v4745_v56  ;;  %v4746_v14 = vadd.f32 %v4403_v22, %v19675_v58 }
 0x406   :  { %v11891_v17 = vpop.eup %11890  ;;  %v5638_v49 = vpack.c.bf16 %v5608_v57, %v5607_v28  ;;  %v5450_v55 = vmul.f32 %v11889_v3, %v19672_v35  ;;  %11908 = vpow2.f32 %v10341_v44  ;;  %v19677_v35 = vld [vmem:[#allocation74_spill] sm:$0xff] }
 0x407   :  { %v11893_v53 = vpop.eup %11892  ;;  %11910 = vpow2.f32 %v10373_v12  ;;  %v19676_v12 = vld [vmem:[#allocation146_spill] sm:$0xff] }
 0x408   :  { %v11895_v0 = vpop.eup %11894  ;;  %v16504_v50 = vadd.f32 %v5482_v32, %v5450_v55  ;;  %v5131_v30 = vadd.f32 1.0, %v11893_v53  ;;  %11912 = vpow2.f32 %v10404_v6  ;;  %5696 = vmatmul.mubr.bf16.gmra.mrb[20].mxu1 %v5638_v49  ;;  %5889 = vmatmul.mubr.bf16.gmra.mrb[20].mxu0 %v5638_v49  ;;  %v10374_v49 = vmul.f32 -1.442695, %v4746_v14 }
 0x409   :  { %v11897_v16 = vpop.eup %11896  ;;  %11914 = vpow2.f32 %v10342_v24  ;;  %5705 = vmatprep.mubr.bf16.mxu1 %v18798_v26  ;;  %5898 = vmatprep.mubr.bf16.mxu0 %v18798_v26  ;;  %v4743_v22 = vadd.f32 %v4590_v60, %v19676_v12  ;;  %v4744_v55 = vadd.f32 %v4592_v63, %v19677_v35  ;;  %v19680_v35 = vld [vmem:[#allocation233_spill] sm:$0xff] }
 0x40a   :  { %19673 = vst [vmem:[#allocation281_spill] sm:$0xff] %v16504_v50  ;;  %v11899_v57 = vpop.eup %11898  ;;  %11916 = vtanh.f32 %v16504_v50  ;;  %v4940_v28 = vadd.f32 1.0, %v11897_v16  ;;  %v4747_v16 = vadd.f32 %v4594_v15, %v19678_v41  ;;  %v19682_v41 = vld [vmem:[#allocation102_spill] sm:$0xff] }
 0x40b   :  { %v11901_v44 = vpop.eup %11900  ;;  %11918 = vrcp.f32 %v5131_v30  ;;  %v10405_v60 = vmul.f32 -1.442695, %v4744_v55 }
 0x40c   :  { %v11903_v56 = vpop.eup %11902  ;;  %11920 = vtanh.f32 %v4739_v34  ;;  %v5132_v39 = vadd.f32 1.0, %v11901_v44 }
 0x40d   :  { %v11905_v6 = vpop.eup %11904  ;;  %v5483_v32 = vmul.f32 %v11903_v56, %v11895_v0  ;;  %11922 = vrcp.f32 %v4940_v28  ;;  %v19679_v0 = vld [vmem:[#allocation93_spill] sm:$0xff] }
 0x40e   :  { %11924 = vrcp.f32 %v5132_v39  ;;  %v4748_v14 = vadd.f32 %v4596_v38, %v19679_v0  ;;  %v5355_v63 = vadd.f32 1.0, %v11905_v6 }
 0x40f   :  { %v11907_v3 = vpop.eup %11906  ;;  %11926 = vpow2.f32 %v10374_v49 }
 0x410   :  { %v11909_v24 = vpop.eup %11908  ;;  %11928 = vtanh.f32 %v4743_v22  ;;  %v5577_v50 = vmul.f32 %v11907_v3, %v11891_v17  ;;  %v19681_v22 = vld [vmem:[#allocation186_spill] sm:$0xff] }
 0x411   :  { %v11911_v53 = vpop.eup %11910  ;;  %v4941_v48 = vadd.f32 1.0, %v11909_v24 }
 0x412   :  { %v11913_v30 = vpop.eup %11912  ;;  %v5133_v34 = vadd.f32 1.0, %v11911_v53  ;;  %v5609_v53 = vadd.f32 %v5577_v50, %v19681_v22 }
 0x413   :  { %v11915_v44 = vpop.eup %11914  ;;  %11930 = vrcp.f32 %v4941_v48  ;;  %v10406_v48 = vmul.f32 -1.442695, %v4748_v14  ;;  %v5356_v55 = vadd.f32 1.0, %v11913_v30 }
 0x414   :  { %v11917_v28 = vpop.eup %11916  ;;  %11932 = vrcp.f32 %v5133_v34  ;;  %v4942_v56 = vadd.f32 1.0, %v11915_v44 }
 0x415   :  { %v11919_v39 = vpop.eup %11918  ;;  %v5578_v58 = vmul.f32 %v11917_v28, %v11899_v57  ;;  %11934 = vtanh.f32 %v4747_v16  ;;  %v19684_v57 = vld [vmem:[#allocation149_spill] sm:$0xff] }
 0x416   :  { %v11921_v24 = vpop.eup %11920  ;;  %v5451_v15 = vmul.f32 %v11919_v39, %v19680_v35  ;;  %11936 = vrcp.f32 %v4942_v56 }
 0x417   :  { %v11923_v49 = vpop.eup %11922  ;;  %v5610_v17 = vadd.f32 %v5578_v58, %v19682_v41  ;;  %11938 = vpow2.f32 %v10405_v60  ;;  %v19686_v60 = vld [vmem:[#allocation97_spill] sm:$0xff] }
 0x418   :  { %v11925_v3 = vpop.eup %11924  ;;  %v16519_v38 = vadd.f32 %v5483_v32, %v5451_v15  ;;  %v5484_v34 = vmul.f32 %v11923_v49, %v11921_v24  ;;  %11940 = vrcp.f32 %v5355_v63  ;;  %v19699_v41 = vld [vmem:[#allocation237_spill] sm:$0xff] }
 0x419   :  { %v5639_v44 = vpack.c.bf16 %v5610_v17, %v5609_v53  ;;  %v5452_v6 = vmul.f32 %v11925_v3, %v19684_v57  ;;  %v11927_v35 = vpop.eup %11926 }
 0x41a   :  { %19683 = vst [vmem:[#allocation112_spill] sm:$0xff] %v16519_v38  ;;  %11942 = vtanh.f32 %v16519_v38  ;;  %v11929_v50 = vpop.eup %11928  ;;  %v5134_v58 = vadd.f32 1.0, %v11927_v35  ;;  %v19688_v35 = vld [vmem:[#allocation100_spill] sm:$0xff] }
 0x41b   :  { %v16523_v16 = vadd.f32 %v5484_v34, %v5452_v6  ;;  %11944 = vpow2.f32 %v10406_v48  ;;  %5706 = vmatmul.mubr.bf16.gmra.mrb[24].mxu1 %v5639_v44  ;;  %5899 = vmatmul.mubr.bf16.gmra.mrb[24].mxu0 %v5639_v44  ;;  %v19707_v38 = vld [vmem:[#allocation80_spill] sm:$0xff] }
 0x41c   :  { %11946 = vrcp.f32 %v5356_v55  ;;  %5715 = vmatprep.mubr.bf16.mxu1 %v18798_v26  ;;  %5908 = vmatprep.mubr.bf16.mxu0 %v18798_v26 }
 0x41d   :  { %19685 = vst [vmem:[#allocation190_spill] sm:$0xff] %v16523_v16  ;;  %v11931_v32 = vpop.eup %11930  ;;  %11948 = vtanh.f32 %v16523_v16 }
 0x41e   :  { %v11933_v30 = vpop.eup %11932  ;;  %v5485_v14 = vmul.f32 %v11931_v32, %v11929_v50  ;;  %11950 = vrcp.f32 %v5134_v58  ;;  %v19689_v58 = vld [vmem:[#allocation191_spill] sm:$0xff] }
 0x41f   :  { %v11935_v28 = vpop.eup %11934  ;;  %v5453_v56 = vmul.f32 %v11933_v30, %v19686_v60  ;;  %v19690_v30 = vld [vmem:[#allocation121_spill] sm:$0xff] }
 0x420   :  { %v11937_v39 = vpop.eup %11936 }
 0x421   :  { %v16529_v63 = vadd.f32 %v5485_v14, %v5453_v56  ;;  %v5486_v24 = vmul.f32 %v11937_v39, %v11935_v28  ;;  %v11939_v15 = vpop.eup %11938 }
 0x422   :  { %v11941_v49 = vpop.eup %11940  ;;  %v5357_v55 = vadd.f32 1.0, %v11939_v15 }
 0x423   :  { %19687 = vst [vmem:[#allocation114_spill] sm:$0xff] %v16529_v63  ;;  %11952 = vtanh.f32 %v16529_v63 }
 0x424   :  { %v11943_v53 = vpop.eup %11942  ;;  %11954 = vrcp.f32 %v5357_v55 }
 0x425   :  { %v11945_v17 = vpop.eup %11944  ;;  %v5579_v3 = vmul.f32 %v11943_v53, %v11941_v49 }
 0x426   :  { %v11947_v48 = vpop.eup %11946  ;;  %v5358_v6 = vadd.f32 1.0, %v11945_v17 }
 0x427   :  { %v11949_v34 = vpop.eup %11948  ;;  %v5611_v32 = vadd.f32 %v5579_v3, %v19689_v58 }
 0x428   :  { %v11951_v44 = vpop.eup %11950  ;;  %v5580_v57 = vmul.f32 %v11949_v34, %v11947_v48  ;;  %11956 = vrcp.f32 %v5358_v6  ;;  %v19692_v48 = vld [vmem:[#allocation197_spill] sm:$0xff]  ;;  %v19694_v6 = vld [vmem:[#allocation88_spill] sm:$0xff] }
 0x429   :  { %v5454_v50 = vmul.f32 %v11951_v44, %v19688_v35 }
 0x42a   :  { %v5612_v14 = vadd.f32 %v5580_v57, %v19690_v30 }
 0x42b   :  { %v16535_v28 = vadd.f32 %v5486_v24, %v5454_v50  ;;  %v19693_v24 = vld [vmem:[#allocation105_spill] sm:$0xff] }
 0x42c   :  { %v5640_v60 = vpack.c.bf16 %v5612_v14, %v5611_v32  ;;  %v19695_v14 = vld [vmem:[#allocation226_spill] sm:$0xff] }
 0x42d   :  { %19691 = vst [vmem:[#allocation192_spill] sm:$0xff] %v16535_v28  ;;  %11958 = vtanh.f32 %v16535_v28  ;;  %v11953_v56 = vpop.eup %11952 }
 0x42e   :  { %5716 = vmatmul.mubr.bf16.gmra.mrb[28].mxu1 %v5640_v60  ;;  %5909 = vmatmul.mubr.bf16.gmra.mrb[28].mxu0 %v5640_v60  ;;  %v11955_v39 = vpop.eup %11954 }
 0x42f   :  { %5725 = vmatprep.mubr.bf16.mxu1 %v18798_v26  ;;  %5918 = vmatprep.mubr.bf16.mxu0 %v18798_v26  ;;  %v5581_v49 = vmul.f32 %v11955_v39, %v11953_v56 }
 0x431   :  { %v5613_v3 = vadd.f32 %v5581_v49, %v19692_v48  ;;  %v19696_v49 = vld [vmem:[#allocation76_spill] sm:$0xff] }
 0x432   :  { %v11957_v15 = vpop.eup %11956  ;;  %v19698_v48 = vld [vmem:[#allocation224_spill] sm:$0xff] }
 0x437   :  { %v11959_v53 = vpop.eup %11958 }
 0x438   :  { %v5582_v17 = vmul.f32 %v11959_v53, %v11957_v15 }
 0x43a   :  { %v5614_v34 = vadd.f32 %v5582_v17, %v19693_v24 }
 0x43c   :  { %v5641_v55 = vpack.c.bf16 %v5614_v34, %v5613_v3 }
 0x43e   :  { %5726 = vmatmul.mubr.bf16.gmra.mrb[32].mxu1 %v5641_v55  ;;  %5919 = vmatmul.mubr.bf16.gmra.mrb[32].mxu0 %v5641_v55  ;;  %v19697_v55 = vld [vmem:[#allocation235_spill] sm:$0xff] }
 0x43f   :  { %5735 = vmatprep.mubr.bf16.mxu1 %v18798_v26  ;;  %5928 = vmatprep.mubr.bf16.mxu0 %v18798_v26 }
 0x44d   :  { %v4407_v44 = vpop.f32.mrb[228].mxu1  ;;  %v4600_v57 = vpop.f32.mrb[228].mxu0 }
 0x44e   :  { %v4749_v35 = vadd.f32 %v4407_v44, %v19694_v6  ;;  %v4409_v50 = vpop.f32.mrb[229].mxu1  ;;  %v4602_v32 = vpop.f32.mrb[229].mxu0 }
 0x44f   :  { %v4750_v60 = vadd.f32 %v4409_v50, %v19695_v14  ;;  %v4411_v56 = vpop.f32.mrb[230].mxu1  ;;  %v4604_v39 = vpop.f32.mrb[230].mxu0  ;;  %v4752_v24 = vadd.f32 %v4602_v32, %v19697_v55  ;;  %v19701_v32 = vld [vmem:[#allocation78_spill] sm:$0xff] }
 0x450   :  { %v10343_v15 = vmul.f32 -1.442695, %v4749_v35  ;;  %v4753_v53 = vadd.f32 %v4411_v56, %v19696_v49  ;;  %v4413_v17 = vpop.f32.mrb[231].mxu1  ;;  %v4606_v3 = vpop.f32.mrb[231].mxu0  ;;  %v19700_v35 = vld [vmem:[#allocation77_spill] sm:$0xff]  ;;  %v4755_v49 = vadd.f32 %v4604_v39, %v19701_v32  ;;  %v19704_v32 = vld [vmem:[#allocation231_spill] sm:$0xff] }
 0x451   :  { %v10375_v34 = vmul.f32 -1.442695, %v4750_v60  ;;  %v4754_v30 = vadd.f32 %v4413_v17, %v19698_v48  ;;  %v4756_v22 = vadd.f32 %v4606_v3, %v19699_v41  ;;  %v10407_v28 = vmul.f32 -1.442695, %v4752_v24 }
 0x452   :  { %11960 = vpow2.f32 %v10343_v15  ;;  %v10344_v58 = vmul.f32 -1.442695, %v4753_v53  ;;  %v4751_v56 = vadd.f32 %v4600_v57, %v19700_v35  ;;  %v19705_v35 = vld [vmem:[#allocation107_spill] sm:$0xff] }
 0x453   :  { %11962 = vpow2.f32 %v10375_v34  ;;  %v10376_v44 = vmul.f32 -1.442695, %v4754_v30  ;;  %v10408_v50 = vmul.f32 -1.442695, %v4756_v22  ;;  %v19702_v30 = vld [vmem:[#allocation94_spill] sm:$0xff] }
 0x454   :  { %11964 = vpow2.f32 %v10344_v58  ;;  %v19703_v22 = vld [vmem:[#allocation234_spill] sm:$0xff] }
 0x455   :  { %11966 = vpow2.f32 %v10376_v44 }
 0x456   :  { %11968 = vpow2.f32 %v10407_v28 }
 0x457   :  { %11970 = vpow2.f32 %v10408_v50 }
 0x458   :  { %11972 = vtanh.f32 %v4751_v56 }
 0x45c   :  { %v11961_v63 = vpop.eup %11960 }
 0x45d   :  { %v11963_v60 = vpop.eup %11962  ;;  %v4943_v16 = vadd.f32 1.0, %v11961_v63  ;;  %v4417_v17 = vpop.f32.mrb[232].mxu1 }
 0x45e   :  { %v4610_v15 = vpop.f32.mrb[232].mxu0  ;;  %v5135_v53 = vadd.f32 1.0, %v11963_v60  ;;  %v4757_v34 = vadd.f32 %v4417_v17, %v19702_v30  ;;  %v4419_v3 = vpop.f32.mrb[233].mxu1 }
 0x45f   :  { %v4612_v24 = vpop.f32.mrb[233].mxu0  ;;  %v11965_v58 = vpop.eup %11964  ;;  %11974 = vrcp.f32 %v4943_v16  ;;  %v4758_v28 = vadd.f32 %v4419_v3, %v19703_v22 }
 0x460   :  { %v4421_v44 = vpop.f32.mrb[234].mxu1  ;;  %v4614_v57 = vpop.f32.mrb[234].mxu0  ;;  %11976 = vrcp.f32 %v5135_v53  ;;  %v4944_v50 = vadd.f32 1.0, %v11965_v58  ;;  %v10345_v41 = vmul.f32 -1.442695, %v4757_v34  ;;  %v19706_v53 = vld [vmem:[#allocation236_spill] sm:$0xff] }
 0x461   :  { %v4423_v63 = vpop.f32.mrb[235].mxu1  ;;  %v4616_v48 = vpop.f32.mrb[235].mxu0  ;;  %11978 = vtanh.f32 %v4755_v49  ;;  %v4761_v56 = vadd.f32 %v4421_v44, %v19704_v32  ;;  %v10377_v30 = vmul.f32 -1.442695, %v4758_v28  ;;  %v4760_v58 = vadd.f32 %v4612_v24, %v19706_v53  ;;  %v19720_v32 = vld [vmem:[#allocation125_spill] sm:$0xff] }
 0x462   :  { %v11967_v39 = vpop.eup %11966  ;;  %11980 = vrcp.f32 %v4944_v50  ;;  %v4762_v16 = vadd.f32 %v4423_v63, %v19705_v35  ;;  %v4759_v44 = vadd.f32 %v4610_v15, %v19707_v38  ;;  %v19708_v63 = vld [vmem:[#allocation85_spill] sm:$0xff]  ;;  %v19711_v35 = vld [vmem:[#allocation238_spill] sm:$0xff] }
 0x463   :  { %v5136_v60 = vadd.f32 1.0, %v11967_v39  ;;  %v11969_v17 = vpop.eup %11968  ;;  %11982 = vpow2.f32 %v10345_v41  ;;  %v10346_v22 = vmul.f32 -1.442695, %v4761_v56  ;;  %v10409_v41 = vmul.f32 -1.442695, %v4760_v58  ;;  %v19712_v58 = vld [vmem:[#allocation239_spill] sm:$0xff] }
 0x464   :  { %v11971_v3 = vpop.eup %11970  ;;  %v5359_v55 = vadd.f32 1.0, %v11969_v17  ;;  %v10378_v34 = vmul.f32 -1.442695, %v4762_v16  ;;  %v19709_v17 = vld [vmem:[#allocation242_spill] sm:$0xff]  ;;  %v4764_v15 = vadd.f32 %v4616_v48, %v19711_v35 }
 0x465   :  { %11984 = vrcp.f32 %v5136_v60  ;;  %v11973_v14 = vpop.eup %11972  ;;  %v5360_v6 = vadd.f32 1.0, %v11971_v3  ;;  %v4763_v24 = vadd.f32 %v4614_v57, %v19709_v17 }
 0x466   :  { %11986 = vpow2.f32 %v10377_v30 }
 0x467   :  { %11988 = vpow2.f32 %v10346_v22 }
 0x468   :  { %11990 = vrcp.f32 %v5359_v55 }
 0x469   :  { %v11975_v49 = vpop.eup %11974  ;;  %11992 = vpow2.f32 %v10378_v34 }
 0x46a   :  { %v11977_v50 = vpop.eup %11976  ;;  %v5487_v39 = vmul.f32 %v11975_v49, %v11973_v14  ;;  %11994 = vrcp.f32 %v5360_v6  ;;  %v19713_v6 = vld [vmem:[#allocation240_spill] sm:$0xff] }
 0x46b   :  { %v11979_v28 = vpop.eup %11978  ;;  %v5455_v60 = vmul.f32 %v11977_v50, %v19708_v63  ;;  %11996 = vtanh.f32 %v4759_v44  ;;  %v19714_v63 = vld [vmem:[#allocation83_spill] sm:$0xff] }
 0x46c   :  { %v11981_v56 = vpop.eup %11980  ;;  %11998 = vpow2.f32 %v10409_v41  ;;  %v10410_v41 = vmul.f32 -1.442695, %v4764_v15 }
 0x46d   :  { %v11983_v30 = vpop.eup %11982  ;;  %v16560_v16 = vadd.f32 %v5487_v39, %v5455_v60  ;;  %v5488_v3 = vmul.f32 %v11981_v56, %v11979_v28  ;;  %v4427_v22 = vpop.f32.mrb[236].mxu1 }
 0x46e   :  { %v4620_v38 = vpop.f32.mrb[236].mxu0  ;;  %v4945_v55 = vadd.f32 1.0, %v11983_v30  ;;  %v4765_v49 = vadd.f32 %v4427_v22, %v19712_v58  ;;  %v4429_v50 = vpop.f32.mrb[237].mxu1 }
 0x46f   :  { %19710 = vst [vmem:[#allocation247_spill] sm:$0xff] %v16560_v16  ;;  %v11985_v14 = vpop.eup %11984  ;;  %v4622_v34 = vpop.f32.mrb[237].mxu0  ;;  %12000 = vtanh.f32 %v16560_v16  ;;  %v4766_v39 = vadd.f32 %v4429_v50, %v19714_v63 }
 0x470   :  { %v5456_v57 = vmul.f32 %v11985_v14, %v19713_v6  ;;  %v4431_v60 = vpop.f32.mrb[238].mxu1  ;;  %v16567_v28 = vpop.f32.mrb[238].mxu0  ;;  %12002 = vrcp.f32 %v4945_v55  ;;  %v10347_v48 = vmul.f32 -1.442695, %v4765_v49  ;;  %v19716_v6 = vld [vmem:[#allocation89_spill] sm:$0xff]  ;;  %v19717_v49 = vld [vmem:[#allocation171_spill] sm:$0xff] }
 0x471   :  { %v4433_v44 = vpop.f32.mrb[239].mxu1  ;;  %v4626_v56 = vpop.f32.mrb[239].mxu0  ;;  %12004 = vtanh.f32 %v4763_v24  ;;  %v10379_v14 = vmul.f32 -1.442695, %v4766_v39  ;;  %v4769_v50 = vadd.f32 %v4431_v60, %v19716_v6  ;;  %v19718_v24 = vld [vmem:[#allocation168_spill] sm:$0xff]  ;;  %v19719_v39 = vld [vmem:[#allocation111_spill] sm:$0xff] }
 0x472   :  { %v11987_v35 = vpop.eup %11986  ;;  %v16569_v30 = vadd.f32 %v5488_v3, %v5456_v57  ;;  %12006 = vpow2.f32 %v10347_v48  ;;  %v4770_v16 = vadd.f32 %v4433_v44, %v19717_v49  ;;  %v4768_v15 = vadd.f32 %v4622_v34, %v19718_v24  ;;  %v19752_v49 = vld [vmem:[#allocation120_spill] sm:$0xff] }
 0x473   :  { %v5137_v22 = vadd.f32 1.0, %v11987_v35  ;;  %v11989_v58 = vpop.eup %11988  ;;  %v10348_v57 = vmul.f32 -1.442695, %v4769_v50 }
 0x474   :  { %19715 = vst [vmem:[#allocation119_spill] sm:$0xff] %v16569_v30  ;;  %12008 = vtanh.f32 %v16569_v30  ;;  %v11991_v63 = vpop.eup %11990  ;;  %v4946_v17 = vadd.f32 1.0, %v11989_v58  ;;  %v4767_v30 = vadd.f32 %v4620_v38, %v19719_v39  ;;  %v10380_v6 = vmul.f32 -1.442695, %v4770_v16 }
 0x475   :  { %12010 = vrcp.f32 %v5137_v22  ;;  %v11993_v55 = vpop.eup %11992  ;;  %v10411_v58 = vmul.f32 -1.442695, %v4768_v15 }
 0x476   :  { %12012 = vpow2.f32 %v10410_v41  ;;  %v11995_v53 = vpop.eup %11994  ;;  %v5138_v3 = vadd.f32 1.0, %v11993_v55  ;;  %v4772_v41 = vadd.f32 %v4626_v56, %v19720_v32 }
 0x477   :  { %12014 = vrcp.f32 %v4946_v17  ;;  %v11997_v35 = vpop.eup %11996 }
 0x478   :  { %12016 = vpow2.f32 %v10379_v14  ;;  %v11999_v48 = vpop.eup %11998  ;;  %v10412_v38 = vmul.f32 -1.442695, %v4772_v41 }
 0x479   :  { %12018 = vrcp.f32 %v5138_v3  ;;  %v12001_v60 = vpop.eup %12000  ;;  %v5361_v24 = vadd.f32 1.0, %v11999_v48  ;;  %v19722_v48 = vld [vmem:[#allocation243_spill] sm:$0xff] }
 0x47a   :  { %v12003_v22 = vpop.eup %12002  ;;  %12020 = vpow2.f32 %v10348_v57  ;;  %v5583_v55 = vmul.f32 %v12001_v60, %v11991_v63 }
 0x47b   :  { %v12005_v0 = vpop.eup %12004  ;;  %v5489_v44 = vmul.f32 %v12003_v22, %v11997_v35  ;;  %12022 = vtanh.f32 %v4767_v30 }
 0x47c   :  { %v12007_v17 = vpop.eup %12006  ;;  %12024 = vpow2.f32 %v10380_v6  ;;  %v5615_v56 = vadd.f32 %v5583_v55, %v19528_v54 }
 0x47d   :  { %v4947_v14 = vadd.f32 1.0, %v12007_v17  ;;  %12026 = vpow2.f32 %v10411_v58 }
 0x47e   :  { %v12009_v34 = vpop.eup %12008 }
 0x47f   :  { %v12011_v50 = vpop.eup %12010  ;;  %v5584_v3 = vmul.f32 %v12009_v34, %v11995_v53  ;;  %12028 = vrcp.f32 %v4947_v14 }
 0x480   :  { %v12013_v39 = vpop.eup %12012  ;;  %v5457_v16 = vmul.f32 %v12011_v50, %v15828_v40  ;;  %v4437_v57 = vpop.f32.mrb[240].mxu1  ;;  %12030 = vrcp.f32 %v5361_v24 }
 0x481   :  { %v12015_v15 = vpop.eup %12014  ;;  %v5616_v35 = vadd.f32 %v5584_v3, %v19529_v51  ;;  %v4630_v63 = vpop.f32.mrb[240].mxu0  ;;  %v4773_v53 = vadd.f32 %v4437_v57, %v19722_v48  ;;  %v5362_v40 = vadd.f32 1.0, %v12013_v39  ;;  %12032 = vpow2.f32 %v10412_v38  ;;  %v19726_v38 = vld [vmem:[#allocation244_spill] sm:$0xff] }
 0x482   :  { %v12017_v30 = vpop.eup %12016  ;;  %v16580_v60 = vadd.f32 %v5489_v44, %v5457_v16  ;;  %v5490_v6 = vmul.f32 %v12015_v15, %v12005_v0  ;;  %v4439_v22 = vpop.f32.mrb[241].mxu1  ;;  %v19723_v0 = vld [vmem:[#allocation90_spill] sm:$0xff]  ;;  %v19724_v15 = vld [vmem:[#allocation131_spill] sm:$0xff] }
 0x483   :  { %v4632_v58 = vpop.f32.mrb[241].mxu0  ;;  %v12019_v41 = vpop.eup %12018  ;;  %v5642_v17 = vpack.c.bf16 %v5616_v35, %v5615_v56  ;;  %v5139_v34 = vadd.f32 1.0, %v12017_v30  ;;  %v10349_v3 = vmul.f32 -1.442695, %v4773_v53  ;;  %v4771_v24 = vadd.f32 %v16567_v28, %v19723_v0  ;;  %v19727_v53 = vld [vmem:[#allocation98_spill] sm:$0xff] }
 0x484   :  { %19721 = vst [vmem:[#allocation195_spill] sm:$0xff] %v16580_v60  ;;  %v4441_v14 = vpop.f32.mrb[242].mxu1  ;;  %v4634_v55 = vpop.f32.mrb[242].mxu0  ;;  %12034 = vtanh.f32 %v16580_v60  ;;  %v5458_v50 = vmul.f32 %v12019_v41, %v15853_v25  ;;  %v4774_v57 = vadd.f32 %v4439_v22, %v19724_v15  ;;  %v4776_v35 = vadd.f32 %v4632_v58, %v19726_v38  ;;  %v19728_v22 = vld [vmem:[#allocation99_spill] sm:$0xff] }
 0x485   :  { %v4443_v44 = vpop.f32.mrb[243].mxu1  ;;  %v4636_v16 = vpop.f32.mrb[243].mxu0  ;;  %12036 = vrcp.f32 %v5139_v34  ;;  %5736 = vmatmul.mubr.bf16.gmra.mrb[36].mxu1 %v5642_v17  ;;  %5929 = vmatmul.mubr.bf16.gmra.mrb[36].mxu0 %v5642_v17  ;;  %v4777_v41 = vadd.f32 %v4441_v14, %v19727_v53  ;;  %v4775_v17 = vadd.f32 %v4630_v63, %v19728_v22  ;;  %v19730_v15 = vld [vmem:[#allocation251_spill] sm:$0xff] }
 0x486   :  { %v12021_v39 = vpop.eup %12020  ;;  %v16588_v56 = vadd.f32 %v5490_v6, %v5458_v50  ;;  %12038 = vpow2.f32 %v10349_v3  ;;  %5745 = vmatprep.mubr.bf16.mxu1 %v18798_v26  ;;  %5938 = vmatprep.mubr.bf16.mxu0 %v18798_v26  ;;  %v10381_v50 = vmul.f32 -1.442695, %v4774_v57  ;;  %v19729_v3 = vld [vmem:[#allocation110_spill] sm:$0xff]  ;;  %v10413_v32 = vmul.f32 -1.442695, %v4776_v35 }
 0x487   :  { %v12023_v25 = vpop.eup %12022  ;;  %12040 = vrcp.f32 %v5362_v40  ;;  %v4948_v30 = vadd.f32 1.0, %v12021_v39  ;;  %v4778_v58 = vadd.f32 %v4443_v44, %v19729_v3  ;;  %v4780_v48 = vadd.f32 %v4636_v16, %v19730_v15 }
 0x488   :  { %19725 = vst [vmem:[#allocation290_spill] sm:$0xff] %v16588_v56  ;;  %v12025_v28 = vpop.eup %12024  ;;  %12042 = vtanh.f32 %v16588_v56  ;;  %v10350_v39 = vmul.f32 -1.442695, %v4777_v41  ;;  %v19744_v56 = vld [vmem:[#allocation252_spill] sm:$0xff] }
 0x489   :  { %v12027_v34 = vpop.eup %12026  ;;  %12044 = vtanh.f32 %v4771_v24  ;;  %v5140_v6 = vadd.f32 1.0, %v12025_v28  ;;  %v10382_v63 = vmul.f32 -1.442695, %v4778_v58  ;;  %v10414_v24 = vmul.f32 -1.442695, %v4780_v48 }
 0x48a   :  { %v12029_v38 = vpop.eup %12028  ;;  %12046 = vrcp.f32 %v4948_v30  ;;  %v5363_v53 = vadd.f32 1.0, %v12027_v34 }
 0x48b   :  { %v5491_v40 = vmul.f32 %v12029_v38, %v12023_v25  ;;  %12048 = vrcp.f32 %v5140_v6  ;;  %v12031_v14 = vpop.eup %12030 }
 0x48c   :  { %12050 = vtanh.f32 %v4775_v17  ;;  %v12033_v0 = vpop.eup %12032 }
 0x48d   :  { %12052 = vpow2.f32 %v10381_v50  ;;  %v5364_v35 = vadd.f32 1.0, %v12033_v0 }
 0x48e   :  { %v12035_v22 = vpop.eup %12034  ;;  %12054 = vpow2.f32 %v10413_v32  ;;  %v19732_v32 = vld [vmem:[#allocation245_spill] sm:$0xff] }
 0x48f   :  { %v12037_v57 = vpop.eup %12036  ;;  %12056 = vpow2.f32 %v10350_v39  ;;  %v5585_v38 = vmul.f32 %v12035_v22, %v12031_v14  ;;  %v4779_v48 = vadd.f32 %v4634_v55, %v19732_v32  ;;  %v19733_v39 = vld [vmem:[#allocation126_spill] sm:$0xff] }
 0x490   :  { %v12039_v44 = vpop.eup %12038  ;;  %v5459_v30 = vmul.f32 %v12037_v57, %v15891_v21  ;;  %12058 = vrcp.f32 %v5363_v53 }
 0x491   :  { %v12041_v16 = vpop.eup %12040  ;;  %v4949_v25 = vadd.f32 1.0, %v12039_v44  ;;  %12060 = vpow2.f32 %v10382_v63  ;;  %v5617_v0 = vadd.f32 %v5585_v38, %v19547_v46 }
 0x492   :  { %v12043_v41 = vpop.eup %12042  ;;  %v16599_v28 = vadd.f32 %v5491_v40, %v5459_v30  ;;  %12062 = vpow2.f32 %v10414_v24 }
 0x493   :  { %v12045_v17 = vpop.eup %12044  ;;  %v5586_v34 = vmul.f32 %v12043_v41, %v12041_v16  ;;  %12064 = vrcp.f32 %v4949_v25  ;;  %v4447_v50 = vpop.f32.mrb[244].mxu1 }
 0x494   :  { %19731 = vst [vmem:[#allocation248_spill] sm:$0xff] %v16599_v28  ;;  %v12047_v6 = vpop.eup %12046  ;;  %12066 = vrcp.f32 %v5364_v35  ;;  %v4640_v58 = vpop.f32.mrb[244].mxu0  ;;  %v4781_v14 = vadd.f32 %v4447_v50, %v19733_v39 }
 0x495   :  { %v12049_v21 = vpop.eup %12048  ;;  %v5618_v53 = vadd.f32 %v5586_v34, %v19548_v13  ;;  %v5492_v22 = vmul.f32 %v12047_v6, %v12045_v17  ;;  %v4449_v40 = vpop.f32.mrb[245].mxu1  ;;  %12068 = vtanh.f32 %v16599_v28  ;;  %v19735_v6 = vld [vmem:[#allocation253_spill] sm:$0xff]  ;;  %v19736_v13 = vld [vmem:[#allocation104_spill] sm:$0xff] }
 0x496   :  { %v4642_v63 = vpop.f32.mrb[245].mxu0  ;;  %v12051_v24 = vpop.eup %12050  ;;  %v5460_v57 = vmul.f32 %v12049_v21, %v15920_v62  ;;  %12070 = vtanh.f32 %v4779_v48  ;;  %v10351_v16 = vmul.f32 -1.442695, %v4781_v14  ;;  %v4783_v50 = vadd.f32 %v4640_v58, %v19735_v6  ;;  %v19737_v62 = vld [vmem:[#allocation135_spill] sm:$0xff] }
 0x497   :  { %v4451_v55 = vpop.f32.mrb[246].mxu1  ;;  %v16607_v44 = vpop.f32.mrb[246].mxu0  ;;  %v5643_v35 = vpack.c.bf16 %v5618_v53, %v5617_v0  ;;  %v4782_v39 = vadd.f32 %v4449_v40, %v19736_v13  ;;  %v4784_v21 = vadd.f32 %v4642_v63, %v19737_v62  ;;  %v19738_v0 = vld [vmem:[#allocation87_spill] sm:$0xff]  ;;  %v19739_v63 = vld [vmem:[#allocation249_spill] sm:$0xff] }
 0x498   :  { %v12053_v30 = vpop.eup %12052  ;;  %v4453_v38 = vpop.f32.mrb[247].mxu1  ;;  %v16609_v17 = vadd.f32 %v5492_v22, %v5460_v57  ;;  %12072 = vpow2.f32 %v10351_v16  ;;  %v4785_v53 = vadd.f32 %v4451_v55, %v19738_v0 }
 0x499   :  { %v4646_v25 = vpop.f32.mrb[247].mxu0  ;;  %v12055_v41 = vpop.eup %12054  ;;  %v5141_v34 = vadd.f32 1.0, %v12053_v30  ;;  %5746 = vmatmul.mubr.bf16.gmra.mrb[40].mxu1 %v5643_v35  ;;  %5939 = vmatmul.mubr.bf16.gmra.mrb[40].mxu0 %v5643_v35  ;;  %v10383_v57 = vmul.f32 -1.442695, %v4782_v39  ;;  %v4786_v30 = vadd.f32 %v4453_v38, %v19739_v63  ;;  %v10415_v6 = vmul.f32 -1.442695, %v4784_v21 }
 0x49a   :  { %19734 = vst [vmem:[#allocation196_spill] sm:$0xff] %v16609_v17  ;;  %v12057_v32 = vpop.eup %12056  ;;  %12074 = vtanh.f32 %v16609_v17  ;;  %5755 = vmatprep.mubr.bf16.mxu1 %v18798_v26  ;;  %5948 = vmatprep.mubr.bf16.mxu0 %v18798_v26  ;;  %v5365_v58 = vadd.f32 1.0, %v12055_v41  ;;  %v19741_v39 = vld [vmem:[#allocation250_spill] sm:$0xff] }
 0x49b   :  { %v12059_v15 = vpop.eup %12058  ;;  %v4950_v48 = vadd.f32 1.0, %v12057_v32  ;;  %12076 = vrcp.f32 %v5141_v34  ;;  %v4457_v35 = vpop.f32.mrb[248].mxu1  ;;  %v19740_v32 = vld [vmem:[#allocation134_spill] sm:$0xff]  ;;  %v10352_v34 = vmul.f32 -1.442695, %v4785_v53 }
 0x49c   :  { %v12061_v22 = vpop.eup %12060  ;;  %12078 = vtanh.f32 %v4783_v50  ;;  %v4788_v62 = vadd.f32 %v4646_v25, %v19740_v32  ;;  %v16620_v55 = vpop.f32.mrb[248].mxu0  ;;  %v10384_v25 = vmul.f32 -1.442695, %v4786_v30  ;;  %v19745_v30 = vld [vmem:[#allocation145_spill] sm:$0xff] }
 0x49d   :  { %v12063_v14 = vpop.eup %12062  ;;  %v5142_v40 = vadd.f32 1.0, %v12061_v22  ;;  %12080 = vrcp.f32 %v4950_v48  ;;  %v4459_v0 = vpop.f32.mrb[249].mxu1  ;;  %v4789_v22 = vadd.f32 %v4457_v35, %v19741_v39  ;;  %v19743_v35 = vld [vmem:[#allocation254_spill] sm:$0xff] }
 0x49e   :  { %v12065_v16 = vpop.eup %12064  ;;  %v4652_v41 = vpop.f32.mrb[249].mxu0  ;;  %v5366_v50 = vadd.f32 1.0, %v12063_v14 }
 0x49f   :  { %v12067_v13 = vpop.eup %12066  ;;  %v5493_v17 = vmul.f32 %v12065_v16, %v12051_v24  ;;  %12082 = vrcp.f32 %v5142_v40  ;;  %v4461_v28 = vpop.f32.mrb[250].mxu1  ;;  %v10416_v24 = vmul.f32 -1.442695, %v4788_v62  ;;  %v19742_v40 = vld [vmem:[#allocation144_spill] sm:$0xff]  ;;  %v10353_v14 = vmul.f32 -1.442695, %v4789_v22 }
 0x4a0   :  { %12084 = vrcp.f32 %v5365_v58  ;;  %v16623_v38 = vpop.f32.mrb[250].mxu0  ;;  %v16625_v63 = vpop.f32.mrb[251].mxu1  ;;  %v4790_v53 = vadd.f32 %v4459_v0, %v19742_v40  ;;  %v4792_v39 = vadd.f32 %v4652_v41, %v19743_v35  ;;  %v4793_v51 = vadd.f32 %v4461_v28, %v19745_v30 }
 0x4a1   :  { %v12069_v21 = vpop.eup %12068  ;;  %12086 = vpow2.f32 %v10383_v57  ;;  %v16627_v48 = vpop.f32.mrb[251].mxu0  ;;  %v4787_v57 = vadd.f32 %v16607_v44, %v19744_v56 }
 0x4a2   :  { %v12071_v32 = vpop.eup %12070  ;;  %12088 = vpow2.f32 %v10415_v6  ;;  %v5587_v58 = vmul.f32 %v12069_v21, %v12059_v15  ;;  %v10385_v15 = vmul.f32 -1.442695, %v4790_v53 }
 0x4a3   :  { %12090 = vpow2.f32 %v10352_v34  ;;  %v12073_v16 = vpop.eup %12072  ;;  %v16634_v60 = vpop.f32.mrb[252].mxu1 }
 0x4a4   :  { %12092 = vrcp.f32 %v5366_v50  ;;  %v12075_v46 = vpop.eup %12074  ;;  %v4951_v3 = vadd.f32 1.0, %v12073_v16  ;;  %v16636_v6 = vpop.f32.mrb[252].mxu0 }
 0x4a5   :  { %12094 = vpow2.f32 %v10384_v25  ;;  %v12077_v62 = vpop.eup %12076  ;;  %v5588_v0 = vmul.f32 %v12075_v46, %v12067_v13  ;;  %v16638_v34 = vpop.f32.mrb[253].mxu1  ;;  %v5619_v25 = vadd.f32 %v5587_v58, %v19571_v4  ;;  %v10417_v46 = vmul.f32 -1.442695, %v4792_v39  ;;  %v19751_v4 = vld [vmem:[#allocation113_spill] sm:$0xff] }
 0x4a6   :  { %12096 = vpow2.f32 %v10416_v24  ;;  %v16640_v50 = vpop.f32.mrb[253].mxu0  ;;  %v12079_v41 = vpop.eup %12078  ;;  %v5461_v22 = vmul.f32 %v12077_v62, %v15963_v29 }
 0x4a7   :  { %12098 = vrcp.f32 %v4951_v3  ;;  %v16643_v44 = vpop.f32.mrb[254].mxu1  ;;  %v16645_v21 = vpop.f32.mrb[254].mxu0  ;;  %v5620_v16 = vadd.f32 %v5588_v0, %v19572_v8  ;;  %v10354_v3 = vmul.f32 -1.442695, %v4793_v51  ;;  %v19748_v8 = vld [vmem:[#allocation193_spill] sm:$0xff] }
 0x4a8   :  { %v12081_v28 = vpop.eup %12080  ;;  %12100 = vpow2.f32 %v10353_v14  ;;  %v16649_v13 = vpop.f32.mrb[255].mxu1  ;;  %v16653_v35 = vadd.f32 %v5493_v17, %v5461_v22  ;;  %v4791_v56 = vadd.f32 %v16620_v55, %v19748_v8 }
 0x4a9   :  { %v16651_v24 = vpop.f32.mrb[255].mxu0  ;;  %v12083_v53 = vpop.eup %12082  ;;  %v5494_v29 = vmul.f32 %v12081_v28, %v12071_v32  ;;  %12102 = vtanh.f32 %v4787_v57  ;;  %v5644_v30 = vpack.c.bf16 %v5620_v16, %v5619_v25  ;;  %v19749_v57 = vld [vmem:[#allocation109_spill] sm:$0xff] }
 0x4aa   :  { %19746 = vst [vmem:[#allocation295_spill] sm:$0xff] %v16653_v35  ;;  %v12085_v62 = vpop.eup %12084  ;;  %v5462_v40 = vmul.f32 %v12083_v53, %v15995_v9  ;;  %12104 = vpow2.f32 %v10385_v15  ;;  %v4794_v55 = vadd.f32 %v16625_v63, %v19749_v57 }
 0x4ab   :  { %v12087_v58 = vpop.eup %12086  ;;  %12106 = vtanh.f32 %v16653_v35  ;;  %5756 = vmatmul.mubr.bf16.gmra.mrb[44].mxu1 %v5644_v30  ;;  %5949 = vmatmul.mubr.bf16.gmra.mrb[44].mxu0 %v5644_v30  ;;  %v16661_v51 = vpop.f32.mrb[0].mxu1 }
 0x4ac   :  { %v12089_v14 = vpop.eup %12088  ;;  %v16657_v39 = vadd.f32 %v5494_v29, %v5462_v40  ;;  %v5143_v0 = vadd.f32 1.0, %v12087_v58  ;;  %12108 = vpow2.f32 %v10417_v46  ;;  %v16663_v32 = vpop.f32.mrb[0].mxu0  ;;  %5765 = vmatprep.mubr.bf16.mxu1 %v18798_v26  ;;  %5958 = vmatprep.mubr.bf16.mxu0 %v18798_v26  ;;  %v19750_v29 = vld [vmem:[#allocation255_spill] sm:$0xff] }
 0x4ad   :  { %v12091_v17 = vpop.eup %12090  ;;  %12110 = vpow2.f32 %v10354_v3  ;;  %v16670_v15 = vpop.f32.mrb[1].mxu1  ;;  %v5367_v28 = vadd.f32 1.0, %v12089_v14  ;;  %v4796_v3 = vadd.f32 %v16627_v48, %v19750_v29  ;;  %v10386_v14 = vmul.f32 -1.442695, %v4794_v55 }
 0x4ae   :  { %19747 = vst [vmem:[#allocation116_spill] sm:$0xff] %v16657_v39  ;;  %v12093_v9 = vpop.eup %12092  ;;  %12112 = vtanh.f32 %v16657_v39  ;;  %v4952_v40 = vadd.f32 1.0, %v12091_v17  ;;  %v16672_v30 = vpop.f32.mrb[1].mxu0 }
 0x4af   :  { %v12095_v22 = vpop.eup %12094  ;;  %12114 = vrcp.f32 %v5143_v0  ;;  %v16674_v25 = vpop.f32.mrb[2].mxu1  ;;  %v10418_v48 = vmul.f32 -1.442695, %v4796_v3 }
 0x4b0   :  { %v16676_v16 = vpop.f32.mrb[2].mxu0  ;;  %v12097_v46 = vpop.eup %12096  ;;  %v5144_v53 = vadd.f32 1.0, %v12095_v22  ;;  %12116 = vtanh.f32 %v4791_v56  ;;  %v4797_v56 = vadd.f32 %v16634_v60, %v19751_v4 }
 0x4b1   :  { %v16680_v58 = vpop.f32.mrb[3].mxu1  ;;  %v16682_v63 = vpop.f32.mrb[3].mxu0  ;;  %12118 = vrcp.f32 %v4952_v40  ;;  %v5368_v57 = vadd.f32 1.0, %v12097_v46  ;;  %v4795_v40 = vadd.f32 %v16623_v38, %v19752_v49  ;;  %v19753_v46 = vld [vmem:[#allocation257_spill] sm:$0xff] }
 0x4b2   :  { %v12099_v17 = vpop.eup %12098  ;;  %12120 = vrcp.f32 %v5144_v53  ;;  %v10355_v3 = vmul.f32 -1.442695, %v4797_v56  ;;  %v19755_v56 = vld [vmem:[#allocation153_spill] sm:$0xff] }
 0x4b3   :  { %v12101_v8 = vpop.eup %12100  ;;  %v5495_v0 = vmul.f32 %v12099_v17, %v12079_v41  ;;  %12122 = vrcp.f32 %v5367_v28  ;;  %v4798_v41 = vadd.f32 %v16638_v34, %v19753_v46  ;;  %v16690_v53 = vpop.f32.mrb[4].mxu1 }
 0x4b4   :  { %v12103_v39 = vpop.eup %12102  ;;  %v4953_v35 = vadd.f32 1.0, %v12101_v8  ;;  %12124 = vrcp.f32 %v5368_v57  ;;  %v16692_v8 = vpop.f32.mrb[4].mxu0 }
 0x4b5   :  { %v12105_v22 = vpop.eup %12104  ;;  %v16694_v28 = vpop.f32.mrb[5].mxu1 }
 0x4b6   :  { %v12107_v29 = vpop.eup %12106  ;;  %12126 = vrcp.f32 %v4953_v35  ;;  %v5145_v54 = vadd.f32 1.0, %v12105_v22  ;;  %v19754_v35 = vld [vmem:[#allocation129_spill] sm:$0xff]  ;;  %v16698_v22 = vpop.f32.mrb[5].mxu0 }
 0x4b7   :  { %v12109_v55 = vpop.eup %12108  ;;  %12128 = vpow2.f32 %v10386_v14  ;;  %v5589_v57 = vmul.f32 %v12107_v29, %v12085_v62  ;;  %v4801_v17 = vadd.f32 %v16643_v44, %v19754_v35  ;;  %v16700_v38 = vpop.f32.mrb[6].mxu1  ;;  %v4799_v35 = vadd.f32 %v16636_v6, %v19755_v56 }
 0x4b8   :  { %v12111_v60 = vpop.eup %12110  ;;  %12130 = vrcp.f32 %v5145_v54  ;;  %v5369_v49 = vadd.f32 1.0, %v12109_v55  ;;  %v16702_v14 = vpop.f32.mrb[6].mxu0  ;;  %v10387_v54 = vmul.f32 -1.442695, %v4798_v41  ;;  %v19756_v55 = vld [vmem:[#allocation259_spill] sm:$0xff] }
 0x4b9   :  { %v12113_v34 = vpop.eup %12112  ;;  %v4954_v46 = vadd.f32 1.0, %v12111_v60  ;;  %12132 = vpow2.f32 %v10418_v48  ;;  %v16704_v4 = vpop.f32.mrb[7].mxu1  ;;  %v4800_v48 = vadd.f32 %v16640_v50, %v19756_v55  ;;  %v5621_v31 = vadd.f32 %v5589_v57, %v19594_v43 }
 0x4ba   :  { %v12115_v12 = vpop.eup %12114  ;;  %v5590_v36 = vmul.f32 %v12113_v34, %v12093_v9  ;;  %12134 = vtanh.f32 %v4795_v40  ;;  %v16706_v62 = vpop.f32.mrb[7].mxu0  ;;  %v10356_v9 = vmul.f32 -1.442695, %v4801_v17 }
 0x4bb   :  { %v12117_v29 = vpop.eup %12116  ;;  %v5463_v44 = vmul.f32 %v12115_v12, %v19600_v19  ;;  %12136 = vrcp.f32 %v4954_v46  ;;  %v19758_v19 = vld [vmem:[#allocation162_spill] sm:$0xff]  ;;  %v16722_v56 = vpop.f32.mrb[8].mxu1 }
 0x4bc   :  { %v12119_v60 = vpop.eup %12118  ;;  %v5622_v2 = vadd.f32 %v5590_v36, %v19595_v1  ;;  %12138 = vpow2.f32 %v10355_v3  ;;  %v4802_v12 = vadd.f32 %v16649_v13, %v19758_v19  ;;  %v16724_v57 = vpop.f32.mrb[8].mxu0 }
 0x4bd   :  { %v12121_v40 = vpop.eup %12120  ;;  %v16715_v41 = vadd.f32 %v5495_v0, %v5463_v44  ;;  %v5496_v34 = vmul.f32 %v12119_v60, %v12103_v39  ;;  %12140 = vrcp.f32 %v5369_v49  ;;  %v10419_v0 = vmul.f32 -1.442695, %v4800_v48  ;;  %v16729_v39 = vpop.f32.mrb[9].mxu1 }
 0x4be   :  { %v16719_v46 = vpop.eup %12122  ;;  %v5645_v6 = vpack.c.bf16 %v5622_v2, %v5621_v31  ;;  %v5464_v50 = vmul.f32 %v12121_v40, %v19602_v37  ;;  %12142 = vpow2.f32 %v10387_v54  ;;  %v16731_v49 = vpop.f32.mrb[9].mxu0  ;;  %v19760_v2 = vld [vmem:[#allocation262_spill] sm:$0xff]  ;;  %v10388_v48 = vmul.f32 -1.442695, %v4802_v12 }
 0x4bf   :  { %19757 = vst [vmem:[#allocation288_spill] sm:$0xff] %v16715_v41  ;;  %v16726_v36 = vpop.eup %12124  ;;  %12144 = vtanh.f32 %v16715_v41  ;;  %v4804_v37 = vadd.f32 %v16651_v24, %v19760_v2  ;;  %v16737_v31 = vpop.f32.mrb[10].mxu1 }
 0x4c0   :  { %v12127_v13 = vpop.eup %12126  ;;  %v16733_v3 = vadd.f32 %v5496_v34, %v5464_v50  ;;  %12146 = vtanh.f32 %v4799_v35  ;;  %v16739_v17 = vpop.f32.mrb[10].mxu0  ;;  %5766 = vmatmul.mubr.bf16.gmra.mrb[48].mxu1 %v5645_v6  ;;  %5959 = vmatmul.mubr.bf16.gmra.mrb[48].mxu0 %v5645_v6  ;;  %v19761_v34 = vld [vmem:[#allocation258_spill] sm:$0xff]  ;;  %v19762_v6 = vld [vmem:[#allocation164_spill] sm:$0xff] }
 0x4c1   :  { %v12129_v54 = vpop.eup %12128  ;;  %v5497_v44 = vmul.f32 %v12127_v13, %v12117_v29  ;;  %12148 = vpow2.f32 %v10356_v9  ;;  %v16741_v60 = vpop.f32.mrb[11].mxu1  ;;  %5775 = vmatprep.mubr.bf16.mxu1 %v18798_v26  ;;  %5968 = vmatprep.mubr.bf16.mxu0 %v18798_v26  ;;  %v4803_v50 = vadd.f32 %v16645_v21, %v19761_v34  ;;  %v4805_v29 = vadd.f32 %v16661_v51, %v19762_v6 }
 0x4c2   :  { %19759 = vst [vmem:[#allocation128_spill] sm:$0xff] %v16733_v3  ;;  %v16743_v40 = vpop.f32.mrb[11].mxu0  ;;  %v12131_v35 = vpop.eup %12130  ;;  %12150 = vtanh.f32 %v16733_v3  ;;  %v5146_v24 = vadd.f32 1.0, %v12129_v54  ;;  %v10420_v2 = vmul.f32 -1.442695, %v4804_v37 }
 0x4c3   :  { %v12133_v9 = vpop.eup %12132  ;;  %v5465_v12 = vmul.f32 %v12131_v35, %v19603_v27  ;;  %12152 = vpow2.f32 %v10419_v0  ;;  %v10357_v55 = vmul.f32 -1.442695, %v4805_v29  ;;  %v16755_v21 = vpop.f32.mrb[12].mxu1  ;;  %v19764_v0 = vld [vmem:[#allocation256_spill] sm:$0xff] }
 0x4c4   :  { %v12135_v13 = vpop.eup %12134  ;;  %12154 = vrcp.f32 %v5146_v24  ;;  %v5370_v1 = vadd.f32 1.0, %v12133_v9  ;;  %v16757_v34 = vpop.f32.mrb[12].mxu0  ;;  %v4806_v35 = vadd.f32 %v16670_v15, %v19764_v0  ;;  %v19767_v15 = vld [vmem:[#allocation199_spill] sm:$0xff] }
 0x4c5   :  { %v12137_v19 = vpop.eup %12136  ;;  %v16753_v41 = vadd.f32 %v5497_v44, %v5465_v12  ;;  %12156 = vpow2.f32 %v10388_v48  ;;  %v16763_v37 = vpop.f32.mrb[13].mxu1 }
 0x4c6   :  { %v12139_v3 = vpop.eup %12138  ;;  %v5498_v54 = vmul.f32 %v12137_v19, %v12135_v13  ;;  %12158 = vtanh.f32 %v4803_v50  ;;  %v16765_v44 = vpop.f32.mrb[13].mxu0  ;;  %v19765_v19 = vld [vmem:[#allocation137_spill] sm:$0xff]  ;;  %v4809_v13 = vadd.f32 %v16674_v25, %v19767_v15  ;;  %v10389_v43 = vmul.f32 -1.442695, %v4806_v35 }
 0x4c7   :  { %19763 = vst [vmem:[#allocation296_spill] sm:$0xff] %v16753_v41  ;;  %v16759_v51 = vpop.eup %12140  ;;  %12160 = vrcp.f32 %v5370_v1  ;;  %v4955_v27 = vadd.f32 1.0, %v12139_v3  ;;  %v4808_v24 = vadd.f32 %v16672_v30, %v19765_v19  ;;  %v16769_v50 = vpop.f32.mrb[14].mxu1  ;;  %v19766_v3 = vld [vmem:[#allocation140_spill] sm:$0xff] }
 0x4c8   :  { %v12143_v48 = vpop.eup %12142  ;;  %12162 = vpow2.f32 %v10420_v2  ;;  %v16771_v29 = vpop.f32.mrb[14].mxu0  ;;  %v4807_v12 = vadd.f32 %v16663_v32, %v19766_v3  ;;  %v10358_v25 = vmul.f32 -1.442695, %v4809_v13 }
 0x4c9   :  { %v12145_v9 = vpop.eup %12144  ;;  %12164 = vrcp.f32 %v4955_v27  ;;  %v5147_v1 = vadd.f32 1.0, %v12143_v48  ;;  %v16777_v0 = vpop.f32.mrb[15].mxu1  ;;  %v10421_v48 = vmul.f32 -1.442695, %v4808_v24 }
 0x4ca   :  { %v16779_v6 = vpop.f32.mrb[15].mxu0  ;;  %v12147_v2 = vpop.eup %12146  ;;  %12166 = vpow2.f32 %v10357_v55  ;;  %v5591_v19 = vmul.f32 %v12145_v9, %v16719_v46  ;;  %v4811_v55 = vadd.f32 %v16676_v16, %v16169_v52  ;;  %v4810_v46 = vadd.f32 %v16680_v58, %v19768_v59  ;;  %v19769_v58 = vld [vmem:[#allocation147_spill] sm:$0xff] }
 0x4cb   :  { %v12149_v30 = vpop.eup %12148  ;;  %12168 = vrcp.f32 %v5147_v1  ;;  %v16788_v9 = vpop.f32.mrb[16].mxu1  ;;  %v4812_v52 = vadd.f32 %v16682_v63, %v19769_v58 }
 0x4cc   :  { %v12151_v10 = vpop.eup %12150  ;;  %12170 = vtanh.f32 %v16753_v41  ;;  %v4956_v27 = vadd.f32 1.0, %v12149_v30  ;;  %v16790_v35 = vpop.f32.mrb[16].mxu0  ;;  %v5623_v24 = vadd.f32 %v5591_v19, %v19617_v5 }
 0x4cd   :  { %v12153_v32 = vpop.eup %12152  ;;  %v5592_v3 = vmul.f32 %v12151_v10, %v16726_v36  ;;  %12172 = vtanh.f32 %v4807_v12  ;;  %v16795_v36 = vpop.f32.mrb[17].mxu1 }
 0x4ce   :  { %v12155_v15 = vpop.eup %12154  ;;  %12174 = vrcp.f32 %v4956_v27  ;;  %v16797_v12 = vpop.f32.mrb[17].mxu0  ;;  %v5371_v13 = vadd.f32 1.0, %v12153_v32 }
 0x4cf   :  { %v12157_v1 = vpop.eup %12156  ;;  %v5624_v30 = vadd.f32 %v5592_v3, %v19618_v42  ;;  %v5466_v10 = vmul.f32 %v12155_v15, %v19605_v7  ;;  %12176 = vpow2.f32 %v10389_v43  ;;  %v16801_v59 = vpop.f32.mrb[18].mxu1  ;;  %v19770_v43 = vld [vmem:[#allocation200_spill] sm:$0xff] }
 0x4d0   :  { %v12159_v16 = vpop.eup %12158  ;;  %v5148_v27 = vadd.f32 1.0, %v12157_v1  ;;  %12178 = vpow2.f32 %v10421_v48  ;;  %v16803_v41 = vpop.f32.mrb[18].mxu0  ;;  %v4813_v7 = vadd.f32 %v16690_v53, %v19770_v43  ;;  %v10390_v1 = vmul.f32 -1.442695, %v4810_v46 }
 0x4d1   :  { %v12161_v19 = vpop.eup %12160  ;;  %v5646_v3 = vpack.c.bf16 %v5624_v30, %v5623_v24  ;;  %v16805_v42 = vadd.f32 %v5498_v54, %v5466_v10  ;;  %12180 = vpow2.f32 %v10358_v25  ;;  %v16809_v15 = vpop.f32.mrb[19].mxu1  ;;  %v10422_v54 = vmul.f32 -1.442695, %v4812_v52 }
 0x4d2   :  { %v16811_v32 = vpop.f32.mrb[19].mxu0  ;;  %v12163_v48 = vpop.eup %12162  ;;  %12182 = vrcp.f32 %v5148_v27  ;;  %v10359_v30 = vmul.f32 -1.442695, %v4813_v7 }
 0x4d3   :  { %v12165_v63 = vpop.eup %12164  ;;  %12184 = vtanh.f32 %v16805_v42  ;;  %5776 = vmatmul.mubr.bf16.gmra.mrb[52].mxu1 %v5646_v3  ;;  %5969 = vmatmul.mubr.bf16.gmra.mrb[52].mxu0 %v5646_v3  ;;  %v5372_v27 = vadd.f32 1.0, %v12163_v48  ;;  %v4816_v3 = vadd.f32 %v16698_v22, %v16184_v11 }
 0x4d4   :  { %v12167_v5 = vpop.eup %12166  ;;  %v5499_v24 = vmul.f32 %v12165_v63, %v12147_v2  ;;  %12186 = vrcp.f32 %v5371_v13  ;;  %5785 = vmatprep.mubr.bf16.mxu1 %v18798_v26  ;;  %5978 = vmatprep.mubr.bf16.mxu0 %v18798_v26  ;;  %v4814_v2 = vadd.f32 %v16694_v28, %v16177_v20 }
 0x4d5   :  { %v12169_v53 = vpop.eup %12168  ;;  %v4957_v25 = vadd.f32 1.0, %v12167_v5  ;;  %12188 = vtanh.f32 %v4811_v55 }
 0x4d6   :  { %v12171_v10 = vpop.eup %12170  ;;  %v5467_v46 = vmul.f32 %v12169_v53, %v16204_v45  ;;  %12190 = vpow2.f32 %v10390_v1  ;;  %v4815_v45 = vadd.f32 %v16692_v8, %v16173_v33  ;;  %v19771_v1 = vld [vmem:[#allocation272_spill] sm:$0xff] }
 0x4d7   :  { %v12173_v43 = vpop.eup %12172  ;;  %12192 = vrcp.f32 %v4957_v25  ;;  %v4817_v63 = vadd.f32 %v16700_v38, %v19771_v1  ;;  %v5593_v53 = vmul.f32 %v12171_v10, %v16759_v51  ;;  %v19774_v51 = vld [vmem:[#allocation106_spill] sm:$0xff] }
 0x4d8   :  { %v12175_v13 = vpop.eup %12174  ;;  %v16819_v52 = vadd.f32 %v5499_v24, %v5467_v46  ;;  %12194 = vpow2.f32 %v10422_v54  ;;  %v10391_v24 = vmul.f32 -1.442695, %v4814_v2  ;;  %v4818_v10 = vadd.f32 %v16704_v4, %v19774_v51 }
 0x4d9   :  { %v12177_v5 = vpop.eup %12176  ;;  %v5500_v55 = vmul.f32 %v12175_v13, %v12159_v16  ;;  %12196 = vpow2.f32 %v10359_v30  ;;  %v10423_v16 = vmul.f32 -1.442695, %v4816_v3  ;;  %v19772_v30 = vld [vmem:[#allocation208_spill] sm:$0xff]  ;;  %v10360_v13 = vmul.f32 -1.442695, %v4817_v63  ;;  %v19775_v3 = vld [vmem:[#allocation266_spill] sm:$0xff] }
 0x4da   :  { %v12179_v7 = vpop.eup %12178  ;;  %12198 = vrcp.f32 %v5372_v27  ;;  %v5149_v48 = vadd.f32 1.0, %v12177_v5  ;;  %v5625_v63 = vadd.f32 %v5593_v53, %v19619_v18  ;;  %v10392_v18 = vmul.f32 -1.442695, %v4818_v10 }
 0x4db   :  { %v12181_v28 = vpop.eup %12180  ;;  %12200 = vtanh.f32 %v16819_v52  ;;  %v16830_v5 = vpop.f32.mrb[20].mxu1 }
 0x4dc   :  { %v12183_v54 = vpop.eup %12182  ;;  %12202 = vrcp.f32 %v5149_v48  ;;  %v4958_v22 = vadd.f32 1.0, %v12181_v28  ;;  %v16832_v38 = vpop.f32.mrb[20].mxu0  ;;  %v4820_v48 = vadd.f32 %v16706_v62, %v19775_v3  ;;  %v19776_v62 = vld [vmem:[#allocation311_spill] sm:$0xff] }
 0x4dd   :  { %v12185_v25 = vpop.eup %12184  ;;  %v5468_v46 = vmul.f32 %v12183_v54, %v19772_v30  ;;  %12204 = vtanh.f32 %v4815_v45  ;;  %v16840_v28 = vpop.f32.mrb[21].mxu1  ;;  %v4819_v30 = vadd.f32 %v16702_v14, %v19776_v62 }
 0x4de   :  { %v12187_v8 = vpop.eup %12186  ;;  %v5594_v27 = vmul.f32 %v12185_v25, %v12161_v19  ;;  %12206 = vrcp.f32 %v4958_v22  ;;  %v16842_v45 = vpop.f32.mrb[21].mxu0  ;;  %v5373_v22 = vadd.f32 1.0, %v12179_v7 }
 0x4df   :  { %v12189_v33 = vpop.eup %12188  ;;  %v16834_v2 = vadd.f32 %v5500_v55, %v5468_v46  ;;  %12208 = vpow2.f32 %v10391_v24  ;;  %v16846_v55 = vpop.f32.mrb[22].mxu1  ;;  %v19777_v46 = vld [vmem:[#allocation158_spill] sm:$0xff] }
 0x4e0   :  { %v12191_v19 = vpop.eup %12190  ;;  %v5626_v54 = vadd.f32 %v5594_v27, %v19620_v47  ;;  %12210 = vpow2.f32 %v10423_v16  ;;  %v16848_v24 = vpop.f32.mrb[22].mxu0  ;;  %v4821_v3 = vadd.f32 %v16722_v56, %v19777_v46 }
 0x4e1   :  { %19773 = vst [vmem:[#allocation198_spill] sm:$0xff] %v16834_v2  ;;  %v12193_v25 = vpop.eup %12192  ;;  %12212 = vtanh.f32 %v16834_v2  ;;  %v5150_v4 = vadd.f32 1.0, %v12191_v19  ;;  %v16855_v51 = vpop.f32.mrb[23].mxu1  ;;  %v10424_v2 = vmul.f32 -1.442695, %v4820_v48 }
 0x4e2   :  { %v16857_v53 = vpop.f32.mrb[23].mxu0  ;;  %v12195_v7 = vpop.eup %12194  ;;  %v5647_v16 = vpack.c.bf16 %v5626_v54, %v5625_v63  ;;  %v5501_v27 = vmul.f32 %v12193_v25, %v12173_v43  ;;  %12214 = vpow2.f32 %v10360_v13  ;;  %v10361_v56 = vmul.f32 -1.442695, %v4821_v3  ;;  %v19778_v43 = vld [vmem:[#allocation180_spill] sm:$0xff]  ;;  %v19779_v54 = vld [vmem:[#allocation169_spill] sm:$0xff] }
 0x4e3   :  { %v12197_v47 = vpop.eup %12196  ;;  %12216 = vrcp.f32 %v5150_v4  ;;  %v5374_v63 = vadd.f32 1.0, %v12195_v7  ;;  %v4822_v13 = vadd.f32 %v16729_v39, %v19778_v43  ;;  %v19781_v3 = vld [vmem:[#allocation209_spill] sm:$0xff] }
 0x4e4   :  { %v12199_v11 = vpop.eup %12198  ;;  %12218 = vrcp.f32 %v5373_v22  ;;  %v4959_v19 = vadd.f32 1.0, %v12197_v47  ;;  %5786 = vmatmul.mubr.bf16.gmra.mrb[56].mxu1 %v5647_v16  ;;  %5979 = vmatmul.mubr.bf16.gmra.mrb[56].mxu0 %v5647_v16  ;;  %v19780_v47 = vld [vmem:[#allocation316_spill] sm:$0xff]  ;;  %v4824_v4 = vadd.f32 %v16731_v49, %v19781_v3 }
 0x4e5   :  { %v12201_v14 = vpop.eup %12200  ;;  %12220 = vtanh.f32 %v4819_v30  ;;  %5795 = vmatprep.mubr.bf16.mxu1 %v18798_v26  ;;  %5988 = vmatprep.mubr.bf16.mxu0 %v18798_v26  ;;  %v4823_v48 = vadd.f32 %v16724_v57, %v19780_v47 }
 0x4e6   :  { %v12203_v62 = vpop.eup %12202  ;;  %12222 = vrcp.f32 %v4959_v19  ;;  %v19782_v19 = vld [vmem:[#allocation91_spill] sm:$0xff]  ;;  %v5595_v46 = vmul.f32 %v12201_v14, %v12187_v8  ;;  %v10425_v47 = vmul.f32 -1.442695, %v4824_v4 }
 0x4e7   :  { %v12205_v10 = vpop.eup %12204  ;;  %v5469_v22 = vmul.f32 %v12203_v62, %v19779_v54  ;;  %12224 = vpow2.f32 %v10392_v18  ;;  %v4825_v39 = vadd.f32 %v16737_v31, %v19782_v19  ;;  %v10393_v62 = vmul.f32 -1.442695, %v4822_v13  ;;  %v19783_v14 = vld [vmem:[#allocation175_spill] sm:$0xff] }
 0x4e8   :  { %v12207_v25 = vpop.eup %12206  ;;  %12226 = vpow2.f32 %v10424_v2  ;;  %v5627_v31 = vadd.f32 %v5595_v46, %v19627_v23 }
 0x4e9   :  { %v12209_v30 = vpop.eup %12208  ;;  %v16868_v16 = vadd.f32 %v5501_v27, %v5469_v22  ;;  %v5502_v7 = vmul.f32 %v12207_v25, %v12189_v33  ;;  %12228 = vpow2.f32 %v10361_v56  ;;  %v10362_v33 = vmul.f32 -1.442695, %v4825_v39  ;;  %v19785_v39 = vld [vmem:[#allocation96_spill] sm:$0xff] }
 0x4ea   :  { %v12211_v43 = vpop.eup %12210  ;;  %12230 = vrcp.f32 %v5374_v63  ;;  %v5151_v18 = vadd.f32 1.0, %v12209_v30 }
 0x4eb   :  { %v12213_v54 = vpop.eup %12212  ;;  %12232 = vtanh.f32 %v4823_v48  ;;  %v5375_v22 = vadd.f32 1.0, %v12211_v43 }
 0x4ec   :  { %v12215_v57 = vpop.eup %12214  ;;  %v5596_v2 = vmul.f32 %v12213_v54, %v12199_v11  ;;  %12234 = vrcp.f32 %v5151_v18  ;;  %v19784_v11 = vld [vmem:[#allocation170_spill] sm:$0xff]  ;;  %v4828_v18 = vadd.f32 %v16743_v40, %v19785_v39 }
 0x4ed   :  { %v12217_v49 = vpop.eup %12216  ;;  %12236 = vtanh.f32 %v16868_v16  ;;  %v4960_v27 = vadd.f32 1.0, %v12215_v57  ;;  %v4826_v48 = vadd.f32 %v16741_v60, %v19784_v11  ;;  %v19786_v57 = vld [vmem:[#allocation321_spill] sm:$0xff]  ;;  %v19791_v11 = vld [vmem:[#allocation118_spill] sm:$0xff] }
 0x4ee   :  { %v16873_v56 = vpop.eup %12218  ;;  %v5628_v8 = vadd.f32 %v5596_v2, %v19628_v61  ;;  %v5470_v63 = vmul.f32 %v12217_v49, %v19783_v14  ;;  %12238 = vpow2.f32 %v10393_v62  ;;  %v4827_v62 = vadd.f32 %v16739_v17, %v19786_v57  ;;  %v19787_v2 = vld [vmem:[#allocation276_spill] sm:$0xff]  ;;  %v16888_v49 = vpop.f32.mrb[24].mxu1  ;;  %v19789_v61 = vld [vmem:[#allocation325_spill] sm:$0xff] }
 0x4ef   :  { %v12221_v13 = vpop.eup %12220  ;;  %12240 = vrcp.f32 %v4960_v27  ;;  %v4829_v43 = vadd.f32 %v16755_v21, %v19787_v2  ;;  %v16890_v60 = vpop.f32.mrb[24].mxu0  ;;  %v10394_v17 = vmul.f32 -1.442695, %v4826_v48  ;;  %v10426_v14 = vmul.f32 -1.442695, %v4828_v18  ;;  %v19788_v2 = vld [vmem:[#allocation274_spill] sm:$0xff] }
 0x4f0   :  { %v12223_v25 = vpop.eup %12222  ;;  %v5648_v4 = vpack.c.bf16 %v5628_v8, %v5627_v31  ;;  %v16880_v30 = vadd.f32 %v5502_v7, %v5470_v63  ;;  %12242 = vpow2.f32 %v10425_v47  ;;  %v16893_v40 = vpop.f32.mrb[25].mxu1  ;;  %v4831_v23 = vadd.f32 %v16757_v34, %v19789_v61 }
 0x4f1   :  { %v12225_v46 = vpop.eup %12224  ;;  %v5503_v54 = vmul.f32 %v12223_v25, %v12205_v10  ;;  %12244 = vpow2.f32 %v10362_v33  ;;  %v16895_v10 = vpop.f32.mrb[25].mxu0  ;;  %v4832_v19 = vadd.f32 %v16765_v44, %v19791_v11 }
 0x4f2   :  { %v12227_v27 = vpop.eup %12226  ;;  %12246 = vtanh.f32 %v16880_v30  ;;  %v5152_v47 = vadd.f32 1.0, %v12225_v46  ;;  %5796 = vmatmul.mubr.bf16.gmra.mrb[60].mxu1 %v5648_v4  ;;  %5989 = vmatmul.mubr.bf16.gmra.mrb[60].mxu0 %v5648_v4  ;;  %v16899_v21 = vpop.f32.mrb[26].mxu1 }
 0x4f3   :  { %v12229_v7 = vpop.eup %12228  ;;  %12248 = vrcp.f32 %v5375_v22  ;;  %5805 = vmatprep.mubr.bf16.mxu1 %v18798_v26  ;;  %5998 = vmatprep.mubr.bf16.mxu0 %v18798_v26  ;;  %v16901_v33 = vpop.f32.mrb[26].mxu0  ;;  %v10363_v22 = vmul.f32 -1.442695, %v4829_v43  ;;  %v5376_v46 = vadd.f32 1.0, %v12227_v27  ;;  %v10427_v44 = vmul.f32 -1.442695, %v4832_v19 }
 0x4f4   :  { %v12231_v31 = vpop.eup %12230  ;;  %12250 = vrcp.f32 %v5152_v47  ;;  %v4961_v8 = vadd.f32 1.0, %v12229_v7  ;;  %v16903_v63 = vpop.f32.mrb[27].mxu1  ;;  %v19790_v47 = vld [vmem:[#allocation95_spill] sm:$0xff] }
 0x4f5   :  { %v16905_v25 = vpop.f32.mrb[27].mxu0  ;;  %v12233_v4 = vpop.eup %12232  ;;  %12252 = vtanh.f32 %v4827_v62  ;;  %v4830_v18 = vadd.f32 %v16763_v37, %v19790_v47 }
 0x4f6   :  { %v12235_v48 = vpop.eup %12234  ;;  %12254 = vrcp.f32 %v4961_v8  ;;  %v19792_v8 = vld [vmem:[#allocation101_spill] sm:$0xff] }
 0x4f7   :  { %v12237_v57 = vpop.eup %12236  ;;  %v5471_v39 = vmul.f32 %v12235_v48, %v19788_v2  ;;  %12256 = vpow2.f32 %v10394_v17  ;;  %v4833_v2 = vadd.f32 %v16769_v50, %v19792_v8  ;;  %v10395_v37 = vmul.f32 -1.442695, %v4830_v18 }
 0x4f8   :  { %v12239_v7 = vpop.eup %12238  ;;  %12258 = vpow2.f32 %v10426_v14  ;;  %v5597_v61 = vmul.f32 %v12237_v57, %v16873_v56  ;;  %v19794_v56 = vld [vmem:[#allocation292_spill] sm:$0xff]  ;;  %v19795_v57 = vld [vmem:[#allocation293_spill] sm:$0xff] }
 0x4f9   :  { %v12241_v62 = vpop.eup %12240  ;;  %v16914_v43 = vadd.f32 %v5503_v54, %v5471_v39  ;;  %v5153_v27 = vadd.f32 1.0, %v12239_v7  ;;  %12260 = vpow2.f32 %v10363_v22  ;;  %v10364_v54 = vmul.f32 -1.442695, %v4833_v2  ;;  %v19798_v2 = vld [vmem:[#allocation228_spill] sm:$0xff] }
 0x4fa   :  { %v12243_v17 = vpop.eup %12242  ;;  %v5504_v48 = vmul.f32 %v12241_v62, %v12221_v13  ;;  %12262 = vrcp.f32 %v5376_v46  ;;  %v19793_v13 = vld [vmem:[#allocation277_spill] sm:$0xff]  ;;  %v19796_v62 = vld [vmem:[#allocation187_spill] sm:$0xff] }
 0x4fb   :  { %v12245_v34 = vpop.eup %12244  ;;  %12264 = vtanh.f32 %v4831_v23  ;;  %v5377_v50 = vadd.f32 1.0, %v12243_v17  ;;  %v4834_v46 = vadd.f32 %v16777_v0, %v19793_v13  ;;  %v5629_v23 = vadd.f32 %v5597_v61, %v19794_v56 }
 0x4fc   :  { %v12247_v14 = vpop.eup %12246  ;;  %12266 = vrcp.f32 %v5153_v27  ;;  %v4962_v47 = vadd.f32 1.0, %v12245_v34  ;;  %v4836_v17 = vadd.f32 %v16779_v6, %v19798_v2 }
 0x4fd   :  { %v16919_v11 = vpop.eup %12248  ;;  %v5598_v39 = vmul.f32 %v12247_v14, %v12231_v31  ;;  %12268 = vtanh.f32 %v16914_v43  ;;  %v19797_v31 = vld [vmem:[#allocation329_spill] sm:$0xff] }
 0x4fe   :  { %v12251_v22 = vpop.eup %12250  ;;  %12270 = vrcp.f32 %v4962_v47  ;;  %v4835_v34 = vadd.f32 %v16771_v29, %v19797_v31  ;;  %v19799_v47 = vld [vmem:[#allocation53_spill] sm:$0xff] }
 0x4ff   :  { %v12253_v7 = vpop.eup %12252  ;;  %v5630_v18 = vadd.f32 %v5598_v39, %v19795_v57  ;;  %v5472_v27 = vmul.f32 %v12251_v22, %v19796_v62  ;;  %12272 = vpow2.f32 %v10395_v37  ;;  %v6039_v14 = vadd.f32 %v16788_v9, %v19799_v47 }
 0x500   :  { %v12255_v19 = vpop.eup %12254  ;;  %12274 = vpow2.f32 %v10427_v44  ;;  %v10396_v44 = vmul.f32 -1.442695, %v4834_v46  ;;  %v10428_v62 = vmul.f32 -1.442695, %v4836_v17  ;;  %v19801_v17 = vld [vmem:[#allocation103_spill] sm:$0xff] }
 0x501   :  { %v12257_v0 = vpop.eup %12256  ;;  %v5649_v13 = vpack.c.bf16 %v5630_v18, %v5629_v23  ;;  %v16933_v8 = vadd.f32 %v5504_v48, %v5472_v27  ;;  %v5505_v61 = vmul.f32 %v12255_v19, %v12233_v4  ;;  %12276 = vpow2.f32 %v10364_v54  ;;  %v16938_v9 = vpop.f32.mrb[28].mxu1 }
 0x502   :  { %v12259_v39 = vpop.eup %12258  ;;  %12278 = vrcp.f32 %v5377_v50  ;;  %v5154_v37 = vadd.f32 1.0, %v12257_v0  ;;  %v16940_v4 = vpop.f32.mrb[28].mxu0  ;;  %v10429_v54 = vmul.f32 -1.442695, %v6039_v14  ;;  %v19802_v0 = vld [vmem:[#allocation59_spill] sm:$0xff] }
 0x503   :  { %19800 = vst [vmem:[#allocation142_spill] sm:$0xff] %v16933_v8  ;;  %v12261_v22 = vpop.eup %12260  ;;  %12280 = vtanh.f32 %v16933_v8  ;;  %5806 = vmatmul.mubr.bf16.gmra.mrb[64].mxu1 %v5649_v13  ;;  %5999 = vmatmul.mubr.bf16.gmra.mrb[64].mxu0 %v5649_v13  ;;  %v16942_v50 = vpop.f32.mrb[29].mxu1  ;;  %v5378_v23 = vadd.f32 1.0, %v12259_v39 }
 0x504   :  { %v12263_v29 = vpop.eup %12262  ;;  %12282 = vrcp.f32 %v5154_v37  ;;  %v4963_v6 = vadd.f32 1.0, %v12261_v22  ;;  %5815 = vmatprep.mubr.bf16.mxu1 %v18798_v26  ;;  %6008 = vmatprep.mubr.bf16.mxu0 %v18798_v26  ;;  %v16944_v46 = vpop.f32.mrb[29].mxu0  ;;  %v6041_v37 = vadd.f32 %v16790_v35, %v19802_v0 }
 0x505   :  { %v12265_v48 = vpop.eup %12264  ;;  %12284 = vtanh.f32 %v4835_v34  ;;  %v16946_v18 = vpop.f32.mrb[30].mxu1  ;;  %v19803_v34 = vld [vmem:[#allocation55_spill] sm:$0xff] }
 0x506   :  { %v12267_v13 = vpop.eup %12266  ;;  %12286 = vrcp.f32 %v4963_v6  ;;  %v16948_v27 = vpop.f32.mrb[30].mxu0  ;;  %v6040_v14 = vadd.f32 %v16795_v36, %v19803_v34  ;;  %v19804_v6 = vld [vmem:[#allocation58_spill] sm:$0xff] }
 0x507   :  { %v12269_v19 = vpop.eup %12268  ;;  %v5473_v47 = vmul.f32 %v12267_v13, %v19801_v17  ;;  %12288 = vpow2.f32 %v10396_v44  ;;  %v16955_v22 = vpop.f32.mrb[31].mxu1  ;;  %v6042_v57 = vadd.f32 %v16797_v12, %v19804_v6  ;;  %v19806_v44 = vld [vmem:[#allocation56_spill] sm:$0xff] }
 0x508   :  { %v16957_v31 = vpop.f32.mrb[31].mxu0  ;;  %v12271_v39 = vpop.eup %12270  ;;  %12290 = vpow2.f32 %v10428_v62  ;;  %v6043_v35 = vadd.f32 %v16801_v59, %v19806_v44  ;;  %v10461_v34 = vmul.f32 -1.442695, %v6040_v14  ;;  %v5599_v62 = vmul.f32 %v12269_v19, %v16919_v11  ;;  %v19809_v44 = vld [vmem:[#allocation57_spill] sm:$0xff] }
 0x509   :  { %v12273_v2 = vpop.eup %12272  ;;  %v16961_v56 = vadd.f32 %v5505_v61, %v5473_v47  ;;  %v5506_v13 = vmul.f32 %v12271_v39, %v12253_v7  ;;  %12292 = vpow2.f32 %v10429_v54  ;;  %v10493_v6 = vmul.f32 -1.442695, %v6042_v57  ;;  %v19810_v57 = vld [vmem:[#allocation298_spill] sm:$0xff] }
 0x50a   :  { %v12275_v17 = vpop.eup %12274  ;;  %12294 = vrcp.f32 %v5378_v23  ;;  %v5155_v36 = vadd.f32 1.0, %v12273_v2  ;;  %v10430_v7 = vmul.f32 -1.442695, %v6043_v35  ;;  %v19807_v2 = vld [vmem:[#allocation86_spill] sm:$0xff]  ;;  %v6044_v11 = vadd.f32 %v16809_v15, %v19809_v44 }
 0x50b   :  { %19805 = vst [vmem:[#allocation264_spill] sm:$0xff] %v16961_v56  ;;  %v12277_v0 = vpop.eup %12276  ;;  %12296 = vtanh.f32 %v6041_v37  ;;  %v5379_v59 = vadd.f32 1.0, %v12275_v17  ;;  %v19808_v37 = vld [vmem:[#allocation154_spill] sm:$0xff] }
 0x50c   :  { %v16965_v8 = vpop.eup %12278  ;;  %12298 = vrcp.f32 %v5155_v36  ;;  %v4964_v12 = vadd.f32 1.0, %v12277_v0  ;;  %v6045_v14 = vadd.f32 %v16803_v41, %v19808_v37  ;;  %v5631_v36 = vadd.f32 %v5599_v62, %v19810_v57  ;;  %v19811_v0 = vld [vmem:[#allocation299_spill] sm:$0xff]  ;;  %v19812_v35 = vld [vmem:[#allocation206_spill] sm:$0xff] }
 0x50d   :  { %v12281_v61 = vpop.eup %12280  ;;  %12300 = vtanh.f32 %v16961_v56  ;;  %v10462_v62 = vmul.f32 -1.442695, %v6044_v11 }
 0x50e   :  { %v12283_v54 = vpop.eup %12282  ;;  %v5600_v47 = vmul.f32 %v12281_v61, %v12263_v29  ;;  %12302 = vrcp.f32 %v4964_v12  ;;  %v6046_v29 = vadd.f32 %v16811_v32, %v19812_v35  ;;  %v19815_v35 = vld [vmem:[#allocation283_spill] sm:$0xff] }
 0x50f   :  { %v12285_v23 = vpop.eup %12284  ;;  %v5474_v39 = vmul.f32 %v12283_v54, %v19807_v2  ;;  %12304 = vpow2.f32 %v10461_v34  ;;  %v19814_v34 = vld [vmem:[#allocation60_spill] sm:$0xff] }
 0x510   :  { %v12287_v19 = vpop.eup %12286  ;;  %v5632_v56 = vadd.f32 %v5600_v47, %v19811_v0  ;;  %12306 = vpow2.f32 %v10493_v6  ;;  %v6047_v41 = vadd.f32 %v16830_v5, %v19814_v34 }
 0x511   :  { %v12289_v17 = vpop.eup %12288  ;;  %v16978_v12 = vadd.f32 %v5506_v13, %v5474_v39  ;;  %v5507_v61 = vmul.f32 %v12287_v19, %v12265_v48  ;;  %12308 = vpow2.f32 %v10430_v7  ;;  %v10494_v13 = vmul.f32 -1.442695, %v6046_v29  ;;  %v16983_v47 = vpop.f32.mrb[32].mxu1 }
 0x512   :  { %v12291_v54 = vpop.eup %12290  ;;  %v5650_v2 = vpack.c.bf16 %v5632_v56, %v5631_v36  ;;  %12310 = vrcp.f32 %v5379_v59  ;;  %v5156_v15 = vadd.f32 1.0, %v12289_v17  ;;  %v16985_v48 = vpop.f32.mrb[32].mxu0  ;;  %v10431_v5 = vmul.f32 -1.442695, %v6047_v41  ;;  %v19816_v17 = vld [vmem:[#allocation212_spill] sm:$0xff] }
 0x513   :  { %19813 = vst [vmem:[#allocation127_spill] sm:$0xff] %v16978_v12  ;;  %v12293_v37 = vpop.eup %12292  ;;  %12312 = vtanh.f32 %v16978_v12  ;;  %v16989_v56 = vpop.f32.mrb[33].mxu1  ;;  %v5380_v44 = vadd.f32 1.0, %v12291_v54  ;;  %v6049_v34 = vadd.f32 %v16832_v38, %v19816_v17 }
 0x514   :  { %v12295_v6 = vpop.eup %12294  ;;  %12314 = vrcp.f32 %v5156_v15  ;;  %5816 = vmatmul.mubr.bf16.gmra.mrb[68].mxu1 %v5650_v2  ;;  %6009 = vmatmul.mubr.bf16.gmra.mrb[68].mxu0 %v5650_v2  ;;  %v6263_v32 = vadd.f32 1.0, %v12293_v37  ;;  %v16991_v59 = vpop.f32.mrb[33].mxu0  ;;  %v19818_v37 = vld [vmem:[#allocation79_spill] sm:$0xff] }
 0x515   :  { %v12297_v7 = vpop.eup %12296  ;;  %5825 = vmatprep.mubr.bf16.mxu1 %v18798_v26  ;;  %6018 = vmatprep.mubr.bf16.mxu0 %v18798_v26  ;;  %12316 = vtanh.f32 %v6045_v14  ;;  %v16993_v11 = vpop.f32.mrb[34].mxu1  ;;  %v19817_v14 = vld [vmem:[#allocation204_spill] sm:$0xff] }
 0x516   :  { %v12299_v39 = vpop.eup %12298  ;;  %12318 = vrcp.f32 %v6263_v32  ;;  %v16995_v19 = vpop.f32.mrb[34].mxu0  ;;  %v6048_v41 = vadd.f32 %v16840_v28, %v19817_v14  ;;  %v6050_v32 = vadd.f32 %v16842_v45, %v19818_v37 }
 0x517   :  { %v12301_v36 = vpop.eup %12300  ;;  %v5475_v29 = vmul.f32 %v12299_v39, %v19815_v35  ;;  %12320 = vpow2.f32 %v10462_v62  ;;  %v17002_v2 = vpop.f32.mrb[35].mxu1  ;;  %v19820_v62 = vld [vmem:[#allocation62_spill] sm:$0xff] }
 0x518   :  { %v17004_v15 = vpop.f32.mrb[35].mxu0  ;;  %v12303_v54 = vpop.eup %12302  ;;  %12322 = vpow2.f32 %v10494_v13  ;;  %v6051_v38 = vadd.f32 %v16846_v55, %v19820_v62  ;;  %v10463_v14 = vmul.f32 -1.442695, %v6048_v41  ;;  %v5601_v13 = vmul.f32 %v12301_v36, %v16965_v8  ;;  %v19823_v62 = vld [vmem:[#allocation64_spill] sm:$0xff] }
 0x519   :  { %v12305_v0 = vpop.eup %12304  ;;  %v17008_v57 = vadd.f32 %v5507_v61, %v5475_v29  ;;  %v5508_v39 = vmul.f32 %v12303_v54, %v12285_v23  ;;  %12324 = vpow2.f32 %v10431_v5  ;;  %v10495_v37 = vmul.f32 -1.442695, %v6050_v32  ;;  %v19824_v32 = vld [vmem:[#allocation306_spill] sm:$0xff] }
 0x51a   :  { %v12307_v35 = vpop.eup %12306  ;;  %12326 = vrcp.f32 %v5380_v44  ;;  %v6455_v28 = vadd.f32 1.0, %v12305_v0  ;;  %v10432_v23 = vmul.f32 -1.442695, %v6051_v38  ;;  %v19821_v0 = vld [vmem:[#allocation108_spill] sm:$0xff]  ;;  %v6052_v8 = vadd.f32 %v16855_v51, %v19823_v62  ;;  %v19826_v38 = vld [vmem:[#allocation66_spill] sm:$0xff] }
 0x51b   :  { %19819 = vst [vmem:[#allocation291_spill] sm:$0xff] %v17008_v57  ;;  %v12309_v17 = vpop.eup %12308  ;;  %12328 = vtanh.f32 %v6049_v34  ;;  %v6679_v55 = vadd.f32 1.0, %v12307_v35  ;;  %v19822_v34 = vld [vmem:[#allocation68_spill] sm:$0xff] }
 0x51c   :  { %v17012_v12 = vpop.eup %12310  ;;  %12330 = vrcp.f32 %v6455_v28  ;;  %v6264_v45 = vadd.f32 1.0, %v12309_v17  ;;  %v6053_v41 = vadd.f32 %v16848_v24, %v19822_v34  ;;  %v5633_v28 = vadd.f32 %v5601_v13, %v19824_v32  ;;  %v19825_v17 = vld [vmem:[#allocation309_spill] sm:$0xff]  ;;  %v19829_v62 = vld [vmem:[#allocation284_spill] sm:$0xff] }
 0x51d   :  { %v12313_v61 = vpop.eup %12312  ;;  %12332 = vtanh.f32 %v17008_v57  ;;  %v10464_v13 = vmul.f32 -1.442695, %v6052_v8 }
 0x51e   :  { %v12315_v5 = vpop.eup %12314  ;;  %v5602_v29 = vmul.f32 %v12313_v61, %v12295_v6  ;;  %12334 = vrcp.f32 %v6264_v45  ;;  %v6054_v6 = vadd.f32 %v16857_v53, %v19826_v38 }
 0x51f   :  { %v12317_v44 = vpop.eup %12316  ;;  %v5476_v54 = vmul.f32 %v12315_v5, %v19821_v0  ;;  %12336 = vpow2.f32 %v10463_v14  ;;  %v19827_v14 = vld [vmem:[#allocation214_spill] sm:$0xff] }
 0x520   :  { %v12319_v36 = vpop.eup %12318  ;;  %v5634_v57 = vadd.f32 %v5602_v29, %v19825_v17  ;;  %12338 = vpow2.f32 %v10495_v37  ;;  %v6055_v24 = vadd.f32 %v16888_v49, %v19827_v14  ;;  %v19828_v37 = vld [vmem:[#allocation69_spill] sm:$0xff] }
 0x521   :  { %v12321_v35 = vpop.eup %12320  ;;  %v17025_v45 = vadd.f32 %v5508_v39, %v5476_v54  ;;  %v6807_v61 = vmul.f32 %v12319_v36, %v12297_v7  ;;  %12340 = vpow2.f32 %v10432_v23  ;;  %v6056_v29 = vadd.f32 %v16893_v40, %v19828_v37  ;;  %v19830_v36 = vld [vmem:[#allocation61_spill] sm:$0xff] }
 0x522   :  { %v12323_v5 = vpop.eup %12322  ;;  %v5651_v0 = vpack.c.bf16 %v5634_v57, %v5633_v28  ;;  %12342 = vrcp.f32 %v6679_v55  ;;  %v6456_v51 = vadd.f32 1.0, %v12321_v35  ;;  %v10496_v39 = vmul.f32 -1.442695, %v6054_v6  ;;  %v19831_v6 = vld [vmem:[#allocation216_spill] sm:$0xff] }
 0x523   :  { %v12325_v34 = vpop.eup %12324  ;;  %12344 = vtanh.f32 %v17025_v45  ;;  %v10433_v49 = vmul.f32 -1.442695, %v6055_v24  ;;  %v6680_v55 = vadd.f32 1.0, %v12323_v5  ;;  %v10465_v40 = vmul.f32 -1.442695, %v6056_v29  ;;  %v19834_v29 = vld [vmem:[#allocation217_spill] sm:$0xff] }
 0x524   :  { %v12327_v53 = vpop.eup %12326  ;;  %5826 = vmatmul.mubr.bf16.gmra.mrb[72].mxu1 %v5651_v0  ;;  %6019 = vmatmul.mubr.bf16.gmra.mrb[72].mxu0 %v5651_v0  ;;  %12346 = vrcp.f32 %v6456_v51  ;;  %v6265_v7 = vadd.f32 1.0, %v12325_v34  ;;  %v6058_v28 = vadd.f32 %v16895_v10, %v19830_v36  ;;  %v6059_v35 = vadd.f32 %v16899_v21, %v19831_v6  ;;  %v19833_v34 = vld [vmem:[#allocation82_spill] sm:$0xff]  ;;  %v19838_v6 = vld [vmem:[#allocation319_spill] sm:$0xff] }
 0x525   :  { %v12329_v23 = vpop.eup %12328  ;;  %5835 = vmatprep.mubr.bf16.mxu1 %v18798_v26  ;;  %6028 = vmatprep.mubr.bf16.mxu0 %v18798_v26  ;;  %12348 = vtanh.f32 %v6053_v41  ;;  %v19832_v41 = vld [vmem:[#allocation213_spill] sm:$0xff]  ;;  %v6062_v21 = vadd.f32 %v16905_v25, %v19834_v29  ;;  %v19836_v25 = vld [vmem:[#allocation63_spill] sm:$0xff] }
 0x526   :  { %v12331_v57 = vpop.eup %12330  ;;  %12350 = vrcp.f32 %v6265_v7  ;;  %v6057_v24 = vadd.f32 %v16890_v60, %v19832_v41  ;;  %v10497_v37 = vmul.f32 -1.442695, %v6058_v28  ;;  %v6063_v28 = vadd.f32 %v16938_v9, %v19836_v25 }
 0x527   :  { %v12333_v54 = vpop.eup %12332  ;;  %v6775_v8 = vmul.f32 %v12331_v57, %v19829_v62  ;;  %12352 = vpow2.f32 %v10464_v13  ;;  %v6060_v13 = vadd.f32 %v16903_v63, %v19833_v34  ;;  %v10498_v36 = vmul.f32 -1.442695, %v6062_v21  ;;  %v19841_v21 = vld [vmem:[#allocation71_spill] sm:$0xff] }
 0x528   :  { %v12335_v38 = vpop.eup %12334  ;;  %12354 = vpow2.f32 %v10496_v39  ;;  %v10435_v29 = vmul.f32 -1.442695, %v6063_v28 }
 0x529   :  { %v12337_v14 = vpop.eup %12336  ;;  %v6808_v26 = vmul.f32 %v12335_v38, %v12317_v44  ;;  %12356 = vpow2.f32 %v10433_v49  ;;  %v17041_v5 = vadd.f32 %v6807_v61, %v6775_v8  ;;  %v5603_v44 = vmul.f32 %v12333_v54, %v17012_v12  ;;  %v19835_v8 = vld [vmem:[#allocation122_spill] sm:$0xff]  ;;  %v19837_v12 = vld [vmem:[#allocation315_spill] sm:$0xff] }
 0x52a   :  { %v12339_v0 = vpop.eup %12338  ;;  %12358 = vrcp.f32 %v6680_v55  ;;  %v6457_v51 = vadd.f32 1.0, %v12337_v14  ;;  %v10434_v61 = vmul.f32 -1.442695, %v6059_v35  ;;  %v10466_v63 = vmul.f32 -1.442695, %v6060_v13 }
 0x52b   :  { %v12341_v10 = vpop.eup %12340  ;;  %12360 = vpow2.f32 %v10465_v40  ;;  %v6681_v49 = vadd.f32 1.0, %v12339_v0  ;;  %v5635_v54 = vadd.f32 %v5603_v44, %v19837_v12  ;;  %v6066_v44 = vadd.f32 %v16944_v46, %v19841_v21  ;;  %v19847_v21 = vld [vmem:[#allocation223_spill] sm:$0xff] }
 0x52c   :  { %v17047_v7 = vpop.eup %12342  ;;  %12362 = vrcp.f32 %v6457_v51  ;;  %v6266_v60 = vadd.f32 1.0, %v12341_v10  ;;  %v19840_v10 = vld [vmem:[#allocation65_spill] sm:$0xff] }
 0x52d   :  { %v12345_v39 = vpop.eup %12344  ;;  %12364 = vtanh.f32 %v6057_v24  ;;  %v6064_v9 = vadd.f32 %v16942_v50, %v19840_v10  ;;  %v19842_v50 = vld [vmem:[#allocation215_spill] sm:$0xff]  ;;  %v10499_v46 = vmul.f32 -1.442695, %v6066_v44 }
 0x52e   :  { %v12347_v57 = vpop.eup %12346  ;;  %v5604_v55 = vmul.f32 %v12345_v39, %v12327_v53  ;;  %12366 = vrcp.f32 %v6266_v60  ;;  %v19839_v53 = vld [vmem:[#allocation67_spill] sm:$0xff] }
 0x52f   :  { %v12349_v62 = vpop.eup %12348  ;;  %v6776_v40 = vmul.f32 %v12347_v57, %v19835_v8  ;;  %12368 = vpow2.f32 %v10497_v37  ;;  %v6061_v24 = vadd.f32 %v16901_v33, %v19839_v53  ;;  %v6067_v57 = vadd.f32 %v16946_v18, %v19842_v50  ;;  %v19845_v53 = vld [vmem:[#allocation70_spill] sm:$0xff] }
 0x530   :  { %v12351_v38 = vpop.eup %12350  ;;  %v5636_v35 = vadd.f32 %v5604_v55, %v19838_v6  ;;  %12370 = vpow2.f32 %v10434_v61  ;;  %v6068_v18 = vadd.f32 %v16955_v22, %v19845_v53  ;;  %v6070_v22 = vadd.f32 %v16957_v31, %v19847_v21  ;;  %v19854_v53 = vld [vmem:[#allocation81_spill] sm:$0xff] }
 0x531   :  { %v12353_v14 = vpop.eup %12352  ;;  %v6809_v41 = vmul.f32 %v12351_v38, %v12329_v23  ;;  %12372 = vrcp.f32 %v6681_v49  ;;  %v17057_v0 = vadd.f32 %v6808_v26, %v6776_v40  ;;  %v10467_v49 = vmul.f32 -1.442695, %v6064_v9 }
 0x532   :  { %v12355_v51 = vpop.eup %12354  ;;  %v5652_v34 = vpack.c.bf16 %v5636_v35, %v5635_v54  ;;  %v6458_v13 = vadd.f32 1.0, %v12353_v14  ;;  %12374 = vpow2.f32 %v10466_v63  ;;  %v19843_v63 = vld [vmem:[#allocation229_spill] sm:$0xff]  ;;  %v10436_v14 = vmul.f32 -1.442695, %v6067_v57 }
 0x533   :  { %v12357_v37 = vpop.eup %12356  ;;  %12376 = vpow2.f32 %v10498_v36  ;;  %v6682_v60 = vadd.f32 1.0, %v12355_v51  ;;  %v19844_v36 = vld [vmem:[#allocation221_spill] sm:$0xff] }
 0x534   :  { %v17063_v23 = vpop.eup %12358  ;;  %5836 = vmatmul.mubr.bf16.gmra.mrb[76].mxu1 %v5652_v34  ;;  %6029 = vmatmul.mubr.bf16.gmra.mrb[76].mxu0 %v5652_v34  ;;  %12378 = vrcp.f32 %v6458_v13  ;;  %v6267_v33 = vadd.f32 1.0, %v12357_v37  ;;  %v6065_v25 = vadd.f32 %v16940_v4, %v19844_v36 }
 0x535   :  { %v12361_v26 = vpop.eup %12360  ;;  %12380 = vtanh.f32 %v6061_v24 }
 0x536   :  { %v12363_v61 = vpop.eup %12362  ;;  %12382 = vrcp.f32 %v6267_v33  ;;  %v6459_v39 = vadd.f32 1.0, %v12361_v26  ;;  %v19848_v33 = vld [vmem:[#allocation189_spill] sm:$0xff] }
 0x537   :  { %v12365_v55 = vpop.eup %12364  ;;  %v6777_v8 = vmul.f32 %v12363_v61, %v19843_v63  ;;  %12384 = vpow2.f32 %v10435_v29  ;;  %v10468_v29 = vmul.f32 -1.442695, %v6068_v18 }
 0x538   :  { %v12367_v40 = vpop.eup %12366  ;;  %12386 = vrcp.f32 %v6459_v39 }
 0x539   :  { %v12369_v28 = vpop.eup %12368  ;;  %v6810_v38 = vmul.f32 %v12367_v40, %v12349_v62  ;;  %12388 = vrcp.f32 %v6682_v60  ;;  %v17070_v54 = vadd.f32 %v6809_v41, %v6777_v8  ;;  %v19846_v62 = vld [vmem:[#allocation73_spill] sm:$0xff]  ;;  %v19849_v60 = vld [vmem:[#allocation72_spill] sm:$0xff]  ;;  %v10500_v40 = vmul.f32 -1.442695, %v6070_v22 }
 0x53a   :  { %v12371_v35 = vpop.eup %12370  ;;  %12390 = vpow2.f32 %v10467_v49  ;;  %v6683_v13 = vadd.f32 1.0, %v12369_v28  ;;  %v6071_v41 = vadd.f32 %v16983_v47, %v19846_v62  ;;  %v6069_v61 = vadd.f32 %v16948_v27, %v19849_v60  ;;  %v19850_v49 = vld [vmem:[#allocation225_spill] sm:$0xff]  ;;  %v19855_v62 = vld [vmem:[#allocation222_spill] sm:$0xff] }
 0x53b   :  { %v17074_v24 = vpop.eup %12372  ;;  %v6268_v51 = vadd.f32 1.0, %v12371_v35  ;;  %12392 = vpow2.f32 %v10499_v46  ;;  %v6072_v50 = vadd.f32 %v16989_v56, %v19850_v49  ;;  %v19852_v35 = vld [vmem:[#allocation146_spill] sm:$0xff]  ;;  %v19856_v22 = vld [vmem:[#allocation93_spill] sm:$0xff] }
 0x53c   :  { %v12375_v34 = vpop.eup %12374  ;;  %12394 = vtanh.f32 %v6065_v25  ;;  %v10437_v63 = vmul.f32 -1.442695, %v6071_v41  ;;  %v19851_v25 = vld [vmem:[#allocation139_spill] sm:$0xff]  ;;  %v6073_v56 = vadd.f32 %v16985_v48, %v19852_v35  ;;  %v6076_v41 = vadd.f32 %v17002_v2, %v19855_v62  ;;  %v19857_v60 = vld [vmem:[#allocation281_spill] sm:$0xff]  ;;  %v19858_v49 = vld [vmem:[#allocation230_spill] sm:$0xff] }
 0x53d   :  { %v12377_v10 = vpop.eup %12376  ;;  %12396 = vrcp.f32 %v6268_v51  ;;  %v6460_v4 = vadd.f32 1.0, %v12375_v34  ;;  %v10469_v34 = vmul.f32 -1.442695, %v6072_v50 }
 0x53e   :  { %v12379_v9 = vpop.eup %12378  ;;  %v6684_v37 = vadd.f32 1.0, %v12377_v10  ;;  %12398 = vpow2.f32 %v10436_v14  ;;  %v19853_v14 = vld [vmem:[#allocation74_spill] sm:$0xff] }
 0x53f   :  { %v12381_v44 = vpop.eup %12380  ;;  %v6778_v26 = vmul.f32 %v12379_v9, %v19848_v33  ;;  %12400 = vrcp.f32 %v6460_v4  ;;  %v6078_v33 = vadd.f32 %v17004_v15, %v19856_v22 }
 0x540   :  { %v12383_v39 = vpop.eup %12382  ;;  %12402 = vrcp.f32 %v6683_v13 }
 0x541   :  { %v12385_v47 = vpop.eup %12384  ;;  %v6811_v57 = vmul.f32 %v12383_v39, %v12365_v55  ;;  %12404 = vrcp.f32 %v6684_v37  ;;  %v17085_v8 = vadd.f32 %v6810_v38, %v6778_v26  ;;  %v6074_v55 = vadd.f32 %v16991_v59, %v19853_v14 }
 0x542   :  { %v12387_v46 = vpop.eup %12386  ;;  %v6269_v31 = vadd.f32 1.0, %v12385_v47  ;;  %12406 = vpow2.f32 %v10468_v29  ;;  %v6075_v38 = vadd.f32 %v16993_v11, %v19854_v53  ;;  %v10470_v39 = vmul.f32 -1.442695, %v6076_v41 }
 0x543   :  { %v17087_v36 = vpop.eup %12388  ;;  %v6779_v28 = vmul.f32 %v12387_v46, %v19851_v25  ;;  %12408 = vtanh.f32 %v6069_v61  ;;  %v10501_v21 = vmul.f32 -1.442695, %v6074_v55  ;;  %v10502_v46 = vmul.f32 -1.442695, %v6078_v33 }
 0x544   :  { %v12391_v27 = vpop.eup %12390  ;;  %12410 = vrcp.f32 %v6269_v31  ;;  %v10438_v59 = vmul.f32 -1.442695, %v6075_v38 }
 0x545   :  { %v12393_v18 = vpop.eup %12392  ;;  %v6461_v51 = vadd.f32 1.0, %v12391_v27  ;;  %12412 = vpow2.f32 %v10437_v63  ;;  %v17096_v13 = vadd.f32 %v6811_v57, %v6779_v28 }
 0x546   :  { %v12395_v10 = vpop.eup %12394  ;;  %v6685_v4 = vadd.f32 1.0, %v12393_v18  ;;  %12414 = vpow2.f32 %v10500_v40 }
 0x547   :  { %v12397_v9 = vpop.eup %12396  ;;  %12416 = vrcp.f32 %v6461_v51 }
 0x548   :  { %v12399_v48 = vpop.eup %12398  ;;  %v6812_v37 = vmul.f32 %v12397_v9, %v12381_v44  ;;  %12418 = vtanh.f32 %v6073_v56  ;;  %v6077_v44 = vadd.f32 %v16995_v19, %v19858_v49  ;;  %v19859_v56 = vld [vmem:[#allocation112_spill] sm:$0xff] }
 0x549   :  { %v12401_v29 = vpop.eup %12400  ;;  %v6270_v11 = vadd.f32 1.0, %v12399_v48  ;;  %12420 = vpow2.f32 %v10469_v34 }
 0x54a   :  { %v17102_v26 = vpop.eup %12402  ;;  %v6780_v61 = vmul.f32 %v12401_v29, %v19857_v60  ;;  %12422 = vrcp.f32 %v6685_v4  ;;  %v19861_v60 = vld [vmem:[#allocation226_spill] sm:$0xff] }
 0x54b   :  { %v17105_v2 = vpop.eup %12404  ;;  %12424 = vrcp.f32 %v6270_v11 }
 0x54c   :  { %v12407_v50 = vpop.eup %12406  ;;  %12426 = vpow2.f32 %v10438_v59  ;;  %v6844_v47 = vadd.f32 %v6812_v37, %v6780_v61 }
 0x54d   :  { %v12409_v57 = vpop.eup %12408  ;;  %v6462_v63 = vadd.f32 1.0, %v12407_v50  ;;  %12428 = vpow2.f32 %v10501_v21 }
 0x54e   :  { %v12411_v15 = vpop.eup %12410  ;;  %12430 = vpow2.f32 %v10470_v39 }
 0x54f   :  { %v12413_v31 = vpop.eup %12412  ;;  %v6813_v40 = vmul.f32 %v12411_v15, %v12395_v10  ;;  %12432 = vtanh.f32 %v6077_v44 }
 0x550   :  { %v12415_v25 = vpop.eup %12414  ;;  %12434 = vrcp.f32 %v6462_v63  ;;  %v6271_v28 = vadd.f32 1.0, %v12413_v31 }
 0x551   :  { %v12417_v27 = vpop.eup %12416  ;;  %12436 = vpow2.f32 %v10502_v46  ;;  %v6686_v55 = vadd.f32 1.0, %v12415_v25  ;;  %v19863_v46 = vld [vmem:[#allocation76_spill] sm:$0xff]  ;;  %v19864_v25 = vld [vmem:[#allocation190_spill] sm:$0xff] }
 0x552   :  { %v12419_v35 = vpop.eup %12418  ;;  %v6781_v19 = vmul.f32 %v12417_v27, %v19859_v56  ;;  %12438 = vrcp.f32 %v6271_v28  ;;  %v19865_v27 = vld [vmem:[#allocation77_spill] sm:$0xff] }
 0x553   :  { %v12421_v14 = vpop.eup %12420  ;;  %12440 = vtanh.f32 %v17041_v5 }
 0x554   :  { %v17111_v53 = vpop.eup %12422  ;;  %v6463_v38 = vadd.f32 1.0, %v12421_v14  ;;  %12442 = vtanh.f32 %v17057_v0  ;;  %v17114_v18 = vadd.f32 %v6813_v40, %v6781_v19 }
 0x555   :  { %v12425_v51 = vpop.eup %12424  ;;  %12444 = vtanh.f32 %v17070_v54  ;;  %v19860_v54 = vld [vmem:[#allocation88_spill] sm:$0xff] }
 0x556   :  { %v12427_v34 = vpop.eup %12426  ;;  %v6814_v10 = vmul.f32 %v12425_v51, %v12409_v57  ;;  %12446 = vrcp.f32 %v6463_v38  ;;  %v19862_v57 = vld [vmem:[#allocation235_spill] sm:$0xff]  ;;  %v19866_v38 = vld [vmem:[#allocation224_spill] sm:$0xff] }
 0x557   :  { %v12429_v4 = vpop.eup %12428  ;;  %12448 = vrcp.f32 %v6686_v55  ;;  %v6272_v62 = vadd.f32 1.0, %v12427_v34 }
 0x558   :  { %v12431_v41 = vpop.eup %12430  ;;  %12450 = vtanh.f32 %v17085_v8  ;;  %v6687_v37 = vadd.f32 1.0, %v12429_v4  ;;  %v5737_v0 = vpop.f32.mrb[36].mxu1 }
 0x559   :  { %v12433_v5 = vpop.eup %12432  ;;  %12452 = vrcp.f32 %v6272_v62  ;;  %v6464_v9 = vadd.f32 1.0, %v12431_v41  ;;  %v5930_v59 = vpop.f32.mrb[36].mxu0  ;;  %v6079_v11 = vadd.f32 %v5737_v0, %v19860_v54 }
 0x55a   :  { %v12435_v48 = vpop.eup %12434  ;;  %12454 = vtanh.f32 %v17096_v13  ;;  %v5739_v21 = vpop.f32.mrb[37].mxu1  ;;  %v6081_v56 = vadd.f32 %v5930_v59, %v19865_v27  ;;  %v19868_v59 = vld [vmem:[#allocation237_spill] sm:$0xff] }
 0x55b   :  { %v12437_v29 = vpop.eup %12436  ;;  %12456 = vrcp.f32 %v6464_v9  ;;  %v5932_v22 = vpop.f32.mrb[37].mxu0  ;;  %v6080_v61 = vadd.f32 %v5739_v21, %v19861_v60  ;;  %v10439_v50 = vmul.f32 -1.442695, %v6079_v11  ;;  %v6782_v28 = vmul.f32 %v12435_v48, %v19864_v25  ;;  %v19867_v9 = vld [vmem:[#allocation114_spill] sm:$0xff]  ;;  %v19869_v11 = vld [vmem:[#allocation123_spill] sm:$0xff] }
 0x55c   :  { %v12439_v33 = vpop.eup %12438  ;;  %v5741_v39 = vpop.f32.mrb[38].mxu1  ;;  %12458 = vtanh.f32 %v6844_v47  ;;  %v6082_v63 = vadd.f32 %v5932_v22, %v19862_v57  ;;  %v6688_v55 = vadd.f32 1.0, %v12437_v29  ;;  %v19870_v22 = vld [vmem:[#allocation124_spill] sm:$0xff]  ;;  %v19871_v60 = vld [vmem:[#allocation163_spill] sm:$0xff] }
 0x55d   :  { %v17121_v8 = vpop.f32.mrb[38].mxu0  ;;  %v12441_v49 = vpop.eup %12440  ;;  %v6815_v44 = vmul.f32 %v12439_v33, %v12419_v35  ;;  %v6083_v13 = vadd.f32 %v5741_v39, %v19863_v46  ;;  %12460 = vrcp.f32 %v6687_v37  ;;  %v10471_v19 = vmul.f32 -1.442695, %v6080_v61  ;;  %v19872_v57 = vld [vmem:[#allocation19_spill] sm:$0xff]  ;;  %v19873_v46 = vld [vmem:[#allocation21_spill] sm:$0xff] }
 0x55e   :  { %v5743_v15 = vpop.f32.mrb[39].mxu1  ;;  %v5936_v31 = vpop.f32.mrb[39].mxu0  ;;  %12462 = vpow2.f32 %v10439_v50  ;;  %v6903_v34 = vmul.f32 %v12441_v49, %v17047_v7  ;;  %v10503_v37 = vmul.f32 -1.442695, %v6082_v63  ;;  %v19875_v25 = vld [vmem:[#allocation167_spill] sm:$0xff] }
 0x55f   :  { %v12443_v40 = vpop.eup %12442  ;;  %v10440_v47 = vmul.f32 -1.442695, %v6083_v13  ;;  %v6084_v35 = vadd.f32 %v5743_v15, %v19866_v38  ;;  %12464 = vpow2.f32 %v10471_v19  ;;  %v6086_v29 = vadd.f32 %v5936_v31, %v19868_v59  ;;  %v19874_v31 = vld [vmem:[#allocation18_spill] sm:$0xff] }
 0x560   :  { %v12445_v14 = vpop.eup %12444  ;;  %v6904_v4 = vmul.f32 %v12443_v40, %v17063_v23  ;;  %v6935_v21 = vadd.f32 %v6903_v34, %v19869_v11 }
 0x561   :  { %v12447_v51 = vpop.eup %12446  ;;  %v6905_v62 = vmul.f32 %v12445_v14, %v17074_v24  ;;  %v10472_v0 = vmul.f32 -1.442695, %v6084_v35  ;;  %12466 = vpow2.f32 %v10440_v47  ;;  %v6846_v24 = vadd.f32 %v6814_v10, %v6782_v28  ;;  %v19876_v14 = vld [vmem:[#allocation192_spill] sm:$0xff]  ;;  %v19878_v28 = vld [vmem:[#allocation186_spill] sm:$0xff] }
 0x562   :  { %v17131_v41 = vpop.eup %12448  ;;  %v6783_v48 = vmul.f32 %v12447_v51, %v19867_v9  ;;  %v6936_v33 = vadd.f32 %v6904_v4, %v19870_v22  ;;  %12468 = vtanh.f32 %v6081_v56  ;;  %v6967_v63 = vmul.f32 %v6935_v21, %v19872_v57 }
 0x563   :  { %v12451_v54 = vpop.eup %12450  ;;  %v6937_v7 = vadd.f32 %v6905_v62, %v19871_v60  ;;  %12470 = vpow2.f32 %v10472_v0  ;;  %v10504_v10 = vmul.f32 -1.442695, %v6086_v29  ;;  %v19880_v62 = vld [vmem:[#allocation102_spill] sm:$0xff] }
 0x564   :  { %v12453_v61 = vpop.eup %12452  ;;  %v6906_v23 = vmul.f32 %v12451_v54, %v17087_v36  ;;  %v6847_v39 = vadd.f32 %v6815_v44, %v6783_v48  ;;  %v6968_v13 = vmul.f32 %v6936_v33, %v19873_v46  ;;  %12472 = vpow2.f32 %v10503_v37  ;;  %6999 = vadd.xlane.f32.xlu0 %v6967_v63 }
 0x565   :  { %v12455_v49 = vpop.eup %12454  ;;  %v6816_v50 = vmul.f32 %v12453_v61, %v12433_v5  ;;  %v6969_v40 = vmul.f32 %v19874_v31, %v6937_v7  ;;  %12474 = vtanh.f32 %v17114_v18  ;;  %v19877_v5 = vld [vmem:[#allocation20_spill] sm:$0xff]  ;;  %v19881_v18 = vld [vmem:[#allocation78_spill] sm:$0xff] }
 0x566   :  { %v12457_v15 = vpop.eup %12456  ;;  %v6938_v27 = vadd.f32 %v6906_v23, %v19875_v25  ;;  %v6907_v19 = vmul.f32 %v12455_v49, %v17102_v26  ;;  %12476 = vtanh.f32 %v6846_v24  ;;  %v19879_v26 = vld [vmem:[#allocation23_spill] sm:$0xff]  ;;  %v6085_v0 = vadd.f32 %v17121_v8, %v19881_v18  ;;  %v19883_v7 = vld [vmem:[#allocation94_spill] sm:$0xff] }
 0x567   :  { %v12459_v56 = vpop.eup %12458  ;;  %v6784_v36 = vmul.f32 %v12457_v15, %v19876_v14  ;;  %7003 = vadd.xlane.f32.xlu1 %v6969_v40  ;;  %12478 = vtanh.f32 %v6847_v39  ;;  %v19884_v49 = vld [vmem:[#allocation234_spill] sm:$0xff]  ;;  %v19885_v15 = vld [vmem:[#allocation231_spill] sm:$0xff] }
 0x568   :  { %v6970_v44 = vmul.f32 %v19877_v5, %v6938_v27  ;;  %v6939_v47 = vadd.f32 %v6907_v19, %v19878_v28  ;;  %v6908_v38 = vmul.f32 %v12459_v56, %v17105_v2  ;;  %v12461_v35 = vpop.eup %12460  ;;  %12480 = vrcp.f32 %v6688_v55  ;;  %7001 = vadd.xlane.f32.xlu0 %v6968_v13  ;;  %v19882_v2 = vld [vmem:[#allocation25_spill] sm:$0xff]  ;;  %v19886_v56 = vld [vmem:[#allocation236_spill] sm:$0xff]  ;;  %v19887_v5 = vld [vmem:[#allocation107_spill] sm:$0xff] }
 0x569   :  { %v6848_v51 = vadd.f32 %v6816_v50, %v6784_v36  ;;  %v12463_v34 = vpop.eup %12462 }
 0x56a   :  { %v6971_v4 = vmul.f32 %v6939_v47, %v19879_v26  ;;  %v6940_v9 = vadd.f32 %v6908_v38, %v19880_v62  ;;  %v12465_v48 = vpop.eup %12464  ;;  %v6273_v37 = vadd.f32 1.0, %v12463_v34 }
 0x56b   :  { %12482 = vtanh.f32 %v6848_v51  ;;  %v6465_v59 = vadd.f32 1.0, %v12465_v48  ;;  %7005 = vadd.xlane.f32.xlu1 %v6970_v44  ;;  %v12467_v54 = vpop.eup %12466 }
 0x56c   :  { %12484 = vpow2.f32 %v10504_v10  ;;  %v6972_v29 = vmul.f32 %v6940_v9, %v19882_v2  ;;  %v12469_v11 = vpop.eup %12468  ;;  %v6274_v55 = vadd.f32 1.0, %v12467_v54  ;;  %v5747_v22 = vpop.f32.mrb[40].mxu1  ;;  %7007 = vadd.xlane.f32.xlu0 %v6971_v4  ;;  %v19888_v4 = vld [vmem:[#allocation191_spill] sm:$0xff]  ;;  %v19890_v2 = vld [vmem:[#allocation197_spill] sm:$0xff] }
 0x56d   :  { %12486 = vrcp.f32 %v6273_v37  ;;  %v12471_v21 = vpop.eup %12470  ;;  %v5940_v33 = vpop.f32.mrb[40].mxu0  ;;  %v6087_v61 = vadd.f32 %v5747_v22, %v19883_v7  ;;  %v19894_v7 = vld [vmem:[#allocation24_spill] sm:$0xff] }
 0x56e   :  { %12488 = vrcp.f32 %v6465_v59  ;;  %v12473_v60 = vpop.eup %12472  ;;  %v6466_v8 = vadd.f32 1.0, %v12471_v21  ;;  %v5749_v23 = vpop.f32.mrb[41].mxu1 }
 0x56f   :  { %12490 = vtanh.f32 %v6085_v0  ;;  %v5942_v24 = vpop.f32.mrb[41].mxu0  ;;  %7009 = vadd.xlane.f32.xlu1 %v6972_v29  ;;  %v12475_v39 = vpop.eup %12474  ;;  %v6088_v50 = vadd.f32 %v5749_v23, %v19884_v49  ;;  %v10441_v13 = vmul.f32 -1.442695, %v6087_v61  ;;  %v6689_v26 = vadd.f32 1.0, %v12473_v60  ;;  %v19889_v0 = vld [vmem:[#allocation121_spill] sm:$0xff]  ;;  %v19893_v60 = vld [vmem:[#allocation247_spill] sm:$0xff] }
 0x570   :  { %12492 = vrcp.f32 %v6274_v55  ;;  %v5751_v57 = vpop.f32.mrb[42].mxu1  ;;  %v5944_v63 = vpop.f32.mrb[42].mxu0  ;;  %v6090_v14 = vadd.f32 %v5942_v24, %v19886_v56  ;;  %v6909_v28 = vmul.f32 %v12475_v39, %v17111_v53  ;;  %v19891_v53 = vld [vmem:[#allocation22_spill] sm:$0xff]  ;;  %v19895_v23 = vld [vmem:[#allocation29_spill] sm:$0xff] }
 0x571   :  { %v12477_v46 = vpop.eup %12476  ;;  %12494 = vrcp.f32 %v6466_v8  ;;  %v6091_v31 = vadd.f32 %v5751_v57, %v19885_v15  ;;  %v17157_v40 = vpop.f32.mrb[43].mxu0  ;;  %v10473_v19 = vmul.f32 -1.442695, %v6088_v50  ;;  %v19896_v49 = vld [vmem:[#allocation33_spill] sm:$0xff]  ;;  %v19897_v15 = vld [vmem:[#allocation80_spill] sm:$0xff] }
 0x572   :  { %v5753_v25 = vpop.f32.mrb[43].mxu1  ;;  %v12479_v27 = vpop.eup %12478  ;;  %12496 = vpow2.f32 %v10441_v13  ;;  %v6910_v38 = vmul.f32 %v12477_v46, %v17131_v41  ;;  %v6941_v62 = vadd.f32 %v6909_v28, %v19888_v4  ;;  %v10505_v37 = vmul.f32 -1.442695, %v6090_v14  ;;  %v19892_v41 = vld [vmem:[#allocation105_spill] sm:$0xff] }
 0x573   :  { %v12481_v36 = vpop.eup %12480  ;;  %v10442_v10 = vmul.f32 -1.442695, %v6091_v31  ;;  %v6092_v44 = vadd.f32 %v5753_v25, %v19887_v5  ;;  %v6911_v51 = vmul.f32 %v12479_v27, %v12461_v35  ;;  %12498 = vpow2.f32 %v10473_v19  ;;  %v19898_v25 = vld [vmem:[#allocation119_spill] sm:$0xff] }
 0x574   :  { %v6942_v59 = vadd.f32 %v6910_v38, %v19889_v0  ;;  %v6973_v21 = vmul.f32 %v19891_v53, %v6941_v62  ;;  %v6089_v31 = vadd.f32 %v5940_v33, %v19897_v15  ;;  %v19900_v33 = vld [vmem:[#allocation239_spill] sm:$0xff] }
 0x575   :  { %v12483_v47 = vpop.eup %12482  ;;  %v10474_v18 = vmul.f32 -1.442695, %v6092_v44  ;;  %v6943_v29 = vadd.f32 %v6911_v51, %v19890_v2  ;;  %12500 = vpow2.f32 %v10442_v10  ;;  %v19899_v10 = vld [vmem:[#allocation242_spill] sm:$0xff]  ;;  %v19901_v62 = vld [vmem:[#allocation83_spill] sm:$0xff] }
 0x576   :  { %v12485_v34 = vpop.eup %12484  ;;  %v6912_v9 = vmul.f32 %v12483_v47, %v12481_v36  ;;  %v6974_v61 = vmul.f32 %v19894_v7, %v6942_v59  ;;  %12502 = vrcp.f32 %v6689_v26  ;;  %7011 = vadd.xlane.f32.xlu0 %v6973_v21  ;;  %v6093_v5 = vadd.f32 %v5944_v63, %v19899_v10  ;;  %v19902_v63 = vld [vmem:[#allocation89_spill] sm:$0xff] }
 0x577   :  { %v12487_v48 = vpop.eup %12486  ;;  %v6975_v24 = vmul.f32 %v6943_v29, %v19895_v23  ;;  %v6690_v46 = vadd.f32 1.0, %v12485_v34  ;;  %12504 = vpow2.f32 %v10474_v18 }
 0x578   :  { %v12489_v54 = vpop.eup %12488  ;;  %v6817_v55 = vmul.f32 %v12487_v48, %v12469_v11  ;;  %v6944_v35 = vadd.f32 %v6912_v9, %v19892_v41  ;;  %7013 = vadd.xlane.f32.xlu1 %v6974_v61  ;;  %12506 = vpow2.f32 %v10505_v37 }
 0x579   :  { %v12491_v22 = vpop.eup %12490  ;;  %v6785_v8 = vmul.f32 %v12489_v54, %v19893_v60  ;;  %v19904_v60 = vld [vmem:[#allocation171_spill] sm:$0xff] }
 0x57a   :  { %v12493_v39 = vpop.eup %12492  ;;  %v6976_v50 = vmul.f32 %v6944_v35, %v19896_v49  ;;  %7015 = vadd.xlane.f32.xlu0 %v6975_v24 }
 0x57b   :  { %v6818_v57 = vmul.f32 %v12493_v39, %v12491_v22  ;;  %v6849_v11 = vadd.f32 %v6817_v55, %v6785_v8  ;;  %v12495_v13 = vpop.eup %12494  ;;  %v19903_v55 = vld [vmem:[#allocation238_spill] sm:$0xff]  ;;  %v19905_v39 = vld [vmem:[#allocation168_spill] sm:$0xff] }
 0x57c   :  { %v6786_v27 = vmul.f32 %v12495_v13, %v19898_v25  ;;  %v12497_v19 = vpop.eup %12496  ;;  %7017 = vadd.xlane.f32.xlu1 %v6976_v50  ;;  %v6094_v53 = vadd.f32 %v17157_v40, %v19903_v55  ;;  %v19907_v25 = vld [vmem:[#allocation111_spill] sm:$0xff] }
 0x57d   :  { %12508 = vtanh.f32 %v6849_v11  ;;  %v6275_v56 = vadd.f32 1.0, %v12497_v19  ;;  %v12499_v36 = vpop.eup %12498  ;;  %v19908_v19 = vld [vmem:[#allocation27_spill] sm:$0xff] }
 0x57e   :  { %12510 = vrcp.f32 %v6690_v46  ;;  %v6850_v14 = vadd.f32 %v6818_v57, %v6786_v27  ;;  %v6467_v44 = vadd.f32 1.0, %v12499_v36  ;;  %v5757_v28 = vpop.f32.mrb[44].mxu1  ;;  %v5950_v47 = vpop.f32.mrb[44].mxu0  ;;  %v10506_v24 = vmul.f32 -1.442695, %v6094_v53  ;;  %v19906_v46 = vld [vmem:[#allocation205_spill] sm:$0xff] }
 0x57f   :  { %12512 = vtanh.f32 %v6089_v31  ;;  %v12501_v38 = vpop.eup %12500  ;;  %v6095_v51 = vadd.f32 %v5757_v28, %v19900_v33  ;;  %v5759_v34 = vpop.f32.mrb[45].mxu1  ;;  %v6097_v27 = vadd.f32 %v5950_v47, %v19907_v25  ;;  %v19910_v33 = vld [vmem:[#allocation207_spill] sm:$0xff] }
 0x580   :  { %12514 = vrcp.f32 %v6275_v56  ;;  %v5952_v26 = vpop.f32.mrb[45].mxu0  ;;  %v6276_v4 = vadd.f32 1.0, %v12501_v38  ;;  %v6096_v9 = vadd.f32 %v5759_v34, %v19901_v62  ;;  %v5761_v48 = vpop.f32.mrb[46].mxu1  ;;  %v19911_v62 = vld [vmem:[#allocation31_spill] sm:$0xff] }
 0x581   :  { %12516 = vtanh.f32 %v6850_v14  ;;  %v5954_v37 = vpop.f32.mrb[46].mxu0  ;;  %v12503_v18 = vpop.eup %12502  ;;  %v10443_v0 = vmul.f32 -1.442695, %v6095_v51  ;;  %v6099_v59 = vadd.f32 %v5761_v48, %v19902_v63  ;;  %v6098_v49 = vadd.f32 %v5952_v26, %v19905_v39 }
 0x582   :  { %12518 = vrcp.f32 %v6467_v44  ;;  %v17178_v2 = vpop.f32.mrb[47].mxu0  ;;  %v5763_v29 = vpop.f32.mrb[47].mxu1  ;;  %v10475_v35 = vmul.f32 -1.442695, %v6096_v9  ;;  %v19909_v44 = vld [vmem:[#allocation195_spill] sm:$0xff] }
 0x583   :  { %12520 = vtanh.f32 %v6093_v5  ;;  %v12505_v54 = vpop.eup %12504  ;;  %v6100_v8 = vadd.f32 %v5763_v29, %v19904_v60  ;;  %v10444_v7 = vmul.f32 -1.442695, %v6099_v59  ;;  %v10507_v36 = vmul.f32 -1.442695, %v6098_v49  ;;  %v19913_v59 = vld [vmem:[#allocation90_spill] sm:$0xff] }
 0x584   :  { %12522 = vrcp.f32 %v6276_v4  ;;  %v12507_v21 = vpop.eup %12506  ;;  %v6468_v41 = vadd.f32 1.0, %v12505_v54  ;;  %v6101_v29 = vadd.f32 %v5954_v37, %v19913_v59 }
 0x585   :  { %12524 = vpow2.f32 %v10443_v0  ;;  %v6691_v57 = vadd.f32 1.0, %v12507_v21  ;;  %v10476_v13 = vmul.f32 -1.442695, %v6100_v8  ;;  %v19914_v21 = vld [vmem:[#allocation243_spill] sm:$0xff] }
 0x586   :  { %12526 = vrcp.f32 %v6468_v41 }
 0x587   :  { %v12509_v22 = vpop.eup %12508  ;;  %12528 = vpow2.f32 %v10475_v35 }
 0x588   :  { %v6913_v61 = vmul.f32 %v12509_v22, %v12503_v18  ;;  %v12511_v23 = vpop.eup %12510  ;;  %12530 = vpow2.f32 %v10444_v7  ;;  %v19912_v18 = vld [vmem:[#allocation290_spill] sm:$0xff]  ;;  %v19915_v7 = vld [vmem:[#allocation131_spill] sm:$0xff] }
 0x589   :  { %v12513_v50 = vpop.eup %12512  ;;  %12532 = vpow2.f32 %v10506_v24 }
 0x58a   :  { %v6945_v11 = vadd.f32 %v6913_v61, %v19906_v46  ;;  %v12515_v40 = vpop.eup %12514  ;;  %12534 = vrcp.f32 %v6691_v57 }
 0x58b   :  { %v12517_v15 = vpop.eup %12516  ;;  %v6819_v31 = vmul.f32 %v12515_v40, %v12513_v50  ;;  %12536 = vpow2.f32 %v10476_v13 }
 0x58c   :  { %v6977_v56 = vmul.f32 %v19908_v19, %v6945_v11  ;;  %v12519_v14 = vpop.eup %12518  ;;  %v6914_v10 = vmul.f32 %v12517_v15, %v12511_v23  ;;  %12538 = vtanh.f32 %v6097_v27  ;;  %v19916_v11 = vld [vmem:[#allocation98_spill] sm:$0xff]  ;;  %v19917_v15 = vld [vmem:[#allocation125_spill] sm:$0xff] }
 0x58d   :  { %v12521_v5 = vpop.eup %12520  ;;  %v6787_v28 = vmul.f32 %v12519_v14, %v19909_v44  ;;  %12540 = vpow2.f32 %v10507_v36  ;;  %v19918_v36 = vld [vmem:[#allocation110_spill] sm:$0xff] }
 0x58e   :  { %7019 = vadd.xlane.f32.xlu0 %v6977_v56  ;;  %v12523_v38 = vpop.eup %12522  ;;  %v6946_v51 = vadd.f32 %v6914_v10, %v19910_v33 }
 0x58f   :  { %v12525_v34 = vpop.eup %12524  ;;  %v6820_v26 = vmul.f32 %v12523_v38, %v12521_v5  ;;  %v6851_v47 = vadd.f32 %v6819_v31, %v6787_v28  ;;  %v6102_v31 = vadd.f32 %v17178_v2, %v19917_v15  ;;  %v19919_v2 = vld [vmem:[#allocation220_spill] sm:$0xff] }
 0x590   :  { %v6277_v4 = vadd.f32 1.0, %v12525_v34  ;;  %v6978_v9 = vmul.f32 %v19911_v62, %v6946_v51  ;;  %v12527_v48 = vpop.eup %12526 }
 0x591   :  { %12542 = vtanh.f32 %v6851_v47  ;;  %v6788_v0 = vmul.f32 %v12527_v48, %v19912_v18  ;;  %v12529_v63 = vpop.eup %12528  ;;  %v10508_v38 = vmul.f32 -1.442695, %v6102_v31  ;;  %v19921_v48 = vld [vmem:[#allocation99_spill] sm:$0xff] }
 0x592   :  { %12544 = vrcp.f32 %v6277_v4  ;;  %7021 = vadd.xlane.f32.xlu1 %v6978_v9  ;;  %v6469_v53 = vadd.f32 1.0, %v12529_v63  ;;  %v12531_v8 = vpop.eup %12530  ;;  %v19920_v4 = vld [vmem:[#allocation244_spill] sm:$0xff] }
 0x593   :  { %v5767_v54 = vpop.f32.mrb[48].mxu1  ;;  %v5960_v55 = vpop.f32.mrb[48].mxu0  ;;  %v6852_v60 = vadd.f32 %v6820_v26, %v6788_v0  ;;  %v6278_v49 = vadd.f32 1.0, %v12531_v8  ;;  %v19922_v0 = vld [vmem:[#allocation37_spill] sm:$0xff] }
 0x594   :  { %v6103_v41 = vadd.f32 %v5767_v54, %v19914_v21  ;;  %v5769_v35 = vpop.f32.mrb[49].mxu1  ;;  %v5962_v22 = vpop.f32.mrb[49].mxu0  ;;  %12546 = vrcp.f32 %v6469_v53  ;;  %v6105_v18 = vadd.f32 %v5960_v55, %v19921_v48  ;;  %v19931_v48 = vld [vmem:[#allocation249_spill] sm:$0xff] }
 0x595   :  { %v6104_v61 = vadd.f32 %v5769_v35, %v19915_v7  ;;  %v5771_v23 = vpop.f32.mrb[50].mxu1  ;;  %v5964_v24 = vpop.f32.mrb[50].mxu0  ;;  %12548 = vtanh.f32 %v6101_v29  ;;  %v6106_v62 = vadd.f32 %v5962_v22, %v19920_v4  ;;  %v19923_v29 = vld [vmem:[#allocation248_spill] sm:$0xff] }
 0x596   :  { %v12533_v39 = vpop.eup %12532  ;;  %v10445_v50 = vmul.f32 -1.442695, %v6103_v41  ;;  %v5966_v57 = vpop.f32.mrb[51].mxu0  ;;  %v6107_v40 = vadd.f32 %v5771_v23, %v19916_v11  ;;  %12550 = vrcp.f32 %v6278_v49  ;;  %v19925_v23 = vld [vmem:[#allocation251_spill] sm:$0xff] }
 0x597   :  { %v5773_v46 = vpop.f32.mrb[51].mxu1  ;;  %v12535_v37 = vpop.eup %12534  ;;  %v10477_v19 = vmul.f32 -1.442695, %v6104_v61  ;;  %v6692_v14 = vadd.f32 1.0, %v12533_v39  ;;  %v10509_v35 = vmul.f32 -1.442695, %v6106_v62  ;;  %v6110_v39 = vadd.f32 %v5966_v57, %v19925_v23 }
 0x598   :  { %v12537_v13 = vpop.eup %12536  ;;  %12552 = vpow2.f32 %v10445_v50  ;;  %v6108_v10 = vadd.f32 %v5773_v46, %v19918_v36  ;;  %v10446_v44 = vmul.f32 -1.442695, %v6107_v40  ;;  %v19924_v61 = vld [vmem:[#allocation196_spill] sm:$0xff]  ;;  %v19927_v40 = vld [vmem:[#allocation126_spill] sm:$0xff] }
 0x599   :  { %v12539_v25 = vpop.eup %12538  ;;  %v6470_v27 = vadd.f32 1.0, %v12537_v13 }
 0x59a   :  { %v12541_v56 = vpop.eup %12540  ;;  %v10478_v26 = vmul.f32 -1.442695, %v6108_v10 }
 0x59b   :  { %v12543_v5 = vpop.eup %12542  ;;  %12554 = vrcp.f32 %v6470_v27  ;;  %v6693_v34 = vadd.f32 1.0, %v12541_v56  ;;  %v19928_v27 = vld [vmem:[#allocation104_spill] sm:$0xff] }
 0x59c   :  { %v12545_v28 = vpop.eup %12544  ;;  %v6915_v33 = vmul.f32 %v12543_v5, %v12535_v37  ;;  %12556 = vpow2.f32 %v10477_v19  ;;  %v19926_v37 = vld [vmem:[#allocation245_spill] sm:$0xff] }
 0x59d   :  { %v6821_v51 = vmul.f32 %v12545_v28, %v12539_v25  ;;  %12558 = vrcp.f32 %v6692_v14  ;;  %v6109_v11 = vadd.f32 %v5964_v24, %v19926_v37  ;;  %v19929_v24 = vld [vmem:[#allocation87_spill] sm:$0xff] }
 0x59e   :  { %v6947_v47 = vadd.f32 %v6915_v33, %v19919_v2  ;;  %12560 = vpow2.f32 %v10446_v44  ;;  %v12547_v9 = vpop.eup %12546  ;;  %v10510_v33 = vmul.f32 -1.442695, %v6110_v39  ;;  %v19934_v39 = vld [vmem:[#allocation241_spill] sm:$0xff] }
 0x59f   :  { %12562 = vpow2.f32 %v10508_v38  ;;  %v12549_v59 = vpop.eup %12548  ;;  %v6789_v54 = vmul.f32 %v12547_v9, %v19923_v29 }
 0x5a0   :  { %v6979_v63 = vmul.f32 %v6947_v47, %v19922_v0  ;;  %12564 = vrcp.f32 %v6693_v34  ;;  %v12551_v53 = vpop.eup %12550  ;;  %v19930_v47 = vld [vmem:[#allocation135_spill] sm:$0xff] }
 0x5a1   :  { %12566 = vpow2.f32 %v10478_v26  ;;  %v6822_v41 = vmul.f32 %v12551_v53, %v12549_v59  ;;  %v6853_v8 = vadd.f32 %v6821_v51, %v6789_v54 }
 0x5a2   :  { %7023 = vadd.xlane.f32.xlu0 %v6979_v63  ;;  %v12553_v21 = vpop.eup %12552  ;;  %12568 = vtanh.f32 %v6852_v60 }
 0x5a3   :  { %v6279_v22 = vadd.f32 1.0, %v12553_v21  ;;  %12570 = vtanh.f32 %v6105_v18 }
 0x5a4   :  { %12572 = vtanh.f32 %v6853_v8 }
 0x5a5   :  { %v12555_v7 = vpop.eup %12554  ;;  %12574 = vrcp.f32 %v6279_v22 }
 0x5a6   :  { %v6790_v55 = vmul.f32 %v12555_v7, %v19924_v61  ;;  %v5777_v49 = vpop.f32.mrb[52].mxu1  ;;  %v5970_v50 = vpop.f32.mrb[52].mxu0  ;;  %12576 = vpow2.f32 %v10509_v35 }
 0x5a7   :  { %v12557_v46 = vpop.eup %12556  ;;  %v6111_v13 = vadd.f32 %v5777_v49, %v19927_v40  ;;  %v5779_v15 = vpop.f32.mrb[53].mxu1 }
 0x5a8   :  { %v5972_v60 = vpop.f32.mrb[53].mxu0  ;;  %v12559_v31 = vpop.eup %12558  ;;  %v6471_v25 = vadd.f32 1.0, %v12557_v46  ;;  %v6112_v19 = vadd.f32 %v5779_v15, %v19928_v27  ;;  %v6854_v36 = vadd.f32 %v6822_v41, %v6790_v55  ;;  %v19932_v41 = vld [vmem:[#allocation227_spill] sm:$0xff]  ;;  %v19933_v55 = vld [vmem:[#allocation41_spill] sm:$0xff] }
 0x5a9   :  { %v5781_v56 = vpop.f32.mrb[54].mxu1  ;;  %v5974_v14 = vpop.f32.mrb[54].mxu0  ;;  %v10447_v5 = vmul.f32 -1.442695, %v6111_v13  ;;  %v6114_v4 = vadd.f32 %v5972_v60, %v19930_v47  ;;  %v19935_v46 = vld [vmem:[#allocation253_spill] sm:$0xff]  ;;  %v19936_v13 = vld [vmem:[#allocation35_spill] sm:$0xff] }
 0x5aa   :  { %v12561_v10 = vpop.eup %12560  ;;  %v5976_v57 = vpop.f32.mrb[55].mxu0  ;;  %12578 = vrcp.f32 %v6471_v25  ;;  %v6115_v51 = vadd.f32 %v5781_v56, %v19929_v24  ;;  %v10479_v2 = vmul.f32 -1.442695, %v6112_v19  ;;  %v6113_v37 = vadd.f32 %v5970_v50, %v19935_v46  ;;  %v19938_v19 = vld [vmem:[#allocation134_spill] sm:$0xff]  ;;  %v19945_v46 = vld [vmem:[#allocation193_spill] sm:$0xff] }
 0x5ab   :  { %v5783_v44 = vpop.f32.mrb[55].mxu1  ;;  %v12563_v28 = vpop.eup %12562  ;;  %v6280_v38 = vadd.f32 1.0, %v12561_v10  ;;  %12580 = vtanh.f32 %v6109_v11  ;;  %v10511_v21 = vmul.f32 -1.442695, %v6114_v4  ;;  %v6118_v56 = vadd.f32 %v5976_v57, %v19938_v19 }
 0x5ac   :  { %v12565_v34 = vpop.eup %12564  ;;  %v6116_v18 = vadd.f32 %v5783_v44, %v19931_v48  ;;  %v10448_v63 = vmul.f32 -1.442695, %v6115_v51  ;;  %v6694_v54 = vadd.f32 1.0, %v12563_v28  ;;  %v19939_v44 = vld [vmem:[#allocation252_spill] sm:$0xff] }
 0x5ad   :  { %v12567_v26 = vpop.eup %12566  ;;  %12582 = vrcp.f32 %v6280_v38  ;;  %v6117_v50 = vadd.f32 %v5974_v14, %v19939_v44 }
 0x5ae   :  { %v12569_v62 = vpop.eup %12568  ;;  %v6472_v9 = vadd.f32 1.0, %v12567_v26  ;;  %12584 = vpow2.f32 %v10447_v5  ;;  %v10480_v61 = vmul.f32 -1.442695, %v6116_v18  ;;  %v19942_v18 = vld [vmem:[#allocation116_spill] sm:$0xff] }
 0x5af   :  { %v12571_v0 = vpop.eup %12570  ;;  %12586 = vpow2.f32 %v10510_v33  ;;  %v6916_v59 = vmul.f32 %v12569_v62, %v12559_v31  ;;  %v19937_v31 = vld [vmem:[#allocation295_spill] sm:$0xff]  ;;  %v19941_v62 = vld [vmem:[#allocation144_spill] sm:$0xff] }
 0x5b0   :  { %v12573_v29 = vpop.eup %12572  ;;  %12588 = vrcp.f32 %v6472_v9 }
 0x5b1   :  { %v12575_v53 = vpop.eup %12574  ;;  %12590 = vpow2.f32 %v10479_v2  ;;  %v6948_v35 = vadd.f32 %v6916_v59, %v19932_v41  ;;  %v6917_v8 = vmul.f32 %v12573_v29, %v12565_v34  ;;  %v19940_v34 = vld [vmem:[#allocation250_spill] sm:$0xff]  ;;  %v19943_v41 = vld [vmem:[#allocation145_spill] sm:$0xff] }
 0x5b2   :  { %v12577_v22 = vpop.eup %12576  ;;  %v6823_v7 = vmul.f32 %v12575_v53, %v12571_v0  ;;  %12592 = vpow2.f32 %v10448_v63  ;;  %v10512_v0 = vmul.f32 -1.442695, %v6118_v56 }
 0x5b3   :  { %v6980_v23 = vmul.f32 %v6948_v35, %v19933_v55  ;;  %v6949_v49 = vadd.f32 %v6917_v8, %v19934_v39  ;;  %12594 = vrcp.f32 %v6694_v54  ;;  %v6695_v40 = vadd.f32 1.0, %v12577_v22  ;;  %v19944_v55 = vld [vmem:[#allocation254_spill] sm:$0xff] }
 0x5b4   :  { %v12579_v11 = vpop.eup %12578  ;;  %12596 = vpow2.f32 %v10511_v21 }
 0x5b5   :  { %7025 = vadd.xlane.f32.xlu1 %v6980_v23  ;;  %v6981_v15 = vmul.f32 %v19936_v13, %v6949_v49  ;;  %v12581_v60 = vpop.eup %12580  ;;  %v6791_v25 = vmul.f32 %v12579_v11, %v19937_v31  ;;  %12598 = vpow2.f32 %v10480_v61  ;;  %v19946_v11 = vld [vmem:[#allocation109_spill] sm:$0xff]  ;;  %v19947_v31 = vld [vmem:[#allocation255_spill] sm:$0xff] }
 0x5b6   :  { %12600 = vtanh.f32 %v6854_v36 }
 0x5b7   :  { %v12583_v27 = vpop.eup %12582  ;;  %7027 = vadd.xlane.f32.xlu0 %v6981_v15  ;;  %12602 = vtanh.f32 %v6113_v37  ;;  %v5787_v28 = vpop.f32.mrb[56].mxu1  ;;  %v6855_v33 = vadd.f32 %v6823_v7, %v6791_v25 }
 0x5b8   :  { %v12585_v10 = vpop.eup %12584  ;;  %v6824_v5 = vmul.f32 %v12583_v27, %v12581_v60  ;;  %v5980_v38 = vpop.f32.mrb[56].mxu0  ;;  %12604 = vrcp.f32 %v6695_v40  ;;  %v6119_v26 = vadd.f32 %v5787_v28, %v19940_v34  ;;  %v19948_v28 = vld [vmem:[#allocation246_spill] sm:$0xff] }
 0x5b9   :  { %v12587_v24 = vpop.eup %12586  ;;  %v6281_v51 = vadd.f32 1.0, %v12585_v10  ;;  %v5789_v2 = vpop.f32.mrb[57].mxu1  ;;  %12606 = vtanh.f32 %v6855_v33  ;;  %v6121_v37 = vadd.f32 %v5980_v38, %v19945_v46 }
 0x5ba   :  { %v5982_v47 = vpop.f32.mrb[57].mxu0  ;;  %v12589_v4 = vpop.eup %12588  ;;  %v6120_v57 = vadd.f32 %v5789_v2, %v19941_v62  ;;  %v10449_v63 = vmul.f32 -1.442695, %v6119_v26  ;;  %v6696_v22 = vadd.f32 1.0, %v12587_v24 }
 0x5bb   :  { %v5791_v9 = vpop.f32.mrb[58].mxu1  ;;  %v17221_v36 = vpop.f32.mrb[58].mxu0  ;;  %v6792_v14 = vmul.f32 %v12589_v4, %v19942_v18  ;;  %12608 = vrcp.f32 %v6281_v51  ;;  %v6122_v23 = vadd.f32 %v5982_v47, %v19944_v55  ;;  %v19949_v4 = vld [vmem:[#allocation39_spill] sm:$0xff] }
 0x5bc   :  { %v12591_v48 = vpop.eup %12590  ;;  %v5986_v59 = vpop.f32.mrb[59].mxu0  ;;  %12610 = vtanh.f32 %v6117_v50  ;;  %v10481_v21 = vmul.f32 -1.442695, %v6120_v57  ;;  %v6123_v35 = vadd.f32 %v5791_v9, %v19943_v41  ;;  %v19950_v9 = vld [vmem:[#allocation113_spill] sm:$0xff] }
 0x5bd   :  { %v5793_v29 = vpop.f32.mrb[59].mxu1  ;;  %v6473_v54 = vadd.f32 1.0, %v12591_v48  ;;  %v12593_v53 = vpop.eup %12592  ;;  %12612 = vpow2.f32 %v10449_v63  ;;  %v17226_v39 = vadd.f32 %v6824_v5, %v6792_v14  ;;  %v6126_v25 = vadd.f32 %v5986_v59, %v19947_v31 }
 0x5be   :  { %v12595_v8 = vpop.eup %12594  ;;  %v6282_v7 = vadd.f32 1.0, %v12593_v53  ;;  %v6124_v40 = vadd.f32 %v5793_v29, %v19946_v11  ;;  %v10450_v60 = vmul.f32 -1.442695, %v6123_v35  ;;  %v10513_v5 = vmul.f32 -1.442695, %v6122_v23  ;;  %v19955_v23 = vld [vmem:[#allocation129_spill] sm:$0xff] }
 0x5bf   :  { %12614 = vrcp.f32 %v6473_v54  ;;  %v12597_v61 = vpop.eup %12596  ;;  %v10514_v24 = vmul.f32 -1.442695, %v6126_v25  ;;  %v19952_v54 = vld [vmem:[#allocation257_spill] sm:$0xff] }
 0x5c0   :  { %12616 = vpow2.f32 %v10512_v0  ;;  %v12599_v49 = vpop.eup %12598  ;;  %v6697_v19 = vadd.f32 1.0, %v12597_v61  ;;  %v10482_v50 = vmul.f32 -1.442695, %v6124_v40  ;;  %v19951_v0 = vld [vmem:[#allocation261_spill] sm:$0xff] }
 0x5c1   :  { %12618 = vrcp.f32 %v6282_v7  ;;  %v12601_v13 = vpop.eup %12600  ;;  %v6474_v15 = vadd.f32 1.0, %v12599_v49  ;;  %v19954_v7 = vld [vmem:[#allocation288_spill] sm:$0xff] }
 0x5c2   :  { %12620 = vpow2.f32 %v10481_v21  ;;  %v12603_v27 = vpop.eup %12602  ;;  %v6918_v56 = vmul.f32 %v12601_v13, %v12595_v8  ;;  %v19953_v21 = vld [vmem:[#allocation259_spill] sm:$0xff] }
 0x5c3   :  { %12622 = vrcp.f32 %v6696_v22  ;;  %v12605_v10 = vpop.eup %12604 }
 0x5c4   :  { %12624 = vrcp.f32 %v6474_v15  ;;  %v12607_v44 = vpop.eup %12606  ;;  %v6950_v38 = vadd.f32 %v6918_v56, %v19948_v28  ;;  %v19956_v56 = vld [vmem:[#allocation28_spill] sm:$0xff] }
 0x5c5   :  { %12626 = vtanh.f32 %v6121_v37  ;;  %v12609_v33 = vpop.eup %12608  ;;  %v6919_v51 = vmul.f32 %v12607_v44, %v12605_v10  ;;  %v5797_v2 = vpop.f32.mrb[60].mxu1  ;;  %v19957_v44 = vld [vmem:[#allocation120_spill] sm:$0xff] }
 0x5c6   :  { %12628 = vpow2.f32 %v10450_v60  ;;  %v12611_v34 = vpop.eup %12610  ;;  %v6825_v26 = vmul.f32 %v12609_v33, %v12603_v27  ;;  %v5990_v47 = vpop.f32.mrb[60].mxu0  ;;  %v6982_v62 = vmul.f32 %v19949_v4, %v6950_v38  ;;  %v6127_v48 = vadd.f32 %v5797_v2, %v19950_v9  ;;  %v19958_v33 = vld [vmem:[#allocation128_spill] sm:$0xff]  ;;  %v19960_v4 = vld [vmem:[#allocation153_spill] sm:$0xff] }
 0x5c7   :  { %12630 = vrcp.f32 %v6697_v19  ;;  %v12613_v57 = vpop.eup %12612  ;;  %v5799_v18 = vpop.f32.mrb[61].mxu1  ;;  %v6951_v63 = vadd.f32 %v6919_v51, %v19951_v0  ;;  %v19959_v51 = vld [vmem:[#allocation162_spill] sm:$0xff] }
 0x5c8   :  { %12632 = vpow2.f32 %v10513_v5  ;;  %v5992_v14 = vpop.f32.mrb[61].mxu0  ;;  %v6283_v29 = vadd.f32 1.0, %v12613_v57  ;;  %v6128_v53 = vadd.f32 %v5799_v18, %v19952_v54  ;;  %v5801_v35 = vpop.f32.mrb[62].mxu1  ;;  %7029 = vadd.xlane.f32.xlu1 %v6982_v62  ;;  %v10451_v55 = vmul.f32 -1.442695, %v6127_v48  ;;  %v19961_v48 = vld [vmem:[#allocation258_spill] sm:$0xff] }
 0x5c9   :  { %v12615_v59 = vpop.eup %12614  ;;  %12634 = vpow2.f32 %v10482_v50  ;;  %v6130_v41 = vadd.f32 %v5992_v14, %v19953_v21  ;;  %v5994_v8 = vpop.f32.mrb[62].mxu0  ;;  %v6131_v49 = vadd.f32 %v5801_v35, %v19955_v23  ;;  %v6983_v10 = vmul.f32 %v6951_v63, %v19956_v56 }
 0x5ca   :  { %v12617_v22 = vpop.eup %12616  ;;  %v6793_v61 = vmul.f32 %v12615_v59, %v19954_v7  ;;  %12636 = vpow2.f32 %v10514_v24  ;;  %v5996_v46 = vpop.f32.mrb[63].mxu0  ;;  %v10483_v40 = vmul.f32 -1.442695, %v6128_v53  ;;  %v6125_v50 = vadd.f32 %v17221_v36, %v19957_v44 }
 0x5cb   :  { %v5803_v37 = vpop.f32.mrb[63].mxu1  ;;  %v12619_v11 = vpop.eup %12618  ;;  %12638 = vrcp.f32 %v6283_v29  ;;  %v10515_v13 = vmul.f32 -1.442695, %v6130_v41  ;;  %v10452_v31 = vmul.f32 -1.442695, %v6131_v49  ;;  %v6698_v27 = vadd.f32 1.0, %v12617_v22  ;;  %7031 = vadd.xlane.f32.xlu0 %v6983_v10 }
 0x5cc   :  { %v12621_v15 = vpop.eup %12620  ;;  %v6826_v60 = vmul.f32 %v12619_v11, %v12611_v34  ;;  %12640 = vpow2.f32 %v10451_v55  ;;  %v17244_v28 = vadd.f32 %v6825_v26, %v6793_v61  ;;  %v6132_v34 = vadd.f32 %v5803_v37, %v19959_v51  ;;  %v19962_v29 = vld [vmem:[#allocation262_spill] sm:$0xff]  ;;  %v19963_v37 = vld [vmem:[#allocation164_spill] sm:$0xff] }
 0x5cd   :  { %v17239_v25 = vpop.eup %12622  ;;  %v6475_v19 = vadd.f32 1.0, %v12621_v15  ;;  %12642 = vpow2.f32 %v10483_v40  ;;  %v6129_v62 = vadd.f32 %v5990_v47, %v19960_v4  ;;  %v6133_v36 = vadd.f32 %v5994_v8, %v19961_v48  ;;  %v19964_v15 = vld [vmem:[#allocation296_spill] sm:$0xff] }
 0x5ce   :  { %v12625_v5 = vpop.eup %12624  ;;  %12644 = vpow2.f32 %v10515_v13  ;;  %v10484_v0 = vmul.f32 -1.442695, %v6132_v34  ;;  %v6134_v54 = vadd.f32 %v5996_v46, %v19962_v29 }
 0x5cf   :  { %v12627_v38 = vpop.eup %12626  ;;  %v6794_v24 = vmul.f32 %v12625_v5, %v19958_v33  ;;  %12646 = vrcp.f32 %v6475_v19 }
 0x5d0   :  { %v12629_v2 = vpop.eup %12628  ;;  %12648 = vpow2.f32 %v10452_v31  ;;  %v10516_v61 = vmul.f32 -1.442695, %v6134_v54  ;;  %v19965_v31 = vld [vmem:[#allocation256_spill] sm:$0xff] }
 0x5d1   :  { %v17249_v57 = vpop.eup %12630  ;;  %12650 = vrcp.f32 %v6698_v27  ;;  %v6284_v9 = vadd.f32 1.0, %v12629_v2  ;;  %v17252_v18 = vadd.f32 %v6826_v60, %v6794_v24  ;;  %v19969_v54 = vld [vmem:[#allocation140_spill] sm:$0xff] }
 0x5d2   :  { %v12633_v26 = vpop.eup %12632  ;;  %12652 = vtanh.f32 %v6125_v50 }
 0x5d3   :  { %v12635_v14 = vpop.eup %12634  ;;  %12654 = vrcp.f32 %v6284_v9  ;;  %v6699_v35 = vadd.f32 1.0, %v12633_v26 }
 0x5d4   :  { %v12637_v63 = vpop.eup %12636  ;;  %v6476_v59 = vadd.f32 1.0, %v12635_v14  ;;  %12656 = vtanh.f32 %v6129_v62  ;;  %v19967_v62 = vld [vmem:[#allocation137_spill] sm:$0xff]  ;;  %v19968_v14 = vld [vmem:[#allocation178_spill] sm:$0xff] }
 0x5d5   :  { %v12639_v47 = vpop.eup %12638  ;;  %12658 = vtanh.f32 %v6133_v36  ;;  %v6700_v51 = vadd.f32 1.0, %v12637_v63 }
 0x5d6   :  { %v12641_v53 = vpop.eup %12640  ;;  %v6827_v21 = vmul.f32 %v12639_v47, %v12627_v38  ;;  %12660 = vrcp.f32 %v6476_v59  ;;  %v5807_v55 = vpop.f32.mrb[64].mxu1 }
 0x5d7   :  { %v12643_v41 = vpop.eup %12642  ;;  %v6285_v8 = vadd.f32 1.0, %v12641_v53  ;;  %12662 = vpow2.f32 %v10484_v0  ;;  %v6000_v23 = vpop.f32.mrb[64].mxu0  ;;  %v6135_v46 = vadd.f32 %v5807_v55, %v19963_v37 }
 0x5d8   :  { %v12645_v22 = vpop.eup %12644  ;;  %v6477_v7 = vadd.f32 1.0, %v12643_v41  ;;  %12664 = vtanh.f32 %v17226_v39  ;;  %v5809_v11 = vpop.f32.mrb[65].mxu1  ;;  %v19966_v39 = vld [vmem:[#allocation199_spill] sm:$0xff]  ;;  %v6137_v47 = vadd.f32 %v6000_v23, %v19969_v54 }
 0x5d9   :  { %v12647_v49 = vpop.eup %12646  ;;  %12666 = vrcp.f32 %v6285_v8  ;;  %v6002_v40 = vpop.f32.mrb[65].mxu0  ;;  %v6136_v27 = vadd.f32 %v5809_v11, %v19965_v31  ;;  %v10453_v44 = vmul.f32 -1.442695, %v6135_v46  ;;  %v6701_v4 = vadd.f32 1.0, %v12645_v22 }
 0x5da   :  { %v12649_v13 = vpop.eup %12648  ;;  %v6795_v60 = vmul.f32 %v12647_v49, %v19964_v15  ;;  %12668 = vrcp.f32 %v6477_v7  ;;  %v5811_v19 = vpop.f32.mrb[66].mxu1  ;;  %v6138_v9 = vadd.f32 %v6002_v40, %v19967_v62  ;;  %v19971_v15 = vld [vmem:[#allocation32_spill] sm:$0xff] }
 0x5db   :  { %v6004_v56 = vpop.f32.mrb[66].mxu0  ;;  %v17259_v10 = vpop.eup %12650  ;;  %12670 = vrcp.f32 %v6699_v35  ;;  %v6286_v5 = vadd.f32 1.0, %v12649_v13  ;;  %v6139_v50 = vadd.f32 %v5811_v19, %v19966_v39  ;;  %v10485_v34 = vmul.f32 -1.442695, %v6136_v27 }
 0x5dc   :  { %v6006_v38 = vpop.f32.mrb[67].mxu0  ;;  %v5813_v33 = vpop.f32.mrb[67].mxu1  ;;  %12672 = vpow2.f32 %v10516_v61  ;;  %v6859_v59 = vadd.f32 %v6827_v21, %v6795_v60  ;;  %v10517_v35 = vmul.f32 -1.442695, %v6138_v9 }
 0x5dd   :  { %v12653_v24 = vpop.eup %12652  ;;  %12674 = vrcp.f32 %v6286_v5  ;;  %v10454_v48 = vmul.f32 -1.442695, %v6139_v50  ;;  %v6140_v0 = vadd.f32 %v5813_v33, %v19968_v14 }
 0x5de   :  { %v12655_v2 = vpop.eup %12654  ;;  %12676 = vpow2.f32 %v10453_v44  ;;  %v19972_v44 = vld [vmem:[#allocation151_spill] sm:$0xff] }
 0x5df   :  { %v12657_v36 = vpop.eup %12656  ;;  %v6828_v26 = vmul.f32 %v12655_v2, %v12653_v24  ;;  %12678 = vpow2.f32 %v10485_v34  ;;  %v10486_v7 = vmul.f32 -1.442695, %v6140_v0  ;;  %v19973_v34 = vld [vmem:[#allocation200_spill] sm:$0xff] }
 0x5e0   :  { %v12659_v29 = vpop.eup %12658  ;;  %12680 = vrcp.f32 %v6700_v51  ;;  %v6142_v51 = vadd.f32 %v6006_v38, %v19769_v58 }
 0x5e1   :  { %v12661_v53 = vpop.eup %12660  ;;  %12682 = vrcp.f32 %v6701_v4 }
 0x5e2   :  { %v12663_v63 = vpop.eup %12662  ;;  %v6796_v41 = vmul.f32 %v12661_v53, %v16805_v42  ;;  %12684 = vpow2.f32 %v10454_v48  ;;  %v19970_v42 = vld [vmem:[#allocation263_spill] sm:$0xff] }
 0x5e3   :  { %v12665_v8 = vpop.eup %12664  ;;  %v6478_v22 = vadd.f32 1.0, %v12663_v63  ;;  %12686 = vtanh.f32 %v6137_v47  ;;  %v10518_v47 = vmul.f32 -1.442695, %v6142_v51 }
 0x5e4   :  { %v12667_v61 = vpop.eup %12666  ;;  %v6920_v55 = vmul.f32 %v12665_v8, %v17239_v25  ;;  %v6860_v21 = vadd.f32 %v6828_v26, %v6796_v41  ;;  %v19975_v41 = vld [vmem:[#allocation92_spill] sm:$0xff] }
 0x5e5   :  { %v12669_v49 = vpop.eup %12668  ;;  %v6829_v37 = vmul.f32 %v12667_v61, %v12657_v36  ;;  %12688 = vrcp.f32 %v6478_v22  ;;  %v19976_v22 = vld [vmem:[#allocation106_spill] sm:$0xff] }
 0x5e6   :  { %v17267_v23 = vpop.eup %12670  ;;  %v6797_v46 = vmul.f32 %v12669_v49, %v16819_v52  ;;  %12690 = vpow2.f32 %v10517_v35  ;;  %v6952_v11 = vadd.f32 %v6920_v55, %v19970_v42  ;;  %v6141_v52 = vadd.f32 %v6004_v56, %v19972_v44 }
 0x5e7   :  { %v12673_v40 = vpop.eup %12672  ;;  %12692 = vpow2.f32 %v10486_v7  ;;  %v5817_v39 = vpop.f32.mrb[68].mxu1 }
 0x5e8   :  { %v12675_v13 = vpop.eup %12674  ;;  %v6984_v60 = vmul.f32 %v6952_v11, %v19971_v15  ;;  %12694 = vtanh.f32 %v17244_v28  ;;  %v17273_v31 = vadd.f32 %v6829_v37, %v6797_v46  ;;  %v6010_v50 = vpop.f32.mrb[68].mxu0  ;;  %v6143_v28 = vadd.f32 %v5817_v39, %v19973_v34  ;;  %v19980_v39 = vld [vmem:[#allocation270_spill] sm:$0xff] }
 0x5e9   :  { %v12677_v25 = vpop.eup %12676  ;;  %v6830_v27 = vmul.f32 %v12675_v13, %v12659_v29  ;;  %12696 = vtanh.f32 %v17252_v18  ;;  %v5819_v2 = vpop.f32.mrb[69].mxu1  ;;  %v6702_v36 = vadd.f32 1.0, %v12673_v40  ;;  %v19981_v34 = vld [vmem:[#allocation26_spill] sm:$0xff] }
 0x5ea   :  { %v12679_v19 = vpop.eup %12678  ;;  %v6287_v5 = vadd.f32 1.0, %v12677_v25  ;;  %7033 = vadd.xlane.f32.xlu1 %v6984_v60  ;;  %12698 = vtanh.f32 %v6859_v59  ;;  %v6012_v4 = vpop.f32.mrb[69].mxu0  ;;  %v6144_v18 = vadd.f32 %v5819_v2, %v16177_v20  ;;  %v10455_v26 = vmul.f32 -1.442695, %v6143_v28  ;;  %v19974_v20 = vld [vmem:[#allocation198_spill] sm:$0xff]  ;;  %v19982_v2 = vld [vmem:[#allocation279_spill] sm:$0xff] }
 0x5eb   :  { %v12681_v33 = vpop.eup %12680  ;;  %v6479_v24 = vadd.f32 1.0, %v12679_v19  ;;  %12700 = vtanh.f32 %v6860_v21  ;;  %v5821_v9 = vpop.f32.mrb[70].mxu1  ;;  %v6146_v35 = vadd.f32 %v6012_v4, %v19975_v41  ;;  %v19978_v60 = vld [vmem:[#allocation266_spill] sm:$0xff] }
 0x5ec   :  { %v17279_v62 = vpop.eup %12682  ;;  %12702 = vrcp.f32 %v6287_v5  ;;  %v17282_v56 = vpop.f32.mrb[70].mxu0  ;;  %v10487_v59 = vmul.f32 -1.442695, %v6144_v18  ;;  %v6147_v29 = vadd.f32 %v5821_v9, %v19771_v1  ;;  %v19977_v1 = vld [vmem:[#allocation156_spill] sm:$0xff]  ;;  %v19979_v5 = vld [vmem:[#allocation269_spill] sm:$0xff]  ;;  %v19983_v9 = vld [vmem:[#allocation30_spill] sm:$0xff] }
 0x5ed   :  { %v12685_v48 = vpop.eup %12684  ;;  %12704 = vrcp.f32 %v6479_v24  ;;  %v6016_v14 = vpop.f32.mrb[71].mxu0  ;;  %v6145_v46 = vadd.f32 %v6010_v50, %v19977_v1  ;;  %v10519_v40 = vmul.f32 -1.442695, %v6146_v35  ;;  %v19987_v35 = vld [vmem:[#allocation158_spill] sm:$0xff] }
 0x5ee   :  { %v5823_v0 = vpop.f32.mrb[71].mxu1  ;;  %v12687_v58 = vpop.eup %12686  ;;  %v6288_v38 = vadd.f32 1.0, %v12685_v48  ;;  %12706 = vtanh.f32 %v6141_v52  ;;  %v10456_v21 = vmul.f32 -1.442695, %v6147_v29  ;;  %v6150_v25 = vadd.f32 %v6016_v14, %v19978_v60 }
 0x5ef   :  { %v12689_v54 = vpop.eup %12688  ;;  %12708 = vpow2.f32 %v10455_v26  ;;  %v6148_v7 = vadd.f32 %v5823_v0, %v19976_v22 }
 0x5f0   :  { %v12691_v53 = vpop.eup %12690  ;;  %v6798_v63 = vmul.f32 %v12689_v54, %v19974_v20  ;;  %12710 = vrcp.f32 %v6288_v38  ;;  %v10520_v0 = vmul.f32 -1.442695, %v6150_v25 }
 0x5f1   :  { %v12693_v8 = vpop.eup %12692  ;;  %12712 = vrcp.f32 %v6702_v36  ;;  %v10488_v19 = vmul.f32 -1.442695, %v6148_v7  ;;  %v19984_v36 = vld [vmem:[#allocation280_spill] sm:$0xff]  ;;  %v6703_v14 = vadd.f32 1.0, %v12691_v53 }
 0x5f2   :  { %v12695_v61 = vpop.eup %12694  ;;  %v6480_v55 = vadd.f32 1.0, %v12693_v8  ;;  %12714 = vpow2.f32 %v10487_v59  ;;  %v6862_v49 = vadd.f32 %v6830_v27, %v6798_v63 }
 0x5f3   :  { %v12697_v37 = vpop.eup %12696  ;;  %12716 = vpow2.f32 %v10518_v47  ;;  %v6921_v42 = vmul.f32 %v12695_v61, %v17249_v57  ;;  %v19986_v47 = vld [vmem:[#allocation40_spill] sm:$0xff] }
 0x5f4   :  { %v12699_v11 = vpop.eup %12698  ;;  %12718 = vrcp.f32 %v6480_v55  ;;  %v6922_v13 = vmul.f32 %v12697_v37, %v17259_v10  ;;  %v19988_v61 = vld [vmem:[#allocation180_spill] sm:$0xff] }
 0x5f5   :  { %v12701_v15 = vpop.eup %12700  ;;  %v6953_v44 = vadd.f32 %v6921_v42, %v19979_v5  ;;  %v6923_v52 = vmul.f32 %v12699_v11, %v17267_v23  ;;  %12720 = vpow2.f32 %v10456_v21 }
 0x5f6   :  { %v12703_v27 = vpop.eup %12702  ;;  %v6954_v24 = vadd.f32 %v6922_v13, %v19980_v39  ;;  %v6924_v50 = vmul.f32 %v12701_v15, %v12681_v33  ;;  %12722 = vtanh.f32 %v6145_v46  ;;  %v19985_v33 = vld [vmem:[#allocation36_spill] sm:$0xff]  ;;  %v19989_v15 = vld [vmem:[#allocation311_spill] sm:$0xff] }
 0x5f7   :  { %v12705_v51 = vpop.eup %12704  ;;  %v6831_v57 = vmul.f32 %v12703_v27, %v12687_v58  ;;  %v6985_v28 = vmul.f32 %v19981_v34, %v6953_v44  ;;  %v6955_v10 = vadd.f32 %v6923_v52, %v19982_v2  ;;  %12724 = vpow2.f32 %v10519_v40  ;;  %v5827_v29 = vpop.f32.mrb[72].mxu1  ;;  %v19992_v2 = vld [vmem:[#allocation316_spill] sm:$0xff] }
 0x5f8   :  { %v12707_v4 = vpop.eup %12706  ;;  %v6799_v18 = vmul.f32 %v12705_v51, %v16868_v16  ;;  %v6986_v48 = vmul.f32 %v19983_v9, %v6954_v24  ;;  %v6956_v23 = vadd.f32 %v6924_v50, %v19984_v36  ;;  %12726 = vpow2.f32 %v10488_v19  ;;  %v6020_v54 = vpop.f32.mrb[72].mxu0  ;;  %v19990_v19 = vld [vmem:[#allocation91_spill] sm:$0xff]  ;;  %v19991_v51 = vld [vmem:[#allocation170_spill] sm:$0xff] }
 0x5f9   :  { %v12709_v26 = vpop.eup %12708  ;;  %7035 = vadd.xlane.f32.xlu0 %v6985_v28  ;;  %v6987_v58 = vmul.f32 %v6955_v10, %v19985_v33  ;;  %12728 = vtanh.f32 %v17273_v31  ;;  %v6151_v53 = vadd.f32 %v5827_v29, %v19987_v35  ;;  %v5829_v8 = vpop.f32.mrb[73].mxu1  ;;  %v6153_v10 = vadd.f32 %v6020_v54, %v19992_v2  ;;  %v19995_v29 = vld [vmem:[#allocation16_spill] sm:$0xff] }
 0x5fa   :  { %v12711_v38 = vpop.eup %12710  ;;  %v6289_v59 = vadd.f32 1.0, %v12709_v26  ;;  %7037 = vadd.xlane.f32.xlu1 %v6986_v48  ;;  %v6988_v20 = vmul.f32 %v6956_v23, %v19986_v47  ;;  %v17303_v16 = vadd.f32 %v6831_v57, %v6799_v18  ;;  %v6022_v22 = vpop.f32.mrb[73].mxu0  ;;  %12730 = vtanh.f32 %v6862_v49 }
 0x5fb   :  { %v12713_v63 = vpop.eup %12712  ;;  %v6832_v41 = vmul.f32 %v12711_v38, %v12707_v4  ;;  %v6152_v55 = vadd.f32 %v5829_v8, %v19988_v61  ;;  %v5831_v21 = vpop.f32.mrb[74].mxu1  ;;  %v10457_v31 = vmul.f32 -1.442695, %v6151_v53  ;;  %v6154_v42 = vadd.f32 %v6022_v22, %v19781_v3  ;;  %v19994_v38 = vld [vmem:[#allocation287_spill] sm:$0xff]  ;;  %v19997_v22 = vld [vmem:[#allocation96_spill] sm:$0xff] }
 0x5fc   :  { %v12715_v7 = vpop.eup %12714  ;;  %12732 = vrcp.f32 %v6289_v59  ;;  %v17307_v37 = vpop.f32.mrb[74].mxu0  ;;  %v6149_v49 = vadd.f32 %v17282_v56, %v19989_v15  ;;  %v6155_v5 = vadd.f32 %v5831_v21, %v19990_v19  ;;  %v17322_v54 = vsub.s32 4, %v19995_v29  ;;  %v19998_v21 = vld [vmem:[#allocation38_spill] sm:$0xff]  ;;  %v19999_v15 = vld [vmem:[#allocation276_spill] sm:$0xff] }
 0x5fd   :  { %v12717_v1 = vpop.eup %12716  ;;  %12734 = vrcp.f32 %v6703_v14  ;;  %v6481_v46 = vadd.f32 1.0, %v12715_v7  ;;  %v6026_v11 = vpop.f32.mrb[75].mxu0  ;;  %7039 = vadd.xlane.f32.xlu0 %v6987_v58  ;;  %v10489_v60 = vmul.f32 -1.442695, %v6152_v55  ;;  %v10521_v39 = vmul.f32 -1.442695, %v6154_v42 }
 0x5fe   :  { %v5833_v40 = vpop.f32.mrb[75].mxu1  ;;  %v12719_v13 = vpop.eup %12718  ;;  %12736 = vpow2.f32 %v10520_v0  ;;  %7041 = vadd.xlane.f32.xlu1 %v6988_v20  ;;  %v6704_v52 = vadd.f32 1.0, %v12717_v1  ;;  %v10458_v34 = vmul.f32 -1.442695, %v6155_v5  ;;  %v19993_v0 = vld [vmem:[#allocation285_spill] sm:$0xff]  ;;  %v17325_v47 = vsub.s32 5, %v19995_v29 }
 0x5ff   :  { %v6800_v25 = vmul.f32 %v12719_v13, %v16880_v30  ;;  %12738 = vrcp.f32 %v6481_v46  ;;  %v12721_v44 = vpop.eup %12720  ;;  %v6156_v56 = vadd.f32 %v5833_v40, %v19991_v51  ;;  %v19996_v20 = vld [vmem:[#allocation34_spill] sm:$0xff]  ;;  %v17331_v35 = vsub.s32 6, %v19995_v29 }
 0x600   :  { %12740 = vpow2.f32 %v10457_v31  ;;  %v12723_v27 = vpop.eup %12722  ;;  %v6290_v3 = vadd.f32 1.0, %v12721_v44  ;;  %v17334_v53 = vsub.s32 7, %v19995_v29  ;;  %v6158_v7 = vadd.f32 %v6026_v11, %v19997_v22  ;;  %v20000_v44 = vld [vmem:[#allocation95_spill] sm:$0xff] }
 0x601   :  { %12742 = vpow2.f32 %v10489_v60  ;;  %v6864_v24 = vadd.f32 %v6832_v41, %v6800_v25  ;;  %v12725_v50 = vpop.eup %12724  ;;  %v10490_v36 = vmul.f32 -1.442695, %v6156_v56  ;;  %v17328_v41 = vpop.xlane.xlu0 %6999  ;;  %v13053_v46 = vmov 1966171168  }
 0x602   :  { %12744 = vtanh.f32 %v6149_v49  ;;  %v12727_v57 = vpop.eup %12726  ;;  %v6705_v18 = vadd.f32 1.0, %v12725_v50  ;;  %v17338_v31 = vunpack.c.l.s4 %v13053_v46  ;;  %v20001_v50 = vld [vmem:[#allocation321_spill] sm:$0xff]  ;;  %v20010_v46 = vld [vmem:[#allocation118_spill] sm:$0xff] }
 0x603   :  { %12746 = vrcp.f32 %v6290_v3  ;;  %v12729_v28 = vpop.eup %12728  ;;  %v6482_v30 = vadd.f32 1.0, %v12727_v57  ;;  %v6157_v51 = vadd.f32 %v17307_v37, %v20001_v50  ;;  %v20002_v57 = vld [vmem:[#allocation101_spill] sm:$0xff] }
 0x604   :  { %12748 = vrcp.f32 %v6704_v52  ;;  %v12731_v4 = vpop.eup %12730  ;;  %v6925_v9 = vmul.f32 %v12729_v28, %v17279_v62 }
 0x605   :  { %12750 = vpow2.f32 %v10521_v39  ;;  %v6926_v23 = vmul.f32 %v12731_v4, %v12713_v63 }
 0x606   :  { %v12733_v48 = vpop.eup %12732  ;;  %12752 = vrcp.f32 %v6482_v30  ;;  %v6957_v33 = vadd.f32 %v6925_v9, %v19993_v0  ;;  %v20005_v0 = vld [vmem:[#allocation54_spill] sm:$0xff] }
 0x607   :  { %v17317_v26 = vpop.eup %12734  ;;  %v6833_v14 = vmul.f32 %v12733_v48, %v12723_v27  ;;  %12754 = vpow2.f32 %v10458_v34  ;;  %v6958_v59 = vadd.f32 %v6926_v23, %v19994_v38  ;;  %v5837_v61 = vpop.f32.mrb[76].mxu1  ;;  %v20004_v48 = vld [vmem:[#allocation50_spill] sm:$0xff] }
 0x608   :  { %v12737_v58 = vpop.eup %12736  ;;  %12756 = vtanh.f32 %v6153_v10  ;;  %v6989_v63 = vmul.f32 %v19996_v20, %v6957_v33  ;;  %v6030_v55 = vpop.f32.mrb[76].mxu0  ;;  %v6159_v49 = vadd.f32 %v5837_v61, %v19999_v15  ;;  %v8126_v10 = vunpack.c.0.s8 %v17338_v31 }
 0x609   :  { %v12739_v62 = vpop.eup %12738  ;;  %12758 = vrcp.f32 %v6705_v18  ;;  %v6990_v1 = vmul.f32 %v19998_v21, %v6958_v59  ;;  %v6706_v40 = vadd.f32 1.0, %v12737_v58  ;;  %v5839_v60 = vpop.f32.mrb[77].mxu1  ;;  %v10522_v18 = vmul.f32 -1.442695, %v6158_v7  ;;  %v20006_v58 = vld [vmem:[#allocation52_spill] sm:$0xff]  ;;  %v20009_v21 = vld [vmem:[#allocation325_spill] sm:$0xff] }
 0x60a   :  { %v12741_v8 = vpop.eup %12740  ;;  %12760 = vpow2.f32 %v10490_v36  ;;  %v6032_v25 = vpop.f32.mrb[77].mxu0  ;;  %7043 = vadd.xlane.f32.xlu0 %v6989_v63  ;;  %v6801_v11 = vmul.f32 %v12739_v62, %v16914_v43  ;;  %v6160_v52 = vadd.f32 %v5839_v60, %v20000_v44  ;;  %v10459_v56 = vmul.f32 -1.442695, %v6159_v49  ;;  %v20007_v62 = vld [vmem:[#allocation142_spill] sm:$0xff] }
 0x60b   :  { %v12743_v42 = vpop.eup %12742  ;;  %v6291_v13 = vadd.f32 1.0, %v12741_v8  ;;  %12762 = vtanh.f32 %v17303_v16  ;;  %v5841_v27 = vpop.f32.mrb[78].mxu1  ;;  %7045 = vadd.xlane.f32.xlu1 %v6990_v1  ;;  %v7103_v37 = vrot.slane %v17328_v41, %v20004_v48  ;;  %v7107_v33 = vrot.slane %v17328_v41, %v20005_v0  ;;  %v20008_v8 = vld [vmem:[#allocation277_spill] sm:$0xff] }
 0x60c   :  { %v12745_v19 = vpop.eup %12744  ;;  %v6483_v5 = vadd.f32 1.0, %v12743_v42  ;;  %v17344_v3 = vpop.f32.mrb[78].mxu0  ;;  %12764 = vtanh.f32 %v6864_v24  ;;  %v6163_v34 = vadd.f32 %v5841_v27, %v20002_v57  ;;  %v10491_v2 = vmul.f32 -1.442695, %v6160_v52  ;;  %v20003_v24 = vld [vmem:[#allocation48_spill] sm:$0xff] }
 0x60d   :  { %v12747_v39 = vpop.eup %12746  ;;  %12766 = vrcp.f32 %v6291_v13  ;;  %v5843_v16 = vpop.f32.mrb[79].mxu1  ;;  %v7099_v9 = vrot.slane %v17328_v41, %v20003_v24  ;;  %v6865_v23 = vadd.f32 %v6833_v14, %v6801_v11  ;;  %v7111_v38 = vrot.slane %v17328_v41, %v20006_v58 }
 0x60e   :  { %v6036_v28 = vpop.f32.mrb[79].mxu0  ;;  %v12749_v30 = vpop.eup %12748  ;;  %v6834_v43 = vmul.f32 %v12747_v39, %v12745_v19  ;;  %12768 = vrcp.f32 %v6483_v5  ;;  %v10460_v63 = vmul.f32 -1.442695, %v6163_v34  ;;  %v6164_v22 = vadd.f32 %v5843_v16, %v20008_v8  ;;  %v20011_v16 = vld [vmem:[#allocation292_spill] sm:$0xff]  ;;  %v20016_v8 = vld [vmem:[#allocation45_spill] sm:$0xff] }
 0x60f   :  { %v12751_v4 = vpop.eup %12750  ;;  %12770 = vpow2.f32 %v10459_v56  ;;  %v6161_v1 = vadd.f32 %v6030_v55, %v20009_v21  ;;  %v6162_v14 = vadd.f32 %v6032_v25, %v20010_v46  ;;  %v7119_v13 = vrot.slane %v17328_v41, %v17325_v47  ;;  %v20017_v21 = vld [vmem:[#allocation329_spill] sm:$0xff] }
 0x610   :  { %v12753_v36 = vpop.eup %12752  ;;  %12772 = vrcp.f32 %v6706_v40  ;;  %v7115_v40 = vrot.slane %v17328_v41, %v17322_v54  ;;  %v6707_v49 = vadd.f32 1.0, %v12751_v4  ;;  %v7123_v60 = vrot.slane %v17328_v41, %v17331_v35 }
 0x611   :  { %v12755_v59 = vpop.eup %12754  ;;  %v6802_v20 = vmul.f32 %v12753_v36, %v20007_v62  ;;  %12774 = vtanh.f32 %v6157_v51  ;;  %v7127_v55 = vrot.slane %v17328_v41, %v17334_v53  ;;  %v10492_v11 = vmul.f32 -1.442695, %v6164_v22 }
 0x612   :  { %v12757_v7 = vpop.eup %12756  ;;  %v6292_v61 = vadd.f32 1.0, %v12755_v59  ;;  %12776 = vpow2.f32 %v10491_v2  ;;  %v17373_v5 = vsub.s32 %v8126_v10, %v19995_v29  ;;  %v10523_v52 = vmul.f32 -1.442695, %v6162_v14  ;;  %v17381_v2 = vpop.xlane.xlu0 %7001 }
 0x613   :  { %v17362_v31 = vpop.eup %12758  ;;  %12778 = vpow2.f32 %v10522_v18  ;;  %v6866_v42 = vadd.f32 %v6834_v43, %v6802_v20  ;;  %v17376_v39 = vcombine.low %v7099_v9, %v7103_v37  ;;  %v8121_v56 = vcombine.low %v7107_v33, %v7111_v38  ;;  %v20012_v18 = vld [vmem:[#allocation264_spill] sm:$0xff]  ;;  %v20014_v37 = vld [vmem:[#allocation293_spill] sm:$0xff]  ;;  %v20015_v38 = vld [vmem:[#allocation43_spill] sm:$0xff] }
 0x614   :  { %v12761_v15 = vpop.eup %12760  ;;  %12780 = vrcp.f32 %v6292_v61  ;;  %v17378_v57 = vcombine.low %v7115_v40, %v7119_v13  ;;  %v8123_v10 = vcombine.low %v7123_v60, %v7127_v55  ;;  %v7131_v61 = vrot.slane %v17381_v2, %v20003_v24 }
 0x615   :  { %v12763_v25 = vpop.eup %12762  ;;  %v6484_v19 = vadd.f32 1.0, %v12761_v15  ;;  %12782 = vpow2.f32 %v10460_v63  ;;  %v8130_v20 = vrot.slane %v17376_v39, %v17373_v5  ;;  %v7135_v46 = vrot.slane %v17381_v2, %v20004_v48 }
 0x616   :  { %v12765_v44 = vpop.eup %12764  ;;  %12784 = vtanh.f32 %v6161_v1  ;;  %v6927_v27 = vmul.f32 %v12763_v25, %v17317_v26  ;;  %v20013_v26 = vld [vmem:[#allocation228_spill] sm:$0xff]  ;;  %v6165_v1 = vadd.f32 %v17344_v3, %v20017_v21  ;;  %v7139_v14 = vrot.slane %v17381_v2, %v20005_v0 }
 0x617   :  { %v12767_v50 = vpop.eup %12766  ;;  %12786 = vrcp.f32 %v6484_v19  ;;  %v6928_v51 = vmul.f32 %v12765_v44, %v12749_v30  ;;  %v6166_v9 = vadd.f32 %v6036_v28, %v20013_v26  ;;  %v8137_v60 = vrot.slane %v8121_v56, %v17373_v5 }
 0x618   :  { %v12769_v41 = vpop.eup %12768  ;;  %v6835_v34 = vmul.f32 %v12767_v50, %v12757_v7  ;;  %12788 = vrcp.f32 %v6707_v49  ;;  %v6959_v43 = vadd.f32 %v6927_v27, %v20011_v16  ;;  %v7147_v3 = vrot.slane %v17381_v2, %v17322_v54  ;;  %v20018_v16 = vld [vmem:[#allocation127_spill] sm:$0xff] }
 0x619   :  { %v12771_v4 = vpop.eup %12770  ;;  %v6803_v36 = vmul.f32 %v12769_v41, %v20012_v18  ;;  %12790 = vpow2.f32 %v10492_v11  ;;  %v6960_v59 = vadd.f32 %v6928_v51, %v20014_v37  ;;  %v10524_v15 = vmul.f32 -1.442695, %v6166_v9  ;;  %v7004_v9 = vpop.xlane.xlu1 %7003 }
 0x61a   :  { %v17386_v30 = vpop.eup %12772  ;;  %v6293_v33 = vadd.f32 1.0, %v12771_v4  ;;  %12792 = vpow2.f32 %v10523_v52  ;;  %v6991_v62 = vmul.f32 %v6959_v43, %v20015_v38  ;;  %v7151_v55 = vrot.slane %v17381_v2, %v17325_v47 }
 0x61b   :  { %v12775_v63 = vpop.eup %12774  ;;  %v6992_v22 = vmul.f32 %v6960_v59, %v20016_v8  ;;  %12794 = vtanh.f32 %v6865_v23  ;;  %v6867_v7 = vadd.f32 %v6835_v34, %v6803_v36  ;;  %v7143_v23 = vrot.slane %v17381_v2, %v20006_v58 }
 0x61c   :  { %v12777_v28 = vpop.eup %12776  ;;  %12796 = vrcp.f32 %v6293_v33  ;;  %7047 = vadd.xlane.f32.xlu0 %v6991_v62  ;;  %v8144_v11 = vrot.slane %v17378_v57, %v17373_v5  ;;  %v7155_v39 = vrot.slane %v17381_v2, %v17331_v35  ;;  %v7159_v51 = vrot.slane %v17381_v2, %v17334_v53 }
 0x61d   :  { %v12779_v40 = vpop.eup %12778  ;;  %v6485_v13 = vadd.f32 1.0, %v12777_v28  ;;  %7049 = vadd.xlane.f32.xlu1 %v6992_v22  ;;  %12798 = vtanh.f32 %v6866_v42  ;;  %v8151_v42 = vrot.slane %v8123_v10, %v17373_v5  ;;  %v8169_v56 = vcombine.low %v7131_v61, %v7135_v46  ;;  %v20019_v46 = vld [vmem:[#allocation298_spill] sm:$0xff] }
 0x61e   :  { %v12781_v49 = vpop.eup %12780  ;;  %12800 = vtanh.f32 %v6867_v7  ;;  %v6708_v52 = vadd.f32 1.0, %v12779_v40  ;;  %v8170_v41 = vcombine.low %v7139_v14, %v7143_v23  ;;  %v17415_v57 = vcombine.low %v8130_v20, %v8137_v60 }
 0x61f   :  { %v12783_v25 = vpop.eup %12782  ;;  %v6836_v19 = vmul.f32 %v12781_v49, %v12775_v63  ;;  %12802 = vrcp.f32 %v6485_v13  ;;  %v8171_v10 = vcombine.low %v7147_v3, %v7151_v55  ;;  %v17417_v37 = vcombine.low %v8144_v11, %v8151_v42  ;;  %v20020_v55 = vld [vmem:[#allocation291_spill] sm:$0xff] }
 0x620   :  { %v12785_v44 = vpop.eup %12784  ;;  %v6294_v27 = vadd.f32 1.0, %v12783_v25  ;;  %12804 = vtanh.f32 %v6165_v1  ;;  %v8172_v33 = vcombine.low %v7155_v39, %v7159_v51  ;;  %v8179_v2 = vrot.slane %v8169_v56, %v17373_v5  ;;  %v20022_v42 = vld [vmem:[#allocation299_spill] sm:$0xff] }
 0x621   :  { %v12787_v50 = vpop.eup %12786  ;;  %12806 = vpow2.f32 %v10524_v15  ;;  %v8186_v38 = vrot.slane %v8170_v41, %v17373_v5  ;;  %v8160_v63 = vrot.slane %v17415_v57, %v17373_v5  ;;  %v8193_v8 = vrot.slane %v8171_v10, %v17373_v5  ;;  %v20023_v41 = vld [vmem:[#allocation44_spill] sm:$0xff] }
 0x622   :  { %v12789_v34 = vpop.eup %12788  ;;  %v6804_v43 = vmul.f32 %v12787_v50, %v20018_v16  ;;  %12808 = vrcp.f32 %v6294_v27  ;;  %v7163_v61 = vrot.slane %v7004_v9, %v20003_v24  ;;  %v7167_v28 = vrot.slane %v7004_v9, %v20004_v48 }
 0x623   :  { %v12791_v4 = vpop.eup %12790  ;;  %12810 = vrcp.f32 %v6708_v52  ;;  %v7171_v21 = vrot.slane %v7004_v9, %v20005_v0  ;;  %v8200_v49 = vrot.slane %v8172_v33, %v17373_v5  ;;  %v17432_v60 = vcombine.low %v8179_v2, %v8186_v38  ;;  %v7008_v38 = vpop.xlane.xlu0 %7007 }
 0x624   :  { %v12793_v18 = vpop.eup %12792  ;;  %v6486_v36 = vadd.f32 1.0, %v12791_v4  ;;  %v6868_v26 = vadd.f32 %v6836_v19, %v6804_v43  ;;  %v20021_v19 = vld [vmem:[#allocation42_spill] sm:$0xff]  ;;  %v7179_v52 = vrot.slane %v7004_v9, %v17322_v54  ;;  %v7183_v39 = vrot.slane %v7004_v9, %v17325_v47  ;;  %v7006_v43 = vpop.xlane.xlu1 %7005 }
 0x625   :  { %v12795_v59 = vpop.eup %12794  ;;  %v6709_v15 = vadd.f32 1.0, %v12793_v18  ;;  %v7187_v50 = vrot.slane %v7004_v9, %v17331_v35  ;;  %v7191_v51 = vrot.slane %v7004_v9, %v17334_v53  ;;  %v8218_v10 = vcombine.low %v7163_v61, %v7167_v28 }
 0x626   :  { %v12797_v62 = vpop.eup %12796  ;;  %12812 = vrcp.f32 %v6486_v36  ;;  %v6929_v20 = vmul.f32 %v12795_v59, %v17362_v31  ;;  %v7175_v31 = vrot.slane %v7004_v9, %v20006_v58  ;;  %v20024_v36 = vld [vmem:[#allocation47_spill] sm:$0xff]  ;;  %v17446_v33 = vcombine.low %v8193_v8, %v8200_v49 }
 0x627   :  { %v12799_v22 = vpop.eup %12798  ;;  %v6837_v7 = vmul.f32 %v12797_v62, %v12785_v44  ;;  %12814 = vtanh.f32 %v6868_v26  ;;  %v8209_v9 = vrot.slane %v17432_v60, %v17373_v5  ;;  %v8220_v62 = vcombine.low %v7179_v52, %v7183_v39 }
 0x628   :  { %v12801_v1 = vpop.eup %12800  ;;  %v6961_v14 = vadd.f32 %v6929_v20, %v20019_v46  ;;  %v6930_v40 = vmul.f32 %v12799_v22, %v17386_v30  ;;  %v8219_v4 = vcombine.low %v7171_v21, %v7175_v31  ;;  %12816 = vrcp.f32 %v6709_v15 }
 0x629   :  { %v12803_v13 = vpop.eup %12802  ;;  %v6931_v23 = vmul.f32 %v12801_v1, %v12789_v34  ;;  %v8221_v20 = vcombine.low %v7187_v50, %v7191_v51  ;;  %v7195_v22 = vrot.slane %v7006_v43, %v20003_v24  ;;  %v8228_v28 = vrot.slane %v8218_v10, %v17373_v5 }
 0x62a   :  { %v12805_v3 = vpop.eup %12804  ;;  %v6805_v25 = vmul.f32 %v12803_v13, %v20020_v55  ;;  %v6993_v11 = vmul.f32 %v20021_v19, %v6961_v14  ;;  %v6962_v44 = vadd.f32 %v6930_v40, %v20022_v42  ;;  %v8235_v21 = vrot.slane %v8219_v4, %v17373_v5 }
 0x62b   :  { %v12807_v30 = vpop.eup %12806  ;;  %v6963_v27 = vadd.f32 %v6931_v23, %v19824_v32  ;;  %v8167_v32 = vrot.slane %v17417_v37, %v17373_v5  ;;  %v7203_v8 = vrot.slane %v7006_v43, %v20005_v0  ;;  %v7207_v1 = vrot.slane %v7006_v43, %v20006_v58 }
 0x62c   :  { %v12809_v56 = vpop.eup %12808  ;;  %7051 = vadd.xlane.f32.xlu0 %v6993_v11  ;;  %v6994_v34 = vmul.f32 %v20023_v41, %v6962_v44  ;;  %v6869_v16 = vadd.f32 %v6837_v7, %v6805_v25  ;;  %v6710_v59 = vadd.f32 1.0, %v12807_v30  ;;  %v7199_v7 = vrot.slane %v7006_v43, %v20004_v48 }
 0x62d   :  { %v6838_v18 = vmul.f32 %v12809_v56, %v12805_v3  ;;  %v6995_v26 = vmul.f32 %v6963_v27, %v20024_v36  ;;  %v12811_v2 = vpop.eup %12810  ;;  %v7211_v14 = vrot.slane %v7006_v43, %v17322_v54  ;;  %v7215_v40 = vrot.slane %v7006_v43, %v17325_v47  ;;  %v7010_v27 = vpop.xlane.xlu1 %7009 }
 0x62e   :  { %7053 = vadd.xlane.f32.xlu1 %v6994_v34  ;;  %12818 = vtanh.f32 %v6869_v16  ;;  %v7219_v31 = vrot.slane %v7006_v43, %v17331_v35  ;;  %v7223_v15 = vrot.slane %v7006_v43, %v17334_v53  ;;  %v7227_v23 = vrot.slane %v7008_v38, %v20003_v24  ;;  %v20025_v16 = vld [vmem:[#allocation51_spill] sm:$0xff] }
 0x62f   :  { %12820 = vrcp.f32 %v6710_v59  ;;  %v7231_v49 = vrot.slane %v7008_v38, %v20004_v48  ;;  %v7235_v25 = vrot.slane %v7008_v38, %v20005_v0  ;;  %v7243_v19 = vrot.slane %v7008_v38, %v17322_v54 }
 0x630   :  { %v12813_v61 = vpop.eup %12812  ;;  %7055 = vadd.xlane.f32.xlu0 %v6995_v26  ;;  %v7247_v11 = vrot.slane %v7008_v38, %v17325_v47  ;;  %v7251_v42 = vrot.slane %v7008_v38, %v17331_v35  ;;  %v7255_v44 = vrot.slane %v7008_v38, %v17334_v53  ;;  %v8216_v30 = vrot.slane %v17446_v33, %v17373_v5 }
 0x631   :  { %v6806_v46 = vmul.f32 %v12813_v61, %v17025_v45  ;;  %v12815_v13 = vpop.eup %12814  ;;  %v7239_v45 = vrot.slane %v7008_v38, %v20006_v58  ;;  %v8242_v39 = vrot.slane %v8220_v62, %v17373_v5  ;;  %v8249_v50 = vrot.slane %v8221_v20, %v17373_v5 }
 0x632   :  { %v6932_v3 = vmul.f32 %v12815_v13, %v12811_v2  ;;  %v17474_v51 = vcombine.low %v8228_v28, %v8235_v21  ;;  %v8267_v56 = vcombine.low %v7195_v22, %v7199_v7  ;;  %v8268_v41 = vcombine.low %v7203_v8, %v7207_v1  ;;  %v12817_v34 = vpop.eup %12816 }
 0x633   :  { %v6870_v55 = vadd.f32 %v6838_v18, %v6806_v46  ;;  %v8269_v10 = vcombine.low %v7211_v14, %v7215_v40  ;;  %v8270_v4 = vcombine.low %v7219_v31, %v7223_v15  ;;  %v8316_v18 = vcombine.low %v7227_v23, %v7231_v49  ;;  %v7012_v46 = vpop.xlane.xlu0 %7011 }
 0x634   :  { %v6964_v52 = vadd.f32 %v6932_v3, %v19825_v17  ;;  %v8317_v36 = vcombine.low %v7235_v25, %v7239_v45  ;;  %v8318_v26 = vcombine.low %v7243_v19, %v7247_v11  ;;  %v8319_v59 = vcombine.low %v7251_v42, %v7255_v44  ;;  %v20026_v3 = vld [vmem:[#allocation46_spill] sm:$0xff] }
 0x635   :  { %12822 = vtanh.f32 %v6870_v55  ;;  %v7259_v2 = vrot.slane %v7010_v27, %v20003_v24  ;;  %v7263_v62 = vrot.slane %v7010_v27, %v20004_v48  ;;  %v7267_v20 = vrot.slane %v7010_v27, %v20005_v0 }
 0x636   :  { %v6996_v43 = vmul.f32 %v6964_v52, %v20025_v16  ;;  %v7271_v22 = vrot.slane %v7010_v27, %v20006_v58  ;;  %v7275_v7 = vrot.slane %v7010_v27, %v17322_v54  ;;  %v7279_v61 = vrot.slane %v7010_v27, %v17325_v47 }
 0x637   :  { %v7283_v28 = vrot.slane %v7010_v27, %v17331_v35  ;;  %v7287_v21 = vrot.slane %v7010_v27, %v17334_v53  ;;  %v8251_v1 = vcombine.low %v8242_v39, %v8249_v50  ;;  %v8277_v14 = vrot.slane %v8267_v56, %v17373_v5 }
 0x638   :  { %v12819_v17 = vpop.eup %12818  ;;  %7057 = vadd.xlane.f32.xlu1 %v6996_v43  ;;  %v8284_v40 = vrot.slane %v8268_v41, %v17373_v5  ;;  %v8291_v13 = vrot.slane %v8269_v10, %v17373_v5  ;;  %v8298_v15 = vrot.slane %v8270_v4, %v17373_v5  ;;  %v8326_v23 = vrot.slane %v8316_v18, %v17373_v5 }
 0x639   :  { %v6933_v38 = vmul.f32 %v12819_v17, %v12817_v34  ;;  %v12821_v31 = vpop.eup %12820  ;;  %v8333_v49 = vrot.slane %v8317_v36, %v17373_v5  ;;  %v8340_v25 = vrot.slane %v8318_v26, %v17373_v5  ;;  %v8365_v45 = vcombine.low %v7259_v2, %v7263_v62  ;;  %v17511_v26 = vpop.xlane.xlu1 %7013 }
 0x63a   :  { %v8366_v19 = vcombine.low %v7267_v20, %v7271_v22  ;;  %v8367_v11 = vcombine.low %v7275_v7, %v7279_v61  ;;  %v8368_v42 = vcombine.low %v7283_v28, %v7287_v21  ;;  %v7291_v44 = vrot.slane %v7012_v46, %v20003_v24  ;;  %v20027_v7 = vld [vmem:[#allocation49_spill] sm:$0xff] }
 0x63b   :  { %v6965_v8 = vadd.f32 %v6933_v38, %v19837_v12  ;;  %v8347_v12 = vrot.slane %v8319_v59, %v17373_v5  ;;  %v7295_v27 = vrot.slane %v7012_v46, %v20004_v48  ;;  %v7299_v39 = vrot.slane %v7012_v46, %v20005_v0 }
 0x63c   :  { %v7303_v50 = vrot.slane %v7012_v46, %v20006_v58  ;;  %v7307_v56 = vrot.slane %v7012_v46, %v17322_v54  ;;  %v7311_v34 = vrot.slane %v7012_v46, %v17325_v47  ;;  %v7315_v16 = vrot.slane %v7012_v46, %v17331_v35 }
 0x63d   :  { %v6997_v55 = vmul.f32 %v20026_v3, %v6965_v8  ;;  %v7319_v43 = vrot.slane %v7012_v46, %v17334_v53  ;;  %v8258_v10 = vrot.slane %v17474_v51, %v17373_v5  ;;  %v8265_v4 = vrot.slane %v8251_v1, %v17373_v5 }
 0x63e   :  { %v17506_v18 = vcombine.low %v8277_v14, %v8284_v40  ;;  %v17508_v17 = vcombine.low %v8291_v13, %v8298_v15  ;;  %v17513_v59 = vcombine.low %v8326_v23, %v8333_v49  ;;  %v17515_v2 = vcombine.low %v8340_v25, %v8347_v12 }
 0x63f   :  { %v12823_v52 = vpop.eup %12822  ;;  %7059 = vadd.xlane.f32.xlu0 %v6997_v55  ;;  %v8375_v38 = vrot.slane %v8365_v45, %v17373_v5  ;;  %v8382_v62 = vrot.slane %v8366_v19, %v17373_v5  ;;  %v8389_v51 = vrot.slane %v8367_v11, %v17373_v5  ;;  %v8396_v20 = vrot.slane %v8368_v42, %v17373_v5 }
 0x640   :  { %v6934_v41 = vmul.f32 %v12823_v52, %v12821_v31  ;;  %v8414_v22 = vcombine.low %v7291_v44, %v7295_v27  ;;  %v8415_v28 = vcombine.low %v7299_v39, %v7303_v50  ;;  %v8416_v21 = vcombine.low %v7307_v56, %v7311_v34  ;;  %v7016_v31 = vpop.xlane.xlu0 %7015 }
 0x641   :  { %v17528_v8 = vcombine.low %v8160_v63, %v8167_v32  ;;  %v17536_v1 = vcombine.low %v8209_v9, %v8216_v30  ;;  %v17538_v46 = vcombine.low %v8258_v10, %v8265_v4  ;;  %v8307_v14 = vrot.slane %v17506_v18, %v17373_v5  ;;  %v7018_v63 = vpop.xlane.xlu1 %7017 }
 0x642   :  { %v6966_v36 = vadd.f32 %v6934_v41, %v19838_v6  ;;  %v8417_v6 = vcombine.low %v7315_v16, %v7319_v43  ;;  %v8314_v37 = vrot.slane %v17508_v17, %v17373_v5  ;;  %v8356_v57 = vrot.slane %v17513_v59, %v17373_v5 }
 0x643   :  { %v7323_v32 = vrot.slane %v17511_v26, %v20003_v24  ;;  %v7327_v60 = vrot.slane %v17511_v26, %v20004_v48  ;;  %v8363_v33 = vrot.slane %v17515_v2, %v17373_v5  ;;  %v17552_v9 = vcombine.low %v8375_v38, %v8382_v62 }
 0x644   :  { %v6998_v61 = vmul.f32 %v20027_v7, %v6966_v36  ;;  %v17554_v30 = vcombine.low %v8389_v51, %v8396_v20  ;;  %v8424_v40 = vrot.slane %v8414_v22, %v17373_v5  ;;  %v8431_v13 = vrot.slane %v8415_v28, %v17373_v5 }
 0x645   :  { %v8438_v15 = vrot.slane %v8416_v21, %v17373_v5  ;;  %v8445_v23 = vrot.slane %v8417_v6, %v17373_v5  ;;  %v7331_v49 = vrot.slane %v17511_v26, %v20005_v0  ;;  %v7335_v3 = vrot.slane %v17511_v26, %v20006_v58  ;;  %v7020_v21 = vpop.xlane.xlu0 %7019 }
 0x646   :  { %7061 = vadd.xlane.f32.xlu1 %v6998_v61  ;;  %v7339_v55 = vrot.slane %v17511_v26, %v17322_v54  ;;  %v7387_v25 = vrot.slane %v7018_v63, %v20003_v24  ;;  %v7391_v12 = vrot.slane %v7018_v63, %v20004_v48  ;;  %v7343_v45 = vrot.slane %v17511_v26, %v17325_v47 }
 0x647   :  { %v7347_v19 = vrot.slane %v17511_v26, %v17331_v35  ;;  %v7351_v11 = vrot.slane %v17511_v26, %v17334_v53  ;;  %v17574_v42 = vcombine.low %v7323_v32, %v7327_v60  ;;  %v7355_v44 = vrot.slane %v7016_v31, %v20003_v24 }
 0x648   :  { %v7395_v52 = vrot.slane %v7018_v63, %v20005_v0  ;;  %v7399_v27 = vrot.slane %v7018_v63, %v20006_v58  ;;  %v7403_v39 = vrot.slane %v7018_v63, %v17322_v54  ;;  %v7359_v50 = vrot.slane %v7016_v31, %v20004_v48 }
 0x649   :  { %v7363_v56 = vrot.slane %v7016_v31, %v20005_v0  ;;  %v7367_v41 = vrot.slane %v7016_v31, %v20006_v58  ;;  %v7407_v34 = vrot.slane %v7018_v63, %v17325_v47  ;;  %v7411_v16 = vrot.slane %v7018_v63, %v17331_v35 }
 0x64a   :  { %v7415_v43 = vrot.slane %v7018_v63, %v17334_v53  ;;  %v8561_v10 = vcombine.low %v7387_v25, %v7391_v12  ;;  %v8562_v4 = vcombine.low %v7395_v52, %v7399_v27  ;;  %v7371_v36 = vrot.slane %v7016_v31, %v17322_v54 }
 0x64b   :  { %v7375_v26 = vrot.slane %v7016_v31, %v17325_v47  ;;  %v7379_v38 = vrot.slane %v7016_v31, %v17331_v35  ;;  %v8563_v62 = vcombine.low %v7403_v39, %v7407_v34  ;;  %v7383_v51 = vrot.slane %v7016_v31, %v17334_v53 }
 0x64c   :  { %v8564_v20 = vcombine.low %v7411_v16, %v7415_v43  ;;  %v8571_v22 = vrot.slane %v8561_v10, %v17373_v5  ;;  %v8578_v7 = vrot.slane %v8562_v4, %v17373_v5  ;;  %v17592_v61 = vcombine.low %v8424_v40, %v8431_v13 }
 0x64d   :  { %v17594_v28 = vcombine.low %v8438_v15, %v8445_v23  ;;  %v8464_v6 = vcombine.low %v7331_v49, %v7335_v3  ;;  %v8585_v63 = vrot.slane %v8563_v62, %v17373_v5  ;;  %v8465_v32 = vcombine.low %v7339_v55, %v7343_v45 }
 0x64e   :  { %v8466_v60 = vcombine.low %v7347_v19, %v7351_v11  ;;  %v8592_v25 = vrot.slane %v8564_v20, %v17373_v5  ;;  %v8593_v12 = vcombine.low %v8571_v22, %v8578_v7  ;;  %v8473_v31 = vrot.slane %v17574_v42, %v17373_v5 }
 0x64f   :  { %v8512_v52 = vcombine.low %v7355_v44, %v7359_v50  ;;  %v8513_v27 = vcombine.low %v7363_v56, %v7367_v41  ;;  %v8514_v39 = vcombine.low %v7371_v36, %v7375_v26  ;;  %v8515_v34 = vcombine.low %v7379_v38, %v7383_v51  ;;  %v7022_v38 = vpop.xlane.xlu1 %7021 }
 0x650   :  { %v8594_v40 = vcombine.low %v8585_v63, %v8592_v25  ;;  %v8601_v13 = vrot.slane %v8593_v12, %v17373_v5  ;;  %v7419_v15 = vrot.slane %v7020_v21, %v20003_v24  ;;  %v7423_v23 = vrot.slane %v7020_v21, %v20004_v48 }
 0x651   :  { %v7427_v49 = vrot.slane %v7020_v21, %v20005_v0  ;;  %v7431_v3 = vrot.slane %v7020_v21, %v20006_v58  ;;  %v7435_v55 = vrot.slane %v7020_v21, %v17322_v54  ;;  %v7439_v19 = vrot.slane %v7020_v21, %v17325_v47 }
 0x652   :  { %v8608_v45 = vrot.slane %v8594_v40, %v17373_v5  ;;  %v7443_v11 = vrot.slane %v7020_v21, %v17331_v35  ;;  %v7447_v42 = vrot.slane %v7020_v21, %v17334_v53  ;;  %v8480_v44 = vrot.slane %v8464_v6, %v17373_v5 }
 0x653   :  { %v8487_v50 = vrot.slane %v8465_v32, %v17373_v5  ;;  %v8494_v56 = vrot.slane %v8466_v60, %v17373_v5  ;;  %v8522_v41 = vrot.slane %v8512_v52, %v17373_v5  ;;  %v8536_v16 = vrot.slane %v8514_v39, %v17373_v5 }
 0x654   :  { %v8543_v43 = vrot.slane %v8515_v34, %v17373_v5  ;;  %v8609_v10 = vcombine.low %v8601_v13, %v8608_v45  ;;  %v8610_v4 = vcombine.low %v7419_v15, %v7423_v23  ;;  %v8611_v36 = vcombine.low %v7427_v49, %v7431_v3  ;;  %v7026_v45 = vpop.xlane.xlu1 %7025 }
 0x655   :  { %9689 = vperm.xlu0 %10596, %v17528_v8   ;;  %v8529_v8 = vrot.slane %v8513_v27, %v17373_v5  ;;  %v8315_v26 = vcombine.low %v8307_v14, %v8314_v37  ;;  %v8612_v62 = vcombine.low %v7435_v55, %v7439_v19  ;;  %v8613_v51 = vcombine.low %v7443_v11, %v7447_v42 }
 0x656   :  { %v8405_v20 = vrot.slane %v17552_v9, %v17373_v5  ;;  %v8412_v17 = vrot.slane %v17554_v30, %v17373_v5  ;;  %v8454_v18 = vrot.slane %v17592_v61, %v17373_v5  ;;  %v8461_v2 = vrot.slane %v17594_v28, %v17373_v5 }
 0x657   :  { %9692 = vperm.xlu1 %10597, %v17536_v1   ;;  %v8364_v1 = vcombine.low %v8356_v57, %v8363_v33  ;;  %v17640_v59 = vcombine.low %v8473_v31, %v8480_v44  ;;  %v17642_v14 = vcombine.low %v8487_v50, %v8494_v56  ;;  %v17644_v37 = vcombine.low %v8522_v41, %v8529_v8  ;;  %v7024_v33 = vpop.xlane.xlu0 %7023 }
 0x658   :  { %v17646_v57 = vcombine.low %v8536_v16, %v8543_v43  ;;  %v8620_v9 = vrot.slane %v8610_v4, %v17373_v5  ;;  %v8627_v30 = vrot.slane %v8611_v36, %v17373_v5  ;;  %v7451_v22 = vrot.slane %v7022_v38, %v20003_v24 }
 0x659   :  { %9716 = vperm.xlu0 %10596, %v8609_v10   ;;  %v7455_v7 = vrot.slane %v7022_v38, %v20004_v48  ;;  %v8634_v61 = vrot.slane %v8612_v62, %v17373_v5  ;;  %v7459_v28 = vrot.slane %v7022_v38, %v20005_v0  ;;  %v7463_v21 = vrot.slane %v7022_v38, %v20006_v58 }
 0x65a   :  { %v7467_v6 = vrot.slane %v7022_v38, %v17322_v54  ;;  %v7471_v63 = vrot.slane %v7022_v38, %v17325_v47  ;;  %v7475_v32 = vrot.slane %v7022_v38, %v17331_v35  ;;  %v7479_v60 = vrot.slane %v7022_v38, %v17334_v53 }
 0x65b   :  { %9695 = vperm.xlu1 %10597, %v17538_v46   ;;  %v8641_v46 = vrot.slane %v8613_v51, %v17373_v5  ;;  %v7483_v25 = vrot.slane %v7024_v33, %v20003_v24  ;;  %v7487_v12 = vrot.slane %v7024_v33, %v20004_v48  ;;  %v7491_v31 = vrot.slane %v7024_v33, %v20005_v0  ;;  %v17680_v38 = vpop.xlane.xlu0 %7027 }
 0x65c   :  { %v7495_v52 = vrot.slane %v7024_v33, %v20006_v58  ;;  %v7499_v27 = vrot.slane %v7024_v33, %v17322_v54  ;;  %v7503_v39 = vrot.slane %v7024_v33, %v17325_v47  ;;  %v7507_v34 = vrot.slane %v7024_v33, %v17331_v35 }
 0x65d   :  { %v7511_v40 = vrot.slane %v7024_v33, %v17334_v53  ;;  %v8413_v13 = vcombine.low %v8405_v20, %v8412_v17  ;;  %v8462_v15 = vcombine.low %v8454_v18, %v8461_v2  ;;  %v8503_v23 = vrot.slane %v17640_v59, %v17373_v5 }
 0x65e   :  { %v8510_v49 = vrot.slane %v17642_v14, %v17373_v5  ;;  %v8552_v3 = vrot.slane %v17644_v37, %v17373_v5  ;;  %v8559_v55 = vrot.slane %v17646_v57, %v17373_v5  ;;  %v8642_v19 = vcombine.low %v8620_v9, %v8627_v30 }
 0x65f   :  { %9698 = vperm.xlu1 %10597, %v8315_v26   ;;  %v8643_v11 = vcombine.low %v8634_v61, %v8641_v46  ;;  %v8659_v42 = vcombine.low %v7451_v22, %v7455_v7  ;;  %v8660_v44 = vcombine.low %v7459_v28, %v7463_v21  ;;  %v8661_v50 = vcombine.low %v7467_v6, %v7471_v63  ;;  %v7032_v22 = vpop.xlane.xlu0 %7031 }
 0x660   :  { %v8662_v56 = vcombine.low %v7475_v32, %v7479_v60  ;;  %v8708_v41 = vcombine.low %v7483_v25, %v7487_v12  ;;  %v8709_v8 = vcombine.low %v7491_v31, %v7495_v52  ;;  %v8710_v16 = vcombine.low %v7499_v27, %v7503_v39 }
 0x661   :  { %v8711_v43 = vcombine.low %v7507_v34, %v7511_v40  ;;  %v7515_v10 = vrot.slane %v7026_v45, %v20003_v24  ;;  %v7519_v4 = vrot.slane %v7026_v45, %v20004_v48  ;;  %v7523_v36 = vrot.slane %v7026_v45, %v20005_v0 }
 0x662   :  { %v7527_v26 = vrot.slane %v7026_v45, %v20006_v58  ;;  %v7535_v62 = vrot.slane %v7026_v45, %v17325_v47  ;;  %v7539_v51 = vrot.slane %v7026_v45, %v17331_v35  ;;  %v7543_v20 = vrot.slane %v7026_v45, %v17334_v53 }
 0x663   :  { %9701 = vperm.xlu1 %10597, %v8364_v1   ;;  %v7531_v1 = vrot.slane %v7026_v45, %v17322_v54  ;;  %v8669_v17 = vrot.slane %v8659_v42, %v17373_v5  ;;  %v8676_v18 = vrot.slane %v8660_v44, %v17373_v5  ;;  %v8683_v2 = vrot.slane %v8661_v50, %v17373_v5 }
 0x664   :  { %v8690_v59 = vrot.slane %v8662_v56, %v17373_v5  ;;  %v8718_v14 = vrot.slane %v8708_v41, %v17373_v5  ;;  %v8725_v37 = vrot.slane %v8709_v8, %v17373_v5  ;;  %v8732_v57 = vrot.slane %v8710_v16, %v17373_v5  ;;  %v17712_v56 = vpop.xlane.xlu1 %7029 }
 0x665   :  { %v8739_v33 = vrot.slane %v8711_v43, %v17373_v5  ;;  %v8757_v9 = vcombine.low %v7515_v10, %v7519_v4  ;;  %v8758_v30 = vcombine.low %v7523_v36, %v7527_v26  ;;  %v8759_v7 = vcombine.low %v7531_v1, %v7535_v62 }
 0x666   :  { %v8760_v61 = vcombine.low %v7539_v51, %v7543_v20  ;;  %v8511_v46 = vcombine.low %v8503_v23, %v8510_v49  ;;  %v8560_v28 = vcombine.low %v8552_v3, %v8559_v55  ;;  %v8650_v21 = vrot.slane %v8642_v19, %v17373_v5 }
 0x667   :  { %9704 = vperm.xlu1 %10597, %v8413_v13   ;;  %v8657_v6 = vrot.slane %v8643_v11, %v17373_v5  ;;  %v8691_v63 = vcombine.low %v8669_v17, %v8676_v18  ;;  %v8692_v32 = vcombine.low %v8683_v2, %v8690_v59  ;;  %v8740_v60 = vcombine.low %v8718_v14, %v8725_v37 }
 0x668   :  { %v8741_v25 = vcombine.low %v8732_v57, %v8739_v33  ;;  %v8767_v12 = vrot.slane %v8757_v9, %v17373_v5  ;;  %v8774_v31 = vrot.slane %v8758_v30, %v17373_v5  ;;  %v7611_v52 = vrot.slane %v7032_v22, %v20003_v24 }
 0x669   :  { %v7615_v27 = vrot.slane %v7032_v22, %v20004_v48  ;;  %v8781_v39 = vrot.slane %v8759_v7, %v17373_v5  ;;  %v8788_v34 = vrot.slane %v8760_v61, %v17373_v5  ;;  %v7619_v40 = vrot.slane %v7032_v22, %v20005_v0 }
 0x66a   :  { %v7623_v13 = vrot.slane %v7032_v22, %v20006_v58  ;;  %v7631_v23 = vrot.slane %v7032_v22, %v17325_v47  ;;  %v7635_v49 = vrot.slane %v7032_v22, %v17331_v35  ;;  %v7639_v3 = vrot.slane %v7032_v22, %v17334_v53 }
 0x66b   :  { %9707 = vperm.xlu1 %10597, %v8462_v15   ;;  %v7627_v15 = vrot.slane %v7032_v22, %v17322_v54  ;;  %v8699_v55 = vrot.slane %v8691_v63, %v17373_v5  ;;  %v8706_v45 = vrot.slane %v8692_v32, %v17373_v5  ;;  %v8748_v19 = vrot.slane %v8740_v60, %v17373_v5 }
 0x66c   :  { %v8755_v11 = vrot.slane %v8741_v25, %v17373_v5  ;;  %v8658_v42 = vcombine.low %v8650_v21, %v8657_v6  ;;  %v8789_v44 = vcombine.low %v8767_v12, %v8774_v31  ;;  %v8904_v50 = vcombine.low %v7611_v52, %v7615_v27 }
 0x66d   :  { %v8790_v41 = vcombine.low %v8781_v39, %v8788_v34  ;;  %v8905_v8 = vcombine.low %v7619_v40, %v7623_v13  ;;  %v8906_v16 = vcombine.low %v7627_v15, %v7631_v23  ;;  %v8907_v43 = vcombine.low %v7635_v49, %v7639_v3 }
 0x66e   :  { %v8707_v10 = vcombine.low %v8699_v55, %v8706_v45  ;;  %v8756_v4 = vcombine.low %v8748_v19, %v8755_v11  ;;  %v8797_v36 = vrot.slane %v8789_v44, %v17373_v5  ;;  %v8914_v26 = vrot.slane %v8904_v50, %v17373_v5 }
 0x66f   :  { %9710 = vperm.xlu1 %10597, %v8511_v46   ;;  %v7547_v1 = vrot.slane %v17680_v38, %v20003_v24  ;;  %v7551_v62 = vrot.slane %v17680_v38, %v20004_v48  ;;  %v8804_v51 = vrot.slane %v8790_v41, %v17373_v5  ;;  %v8921_v17 = vrot.slane %v8905_v8, %v17373_v5 }
 0x670   :  { %v8928_v18 = vrot.slane %v8906_v16, %v17373_v5  ;;  %v8935_v2 = vrot.slane %v8907_v43, %v17373_v5  ;;  %v7555_v46 = vrot.slane %v17680_v38, %v20005_v0  ;;  %v7563_v12 = vrot.slane %v17680_v38, %v17322_v54 }
 0x671   :  { %v8936_v21 = vcombine.low %v8914_v26, %v8921_v17  ;;  %v7567_v31 = vrot.slane %v17680_v38, %v17325_v47  ;;  %v7571_v39 = vrot.slane %v17680_v38, %v17331_v35  ;;  %v7575_v34 = vrot.slane %v17680_v38, %v17334_v53 }
 0x672   :  { %v8937_v6 = vcombine.low %v8928_v18, %v8935_v2  ;;  %v8805_v49 = vcombine.low %v8797_v36, %v8804_v51  ;;  %v17751_v55 = vcombine.low %v7547_v1, %v7551_v62  ;;  %v7579_v41 = vrot.slane %v17712_v56, %v20003_v24 }
 0x673   :  { %9713 = vperm.xlu1 %10597, %v8560_v28   ;;  %v7559_v28 = vrot.slane %v17680_v38, %v20006_v58  ;;  %v8944_v13 = vrot.slane %v8936_v21, %v17373_v5  ;;  %v17756_v11 = vcombine.low %v7563_v12, %v7567_v31  ;;  %v7583_v8 = vrot.slane %v17712_v56, %v20004_v48 }
 0x674   :  { %v8951_v15 = vrot.slane %v8937_v6, %v17373_v5  ;;  %v8816_v50 = vrot.slane %v17751_v55, %v17373_v5  ;;  %v7591_v26 = vrot.slane %v17712_v56, %v20006_v58  ;;  %v7595_v1 = vrot.slane %v17712_v56, %v17322_v54 }
 0x675   :  { %v17754_v19 = vcombine.low %v7555_v46, %v7559_v28  ;;  %v8830_v43 = vrot.slane %v17756_v11, %v17373_v5  ;;  %v7599_v62 = vrot.slane %v17712_v56, %v17325_v47  ;;  %v7603_v51 = vrot.slane %v17712_v56, %v17331_v35 }
 0x676   :  { %v8952_v38 = vcombine.low %v8944_v13, %v8951_v15 }
 0x677   :  { %9719 = vperm.xlu1 %10597, %v8658_v42   ;;  %v7034_v20 = vpop.xlane.xlu1 %7033  ;;  %v17758_v42 = vcombine.low %v7571_v39, %v7575_v34  ;;  %v8823_v16 = vrot.slane %v17754_v19, %v17373_v5 }
 0x678   :  { %v7643_v59 = vrot.slane %v7034_v20, %v20003_v24  ;;  %v7647_v14 = vrot.slane %v7034_v20, %v20004_v48  ;;  %v7651_v37 = vrot.slane %v7034_v20, %v20005_v0  ;;  %v7655_v57 = vrot.slane %v7034_v20, %v20006_v58 }
 0x679   :  { %v7659_v33 = vrot.slane %v7034_v20, %v17322_v54  ;;  %v7663_v9 = vrot.slane %v7034_v20, %v17325_v47  ;;  %v7667_v30 = vrot.slane %v7034_v20, %v17331_v35  ;;  %v7671_v22 = vrot.slane %v7034_v20, %v17334_v53 }
 0x67a   :  { %v8953_v7 = vcombine.low %v7643_v59, %v7647_v14  ;;  %v8954_v61 = vcombine.low %v7651_v37, %v7655_v57 }
 0x67b   :  { %9722 = vperm.xlu1 %10597, %v8707_v10   ;;  %v8955_v63 = vcombine.low %v7659_v33, %v7663_v9  ;;  %v8956_v32 = vcombine.low %v7667_v30, %v7671_v22  ;;  %v8837_v10 = vrot.slane %v17758_v42, %v17373_v5 }
 0x67c   :  { %v8963_v60 = vrot.slane %v8953_v7, %v17373_v5  ;;  %v8970_v25 = vrot.slane %v8954_v61, %v17373_v5 }
 0x67d   :  { %v8977_v52 = vrot.slane %v8955_v63, %v17373_v5  ;;  %v8984_v27 = vrot.slane %v8956_v32, %v17373_v5 }
 0x67e   :  { %v8985_v40 = vcombine.low %v8963_v60, %v8970_v25 }
 0x67f   :  { %9725 = vperm.xlu1 %10597, %v8756_v4   ;;  %v8986_v23 = vcombine.low %v8977_v52, %v8984_v27  ;;  %v7587_v4 = vrot.slane %v17712_v56, %v20005_v0 }
 0x680   :  { %v8993_v3 = vrot.slane %v8985_v40, %v17373_v5 }
 0x681   :  { %v9000_v45 = vrot.slane %v8986_v23, %v17373_v5 }
 0x683   :  { %9728 = vperm.xlu1 %10597, %v8805_v49   ;;  %v9001_v44 = vcombine.low %v8993_v3, %v9000_v45 }
 0x685   :  { %9740 = vperm.xlu0 %10596, %v9001_v44  }
 0x686   :  { %v7036_v36 = vpop.xlane.xlu0 %7035 }
 0x687   :  { %v7038_v20 = vpop.xlane.xlu1 %7037  ;;  %9737 = vperm.xlu1 %10597, %v8952_v38   ;;  %v7675_v17 = vrot.slane %v7036_v36, %v20003_v24  ;;  %v7679_v18 = vrot.slane %v7036_v36, %v20004_v48  ;;  %v7683_v2 = vrot.slane %v7036_v36, %v20005_v0  ;;  %v7687_v59 = vrot.slane %v7036_v36, %v20006_v58 }
 0x688   :  { %v7691_v14 = vrot.slane %v7036_v36, %v17322_v54  ;;  %v7695_v37 = vrot.slane %v7036_v36, %v17325_v47  ;;  %v7699_v57 = vrot.slane %v7036_v36, %v17331_v35  ;;  %v7703_v33 = vrot.slane %v7036_v36, %v17334_v53 }
 0x689   :  { %v9002_v9 = vcombine.low %v7675_v17, %v7679_v18  ;;  %v9003_v30 = vcombine.low %v7683_v2, %v7687_v59  ;;  %v7707_v22 = vrot.slane %v7038_v20, %v20003_v24  ;;  %v7711_v7 = vrot.slane %v7038_v20, %v20004_v48 }
 0x68a   :  { %v9004_v61 = vcombine.low %v7691_v14, %v7695_v37  ;;  %v9005_v46 = vcombine.low %v7699_v57, %v7703_v33  ;;  %v7715_v28 = vrot.slane %v7038_v20, %v20005_v0  ;;  %v7719_v21 = vrot.slane %v7038_v20, %v20006_v58  ;;  %v7040_v6 = vpop.xlane.xlu0 %7039 }
 0x68b   :  { %v9012_v63 = vrot.slane %v9002_v9, %v17373_v5  ;;  %v9019_v32 = vrot.slane %v9003_v30, %v17373_v5  ;;  %v7723_v60 = vrot.slane %v7038_v20, %v17322_v54  ;;  %v7727_v25 = vrot.slane %v7038_v20, %v17325_v47  ;;  %v7042_v17 = vpop.xlane.xlu1 %7041 }
 0x68c   :  { %v9026_v12 = vrot.slane %v9004_v61, %v17373_v5  ;;  %v9033_v31 = vrot.slane %v9005_v46, %v17373_v5  ;;  %v7731_v52 = vrot.slane %v7038_v20, %v17331_v35  ;;  %v7735_v27 = vrot.slane %v7038_v20, %v17334_v53 }
 0x68d   :  { %v9034_v39 = vcombine.low %v9012_v63, %v9019_v32  ;;  %v9051_v34 = vcombine.low %v7707_v22, %v7711_v7  ;;  %v9052_v40 = vcombine.low %v7715_v28, %v7719_v21  ;;  %v9053_v13 = vcombine.low %v7723_v60, %v7727_v25 }
 0x68e   :  { %v9035_v15 = vcombine.low %v9026_v12, %v9033_v31  ;;  %v9054_v23 = vcombine.low %v7731_v52, %v7735_v27  ;;  %v7739_v49 = vrot.slane %v7040_v6, %v20003_v24  ;;  %v7743_v3 = vrot.slane %v7040_v6, %v20004_v48 }
 0x68f   :  { %v9042_v45 = vrot.slane %v9034_v39, %v17373_v5  ;;  %v9061_v38 = vrot.slane %v9051_v34, %v17373_v5  ;;  %v9068_v44 = vrot.slane %v9052_v40, %v17373_v5  ;;  %v9075_v36 = vrot.slane %v9053_v13, %v17373_v5 }
 0x690   :  { %v9049_v20 = vrot.slane %v9035_v15, %v17373_v5  ;;  %v9082_v18 = vrot.slane %v9054_v23, %v17373_v5  ;;  %v7747_v2 = vrot.slane %v7040_v6, %v20005_v0  ;;  %v7751_v59 = vrot.slane %v7040_v6, %v20006_v58 }
 0x691   :  { %v9083_v14 = vcombine.low %v9061_v38, %v9068_v44  ;;  %v7755_v37 = vrot.slane %v7040_v6, %v17322_v54  ;;  %v7759_v57 = vrot.slane %v7040_v6, %v17325_v47  ;;  %v7763_v33 = vrot.slane %v7040_v6, %v17331_v35 }
 0x692   :  { %v9050_v9 = vcombine.low %v9042_v45, %v9049_v20  ;;  %v9084_v30 = vcombine.low %v9075_v36, %v9082_v18  ;;  %v7767_v22 = vrot.slane %v7040_v6, %v17334_v53  ;;  %v9100_v7 = vcombine.low %v7739_v49, %v7743_v3 }
 0x693   :  { %v9091_v61 = vrot.slane %v9083_v14, %v17373_v5  ;;  %v9101_v46 = vcombine.low %v7747_v2, %v7751_v59  ;;  %v9102_v28 = vcombine.low %v7755_v37, %v7759_v57  ;;  %v7771_v21 = vrot.slane %v7042_v17, %v20003_v24 }
 0x694   :  { %9743 = vperm.xlu1 %10597, %v9050_v9   ;;  %v9098_v63 = vrot.slane %v9084_v30, %v17373_v5  ;;  %v9103_v32 = vcombine.low %v7763_v33, %v7767_v22  ;;  %v9110_v60 = vrot.slane %v9100_v7, %v17373_v5  ;;  %v7775_v25 = vrot.slane %v7042_v17, %v20004_v48 }
 0x695   :  { %v9117_v12 = vrot.slane %v9101_v46, %v17373_v5  ;;  %v9124_v31 = vrot.slane %v9102_v28, %v17373_v5  ;;  %v7779_v6 = vrot.slane %v7042_v17, %v20005_v0  ;;  %v7783_v52 = vrot.slane %v7042_v17, %v20006_v58 }
 0x696   :  { %v9099_v27 = vcombine.low %v9091_v61, %v9098_v63  ;;  %v9131_v39 = vrot.slane %v9103_v32, %v17373_v5  ;;  %v7787_v34 = vrot.slane %v7042_v17, %v17322_v54  ;;  %v7791_v40 = vrot.slane %v7042_v17, %v17325_v47 }
 0x697   :  { %v9132_v13 = vcombine.low %v9110_v60, %v9117_v12  ;;  %v7795_v15 = vrot.slane %v7042_v17, %v17331_v35  ;;  %v7799_v23 = vrot.slane %v7042_v17, %v17334_v53  ;;  %v9149_v49 = vcombine.low %v7771_v21, %v7775_v25  ;;  %v7044_v3 = vpop.xlane.xlu0 %7043 }
 0x698   :  { %9746 = vperm.xlu0 %10596, %v9099_v27   ;;  %v9133_v45 = vcombine.low %v9124_v31, %v9131_v39  ;;  %v9150_v38 = vcombine.low %v7779_v6, %v7783_v52  ;;  %v9151_v44 = vcombine.low %v7787_v34, %v7791_v40  ;;  %v7607_v36 = vrot.slane %v17712_v56, %v17334_v53  ;;  %v7046_v33 = vpop.xlane.xlu1 %7045 }
 0x699   :  { %v9140_v20 = vrot.slane %v9132_v13, %v17373_v5  ;;  %v9152_v18 = vcombine.low %v7795_v15, %v7799_v23  ;;  %v9159_v2 = vrot.slane %v9149_v49, %v17373_v5  ;;  %v7803_v59 = vrot.slane %v7044_v3, %v20003_v24 }
 0x69a   :  { %v9147_v14 = vrot.slane %v9133_v45, %v17373_v5  ;;  %v9166_v17 = vrot.slane %v9150_v38, %v17373_v5  ;;  %v9173_v37 = vrot.slane %v9151_v44, %v17373_v5  ;;  %v7807_v57 = vrot.slane %v7044_v3, %v20004_v48 }
 0x69b   :  { %v9180_v9 = vrot.slane %v9152_v18, %v17373_v5  ;;  %v7811_v30 = vrot.slane %v7044_v3, %v20005_v0  ;;  %v7815_v22 = vrot.slane %v7044_v3, %v20006_v58  ;;  %v7819_v7 = vrot.slane %v7044_v3, %v17322_v54 }
 0x69c   :  { %v9148_v61 = vcombine.low %v9140_v20, %v9147_v14  ;;  %v9181_v46 = vcombine.low %v9159_v2, %v9166_v17  ;;  %v7823_v28 = vrot.slane %v7044_v3, %v17325_v47  ;;  %v7827_v21 = vrot.slane %v7044_v3, %v17331_v35 }
 0x69d   :  { %v9182_v63 = vcombine.low %v9173_v37, %v9180_v9  ;;  %v7831_v32 = vrot.slane %v7044_v3, %v17334_v53  ;;  %v9198_v60 = vcombine.low %v7803_v59, %v7807_v57  ;;  %v9199_v25 = vcombine.low %v7811_v30, %v7815_v22 }
 0x69e   :  { %9749 = vperm.xlu1 %10597, %v9148_v61   ;;  %v9189_v12 = vrot.slane %v9181_v46, %v17373_v5  ;;  %v9200_v31 = vcombine.low %v7819_v7, %v7823_v28  ;;  %v7835_v6 = vrot.slane %v7046_v33, %v20003_v24  ;;  %v7839_v52 = vrot.slane %v7046_v33, %v20004_v48 }
 0x69f   :  { %v9196_v27 = vrot.slane %v9182_v63, %v17373_v5  ;;  %v9201_v39 = vcombine.low %v7827_v21, %v7831_v32  ;;  %v9208_v34 = vrot.slane %v9198_v60, %v17373_v5  ;;  %v9215_v40 = vrot.slane %v9199_v25, %v17373_v5 }
 0x6a0   :  { %v9222_v13 = vrot.slane %v9200_v31, %v17373_v5  ;;  %v7843_v15 = vrot.slane %v7046_v33, %v20005_v0  ;;  %v7847_v23 = vrot.slane %v7046_v33, %v20006_v58  ;;  %v7851_v49 = vrot.slane %v7046_v33, %v17322_v54 }
 0x6a1   :  { %v9197_v3 = vcombine.low %v9189_v12, %v9196_v27  ;;  %v9229_v45 = vrot.slane %v9201_v39, %v17373_v5  ;;  %v9230_v38 = vcombine.low %v9208_v34, %v9215_v40  ;;  %v7855_v44 = vrot.slane %v7046_v33, %v17325_v47 }
 0x6a2   :  { %v7859_v20 = vrot.slane %v7046_v33, %v17331_v35  ;;  %v7863_v18 = vrot.slane %v7046_v33, %v17334_v53  ;;  %v9247_v2 = vcombine.low %v7835_v6, %v7839_v52  ;;  %v9248_v59 = vcombine.low %v7843_v15, %v7847_v23 }
 0x6a3   :  { %9752 = vperm.xlu0 %10596, %v9197_v3   ;;  %v9231_v14 = vcombine.low %v9222_v13, %v9229_v45  ;;  %v9238_v17 = vrot.slane %v9230_v38, %v17373_v5  ;;  %v9249_v37 = vcombine.low %v7851_v49, %v7855_v44  ;;  %v8855_v57 = vcombine.low %v7579_v41, %v7583_v8 }
 0x6a4   :  { %v9250_v9 = vcombine.low %v7859_v20, %v7863_v18  ;;  %v9257_v30 = vrot.slane %v9247_v2, %v17373_v5  ;;  %v9264_v22 = vrot.slane %v9248_v59, %v17373_v5  ;;  %v8856_v33 = vcombine.low %v7587_v4, %v7591_v26 }
 0x6a5   :  { %v9245_v7 = vrot.slane %v9231_v14, %v17373_v5  ;;  %v9271_v61 = vrot.slane %v9249_v37, %v17373_v5  ;;  %v8857_v41 = vcombine.low %v7595_v1, %v7599_v62  ;;  %v8858_v8 = vcombine.low %v7603_v51, %v7607_v36 }
 0x6a6   :  { %v9278_v46 = vrot.slane %v9250_v9, %v17373_v5  ;;  %v9279_v28 = vcombine.low %v9257_v30, %v9264_v22  ;;  %v8838_v63 = vcombine.low %v8816_v50, %v8823_v16  ;;  %v8839_v56 = vcombine.low %v8830_v43, %v8837_v10 }
 0x6a7   :  { %v9246_v21 = vcombine.low %v9238_v17, %v9245_v7  ;;  %v8865_v62 = vrot.slane %v8855_v57, %v17373_v5  ;;  %v8872_v51 = vrot.slane %v8856_v33, %v17373_v5  ;;  %v8879_v36 = vrot.slane %v8857_v41, %v17373_v5 }
 0x6a8   :  { %v9280_v4 = vcombine.low %v9271_v61, %v9278_v46  ;;  %v9287_v26 = vrot.slane %v9279_v28, %v17373_v5  ;;  %v8886_v19 = vrot.slane %v8858_v8, %v17373_v5  ;;  %v8846_v46 = vrot.slane %v8838_v63, %v17373_v5 }
 0x6a9   :  { %v7048_v1 = vpop.xlane.xlu0 %7047  ;;  %9755 = vperm.xlu1 %10597, %v9246_v21   ;;  %v8887_v17 = vcombine.low %v8865_v62, %v8872_v51  ;;  %v8853_v28 = vrot.slane %v8839_v56, %v17373_v5 }
 0x6aa   :  { %v7050_v32 = vpop.xlane.xlu1 %7049  ;;  %v9294_v55 = vrot.slane %v9280_v4, %v17373_v5  ;;  %v7867_v50 = vrot.slane %v7048_v1, %v20003_v24  ;;  %v7871_v42 = vrot.slane %v7048_v1, %v20004_v48  ;;  %v7875_v11 = vrot.slane %v7048_v1, %v20005_v0 }
 0x6ab   :  { %v7879_v16 = vrot.slane %v7048_v1, %v20006_v58  ;;  %v7883_v43 = vrot.slane %v7048_v1, %v17322_v54  ;;  %v7887_v10 = vrot.slane %v7048_v1, %v17325_v47  ;;  %v7891_v60 = vrot.slane %v7048_v1, %v17331_v35 }
 0x6ac   :  { %v9295_v25 = vcombine.low %v9287_v26, %v9294_v55  ;;  %v7895_v12 = vrot.slane %v7048_v1, %v17334_v53  ;;  %v9296_v31 = vcombine.low %v7867_v50, %v7871_v42  ;;  %v7899_v6 = vrot.slane %v7050_v32, %v20003_v24 }
 0x6ad   :  { %v9297_v52 = vcombine.low %v7875_v11, %v7879_v16  ;;  %v9298_v27 = vcombine.low %v7883_v43, %v7887_v10  ;;  %v7903_v39 = vrot.slane %v7050_v32, %v20004_v48  ;;  %v7907_v34 = vrot.slane %v7050_v32, %v20005_v0 }
 0x6ae   :  { %9758 = vperm.xlu0 %10596, %v9295_v25   ;;  %v9299_v40 = vcombine.low %v7891_v60, %v7895_v12  ;;  %v9306_v13 = vrot.slane %v9296_v31, %v17373_v5  ;;  %v7911_v15 = vrot.slane %v7050_v32, %v20006_v58  ;;  %v7915_v23 = vrot.slane %v7050_v32, %v17322_v54 }
 0x6af   :  { %v9313_v49 = vrot.slane %v9297_v52, %v17373_v5  ;;  %v9320_v3 = vrot.slane %v9298_v27, %v17373_v5  ;;  %v7919_v45 = vrot.slane %v7050_v32, %v17325_v47  ;;  %v7923_v38 = vrot.slane %v7050_v32, %v17331_v35 }
 0x6b0   :  { %v9327_v44 = vrot.slane %v9299_v40, %v17373_v5  ;;  %v7927_v20 = vrot.slane %v7050_v32, %v17334_v53  ;;  %v9345_v18 = vcombine.low %v7899_v6, %v7903_v39  ;;  %v9346_v2 = vcombine.low %v7907_v34, %v7911_v15 }
 0x6b1   :  { %v9328_v59 = vcombine.low %v9306_v13, %v9313_v49  ;;  %v9347_v14 = vcombine.low %v7915_v23, %v7919_v45  ;;  %v8888_v37 = vcombine.low %v8879_v36, %v8886_v19  ;;  %v8895_v21 = vrot.slane %v8887_v17, %v17373_v5 }
 0x6b2   :  { %v9329_v57 = vcombine.low %v9320_v3, %v9327_v44  ;;  %v9348_v9 = vcombine.low %v7923_v38, %v7927_v20  ;;  %v9355_v30 = vrot.slane %v9345_v18, %v17373_v5  ;;  %v9362_v22 = vrot.slane %v9346_v2, %v17373_v5 }
 0x6b3   :  { %v9336_v33 = vrot.slane %v9328_v59, %v17373_v5  ;;  %v9369_v7 = vrot.slane %v9347_v14, %v17373_v5  ;;  %v8902_v4 = vrot.slane %v8888_v37, %v17373_v5  ;;  %v8854_v19 = vcombine.low %v8846_v46, %v8853_v28 }
 0x6b4   :  { %v9343_v61 = vrot.slane %v9329_v57, %v17373_v5  ;;  %v9376_v41 = vrot.slane %v9348_v9, %v17373_v5  ;;  %v9377_v8 = vcombine.low %v9355_v30, %v9362_v22 }
 0x6b5   :  { %v8903_v32 = vcombine.low %v8895_v21, %v8902_v4 }
 0x6b6   :  { %v9344_v26 = vcombine.low %v9336_v33, %v9343_v61  ;;  %v9378_v1 = vcombine.low %v9369_v7, %v9376_v41  ;;  %v9385_v62 = vrot.slane %v9377_v8, %v17373_v5 }
 0x6b8   :  { %9761 = vperm.xlu1 %10597, %v9344_v26   ;;  %v9392_v51 = vrot.slane %v9378_v1, %v17373_v5 }
 0x6b9   :  { %v7052_v36 = vpop.xlane.xlu0 %7051 }
 0x6ba   :  { %v9393_v55 = vcombine.low %v9385_v62, %v9392_v51  ;;  %v7931_v50 = vrot.slane %v7052_v36, %v20003_v24  ;;  %v7935_v63 = vrot.slane %v7052_v36, %v20004_v48  ;;  %v7939_v56 = vrot.slane %v7052_v36, %v20005_v0 }
 0x6bb   :  { %v7054_v42 = vpop.xlane.xlu1 %7053  ;;  %v7943_v11 = vrot.slane %v7052_v36, %v20006_v58  ;;  %v7947_v16 = vrot.slane %v7052_v36, %v17322_v54  ;;  %v7951_v43 = vrot.slane %v7052_v36, %v17325_v47  ;;  %v7955_v10 = vrot.slane %v7052_v36, %v17331_v35 }
 0x6bc   :  { %9764 = vperm.xlu0 %10596, %v9393_v55   ;;  %9731 = vperm.xlu1 %10597, %v8854_v19   ;;  %v7959_v60 = vrot.slane %v7052_v36, %v17334_v53  ;;  %v9394_v25 = vcombine.low %v7931_v50, %v7935_v63  ;;  %v7963_v12 = vrot.slane %v7054_v42, %v20003_v24 }
 0x6bd   :  { %v9395_v31 = vcombine.low %v7939_v56, %v7943_v11  ;;  %v9396_v6 = vcombine.low %v7947_v16, %v7951_v43  ;;  %v7967_v52 = vrot.slane %v7054_v42, %v20004_v48  ;;  %v7971_v27 = vrot.slane %v7054_v42, %v20005_v0  ;;  %v7056_v39 = vpop.xlane.xlu0 %7055 }
 0x6be   :  { %v9397_v34 = vcombine.low %v7955_v10, %v7959_v60  ;;  %v9404_v40 = vrot.slane %v9394_v25, %v17373_v5  ;;  %v7975_v13 = vrot.slane %v7054_v42, %v20006_v58  ;;  %v7979_v15 = vrot.slane %v7054_v42, %v17322_v54 }
 0x6bf   :  { %v9411_v23 = vrot.slane %v9395_v31, %v17373_v5  ;;  %v9418_v49 = vrot.slane %v9396_v6, %v17373_v5  ;;  %v7983_v3 = vrot.slane %v7054_v42, %v17325_v47  ;;  %v7987_v45 = vrot.slane %v7054_v42, %v17331_v35 }
 0x6c0   :  { %v9425_v38 = vrot.slane %v9397_v34, %v17373_v5  ;;  %9734 = vperm.xlu1 %10597, %v8903_v32   ;;  %v7991_v44 = vrot.slane %v7054_v42, %v17334_v53  ;;  %v9443_v20 = vcombine.low %v7963_v12, %v7967_v52  ;;  %v9444_v18 = vcombine.low %v7971_v27, %v7975_v13 }
 0x6c1   :  { %v9426_v2 = vcombine.low %v9404_v40, %v9411_v23  ;;  %v9445_v59 = vcombine.low %v7979_v15, %v7983_v3  ;;  %v7995_v14 = vrot.slane %v7056_v39, %v20003_v24  ;;  %v7999_v17 = vrot.slane %v7056_v39, %v20004_v48 }
 0x6c2   :  { %v9427_v37 = vcombine.low %v9418_v49, %v9425_v38  ;;  %v9446_v57 = vcombine.low %v7987_v45, %v7991_v44  ;;  %v9453_v9 = vrot.slane %v9443_v20, %v17373_v5  ;;  %v9460_v30 = vrot.slane %v9444_v18, %v17373_v5 }
 0x6c3   :  { %v9434_v22 = vrot.slane %v9426_v2, %v17373_v5  ;;  %v9467_v33 = vrot.slane %v9445_v59, %v17373_v5  ;;  %v8003_v7 = vrot.slane %v7056_v39, %v20005_v0  ;;  %v8007_v61 = vrot.slane %v7056_v39, %v20006_v58 }
 0x6c4   :  { %v9441_v41 = vrot.slane %v9427_v37, %v17373_v5  ;;  %v9474_v8 = vrot.slane %v9446_v57, %v17373_v5  ;;  %v9475_v46 = vcombine.low %v9453_v9, %v9460_v30  ;;  %v8011_v28 = vrot.slane %v7056_v39, %v17322_v54 }
 0x6c5   :  { %v8015_v21 = vrot.slane %v7056_v39, %v17325_v47  ;;  %v8019_v4 = vrot.slane %v7056_v39, %v17331_v35  ;;  %v8023_v26 = vrot.slane %v7056_v39, %v17334_v53  ;;  %v9492_v1 = vcombine.low %v7995_v14, %v7999_v17  ;;  %v7058_v62 = vpop.xlane.xlu1 %7057 }
 0x6c6   :  { %v9442_v51 = vcombine.low %v9434_v22, %v9441_v41  ;;  %v9476_v36 = vcombine.low %v9467_v33, %v9474_v8  ;;  %v9483_v19 = vrot.slane %v9475_v46, %v17373_v5  ;;  %v9493_v32 = vcombine.low %v8003_v7, %v8007_v61 }
 0x6c7   :  { %v9494_v55 = vcombine.low %v8011_v28, %v8015_v21  ;;  %v9495_v50 = vcombine.low %v8019_v4, %v8023_v26  ;;  %v9502_v63 = vrot.slane %v9492_v1, %v17373_v5  ;;  %v8027_v56 = vrot.slane %v7058_v62, %v20003_v24 }
 0x6c8   :  { %9767 = vperm.xlu0 %10596, %v9442_v51   ;;  %v9490_v42 = vrot.slane %v9476_v36, %v17373_v5  ;;  %v9509_v11 = vrot.slane %v9493_v32, %v17373_v5  ;;  %v8031_v16 = vrot.slane %v7058_v62, %v20004_v48  ;;  %v8035_v43 = vrot.slane %v7058_v62, %v20005_v0 }
 0x6c9   :  { %v9516_v10 = vrot.slane %v9494_v55, %v17373_v5  ;;  %v9523_v60 = vrot.slane %v9495_v50, %v17373_v5  ;;  %v8039_v25 = vrot.slane %v7058_v62, %v20006_v58  ;;  %v8043_v12 = vrot.slane %v7058_v62, %v17322_v54 }
 0x6ca   :  { %v9491_v31 = vcombine.low %v9483_v19, %v9490_v42  ;;  %v9524_v6 = vcombine.low %v9502_v63, %v9509_v11  ;;  %v8047_v52 = vrot.slane %v7058_v62, %v17325_v47  ;;  %v8051_v27 = vrot.slane %v7058_v62, %v17331_v35 }
 0x6cb   :  { %v9525_v39 = vcombine.low %v9516_v10, %v9523_v60  ;;  %v8055_v34 = vrot.slane %v7058_v62, %v17334_v53  ;;  %v9541_v40 = vcombine.low %v8027_v56, %v8031_v16  ;;  %v9542_v13 = vcombine.low %v8035_v43, %v8039_v25 }
 0x6cc   :  { %v7060_v15 = vpop.xlane.xlu0 %7059  ;;  %9770 = vperm.xlu0 %10596, %v9491_v31   ;;  %v9532_v23 = vrot.slane %v9524_v6, %v17373_v5  ;;  %v9543_v49 = vcombine.low %v8043_v12, %v8047_v52 }
 0x6cd   :  { %v9539_v3 = vrot.slane %v9525_v39, %v17373_v5  ;;  %v9544_v45 = vcombine.low %v8051_v27, %v8055_v34  ;;  %v9551_v38 = vrot.slane %v9541_v40, %v17373_v5  ;;  %v9558_v44 = vrot.slane %v9542_v13, %v17373_v5 }
 0x6ce   :  { %v9565_v20 = vrot.slane %v9543_v49, %v17373_v5  ;;  %v8059_v18 = vrot.slane %v7060_v15, %v20003_v24  ;;  %v8063_v2 = vrot.slane %v7060_v15, %v20004_v48  ;;  %v8067_v59 = vrot.slane %v7060_v15, %v20005_v0 }
 0x6cf   :  { %v9540_v14 = vcombine.low %v9532_v23, %v9539_v3  ;;  %v9572_v17 = vrot.slane %v9544_v45, %v17373_v5  ;;  %v9573_v37 = vcombine.low %v9551_v38, %v9558_v44  ;;  %v8071_v57 = vrot.slane %v7060_v15, %v20006_v58 }
 0x6d0   :  { %v8075_v9 = vrot.slane %v7060_v15, %v17322_v54  ;;  %v8079_v30 = vrot.slane %v7060_v15, %v17325_v47  ;;  %v8083_v22 = vrot.slane %v7060_v15, %v17331_v35  ;;  %v8087_v33 = vrot.slane %v7060_v15, %v17334_v53 }
 0x6d1   :  { %9773 = vperm.xlu0 %10596, %v9540_v14   ;;  %v9574_v7 = vcombine.low %v9565_v20, %v9572_v17  ;;  %v9581_v61 = vrot.slane %v9573_v37, %v17373_v5  ;;  %v9590_v41 = vcombine.low %v8059_v18, %v8063_v2  ;;  %v9591_v8 = vcombine.low %v8067_v59, %v8071_v57 }
 0x6d2   :  { %v9592_v46 = vcombine.low %v8075_v9, %v8079_v30  ;;  %v9593_v28 = vcombine.low %v8083_v22, %v8087_v33  ;;  %v20028_v30 = vld [vmem:[#allocation17_spill] sm:$0xff] }
 0x6d3   :  { %v7062_v21 = vpop.xlane.xlu1 %7061  ;;  %v9588_v4 = vrot.slane %v9574_v7, %v17373_v5  ;;  %v9600_v26 = vrot.slane %v9590_v41, %v17373_v5  ;;  %v9607_v1 = vrot.slane %v9591_v8, %v17373_v5  ;;  %v9788_v22 = vadd.s32 4294967288, %v20028_v30 }
 0x6d4   :  { %v9614_v62 = vrot.slane %v9592_v46, %v17373_v5  ;;  %v9621_v51 = vrot.slane %v9593_v28, %v17373_v5  ;;  %v8091_v36 = vrot.slane %v7062_v21, %v20003_v24  ;;  %v8095_v19 = vrot.slane %v7062_v21, %v20004_v48  ;;  %v18037_v45 = vpop.permute.xlu0 %9689 }
 0x6d5   :  { %v9589_v32 = vcombine.low %v9581_v61, %v9588_v4  ;;  %v9622_v55 = vcombine.low %v9600_v26, %v9607_v1  ;;  %v8099_v50 = vrot.slane %v7062_v21, %v20005_v0  ;;  %v8103_v63 = vrot.slane %v7062_v21, %v20006_v58 }
 0x6d6   :  { %v9623_v56 = vcombine.low %v9614_v62, %v9621_v51  ;;  %v8107_v42 = vrot.slane %v7062_v21, %v17322_v54  ;;  %v8111_v11 = vrot.slane %v7062_v21, %v17325_v47  ;;  %v8115_v16 = vrot.slane %v7062_v21, %v17331_v35 }
 0x6d7   :  { %9776 = vperm.xlu0 %10596, %v9589_v32   ;;  %v9630_v43 = vrot.slane %v9622_v55, %v17373_v5  ;;  %v8119_v24 = vrot.slane %v7062_v21, %v17334_v53  ;;  %v9639_v10 = vcombine.low %v8091_v36, %v8095_v19  ;;  %v9640_v48 = vcombine.low %v8099_v50, %v8103_v63  ;;  %v18021_v39 = vpop.permute.xlu1 %9692 }
 0x6d8   :  { %v9637_v60 = vrot.slane %v9623_v56, %v17373_v5  ;;  %v9641_v25 = vcombine.low %v8107_v42, %v8111_v11  ;;  %v18041_v44 = vpop.permute.xlu0 %9716  ;;  %v9795_v33 = vadd.s32 4294967280, %v20028_v30  ;;  %v9791_v41 = vsub.s32 %v9788_v22, %v19995_v29 }
 0x6d9   :  { %v9642_v0 = vcombine.low %v8115_v16, %v8119_v24  ;;  %v9649_v58 = vrot.slane %v9639_v10, %v17373_v5  ;;  %v9656_v12 = vrot.slane %v9640_v48, %v17373_v5  ;;  %v9802_v8 = vadd.s32 4294967272, %v20028_v30 }
 0x6da   :  { %v9638_v54 = vcombine.low %v9630_v43, %v9637_v60  ;;  %v9663_v47 = vrot.slane %v9641_v25, %v17373_v5  ;;  %v9809_v46 = vadd.s32 4294967264, %v20028_v30  ;;  %v9798_v28 = vsub.s32 %v9795_v33, %v19995_v29 }
 0x6db   :  { %v9670_v35 = vrot.slane %v9642_v0, %v17373_v5  ;;  %v9671_v31 = vcombine.low %v9649_v58, %v9656_v12  ;;  %v18023_v34 = vpop.permute.xlu1 %9695  ;;  %v9786_v4 = vsub.s32 %v20028_v30, %v19995_v29  ;;  %v9816_v26 = vadd.s32 4294967256, %v20028_v30 }
 0x6dc   :  { %9779 = vperm.xlu0 %10596, %v9638_v54   ;;  %v9805_v36 = vsub.s32 %v9802_v8, %v19995_v29  ;;  %v9812_v19 = vsub.s32 %v9809_v46, %v19995_v29  ;;  %v9823_v32 = vadd.s32 4294967248, %v20028_v30  ;;  %v9830_v50 = vadd.s32 4294967240, %v20028_v30 }
 0x6dd   :  { %v9672_v6 = vcombine.low %v9663_v47, %v9670_v35  ;;  %v9679_v53 = vrot.slane %v9671_v31, %v17373_v5  ;;  %v9837_v63 = vadd.s32 4294967232, %v20028_v30  ;;  %v9819_v42 = vsub.s32 %v9816_v26, %v19995_v29 }
 0x6de   :  { %v9844_v43 = vadd.s32 4294967224, %v20028_v30  ;;  %v9792_v60 = vrot.slane %v18021_v39, %v9791_v41  ;;  %v9826_v25 = vsub.s32 %v9823_v32, %v19995_v29  ;;  %v9851_v0 = vadd.s32 4294967216, %v20028_v30 }
 0x6df   :  { %v9686_v52 = vrot.slane %v9672_v6, %v17373_v5  ;;  %v18025_v40 = vpop.permute.xlu1 %9698  ;;  %v9799_v58 = vrot.slane %v18023_v34, %v9798_v28  ;;  %v9833_v12 = vsub.s32 %v9830_v50, %v19995_v29  ;;  %v9840_v54 = vsub.s32 %v9837_v63, %v19995_v29 }
 0x6e0   :  { %v9858_v47 = vadd.s32 4294967208, %v20028_v30  ;;  %v9787_v31 = vrot.slane %v18037_v45, %v9786_v4  ;;  %v9806_v6 = vrot.slane %v18025_v40, %v9805_v36  ;;  %v9847_v39 = vsub.s32 %v9844_v43, %v19995_v29 }
 0x6e1   :  { %v9687_v27 = vcombine.low %v9679_v53, %v9686_v52  ;;  %v9854_v45 = vsub.s32 %v9851_v0, %v19995_v29  ;;  %v9865_v40 = vadd.s32 4294967200, %v20028_v30  ;;  %v9879_v33 = vadd.s32 4294967184, %v20028_v30 }
 0x6e3   :  { %9782 = vperm.xlu0 %10596, %v9687_v27   ;;  %v18027_v13 = vpop.permute.xlu1 %9701  ;;  %v9882_v32 = vsub.s32 %v9879_v33, %v19995_v29 }
 0x6e4   :  { %v9813_v27 = vrot.slane %v18027_v13, %v9812_v19  ;;  %v9872_v13 = vadd.s32 4294967192, %v20028_v30 }
 0x6e7   :  { %v18029_v15 = vpop.permute.xlu1 %9704 }
 0x6eb   :  { %v18031_v23 = vpop.permute.xlu1 %9707 }
 0x6ef   :  { %v18033_v49 = vpop.permute.xlu1 %9710 }
 0x6f0   :  { %v9834_v8 = vrot.slane %v18033_v49, %v9833_v12 }
 0x6f3   :  { %v18035_v3 = vpop.permute.xlu1 %9713 }
 0x6f7   :  { %v18039_v38 = vpop.permute.xlu1 %9719 }
 0x6fb   :  { %v18043_v20 = vpop.permute.xlu1 %9722 }
 0x6ff   :  { %v18045_v59 = vpop.permute.xlu1 %9725 }
 0x703   :  { %v18049_v17 = vpop.permute.xlu1 %9728 }
 0x704   :  { %v9741_v18 = vpop.permute.xlu0 %9740 }
 0x705   :  { %v9900_v1 = vrot.slane %v9741_v18, %v9791_v41 }
 0x707   :  { %v9738_v57 = vpop.permute.xlu1 %9737 }
 0x708   :  { %v9896_v55 = vrot.slane %v9738_v57, %v9786_v4  ;;  %v9820_v57 = vrot.slane %v18029_v15, %v9819_v42 }
 0x70a   :  { %v9901_v11 = vsel %vm9793_vm1, %v9900_v1, %v9896_v55  ;;  %v9848_v55 = vrot.slane %v18041_v44, %v9847_v39 }
 0x713   :  { %v9744_v7 = vpop.permute.xlu1 %9743 }
 0x714   :  { %v9905_v51 = vrot.slane %v9744_v7, %v9798_v28 }
 0x716   :  { %v9906_v24 = vsel %vm9800_vm7, %v9905_v51, %v9901_v11  ;;  %v9861_v51 = vsub.s32 %v9858_v47, %v19995_v29 }
 0x717   :  { %v9747_v2 = vpop.permute.xlu0 %9746 }
 0x718   :  { %v9910_v16 = vrot.slane %v9747_v2, %v9805_v36  ;;  %v9794_v2 = vsel %vm9793_vm1, %v9792_v60, %v9787_v31  ;;  %v9886_v36 = vadd.s32 4294967176, %v20028_v30  ;;  %v9855_v30 = vrot.slane %v18039_v38, %v9854_v45 }
 0x719   :  { %v9801_v22 = vsel %vm9800_vm7, %v9799_v58, %v9794_v2  ;;  %v9862_v43 = vrot.slane %v18043_v20, %v9861_v51  ;;  %v7063_v2 = vld [vmem:[%s18159_s2] sm:$0x3] }
 0x71a   :  { %v9911_v53 = vsel %vm9807_vm12, %v9910_v16, %v9906_v24  ;;  %v9808_v41 = vsel %vm9807_vm12, %v9806_v6, %v9801_v22  ;;  %v9889_v24 = vsub.s32 %v9886_v36, %v19995_v29 }
 0x71b   :  { %v9815_v28 = vsel %vm9814_vm0, %v9813_v27, %v9808_v41 }
 0x71c   :  { %v9822_v1 = vsel %vm9821_vm10, %v9820_v57, %v9815_v28 }
 0x71d   :  { %v9750_v21 = vpop.permute.xlu1 %9749 }
 0x71e   :  { %v9915_v10 = vrot.slane %v9750_v21, %v9812_v19  ;;  %v9841_v21 = vrot.slane %v18035_v3, %v9840_v54  ;;  %v9868_v19 = vsub.s32 %v9865_v40, %v19995_v29 }
 0x720   :  { %v9916_v34 = vsel %vm9814_vm0, %v9915_v10, %v9911_v53  ;;  %v9869_v10 = vrot.slane %v18045_v59, %v9868_v19 }
 0x722   :  { %v18047_v14 = vpop.permute.xlu0 %9752 }
 0x723   :  { %v9920_v52 = vrot.slane %v18047_v14, %v9819_v42  ;;  %v9827_v14 = vrot.slane %v18031_v23, %v9826_v25 }
 0x725   :  { %v9921_v46 = vsel %vm9821_vm10, %v9920_v52, %v9916_v34  ;;  %v9829_v49 = vsel %vm9828_vm8, %v9827_v14, %v9822_v1 }
 0x726   :  { %v9836_v3 = vsel %vm9835_vm5, %v9834_v8, %v9829_v49 }
 0x728   :  { %v9756_v56 = vpop.permute.xlu1 %9755 }
 0x729   :  { %v9925_v18 = vrot.slane %v9756_v56, %v9826_v25  ;;  %v9843_v56 = vsel %vm9842_vm11, %v9841_v21, %v9836_v3 }
 0x72a   :  { %v9850_v38 = vsel %vm9849_vm15, %v9848_v55, %v9843_v56 }
 0x72b   :  { %v9926_v4 = vsel %vm9828_vm8, %v9925_v18, %v9921_v46  ;;  %v9857_v20 = vsel %vm9856_vm13, %v9855_v30, %v9850_v38 }
 0x72d   :  { %v18051_v37 = vpop.permute.xlu0 %9758 }
 0x72e   :  { %v9930_v15 = vrot.slane %v18051_v37, %v9833_v12  ;;  %v9875_v37 = vsub.s32 %v9872_v13, %v19995_v29  ;;  %v9864_v12 = vsel %vm9863_vm6, %v9862_v43, %v9857_v20 }
 0x730   :  { %v9931_v50 = vsel %vm9835_vm5, %v9930_v15, %v9926_v4  ;;  %v9876_v25 = vrot.slane %v18049_v17, %v9875_v37 }
 0x737   :  { %v9762_v35 = vpop.permute.xlu1 %9761 }
 0x738   :  { %v9935_v23 = vrot.slane %v9762_v35, %v9840_v54 }
 0x73a   :  { %v9936_v42 = vsel %vm9842_vm11, %v9935_v23, %v9931_v50 }
 0x73b   :  { %v18053_v9 = vpop.permute.xlu0 %9764  ;;  %v9732_v26 = vpop.permute.xlu1 %9731 }
 0x73c   :  { %v9940_v63 = vrot.slane %v18053_v9, %v9847_v39  ;;  %v9883_v58 = vrot.slane %v9732_v26, %v9882_v32 }
 0x73f   :  { %v9735_v9 = vpop.permute.xlu1 %9734 }
 0x740   :  { %v9890_v59 = vrot.slane %v9735_v9, %v9889_v24 }
 0x747   :  { %v18057_v61 = vpop.permute.xlu0 %9767 }
 0x748   :  { %v9945_v11 = vrot.slane %v18057_v61, %v9854_v45  ;;  %v9941_v61 = vsel %vm9849_vm15, %v9940_v63, %v9936_v42  ;;  %v20029_v45 = vlaneseq }
 0x74a   :  { %v9946_v29 = vsel %vm9856_vm13, %v9945_v11, %v9941_v61  ;;  %vm9991_vm14 = vcmp.lt.s32.totalorder %v20029_v45, 256 }
 0x74b   :  { %v18066_v62 = vpop.permute.xlu0 %9770 }
 0x74c   :  { %v9950_v44 = vrot.slane %v18066_v62, %v9861_v51 }
 0x74e   :  { %v9951_v54 = vsel %vm9863_vm6, %v9950_v44, %v9946_v29 }
 0x750   :  { %v18077_v48 = vpop.permute.xlu0 %9773 }
 0x751   :  { %v9955_v60 = vrot.slane %v18077_v48, %v9868_v19  ;;  %v9871_v48 = vsel %vm9870_vm2, %v9869_v10, %v9864_v12 }
 0x752   :  { %v9878_v35 = vsel %vm9877_vm4, %v9876_v25, %v9871_v48 }
 0x753   :  { %v9956_v17 = vsel %vm9870_vm2, %v9955_v60, %v9951_v54  ;;  %v9885_v53 = vsel %vm9884_vm9, %v9883_v58, %v9878_v35 }
 0x754   :  { %v9892_v27 = vsel %vm9891_vm3, %v9890_v59, %v9885_v53 }
 0x756   :  { %v9777_v7 = vpop.permute.xlu0 %9776 }
 0x757   :  { %v9960_v0 = vrot.slane %v9777_v7, %v9875_v37 }
 0x759   :  { %v9961_v31 = vsel %vm9877_vm4, %v9960_v0, %v9956_v17 }
 0x75b   :  { %v9780_v16 = vpop.permute.xlu0 %9779 }
 0x75c   :  { %v9965_v62 = vrot.slane %v9780_v16, %v9882_v32 }
 0x75e   :  { %v9966_v52 = vsel %vm9884_vm9, %v9965_v62, %v9961_v31 }
 0x762   :  { %v9783_v47 = vpop.permute.xlu0 %9782 }
 0x763   :  { %v9970_v6 = vrot.slane %v9783_v47, %v9889_v24 }
 0x765   :  { %v9971_v39 = vsel %vm9891_vm3, %v9970_v6, %v9966_v52 }
 0x766   :  { %v9972_v34 = vcombine.low %v9892_v27, %v9971_v39 }
 0x768   :  { %v9979_v18 = vrot.slane %v9972_v34, %v17373_v5 }
 0x76a   :  { %v9986_v57 = vrot.slane %v9979_v18, %v17373_v5 }
 0x76c   :  { %v9988_v40 = vmul.f32 %v9986_v57, %v7063_v2 }
 0x76e   :  { %9993 = vst.msk [vmem:[#allocation11] sm:$0x3] %vm9991_vm14, %v9988_v40 }
 0x76f   :  { %13023 = shalt.err (!%p13020_p2)
}
 0x770   :  { %s13024_s2 = scalar_lea.hbm %s18164_s7, 32 }
 0x771   :  { %p13025_p3 = scmp.ne.s32.totalorder %s18164_s7, %s13024_s2  ;;  %p13028_p4 = scmp.lt.u32.totalorder %s13024_s2, %s18164_s7 }
 0x773   :  { %p13030_p5 = pnand %p13028_p4, %p13025_p3 }
 0x775   :  { %13033 = shalt.err (!%p13030_p5)
}
 0x776   :  { %10003 = dma.vmem_to_hbm [thread:$0]  %s10001_s19, 32, %s18164_s7, [#allocation4]  }
 0x777   :  { %13040 = dma.done.wait [#allocation4], 32  }
 0x778   :  { %13041 = vsyncadd [#allocation4], 4294967264 }
 0x779   :  { %10007 = vsyncpa [#allocation3], 1 }
 0x77a   :  { %10008 = vsyncpa [#allocation6], 1 }
 0x77b   :  { %10009 = vsyncpa [#allocation9], 1 }
 0x77c   :  { %10010 = vsyncpa [#allocation4], 1 }

</bundles_post_ra>
